<compile_context>
chip_gen: v5e
topology: v5e:2x2
jax: 0.10.0
libtpu: 0.0.40
codegen_flags: <defaults>
</compile_context>

<pallas_src>
import functools
import numpy as np
import jax
import jax.numpy as jnp
from jax.experimental import pallas as pl
from jax.experimental.pallas import tpu as pltpu

_BN_EPS = 1e-5
# (cin, cout, first-block stride) for the four residual stages of resnet18.
_LAYER_CFG = [(64, 64, 1), (64, 128, 2), (128, 256, 2), (256, 512, 2)]


def _round_up(x, m):
    return (x + m - 1) // m * m


def _cp(c):
    """Stored (lane-dense) channel count: pad channels to a multiple of 128."""
    return _round_up(c, 128)


def _pick_tile(dim, align, max_tile):
    """Largest tile <= max_tile (multiple of `align`) that divides dim if possible."""
    if dim <= max_tile:
        return _round_up(dim, align)
    t = max_tile - (max_tile % align)
    while t >= align:
        if dim % t == 0:
            return t
        t -= align
    return max_tile  # fall back: will pad


def _pad2(x, rows, cols):
    if x.shape == (rows, cols):
        return x
    return jnp.pad(x, ((0, rows - x.shape[0]), (0, cols - x.shape[1])))


# ----------------------------------------------------------------------------- #
# Pallas GEMM kernels: out = act(A @ B + bias [+ residual])
# ----------------------------------------------------------------------------- #
def _epilogue(acc, c, r, relu):
    out = acc + c
    if r is not None:
        out = out + r.astype(jnp.float32)
    if relu:
        out = jnp.maximum(out, 0.0)
    return out


def _gemm_kernel(a_ref, b_ref, c_ref, o_ref, acc_ref, *, relu):
    @pl.when(pl.program_id(2) == 0)
    def _init():
        acc_ref[...] = jnp.zeros_like(acc_ref)

    acc_ref[...] += jnp.dot(a_ref[...], b_ref[...],
                            preferred_element_type=jnp.float32)

    @pl.when(pl.program_id(2) == pl.num_programs(2) - 1)
    def _fini():
        o_ref[...] = _epilogue(acc_ref[...], c_ref[...], None, relu).astype(o_ref.dtype)


def _gemm_res_kernel(a_ref, b_ref, c_ref, r_ref, o_ref, acc_ref, *, relu):
    @pl.when(pl.program_id(2) == 0)
    def _init():
        acc_ref[...] = jnp.zeros_like(acc_ref)

    acc_ref[...] += jnp.dot(a_ref[...], b_ref[...],
                            preferred_element_type=jnp.float32)

    @pl.when(pl.program_id(2) == pl.num_programs(2) - 1)
    def _fini():
        o_ref[...] = _epilogue(acc_ref[...], c_ref[...], r_ref[...], relu).astype(o_ref.dtype)


def _gemm_kernel_1k(a_ref, b_ref, c_ref, o_ref, *, relu):
    acc = jnp.dot(a_ref[...], b_ref[...], preferred_element_type=jnp.float32)
    o_ref[...] = _epilogue(acc, c_ref[...], None, relu).astype(o_ref.dtype)


def _gemm_res_kernel_1k(a_ref, b_ref, c_ref, r_ref, o_ref, *, relu):
    acc = jnp.dot(a_ref[...], b_ref[...], preferred_element_type=jnp.float32)
    o_ref[...] = _epilogue(acc, c_ref[...], r_ref[...], relu).astype(o_ref.dtype)


def matmul_bias_act(a, b, bias, residual=None, relu=True, out_dtype=jnp.bfloat16):
    """Tiled, pipelined Pallas GEMM with fused bias (+residual, +ReLU) epilogue."""
    M, K = a.shape
    K2, N = b.shape
    assert K == K2

    tm = _pick_tile(M, 8, 512)      # divisor of M where possible -> no pad/slice copy
    tk = _pick_tile(K, 128, 512)    # divides 9*cin for 3x3 convs -> no zero K tile
    tn = _pick_tile(N, 128, 256)
    Mp = _round_up(M, tm)
    # v7x: keep >=2 parallel tiles per call so both TensorCores get work.
    if Mp // tm == 1 and N >= 256:
        tn = 128
    Kp, Np = _round_up(K, tk), _round_up(N, tn)
    single_k = (Kp // tk == 1)

    a_p = _pad2(a.astype(jnp.bfloat16), Mp, Kp)
    b_p = _pad2(b.astype(jnp.bfloat16), Kp, Np)
    c_p = _pad2(bias.reshape(1, -1).astype(jnp.float32), 1, Np)

    in_specs = [
        pl.BlockSpec((tm, tk), lambda i, j, k: (i, k)),
        pl.BlockSpec((tk, tn), lambda i, j, k: (k, j)),
        pl.BlockSpec((1, tn), lambda i, j, k: (0, j)),
    ]
    operands = [a_p, b_p, c_p]
    if residual is not None:
        r_p = _pad2(residual.astype(jnp.bfloat16), Mp, Np)
        in_specs.append(pl.BlockSpec((tm, tn), lambda i, j, k: (i, j)))
        operands.append(r_p)
        kernel = functools.partial(
            _gemm_res_kernel_1k if single_k else _gemm_res_kernel, relu=relu)
    else:
        kernel = functools.partial(
            _gemm_kernel_1k if single_k else _gemm_kernel, relu=relu)

    scratch_shapes = [] if single_k else [pltpu.VMEM((tm, tn), jnp.float32)]

    out = pl.pallas_call(
        kernel,
        out_shape=jax.ShapeDtypeStruct((Mp, Np), out_dtype),
        grid_spec=pltpu.PrefetchScalarGridSpec(
            num_scalar_prefetch=0,
            grid=(Mp // tm, Np // tn, Kp // tk),
            in_specs=in_specs,
            out_specs=pl.BlockSpec((tm, tn), lambda i, j, k: (i, j)),
            scratch_shapes=scratch_shapes,
        ),
        compiler_params=pltpu.CompilerParams(
            dimension_semantics=("parallel", "parallel", "arbitrary"),
            vmem_limit_bytes=32 * 1024 * 1024,
        ),
    )(*operands)

    if (Mp, Np) != (M, N):
        out = out[:M, :N]
    return out


# ----------------------------------------------------------------------------- #
# Global average pool + FC fused in one small Pallas kernel.
# ----------------------------------------------------------------------------- #
def _gap_fc_kernel(x_ref, w_ref, b_ref, o_ref, *, inv_hw):
    pooled = jnp.sum(x_ref[...].astype(jnp.float32), axis=1) * inv_hw      # (N, C)
    o_ref[...] = (jnp.dot(pooled, w_ref[...], preferred_element_type=jnp.float32)
                  + b_ref[...])


def global_avg_pool_fc(x_nhwc, fc_w, fc_b, num_classes):
    N, H, W, C = x_nhwc.shape
    x3 = x_nhwc.reshape(N, H * W, C)
    n_pad = fc_w.shape[1]
    out = pl.pallas_call(
        functools.partial(_gap_fc_kernel, inv_hw=1.0 / float(H * W)),
        out_shape=jax.ShapeDtypeStruct((N, n_pad), jnp.float32),
        in_specs=[pl.BlockSpec(memory_space=pltpu.MemorySpace.VMEM)] * 3,
        out_specs=pl.BlockSpec(memory_space=pltpu.MemorySpace.VMEM),
    )(x3, fc_w, fc_b)
    return out[:, :num_classes]


# ----------------------------------------------------------------------------- #
# Conv / pool glue (plain JAX) feeding the Pallas GEMM
# ----------------------------------------------------------------------------- #
def _im2col(x_nhwc, kh, kw, stride, padding):
    N, H, W, C = x_nhwc.shape
    OH = (H + 2 * padding - kh) // stride + 1
    OW = (W + 2 * padding - kw) // stride + 1
    if padding:
        x_nhwc = jnp.pad(x_nhwc, ((0, 0), (padding, padding), (padding, padding), (0, 0)))
    cols = []
    for i in range(kh):
        for j in range(kw):
            cols.append(x_nhwc[:, i:i + stride * (OH - 1) + 1:stride,
                               j:j + stride * (OW - 1) + 1:stride, :])
    pat = jnp.stack(cols, axis=3)                     # [N, OH, OW, kh*kw, C]
    return pat.reshape(N * OH * OW, kh * kw * C), OH, OW


def conv_bn_act(x_nhwc, conv_p, *, stride, pad, relu, residual_nhwc=None):
    """conv (BN pre-folded) + bias (+ residual) + optional ReLU via one Pallas GEMM."""
    w4 = conv_p['w']                                  # [KH, KW, Cin_stored, Cout_stored] bf16
    KH, KW, CIN, COUT = w4.shape
    N, H, W, C = x_nhwc.shape
    assert C == CIN, (C, CIN)
    a, OH, OW = _im2col(x_nhwc, KH, KW, stride, pad)
    b = w4.reshape(KH * KW * CIN, COUT)
    res = None
    if residual_nhwc is not None:
        res = residual_nhwc.reshape(N * OH * OW, COUT)
    out = matmul_bias_act(a, b, conv_p['b'], residual=res, relu=relu,
                          out_dtype=jnp.bfloat16)
    return out.reshape(N, OH, OW, COUT)


def max_pool_3x3_s2_p1(x_nhwc):
    N, H, W, C = x_nhwc.shape
    OH = (H + 2 - 3) // 2 + 1
    OW = (W + 2 - 3) // 2 + 1
    neg = jnp.asarray(jnp.finfo(x_nhwc.dtype).min, x_nhwc.dtype)
    xp = jnp.pad(x_nhwc, ((0, 0), (1, 1), (1, 1), (0, 0)), constant_values=neg)
    out = None
    for i in range(3):
        for j in range(3):
            win = xp[:, i:i + 2 * (OH - 1) + 1:2, j:j + 2 * (OW - 1) + 1:2, :]
            out = win if out is None else jnp.maximum(out, win)
    return out


# ----------------------------------------------------------------------------- #
# Deterministic parameter construction (resnet18, 1-channel stem, 4 classes).
# Only arrays live in the params pytree; strides/pads/arch are static Python.
# BN (inference mode, fresh init: gamma=1, beta=0, mean=0, var=1, eps=1e-5) is
# folded into the conv weight columns; weights stored as bf16 in a
# channel-padded [KH, KW, Cin_stored, Cout_stored] layout.
# ----------------------------------------------------------------------------- #
def _make_conv(key, cout, cin_natural, kh, kw, cin_stored):
    fan_in = cin_natural * kh * kw
    w = (jax.random.normal(key, (cout, cin_natural, kh, kw), jnp.float32)
         / np.sqrt(float(fan_in)))
    w = w * (1.0 / np.sqrt(1.0 + _BN_EPS))            # fold gamma/sqrt(var+eps)
    w_hwio = jnp.transpose(w, (2, 3, 1, 0))           # [KH, KW, Cin, Cout]
    cout_stored = _cp(cout)
    w_pad = jnp.pad(w_hwio, ((0, 0), (0, 0),
                             (0, cin_stored - cin_natural),
                             (0, cout_stored - cout)))
    b_pad = jnp.zeros((cout_stored,), jnp.float32)    # beta - mean*scale == 0
    return {'w': w_pad.astype(jnp.bfloat16), 'b': b_pad}


def init_resnet18_params(key, num_classes=4):
    keys = iter(jax.random.split(key, 64))
    params = {'conv1': _make_conv(next(keys), 64, 1, 7, 7, cin_stored=1)}

    layers = []
    for cin, cout, stride in _LAYER_CFG:
        blocks = []
        for bi in range(2):
            b_cin = cin if bi == 0 else cout
            b_stride = stride if bi == 0 else 1
            bp = {
                'conv1': _make_conv(next(keys), cout, b_cin, 3, 3, cin_stored=_cp(b_cin)),
                'conv2': _make_conv(next(keys), cout, cout, 3, 3, cin_stored=_cp(cout)),
            }
            if b_stride != 1 or b_cin != cout:
                bp['down'] = _make_conv(next(keys), cout, b_cin, 1, 1, cin_stored=_cp(b_cin))
            blocks.append(bp)
        layers.append(blocks)
    params['layers'] = layers

    fc_w = (jax.random.normal(next(keys), (num_classes, 512), jnp.float32)
            / np.sqrt(512.0))
    nc_p = _cp(num_classes)
    params['fc_w'] = jnp.pad(jnp.transpose(fc_w), ((0, 0), (0, nc_p - num_classes)))
    params['fc_b'] = jnp.zeros((1, nc_p), jnp.float32)
    return params


# ----------------------------------------------------------------------------- #
# Forward pass
# ----------------------------------------------------------------------------- #
def basic_block(x, bp, stride):
    out = conv_bn_act(x, bp['conv1'], stride=stride, pad=1, relu=True)
    if 'down' in bp:
        shortcut = conv_bn_act(x, bp['down'], stride=stride, pad=0, relu=False)
    else:
        shortcut = x
    # conv2 + bn2 + residual-add + relu fused in one Pallas GEMM call.
    out = conv_bn_act(out, bp['conv2'], stride=1, pad=1, relu=True,
                      residual_nhwc=shortcut)
    return out


def transfer_learning_resnet18_forward(params, x_nchw, num_classes=4):
    x = jnp.transpose(x_nchw, (0, 2, 3, 1)).astype(jnp.bfloat16)   # NCHW -> NHWC
    x = conv_bn_act(x, params['conv1'], stride=2, pad=3, relu=True)
    x = max_pool_3x3_s2_p1(x)
    for (_, _, stride), layer in zip(_LAYER_CFG, params['layers']):
        x = basic_block(x, layer[0], stride)
        x = basic_block(x, layer[1], 1)
    # global avg pool + fc fused in one Pallas kernel
    return global_avg_pool_fc(x, params['fc_w'], params['fc_b'], num_classes)


if __name__ == "__main__":
    key = jax.random.PRNGKey(0)
    pkey, xkey = jax.random.split(key)
    params = init_resnet18_params(pkey, num_classes=4)
    # NCHW input with 1 channel (the module's replaced stem expects 1 channel).
    x = jax.random.normal(xkey, (2, 1, 16, 16), jnp.float32)
    fwd = jax.jit(transfer_learning_resnet18_forward)
    logits = fwd(params, x)
    jax.block_until_ready(logits)
    assert logits.shape == (2, 4), logits.shape
    assert bool(jnp.all(jnp.isfinite(logits)))
    print("KERNEL_OK")
</pallas_src>

<mosaic_0001>
module attributes {stable_mosaic.version = 11 : i64} {
  func.func @_gemm_kernel_1k(%arg0: i32, %arg1: i32, %arg2: i32, %arg3: memref<128x128xbf16, #tpu.memory_space<vmem>>, %arg4: memref<128x128xbf16, #tpu.memory_space<vmem>>, %arg5: memref<1x128xf32, #tpu.memory_space<vmem>>, %arg6: memref<128x128xbf16, #tpu.memory_space<vmem>>) attributes {dimension_semantics = [#tpu.dimension_semantics<parallel>, #tpu.dimension_semantics<parallel>, #tpu.dimension_semantics<arbitrary>], iteration_bounds = array<i64: 1, 1, 1>, scalar_prefetch = 0 : i64, scratch_operands = 0 : i64, tpu.core_type = #tpu.core_type<tc>, window_params = [{transform_indices = @transform_0, window_bounds = array<i64: 128, 128>}, {transform_indices = @transform_1, window_bounds = array<i64: 128, 128>}, {transform_indices = @transform_2, window_bounds = array<i64: 1, 128>}, {transform_indices = @transform_3, window_bounds = array<i64: 128, 128>}]} {
    %c0 = arith.constant 0 : index
    %c0_0 = arith.constant 0 : index
    %0 = vector.load %arg3[%c0, %c0_0] : memref<128x128xbf16, #tpu.memory_space<vmem>>, vector<128x128xbf16>
    %c0_1 = arith.constant 0 : index
    %c0_2 = arith.constant 0 : index
    %1 = vector.load %arg4[%c0_1, %c0_2] : memref<128x128xbf16, #tpu.memory_space<vmem>>, vector<128x128xbf16>
    %cst = arith.constant dense<0.000000e+00> : vector<128x128xf32>
    %2 = tpu.matmul %0, %1, %cst {dimension_numbers = #tpu.dot_dimension_numbers<[1], [0], [0], [1], [0, 0, 1, 1], [], []>} : vector<128x128xbf16>, vector<128x128xbf16>, vector<128x128xf32> -> vector<128x128xf32>
    %c0_3 = arith.constant 0 : index
    %c0_4 = arith.constant 0 : index
    %3 = vector.load %arg5[%c0_3, %c0_4] : memref<1x128xf32, #tpu.memory_space<vmem>>, vector<1x128xf32>
    %4 = vector.broadcast %3 : vector<1x128xf32> to vector<128x128xf32>
    %5 = arith.addf %2, %4 : vector<128x128xf32>
    %cst_5 = arith.constant 0.000000e+00 : f32
    %6 = vector.broadcast %cst_5 : f32 to vector<128x128xf32>
    %7 = arith.maximumf %5, %6 : vector<128x128xf32>
    %8 = arith.truncf %7 : vector<128x128xf32> to vector<128x128xbf16>
    %c0_6 = arith.constant 0 : index
    %c0_7 = arith.constant 0 : index
    %9 = vector.load %arg6[%c0_6, %c0_7] : memref<128x128xbf16, #tpu.memory_space<vmem>>, vector<128x128xbf16>
    tpu.vector_store %arg6[%c0_6, %c0_7], %8 {strides = array<i32>} : memref<128x128xbf16, #tpu.memory_space<vmem>>, vector<128x128xbf16>,
    return
  }
  func.func @transform_0(%arg0: i32, %arg1: i32, %arg2: i32) -> (i32, i32) {
    %c0_i32 = arith.constant 0 : i32
    return %arg0, %arg2 : i32, i32
  }
  func.func @transform_1(%arg0: i32, %arg1: i32, %arg2: i32) -> (i32, i32) {
    %c0_i32 = arith.constant 0 : i32
    return %arg2, %arg1 : i32, i32
  }
  func.func @transform_2(%arg0: i32, %arg1: i32, %arg2: i32) -> (i32, i32) {
    %c0_i32 = arith.constant 0 : i32
    %c0_i32_0 = arith.constant 0 : i32
    return %c0_i32, %arg1 : i32, i32
  }
  func.func @transform_3(%arg0: i32, %arg1: i32, %arg2: i32) -> (i32, i32) {
    %c0_i32 = arith.constant 0 : i32
    return %arg0, %arg1 : i32, i32
  }
}

module attributes {stable_mosaic.version = 11 : i64} {
  func.func @_gemm_kernel(%arg0: i32, %arg1: i32, %arg2: i32, %arg3: memref<32x384xbf16, #tpu.memory_space<vmem>>, %arg4: memref<384x128xbf16, #tpu.memory_space<vmem>>, %arg5: memref<1x128xf32, #tpu.memory_space<vmem>>, %arg6: memref<32x128xbf16, #tpu.memory_space<vmem>>, %arg7: memref<32x128xf32, #tpu.memory_space<vmem>>) attributes {dimension_semantics = [#tpu.dimension_semantics<parallel>, #tpu.dimension_semantics<parallel>, #tpu.dimension_semantics<arbitrary>], iteration_bounds = array<i64: 1, 1, 3>, scalar_prefetch = 0 : i64, scratch_operands = 1 : i64, tpu.core_type = #tpu.core_type<tc>, window_params = [{transform_indices = @transform_0, window_bounds = array<i64: 32, 384>}, {transform_indices = @transform_1, window_bounds = array<i64: 384, 128>}, {transform_indices = @transform_2, window_bounds = array<i64: 1, 128>}, {transform_indices = @transform_3, window_bounds = array<i64: 32, 128>}]} {
    %c0_i32 = arith.constant 0 : i32
    %0 = arith.cmpi eq, %arg2, %c0_i32 : i32
    %1 = arith.extui %0 : i1 to i32
    %c0_i32_0 = arith.constant 0 : i32
    %2 = arith.cmpi ne, %1, %c0_i32_0 : i32
    scf.if %2 {
      %cst_9 = arith.constant 0.000000e+00 : f32
      %12 = vector.broadcast %cst_9 : f32 to vector<32x128xf32>
      %c0_10 = arith.constant 0 : index
      %c0_11 = arith.constant 0 : index
      %13 = vector.load %arg7[%c0_10, %c0_11] : memref<32x128xf32, #tpu.memory_space<vmem>>, vector<32x128xf32>
      tpu.vector_store %arg7[%c0_10, %c0_11], %12 {strides = array<i32>} : memref<32x128xf32, #tpu.memory_space<vmem>>, vector<32x128xf32>,
    } else {
    }
    %c0 = arith.constant 0 : index
    %c0_1 = arith.constant 0 : index
    %3 = vector.load %arg7[%c0, %c0_1] : memref<32x128xf32, #tpu.memory_space<vmem>>, vector<32x128xf32>
    %c0_2 = arith.constant 0 : index
    %c0_3 = arith.constant 0 : index
    %4 = vector.load %arg3[%c0_2, %c0_3] : memref<32x384xbf16, #tpu.memory_space<vmem>>, vector<32x384xbf16>
    %c0_4 = arith.constant 0 : index
    %c0_5 = arith.constant 0 : index
    %5 = vector.load %arg4[%c0_4, %c0_5] : memref<384x128xbf16, #tpu.memory_space<vmem>>, vector<384x128xbf16>
    %cst = arith.constant dense<0.000000e+00> : vector<32x128xf32>
    %6 = tpu.matmul %4, %5, %cst {dimension_numbers = #tpu.dot_dimension_numbers<[1], [0], [0], [1], [0, 0, 1, 1], [], []>} : vector<32x384xbf16>, vector<384x128xbf16>, vector<32x128xf32> -> vector<32x128xf32>
    %7 = arith.addf %3, %6 : vector<32x128xf32>
    %c0_6 = arith.constant 0 : index
    %c0_7 = arith.constant 0 : index
    %8 = vector.load %arg7[%c0_6, %c0_7] : memref<32x128xf32, #tpu.memory_space<vmem>>, vector<32x128xf32>
    tpu.vector_store %arg7[%c0_6, %c0_7], %7 {strides = array<i32>} : memref<32x128xf32, #tpu.memory_space<vmem>>, vector<32x128xf32>,
    %c2_i32 = arith.constant 2 : i32
    %9 = arith.cmpi eq, %arg2, %c2_i32 : i32
    %10 = arith.extui %9 : i1 to i32
    %c0_i32_8 = arith.constant 0 : i32
    %11 = arith.cmpi ne, %10, %c0_i32_8 : i32
    scf.if %11 {
      %c0_9 = arith.constant 0 : index
      %c0_10 = arith.constant 0 : index
      %12 = vector.load %arg7[%c0_9, %c0_10] : memref<32x128xf32, #tpu.memory_space<vmem>>, vector<32x128xf32>
      %c0_11 = arith.constant 0 : index
      %c0_12 = arith.constant 0 : index
      %13 = vector.load %arg5[%c0_11, %c0_12] : memref<1x128xf32, #tpu.memory_space<vmem>>, vector<1x128xf32>
      %14 = vector.broadcast %13 : vector<1x128xf32> to vector<32x128xf32>
      %15 = arith.addf %12, %14 : vector<32x128xf32>
      %cst_13 = arith.constant 0.000000e+00 : f32
      %16 = vector.broadcast %cst_13 : f32 to vector<32x128xf32>
      %17 = arith.maximumf %15, %16 : vector<32x128xf32>
      %18 = arith.truncf %17 : vector<32x128xf32> to vector<32x128xbf16>
      %c0_14 = arith.constant 0 : index
      %c0_15 = arith.constant 0 : index
      %19 = vector.load %arg6[%c0_14, %c0_15] : memref<32x128xbf16, #tpu.memory_space<vmem>>, vector<32x128xbf16>
      tpu.vector_store %arg6[%c0_14, %c0_15], %18 {strides = array<i32>} : memref<32x128xbf16, #tpu.memory_space<vmem>>, vector<32x128xbf16>,
    } else {
    }
    return
  }
  func.func @transform_0(%arg0: i32, %arg1: i32, %arg2: i32) -> (i32, i32) {
    %c0_i32 = arith.constant 0 : i32
    return %arg0, %arg2 : i32, i32
  }
  func.func @transform_1(%arg0: i32, %arg1: i32, %arg2: i32) -> (i32, i32) {
    %c0_i32 = arith.constant 0 : i32
    return %arg2, %arg1 : i32, i32
  }
  func.func @transform_2(%arg0: i32, %arg1: i32, %arg2: i32) -> (i32, i32) {
    %c0_i32 = arith.constant 0 : i32
    %c0_i32_0 = arith.constant 0 : i32
    return %c0_i32, %arg1 : i32, i32
  }
  func.func @transform_3(%arg0: i32, %arg1: i32, %arg2: i32) -> (i32, i32) {
    %c0_i32 = arith.constant 0 : i32
    return %arg0, %arg1 : i32, i32
  }
}

module attributes {stable_mosaic.version = 11 : i64} {
  func.func @_gemm_res_kernel(%arg0: i32, %arg1: i32, %arg2: i32, %arg3: memref<32x384xbf16, #tpu.memory_space<vmem>>, %arg4: memref<384x128xbf16, #tpu.memory_space<vmem>>, %arg5: memref<1x128xf32, #tpu.memory_space<vmem>>, %arg6: memref<32x128xbf16, #tpu.memory_space<vmem>>, %arg7: memref<32x128xbf16, #tpu.memory_space<vmem>>, %arg8: memref<32x128xf32, #tpu.memory_space<vmem>>) attributes {dimension_semantics = [#tpu.dimension_semantics<parallel>, #tpu.dimension_semantics<parallel>, #tpu.dimension_semantics<arbitrary>], iteration_bounds = array<i64: 1, 1, 3>, scalar_prefetch = 0 : i64, scratch_operands = 1 : i64, tpu.core_type = #tpu.core_type<tc>, window_params = [{transform_indices = @transform_0, window_bounds = array<i64: 32, 384>}, {transform_indices = @transform_1, window_bounds = array<i64: 384, 128>}, {transform_indices = @transform_2, window_bounds = array<i64: 1, 128>}, {transform_indices = @transform_3, window_bounds = array<i64: 32, 128>}, {transform_indices = @transform_4, window_bounds = array<i64: 32, 128>}]} {
    %c0_i32 = arith.constant 0 : i32
    %0 = arith.cmpi eq, %arg2, %c0_i32 : i32
    %1 = arith.extui %0 : i1 to i32
    %c0_i32_0 = arith.constant 0 : i32
    %2 = arith.cmpi ne, %1, %c0_i32_0 : i32
    scf.if %2 {
      %cst_9 = arith.constant 0.000000e+00 : f32
      %12 = vector.broadcast %cst_9 : f32 to vector<32x128xf32>
      %c0_10 = arith.constant 0 : index
      %c0_11 = arith.constant 0 : index
      %13 = vector.load %arg8[%c0_10, %c0_11] : memref<32x128xf32, #tpu.memory_space<vmem>>, vector<32x128xf32>
      tpu.vector_store %arg8[%c0_10, %c0_11], %12 {strides = array<i32>} : memref<32x128xf32, #tpu.memory_space<vmem>>, vector<32x128xf32>,
    } else {
    }
    %c0 = arith.constant 0 : index
    %c0_1 = arith.constant 0 : index
    %3 = vector.load %arg8[%c0, %c0_1] : memref<32x128xf32, #tpu.memory_space<vmem>>, vector<32x128xf32>
    %c0_2 = arith.constant 0 : index
    %c0_3 = arith.constant 0 : index
    %4 = vector.load %arg3[%c0_2, %c0_3] : memref<32x384xbf16, #tpu.memory_space<vmem>>, vector<32x384xbf16>
    %c0_4 = arith.constant 0 : index
    %c0_5 = arith.constant 0 : index
    %5 = vector.load %arg4[%c0_4, %c0_5] : memref<384x128xbf16, #tpu.memory_space<vmem>>, vector<384x128xbf16>
    %cst = arith.constant dense<0.000000e+00> : vector<32x128xf32>
    %6 = tpu.matmul %4, %5, %cst {dimension_numbers = #tpu.dot_dimension_numbers<[1], [0], [0], [1], [0, 0, 1, 1], [], []>} : vector<32x384xbf16>, vector<384x128xbf16>, vector<32x128xf32> -> vector<32x128xf32>
    %7 = arith.addf %3, %6 : vector<32x128xf32>
    %c0_6 = arith.constant 0 : index
    %c0_7 = arith.constant 0 : index
    %8 = vector.load %arg8[%c0_6, %c0_7] : memref<32x128xf32, #tpu.memory_space<vmem>>, vector<32x128xf32>
    tpu.vector_store %arg8[%c0_6, %c0_7], %7 {strides = array<i32>} : memref<32x128xf32, #tpu.memory_space<vmem>>, vector<32x128xf32>,
    %c2_i32 = arith.constant 2 : i32
    %9 = arith.cmpi eq, %arg2, %c2_i32 : i32
    %10 = arith.extui %9 : i1 to i32
    %c0_i32_8 = arith.constant 0 : i32
    %11 = arith.cmpi ne, %10, %c0_i32_8 : i32
    scf.if %11 {
      %c0_9 = arith.constant 0 : index
      %c0_10 = arith.constant 0 : index
      %12 = vector.load %arg8[%c0_9, %c0_10] : memref<32x128xf32, #tpu.memory_space<vmem>>, vector<32x128xf32>
      %c0_11 = arith.constant 0 : index
      %c0_12 = arith.constant 0 : index
      %13 = vector.load %arg5[%c0_11, %c0_12] : memref<1x128xf32, #tpu.memory_space<vmem>>, vector<1x128xf32>
      %c0_13 = arith.constant 0 : index
      %c0_14 = arith.constant 0 : index
      %14 = vector.load %arg6[%c0_13, %c0_14] : memref<32x128xbf16, #tpu.memory_space<vmem>>, vector<32x128xbf16>
      %15 = vector.broadcast %13 : vector<1x128xf32> to vector<32x128xf32>
      %16 = arith.addf %12, %15 : vector<32x128xf32>
      %17 = arith.extf %14 : vector<32x128xbf16> to vector<32x128xf32>
      %18 = arith.addf %16, %17 : vector<32x128xf32>
      %cst_15 = arith.constant 0.000000e+00 : f32
      %19 = vector.broadcast %cst_15 : f32 to vector<32x128xf32>
      %20 = arith.maximumf %18, %19 : vector<32x128xf32>
      %21 = arith.truncf %20 : vector<32x128xf32> to vector<32x128xbf16>
      %c0_16 = arith.constant 0 : index
      %c0_17 = arith.constant 0 : index
      %22 = vector.load %arg7[%c0_16, %c0_17] : memref<32x128xbf16, #tpu.memory_space<vmem>>, vector<32x128xbf16>
      tpu.vector_store %arg7[%c0_16, %c0_17], %21 {strides = array<i32>} : memref<32x128xbf16, #tpu.memory_space<vmem>>, vector<32x128xbf16>,
    } else {
    }
    return
  }
  func.func @transform_0(%arg0: i32, %arg1: i32, %arg2: i32) -> (i32, i32) {
    %c0_i32 = arith.constant 0 : i32
    return %arg0, %arg2 : i32, i32
  }
  func.func @transform_1(%arg0: i32, %arg1: i32, %arg2: i32) -> (i32, i32) {
    %c0_i32 = arith.constant 0 : i32
    return %arg2, %arg1 : i32, i32
  }
  func.func @transform_2(%arg0: i32, %arg1: i32, %arg2: i32) -> (i32, i32) {
    %c0_i32 = arith.constant 0 : i32
    %c0_i32_0 = arith.constant 0 : i32
    return %c0_i32, %arg1 : i32, i32
  }
  func.func @transform_3(%arg0: i32, %arg1: i32, %arg2: i32) -> (i32, i32) {
    %c0_i32 = arith.constant 0 : i32
    return %arg0, %arg1 : i32, i32
  }
  func.func @transform_4(%arg0: i32, %arg1: i32, %arg2: i32) -> (i32, i32) {
    %c0_i32 = arith.constant 0 : i32
    return %arg0, %arg1 : i32, i32
  }
}

module attributes {stable_mosaic.version = 11 : i64} {
  func.func @_gemm_res_kernel(%arg0: i32, %arg1: i32, %arg2: i32, %arg3: memref<32x384xbf16, #tpu.memory_space<vmem>>, %arg4: memref<384x128xbf16, #tpu.memory_space<vmem>>, %arg5: memref<1x128xf32, #tpu.memory_space<vmem>>, %arg6: memref<32x128xbf16, #tpu.memory_space<vmem>>, %arg7: memref<32x128xbf16, #tpu.memory_space<vmem>>, %arg8: memref<32x128xf32, #tpu.memory_space<vmem>>) attributes {dimension_semantics = [#tpu.dimension_semantics<parallel>, #tpu.dimension_semantics<parallel>, #tpu.dimension_semantics<arbitrary>], iteration_bounds = array<i64: 1, 1, 3>, scalar_prefetch = 0 : i64, scratch_operands = 1 : i64, tpu.core_type = #tpu.core_type<tc>, window_params = [{transform_indices = @transform_0, window_bounds = array<i64: 32, 384>}, {transform_indices = @transform_1, window_bounds = array<i64: 384, 128>}, {transform_indices = @transform_2, window_bounds = array<i64: 1, 128>}, {transform_indices = @transform_3, window_bounds = array<i64: 32, 128>}, {transform_indices = @transform_4, window_bounds = array<i64: 32, 128>}]} {
    %c0_i32 = arith.constant 0 : i32
    %0 = arith.cmpi eq, %arg2, %c0_i32 : i32
    %1 = arith.extui %0 : i1 to i32
    %c0_i32_0 = arith.constant 0 : i32
    %2 = arith.cmpi ne, %1, %c0_i32_0 : i32
    scf.if %2 {
      %cst_9 = arith.constant 0.000000e+00 : f32
      %12 = vector.broadcast %cst_9 : f32 to vector<32x128xf32>
      %c0_10 = arith.constant 0 : index
      %c0_11 = arith.constant 0 : index
      %13 = vector.load %arg8[%c0_10, %c0_11] : memref<32x128xf32, #tpu.memory_space<vmem>>, vector<32x128xf32>
      tpu.vector_store %arg8[%c0_10, %c0_11], %12 {strides = array<i32>} : memref<32x128xf32, #tpu.memory_space<vmem>>, vector<32x128xf32>,
    } else {
    }
    %c0 = arith.constant 0 : index
    %c0_1 = arith.constant 0 : index
    %3 = vector.load %arg8[%c0, %c0_1] : memref<32x128xf32, #tpu.memory_space<vmem>>, vector<32x128xf32>
    %c0_2 = arith.constant 0 : index
    %c0_3 = arith.constant 0 : index
    %4 = vector.load %arg3[%c0_2, %c0_3] : memref<32x384xbf16, #tpu.memory_space<vmem>>, vector<32x384xbf16>
    %c0_4 = arith.constant 0 : index
    %c0_5 = arith.constant 0 : index
    %5 = vector.load %arg4[%c0_4, %c0_5] : memref<384x128xbf16, #tpu.memory_space<vmem>>, vector<384x128xbf16>
    %cst = arith.constant dense<0.000000e+00> : vector<32x128xf32>
    %6 = tpu.matmul %4, %5, %cst {dimension_numbers = #tpu.dot_dimension_numbers<[1], [0], [0], [1], [0, 0, 1, 1], [], []>} : vector<32x384xbf16>, vector<384x128xbf16>, vector<32x128xf32> -> vector<32x128xf32>
    %7 = arith.addf %3, %6 : vector<32x128xf32>
    %c0_6 = arith.constant 0 : index
    %c0_7 = arith.constant 0 : index
    %8 = vector.load %arg8[%c0_6, %c0_7] : memref<32x128xf32, #tpu.memory_space<vmem>>, vector<32x128xf32>
    tpu.vector_store %arg8[%c0_6, %c0_7], %7 {strides = array<i32>} : memref<32x128xf32, #tpu.memory_space<vmem>>, vector<32x128xf32>,
    %c2_i32 = arith.constant 2 : i32
    %9 = arith.cmpi eq, %arg2, %c2_i32 : i32
    %10 = arith.extui %9 : i1 to i32
    %c0_i32_8 = arith.constant 0 : i32
    %11 = arith.cmpi ne, %10, %c0_i32_8 : i32
    scf.if %11 {
      %c0_9 = arith.constant 0 : index
      %c0_10 = arith.constant 0 : index
      %12 = vector.load %arg8[%c0_9, %c0_10] : memref<32x128xf32, #tpu.memory_space<vmem>>, vector<32x128xf32>
      %c0_11 = arith.constant 0 : index
      %c0_12 = arith.constant 0 : index
      %13 = vector.load %arg5[%c0_11, %c0_12] : memref<1x128xf32, #tpu.memory_space<vmem>>, vector<1x128xf32>
      %c0_13 = arith.constant 0 : index
      %c0_14 = arith.constant 0 : index
      %14 = vector.load %arg6[%c0_13, %c0_14] : memref<32x128xbf16, #tpu.memory_space<vmem>>, vector<32x128xbf16>
      %15 = vector.broadcast %13 : vector<1x128xf32> to vector<32x128xf32>
      %16 = arith.addf %12, %15 : vector<32x128xf32>
      %17 = arith.extf %14 : vector<32x128xbf16> to vector<32x128xf32>
      %18 = arith.addf %16, %17 : vector<32x128xf32>
      %cst_15 = arith.constant 0.000000e+00 : f32
      %19 = vector.broadcast %cst_15 : f32 to vector<32x128xf32>
      %20 = arith.maximumf %18, %19 : vector<32x128xf32>
      %21 = arith.truncf %20 : vector<32x128xf32> to vector<32x128xbf16>
      %c0_16 = arith.constant 0 : index
      %c0_17 = arith.constant 0 : index
      %22 = vector.load %arg7[%c0_16, %c0_17] : memref<32x128xbf16, #tpu.memory_space<vmem>>, vector<32x128xbf16>
      tpu.vector_store %arg7[%c0_16, %c0_17], %21 {strides = array<i32>} : memref<32x128xbf16, #tpu.memory_space<vmem>>, vector<32x128xbf16>,
    } else {
    }
    return
  }
  func.func @transform_0(%arg0: i32, %arg1: i32, %arg2: i32) -> (i32, i32) {
    %c0_i32 = arith.constant 0 : i32
    return %arg0, %arg2 : i32, i32
  }
  func.func @transform_1(%arg0: i32, %arg1: i32, %arg2: i32) -> (i32, i32) {
    %c0_i32 = arith.constant 0 : i32
    return %arg2, %arg1 : i32, i32
  }
  func.func @transform_2(%arg0: i32, %arg1: i32, %arg2: i32) -> (i32, i32) {
    %c0_i32 = arith.constant 0 : i32
    %c0_i32_0 = arith.constant 0 : i32
    return %c0_i32, %arg1 : i32, i32
  }
  func.func @transform_3(%arg0: i32, %arg1: i32, %arg2: i32) -> (i32, i32) {
    %c0_i32 = arith.constant 0 : i32
    return %arg0, %arg1 : i32, i32
  }
  func.func @transform_4(%arg0: i32, %arg1: i32, %arg2: i32) -> (i32, i32) {
    %c0_i32 = arith.constant 0 : i32
    return %arg0, %arg1 : i32, i32
  }
}

module attributes {stable_mosaic.version = 11 : i64} {
  func.func @_gemm_kernel(%arg0: i32, %arg1: i32, %arg2: i32, %arg3: memref<8x384xbf16, #tpu.memory_space<vmem>>, %arg4: memref<384x128xbf16, #tpu.memory_space<vmem>>, %arg5: memref<1x128xf32, #tpu.memory_space<vmem>>, %arg6: memref<8x128xbf16, #tpu.memory_space<vmem>>, %arg7: memref<8x128xf32, #tpu.memory_space<vmem>>) attributes {dimension_semantics = [#tpu.dimension_semantics<parallel>, #tpu.dimension_semantics<parallel>, #tpu.dimension_semantics<arbitrary>], iteration_bounds = array<i64: 1, 1, 3>, scalar_prefetch = 0 : i64, scratch_operands = 1 : i64, tpu.core_type = #tpu.core_type<tc>, window_params = [{transform_indices = @transform_0, window_bounds = array<i64: 8, 384>}, {transform_indices = @transform_1, window_bounds = array<i64: 384, 128>}, {transform_indices = @transform_2, window_bounds = array<i64: 1, 128>}, {transform_indices = @transform_3, window_bounds = array<i64: 8, 128>}]} {
    %c0_i32 = arith.constant 0 : i32
    %0 = arith.cmpi eq, %arg2, %c0_i32 : i32
    %1 = arith.extui %0 : i1 to i32
    %c0_i32_0 = arith.constant 0 : i32
    %2 = arith.cmpi ne, %1, %c0_i32_0 : i32
    scf.if %2 {
      %cst_9 = arith.constant 0.000000e+00 : f32
      %12 = vector.broadcast %cst_9 : f32 to vector<8x128xf32>
      %c0_10 = arith.constant 0 : index
      %c0_11 = arith.constant 0 : index
      %13 = vector.load %arg7[%c0_10, %c0_11] : memref<8x128xf32, #tpu.memory_space<vmem>>, vector<8x128xf32>
      tpu.vector_store %arg7[%c0_10, %c0_11], %12 {strides = array<i32>} : memref<8x128xf32, #tpu.memory_space<vmem>>, vector<8x128xf32>,
    } else {
    }
    %c0 = arith.constant 0 : index
    %c0_1 = arith.constant 0 : index
    %3 = vector.load %arg7[%c0, %c0_1] : memref<8x128xf32, #tpu.memory_space<vmem>>, vector<8x128xf32>
    %c0_2 = arith.constant 0 : index
    %c0_3 = arith.constant 0 : index
    %4 = vector.load %arg3[%c0_2, %c0_3] : memref<8x384xbf16, #tpu.memory_space<vmem>>, vector<8x384xbf16>
    %c0_4 = arith.constant 0 : index
    %c0_5 = arith.constant 0 : index
    %5 = vector.load %arg4[%c0_4, %c0_5] : memref<384x128xbf16, #tpu.memory_space<vmem>>, vector<384x128xbf16>
    %cst = arith.constant dense<0.000000e+00> : vector<8x128xf32>
    %6 = tpu.matmul %4, %5, %cst {dimension_numbers = #tpu.dot_dimension_numbers<[1], [0], [0], [1], [0, 0, 1, 1], [], []>} : vector<8x384xbf16>, vector<384x128xbf16>, vector<8x128xf32> -> vector<8x128xf32>
    %7 = arith.addf %3, %6 : vector<8x128xf32>
    %c0_6 = arith.constant 0 : index
    %c0_7 = arith.constant 0 : index
    %8 = vector.load %arg7[%c0_6, %c0_7] : memref<8x128xf32, #tpu.memory_space<vmem>>, vector<8x128xf32>
    tpu.vector_store %arg7[%c0_6, %c0_7], %7 {strides = array<i32>} : memref<8x128xf32, #tpu.memory_space<vmem>>, vector<8x128xf32>,
    %c2_i32 = arith.constant 2 : i32
    %9 = arith.cmpi eq, %arg2, %c2_i32 : i32
    %10 = arith.extui %9 : i1 to i32
    %c0_i32_8 = arith.constant 0 : i32
    %11 = arith.cmpi ne, %10, %c0_i32_8 : i32
    scf.if %11 {
      %c0_9 = arith.constant 0 : index
      %c0_10 = arith.constant 0 : index
      %12 = vector.load %arg7[%c0_9, %c0_10] : memref<8x128xf32, #tpu.memory_space<vmem>>, vector<8x128xf32>
      %c0_11 = arith.constant 0 : index
      %c0_12 = arith.constant 0 : index
      %13 = vector.load %arg5[%c0_11, %c0_12] : memref<1x128xf32, #tpu.memory_space<vmem>>, vector<1x128xf32>
      %14 = vector.broadcast %13 : vector<1x128xf32> to vector<8x128xf32>
      %15 = arith.addf %12, %14 : vector<8x128xf32>
      %cst_13 = arith.constant 0.000000e+00 : f32
      %16 = vector.broadcast %cst_13 : f32 to vector<8x128xf32>
      %17 = arith.maximumf %15, %16 : vector<8x128xf32>
      %18 = arith.truncf %17 : vector<8x128xf32> to vector<8x128xbf16>
      %c0_14 = arith.constant 0 : index
      %c0_15 = arith.constant 0 : index
      %19 = vector.load %arg6[%c0_14, %c0_15] : memref<8x128xbf16, #tpu.memory_space<vmem>>, vector<8x128xbf16>
      tpu.vector_store %arg6[%c0_14, %c0_15], %18 {strides = array<i32>} : memref<8x128xbf16, #tpu.memory_space<vmem>>, vector<8x128xbf16>,
    } else {
    }
    return
  }
  func.func @transform_0(%arg0: i32, %arg1: i32, %arg2: i32) -> (i32, i32) {
    %c0_i32 = arith.constant 0 : i32
    return %arg0, %arg2 : i32, i32
  }
  func.func @transform_1(%arg0: i32, %arg1: i32, %arg2: i32) -> (i32, i32) {
    %c0_i32 = arith.constant 0 : i32
    return %arg2, %arg1 : i32, i32
  }
  func.func @transform_2(%arg0: i32, %arg1: i32, %arg2: i32) -> (i32, i32) {
    %c0_i32 = arith.constant 0 : i32
    %c0_i32_0 = arith.constant 0 : i32
    return %c0_i32, %arg1 : i32, i32
  }
  func.func @transform_3(%arg0: i32, %arg1: i32, %arg2: i32) -> (i32, i32) {
    %c0_i32 = arith.constant 0 : i32
    return %arg0, %arg1 : i32, i32
  }
}

module attributes {stable_mosaic.version = 11 : i64} {
  func.func @_gemm_kernel_1k(%arg0: i32, %arg1: i32, %arg2: i32, %arg3: memref<8x128xbf16, #tpu.memory_space<vmem>>, %arg4: memref<128x128xbf16, #tpu.memory_space<vmem>>, %arg5: memref<1x128xf32, #tpu.memory_space<vmem>>, %arg6: memref<8x128xbf16, #tpu.memory_space<vmem>>) attributes {dimension_semantics = [#tpu.dimension_semantics<parallel>, #tpu.dimension_semantics<parallel>, #tpu.dimension_semantics<arbitrary>], iteration_bounds = array<i64: 1, 1, 1>, scalar_prefetch = 0 : i64, scratch_operands = 0 : i64, tpu.core_type = #tpu.core_type<tc>, window_params = [{transform_indices = @transform_0, window_bounds = array<i64: 8, 128>}, {transform_indices = @transform_1, window_bounds = array<i64: 128, 128>}, {transform_indices = @transform_2, window_bounds = array<i64: 1, 128>}, {transform_indices = @transform_3, window_bounds = array<i64: 8, 128>}]} {
    %c0 = arith.constant 0 : index
    %c0_0 = arith.constant 0 : index
    %0 = vector.load %arg3[%c0, %c0_0] : memref<8x128xbf16, #tpu.memory_space<vmem>>, vector<8x128xbf16>
    %c0_1 = arith.constant 0 : index
    %c0_2 = arith.constant 0 : index
    %1 = vector.load %arg4[%c0_1, %c0_2] : memref<128x128xbf16, #tpu.memory_space<vmem>>, vector<128x128xbf16>
    %cst = arith.constant dense<0.000000e+00> : vector<8x128xf32>
    %2 = tpu.matmul %0, %1, %cst {dimension_numbers = #tpu.dot_dimension_numbers<[1], [0], [0], [1], [0, 0, 1, 1], [], []>} : vector<8x128xbf16>, vector<128x128xbf16>, vector<8x128xf32> -> vector<8x128xf32>
    %c0_3 = arith.constant 0 : index
    %c0_4 = arith.constant 0 : index
    %3 = vector.load %arg5[%c0_3, %c0_4] : memref<1x128xf32, #tpu.memory_space<vmem>>, vector<1x128xf32>
    %4 = vector.broadcast %3 : vector<1x128xf32> to vector<8x128xf32>
    %5 = arith.addf %2, %4 : vector<8x128xf32>
    %6 = arith.truncf %5 : vector<8x128xf32> to vector<8x128xbf16>
    %c0_5 = arith.constant 0 : index
    %c0_6 = arith.constant 0 : index
    %7 = vector.load %arg6[%c0_5, %c0_6] : memref<8x128xbf16, #tpu.memory_space<vmem>>, vector<8x128xbf16>
    tpu.vector_store %arg6[%c0_5, %c0_6], %6 {strides = array<i32>} : memref<8x128xbf16, #tpu.memory_space<vmem>>, vector<8x128xbf16>,
    return
  }
  func.func @transform_0(%arg0: i32, %arg1: i32, %arg2: i32) -> (i32, i32) {
    %c0_i32 = arith.constant 0 : i32
    return %arg0, %arg2 : i32, i32
  }
  func.func @transform_1(%arg0: i32, %arg1: i32, %arg2: i32) -> (i32, i32) {
    %c0_i32 = arith.constant 0 : i32
    return %arg2, %arg1 : i32, i32
  }
  func.func @transform_2(%arg0: i32, %arg1: i32, %arg2: i32) -> (i32, i32) {
    %c0_i32 = arith.constant 0 : i32
    %c0_i32_0 = arith.constant 0 : i32
    return %c0_i32, %arg1 : i32, i32
  }
  func.func @transform_3(%arg0: i32, %arg1: i32, %arg2: i32) -> (i32, i32) {
    %c0_i32 = arith.constant 0 : i32
    return %arg0, %arg1 : i32, i32
  }
}

module attributes {stable_mosaic.version = 11 : i64} {
  func.func @_gemm_res_kernel(%arg0: i32, %arg1: i32, %arg2: i32, %arg3: memref<8x384xbf16, #tpu.memory_space<vmem>>, %arg4: memref<384x128xbf16, #tpu.memory_space<vmem>>, %arg5: memref<1x128xf32, #tpu.memory_space<vmem>>, %arg6: memref<8x128xbf16, #tpu.memory_space<vmem>>, %arg7: memref<8x128xbf16, #tpu.memory_space<vmem>>, %arg8: memref<8x128xf32, #tpu.memory_space<vmem>>) attributes {dimension_semantics = [#tpu.dimension_semantics<parallel>, #tpu.dimension_semantics<parallel>, #tpu.dimension_semantics<arbitrary>], iteration_bounds = array<i64: 1, 1, 3>, scalar_prefetch = 0 : i64, scratch_operands = 1 : i64, tpu.core_type = #tpu.core_type<tc>, window_params = [{transform_indices = @transform_0, window_bounds = array<i64: 8, 384>}, {transform_indices = @transform_1, window_bounds = array<i64: 384, 128>}, {transform_indices = @transform_2, window_bounds = array<i64: 1, 128>}, {transform_indices = @transform_3, window_bounds = array<i64: 8, 128>}, {transform_indices = @transform_4, window_bounds = array<i64: 8, 128>}]} {
    %c0_i32 = arith.constant 0 : i32
    %0 = arith.cmpi eq, %arg2, %c0_i32 : i32
    %1 = arith.extui %0 : i1 to i32
    %c0_i32_0 = arith.constant 0 : i32
    %2 = arith.cmpi ne, %1, %c0_i32_0 : i32
    scf.if %2 {
      %cst_9 = arith.constant 0.000000e+00 : f32
      %12 = vector.broadcast %cst_9 : f32 to vector<8x128xf32>
      %c0_10 = arith.constant 0 : index
      %c0_11 = arith.constant 0 : index
      %13 = vector.load %arg8[%c0_10, %c0_11] : memref<8x128xf32, #tpu.memory_space<vmem>>, vector<8x128xf32>
      tpu.vector_store %arg8[%c0_10, %c0_11], %12 {strides = array<i32>} : memref<8x128xf32, #tpu.memory_space<vmem>>, vector<8x128xf32>,
    } else {
    }
    %c0 = arith.constant 0 : index
    %c0_1 = arith.constant 0 : index
    %3 = vector.load %arg8[%c0, %c0_1] : memref<8x128xf32, #tpu.memory_space<vmem>>, vector<8x128xf32>
    %c0_2 = arith.constant 0 : index
    %c0_3 = arith.constant 0 : index
    %4 = vector.load %arg3[%c0_2, %c0_3] : memref<8x384xbf16, #tpu.memory_space<vmem>>, vector<8x384xbf16>
    %c0_4 = arith.constant 0 : index
    %c0_5 = arith.constant 0 : index
    %5 = vector.load %arg4[%c0_4, %c0_5] : memref<384x128xbf16, #tpu.memory_space<vmem>>, vector<384x128xbf16>
    %cst = arith.constant dense<0.000000e+00> : vector<8x128xf32>
    %6 = tpu.matmul %4, %5, %cst {dimension_numbers = #tpu.dot_dimension_numbers<[1], [0], [0], [1], [0, 0, 1, 1], [], []>} : vector<8x384xbf16>, vector<384x128xbf16>, vector<8x128xf32> -> vector<8x128xf32>
    %7 = arith.addf %3, %6 : vector<8x128xf32>
    %c0_6 = arith.constant 0 : index
    %c0_7 = arith.constant 0 : index
    %8 = vector.load %arg8[%c0_6, %c0_7] : memref<8x128xf32, #tpu.memory_space<vmem>>, vector<8x128xf32>
    tpu.vector_store %arg8[%c0_6, %c0_7], %7 {strides = array<i32>} : memref<8x128xf32, #tpu.memory_space<vmem>>, vector<8x128xf32>,
    %c2_i32 = arith.constant 2 : i32
    %9 = arith.cmpi eq, %arg2, %c2_i32 : i32
    %10 = arith.extui %9 : i1 to i32
    %c0_i32_8 = arith.constant 0 : i32
    %11 = arith.cmpi ne, %10, %c0_i32_8 : i32
    scf.if %11 {
      %c0_9 = arith.constant 0 : index
      %c0_10 = arith.constant 0 : index
      %12 = vector.load %arg8[%c0_9, %c0_10] : memref<8x128xf32, #tpu.memory_space<vmem>>, vector<8x128xf32>
      %c0_11 = arith.constant 0 : index
      %c0_12 = arith.constant 0 : index
      %13 = vector.load %arg5[%c0_11, %c0_12] : memref<1x128xf32, #tpu.memory_space<vmem>>, vector<1x128xf32>
      %c0_13 = arith.constant 0 : index
      %c0_14 = arith.constant 0 : index
      %14 = vector.load %arg6[%c0_13, %c0_14] : memref<8x128xbf16, #tpu.memory_space<vmem>>, vector<8x128xbf16>
      %15 = vector.broadcast %13 : vector<1x128xf32> to vector<8x128xf32>
      %16 = arith.addf %12, %15 : vector<8x128xf32>
      %17 = arith.extf %14 : vector<8x128xbf16> to vector<8x128xf32>
      %18 = arith.addf %16, %17 : vector<8x128xf32>
      %cst_15 = arith.constant 0.000000e+00 : f32
      %19 = vector.broadcast %cst_15 : f32 to vector<8x128xf32>
      %20 = arith.maximumf %18, %19 : vector<8x128xf32>
      %21 = arith.truncf %20 : vector<8x128xf32> to vector<8x128xbf16>
      %c0_16 = arith.constant 0 : index
      %c0_17 = arith.constant 0 : index
      %22 = vector.load %arg7[%c0_16, %c0_17] : memref<8x128xbf16, #tpu.memory_space<vmem>>, vector<8x128xbf16>
      tpu.vector_store %arg7[%c0_16, %c0_17], %21 {strides = array<i32>} : memref<8x128xbf16, #tpu.memory_space<vmem>>, vector<8x128xbf16>,
    } else {
    }
    return
  }
  func.func @transform_0(%arg0: i32, %arg1: i32, %arg2: i32) -> (i32, i32) {
    %c0_i32 = arith.constant 0 : i32
    return %arg0, %arg2 : i32, i32
  }
  func.func @transform_1(%arg0: i32, %arg1: i32, %arg2: i32) -> (i32, i32) {
    %c0_i32 = arith.constant 0 : i32
    return %arg2, %arg1 : i32, i32
  }
  func.func @transform_2(%arg0: i32, %arg1: i32, %arg2: i32) -> (i32, i32) {
    %c0_i32 = arith.constant 0 : i32
    %c0_i32_0 = arith.constant 0 : i32
    return %c0_i32, %arg1 : i32, i32
  }
  func.func @transform_3(%arg0: i32, %arg1: i32, %arg2: i32) -> (i32, i32) {
    %c0_i32 = arith.constant 0 : i32
    return %arg0, %arg1 : i32, i32
  }
  func.func @transform_4(%arg0: i32, %arg1: i32, %arg2: i32) -> (i32, i32) {
    %c0_i32 = arith.constant 0 : i32
    return %arg0, %arg1 : i32, i32
  }
}

module attributes {stable_mosaic.version = 11 : i64} {
  func.func @_gemm_kernel(%arg0: i32, %arg1: i32, %arg2: i32, %arg3: memref<8x384xbf16, #tpu.memory_space<vmem>>, %arg4: memref<384x128xbf16, #tpu.memory_space<vmem>>, %arg5: memref<1x128xf32, #tpu.memory_space<vmem>>, %arg6: memref<8x128xbf16, #tpu.memory_space<vmem>>, %arg7: memref<8x128xf32, #tpu.memory_space<vmem>>) attributes {dimension_semantics = [#tpu.dimension_semantics<parallel>, #tpu.dimension_semantics<parallel>, #tpu.dimension_semantics<arbitrary>], iteration_bounds = array<i64: 1, 2, 3>, scalar_prefetch = 0 : i64, scratch_operands = 1 : i64, tpu.core_type = #tpu.core_type<tc>, window_params = [{transform_indices = @transform_0, window_bounds = array<i64: 8, 384>}, {transform_indices = @transform_1, window_bounds = array<i64: 384, 128>}, {transform_indices = @transform_2, window_bounds = array<i64: 1, 128>}, {transform_indices = @transform_3, window_bounds = array<i64: 8, 128>}]} {
    %c0_i32 = arith.constant 0 : i32
    %0 = arith.cmpi eq, %arg2, %c0_i32 : i32
    %1 = arith.extui %0 : i1 to i32
    %c0_i32_0 = arith.constant 0 : i32
    %2 = arith.cmpi ne, %1, %c0_i32_0 : i32
    scf.if %2 {
      %cst_9 = arith.constant 0.000000e+00 : f32
      %12 = vector.broadcast %cst_9 : f32 to vector<8x128xf32>
      %c0_10 = arith.constant 0 : index
      %c0_11 = arith.constant 0 : index
      %13 = vector.load %arg7[%c0_10, %c0_11] : memref<8x128xf32, #tpu.memory_space<vmem>>, vector<8x128xf32>
      tpu.vector_store %arg7[%c0_10, %c0_11], %12 {strides = array<i32>} : memref<8x128xf32, #tpu.memory_space<vmem>>, vector<8x128xf32>,
    } else {
    }
    %c0 = arith.constant 0 : index
    %c0_1 = arith.constant 0 : index
    %3 = vector.load %arg7[%c0, %c0_1] : memref<8x128xf32, #tpu.memory_space<vmem>>, vector<8x128xf32>
    %c0_2 = arith.constant 0 : index
    %c0_3 = arith.constant 0 : index
    %4 = vector.load %arg3[%c0_2, %c0_3] : memref<8x384xbf16, #tpu.memory_space<vmem>>, vector<8x384xbf16>
    %c0_4 = arith.constant 0 : index
    %c0_5 = arith.constant 0 : index
    %5 = vector.load %arg4[%c0_4, %c0_5] : memref<384x128xbf16, #tpu.memory_space<vmem>>, vector<384x128xbf16>
    %cst = arith.constant dense<0.000000e+00> : vector<8x128xf32>
    %6 = tpu.matmul %4, %5, %cst {dimension_numbers = #tpu.dot_dimension_numbers<[1], [0], [0], [1], [0, 0, 1, 1], [], []>} : vector<8x384xbf16>, vector<384x128xbf16>, vector<8x128xf32> -> vector<8x128xf32>
    %7 = arith.addf %3, %6 : vector<8x128xf32>
    %c0_6 = arith.constant 0 : index
    %c0_7 = arith.constant 0 : index
    %8 = vector.load %arg7[%c0_6, %c0_7] : memref<8x128xf32, #tpu.memory_space<vmem>>, vector<8x128xf32>
    tpu.vector_store %arg7[%c0_6, %c0_7], %7 {strides = array<i32>} : memref<8x128xf32, #tpu.memory_space<vmem>>, vector<8x128xf32>,
    %c2_i32 = arith.constant 2 : i32
    %9 = arith.cmpi eq, %arg2, %c2_i32 : i32
    %10 = arith.extui %9 : i1 to i32
    %c0_i32_8 = arith.constant 0 : i32
    %11 = arith.cmpi ne, %10, %c0_i32_8 : i32
    scf.if %11 {
      %c0_9 = arith.constant 0 : index
      %c0_10 = arith.constant 0 : index
      %12 = vector.load %arg7[%c0_9, %c0_10] : memref<8x128xf32, #tpu.memory_space<vmem>>, vector<8x128xf32>
      %c0_11 = arith.constant 0 : index
      %c0_12 = arith.constant 0 : index
      %13 = vector.load %arg5[%c0_11, %c0_12] : memref<1x128xf32, #tpu.memory_space<vmem>>, vector<1x128xf32>
      %14 = vector.broadcast %13 : vector<1x128xf32> to vector<8x128xf32>
      %15 = arith.addf %12, %14 : vector<8x128xf32>
      %cst_13 = arith.constant 0.000000e+00 : f32
      %16 = vector.broadcast %cst_13 : f32 to vector<8x128xf32>
      %17 = arith.maximumf %15, %16 : vector<8x128xf32>
      %18 = arith.truncf %17 : vector<8x128xf32> to vector<8x128xbf16>
      %c0_14 = arith.constant 0 : index
      %c0_15 = arith.constant 0 : index
      %19 = vector.load %arg6[%c0_14, %c0_15] : memref<8x128xbf16, #tpu.memory_space<vmem>>, vector<8x128xbf16>
      tpu.vector_store %arg6[%c0_14, %c0_15], %18 {strides = array<i32>} : memref<8x128xbf16, #tpu.memory_space<vmem>>, vector<8x128xbf16>,
    } else {
    }
    return
  }
  func.func @transform_0(%arg0: i32, %arg1: i32, %arg2: i32) -> (i32, i32) {
    %c0_i32 = arith.constant 0 : i32
    return %arg0, %arg2 : i32, i32
  }
  func.func @transform_1(%arg0: i32, %arg1: i32, %arg2: i32) -> (i32, i32) {
    %c0_i32 = arith.constant 0 : i32
    return %arg2, %arg1 : i32, i32
  }
  func.func @transform_2(%arg0: i32, %arg1: i32, %arg2: i32) -> (i32, i32) {
    %c0_i32 = arith.constant 0 : i32
    %c0_i32_0 = arith.constant 0 : i32
    return %c0_i32, %arg1 : i32, i32
  }
  func.func @transform_3(%arg0: i32, %arg1: i32, %arg2: i32) -> (i32, i32) {
    %c0_i32 = arith.constant 0 : i32
    return %arg0, %arg1 : i32, i32
  }
}

module attributes {stable_mosaic.version = 11 : i64} {
  func.func @_gemm_kernel_1k(%arg0: i32, %arg1: i32, %arg2: i32, %arg3: memref<8x128xbf16, #tpu.memory_space<vmem>>, %arg4: memref<128x128xbf16, #tpu.memory_space<vmem>>, %arg5: memref<1x128xf32, #tpu.memory_space<vmem>>, %arg6: memref<8x128xbf16, #tpu.memory_space<vmem>>) attributes {dimension_semantics = [#tpu.dimension_semantics<parallel>, #tpu.dimension_semantics<parallel>, #tpu.dimension_semantics<arbitrary>], iteration_bounds = array<i64: 1, 2, 1>, scalar_prefetch = 0 : i64, scratch_operands = 0 : i64, tpu.core_type = #tpu.core_type<tc>, window_params = [{transform_indices = @transform_0, window_bounds = array<i64: 8, 128>}, {transform_indices = @transform_1, window_bounds = array<i64: 128, 128>}, {transform_indices = @transform_2, window_bounds = array<i64: 1, 128>}, {transform_indices = @transform_3, window_bounds = array<i64: 8, 128>}]} {
    %c0 = arith.constant 0 : index
    %c0_0 = arith.constant 0 : index
    %0 = vector.load %arg3[%c0, %c0_0] : memref<8x128xbf16, #tpu.memory_space<vmem>>, vector<8x128xbf16>
    %c0_1 = arith.constant 0 : index
    %c0_2 = arith.constant 0 : index
    %1 = vector.load %arg4[%c0_1, %c0_2] : memref<128x128xbf16, #tpu.memory_space<vmem>>, vector<128x128xbf16>
    %cst = arith.constant dense<0.000000e+00> : vector<8x128xf32>
    %2 = tpu.matmul %0, %1, %cst {dimension_numbers = #tpu.dot_dimension_numbers<[1], [0], [0], [1], [0, 0, 1, 1], [], []>} : vector<8x128xbf16>, vector<128x128xbf16>, vector<8x128xf32> -> vector<8x128xf32>
    %c0_3 = arith.constant 0 : index
    %c0_4 = arith.constant 0 : index
    %3 = vector.load %arg5[%c0_3, %c0_4] : memref<1x128xf32, #tpu.memory_space<vmem>>, vector<1x128xf32>
    %4 = vector.broadcast %3 : vector<1x128xf32> to vector<8x128xf32>
    %5 = arith.addf %2, %4 : vector<8x128xf32>
    %6 = arith.truncf %5 : vector<8x128xf32> to vector<8x128xbf16>
    %c0_5 = arith.constant 0 : index
    %c0_6 = arith.constant 0 : index
    %7 = vector.load %arg6[%c0_5, %c0_6] : memref<8x128xbf16, #tpu.memory_space<vmem>>, vector<8x128xbf16>
    tpu.vector_store %arg6[%c0_5, %c0_6], %6 {strides = array<i32>} : memref<8x128xbf16, #tpu.memory_space<vmem>>, vector<8x128xbf16>,
    return
  }
  func.func @transform_0(%arg0: i32, %arg1: i32, %arg2: i32) -> (i32, i32) {
    %c0_i32 = arith.constant 0 : i32
    return %arg0, %arg2 : i32, i32
  }
  func.func @transform_1(%arg0: i32, %arg1: i32, %arg2: i32) -> (i32, i32) {
    %c0_i32 = arith.constant 0 : i32
    return %arg2, %arg1 : i32, i32
  }
  func.func @transform_2(%arg0: i32, %arg1: i32, %arg2: i32) -> (i32, i32) {
    %c0_i32 = arith.constant 0 : i32
    %c0_i32_0 = arith.constant 0 : i32
    return %c0_i32, %arg1 : i32, i32
  }
  func.func @transform_3(%arg0: i32, %arg1: i32, %arg2: i32) -> (i32, i32) {
    %c0_i32 = arith.constant 0 : i32
    return %arg0, %arg1 : i32, i32
  }
}

module attributes {stable_mosaic.version = 11 : i64} {
  func.func @_gemm_res_kernel(%arg0: i32, %arg1: i32, %arg2: i32, %arg3: memref<8x384xbf16, #tpu.memory_space<vmem>>, %arg4: memref<384x128xbf16, #tpu.memory_space<vmem>>, %arg5: memref<1x128xf32, #tpu.memory_space<vmem>>, %arg6: memref<8x128xbf16, #tpu.memory_space<vmem>>, %arg7: memref<8x128xbf16, #tpu.memory_space<vmem>>, %arg8: memref<8x128xf32, #tpu.memory_space<vmem>>) attributes {dimension_semantics = [#tpu.dimension_semantics<parallel>, #tpu.dimension_semantics<parallel>, #tpu.dimension_semantics<arbitrary>], iteration_bounds = array<i64: 1, 2, 6>, scalar_prefetch = 0 : i64, scratch_operands = 1 : i64, tpu.core_type = #tpu.core_type<tc>, window_params = [{transform_indices = @transform_0, window_bounds = array<i64: 8, 384>}, {transform_indices = @transform_1, window_bounds = array<i64: 384, 128>}, {transform_indices = @transform_2, window_bounds = array<i64: 1, 128>}, {transform_indices = @transform_3, window_bounds = array<i64: 8, 128>}, {transform_indices = @transform_4, window_bounds = array<i64: 8, 128>}]} {
    %c0_i32 = arith.constant 0 : i32
    %0 = arith.cmpi eq, %arg2, %c0_i32 : i32
    %1 = arith.extui %0 : i1 to i32
    %c0_i32_0 = arith.constant 0 : i32
    %2 = arith.cmpi ne, %1, %c0_i32_0 : i32
    scf.if %2 {
      %cst_9 = arith.constant 0.000000e+00 : f32
      %12 = vector.broadcast %cst_9 : f32 to vector<8x128xf32>
      %c0_10 = arith.constant 0 : index
      %c0_11 = arith.constant 0 : index
      %13 = vector.load %arg8[%c0_10, %c0_11] : memref<8x128xf32, #tpu.memory_space<vmem>>, vector<8x128xf32>
      tpu.vector_store %arg8[%c0_10, %c0_11], %12 {strides = array<i32>} : memref<8x128xf32, #tpu.memory_space<vmem>>, vector<8x128xf32>,
    } else {
    }
    %c0 = arith.constant 0 : index
    %c0_1 = arith.constant 0 : index
    %3 = vector.load %arg8[%c0, %c0_1] : memref<8x128xf32, #tpu.memory_space<vmem>>, vector<8x128xf32>
    %c0_2 = arith.constant 0 : index
    %c0_3 = arith.constant 0 : index
    %4 = vector.load %arg3[%c0_2, %c0_3] : memref<8x384xbf16, #tpu.memory_space<vmem>>, vector<8x384xbf16>
    %c0_4 = arith.constant 0 : index
    %c0_5 = arith.constant 0 : index
    %5 = vector.load %arg4[%c0_4, %c0_5] : memref<384x128xbf16, #tpu.memory_space<vmem>>, vector<384x128xbf16>
    %cst = arith.constant dense<0.000000e+00> : vector<8x128xf32>
    %6 = tpu.matmul %4, %5, %cst {dimension_numbers = #tpu.dot_dimension_numbers<[1], [0], [0], [1], [0, 0, 1, 1], [], []>} : vector<8x384xbf16>, vector<384x128xbf16>, vector<8x128xf32> -> vector<8x128xf32>
    %7 = arith.addf %3, %6 : vector<8x128xf32>
    %c0_6 = arith.constant 0 : index
    %c0_7 = arith.constant 0 : index
    %8 = vector.load %arg8[%c0_6, %c0_7] : memref<8x128xf32, #tpu.memory_space<vmem>>, vector<8x128xf32>
    tpu.vector_store %arg8[%c0_6, %c0_7], %7 {strides = array<i32>} : memref<8x128xf32, #tpu.memory_space<vmem>>, vector<8x128xf32>,
    %c5_i32 = arith.constant 5 : i32
    %9 = arith.cmpi eq, %arg2, %c5_i32 : i32
    %10 = arith.extui %9 : i1 to i32
    %c0_i32_8 = arith.constant 0 : i32
    %11 = arith.cmpi ne, %10, %c0_i32_8 : i32
    scf.if %11 {
      %c0_9 = arith.constant 0 : index
      %c0_10 = arith.constant 0 : index
      %12 = vector.load %arg8[%c0_9, %c0_10] : memref<8x128xf32, #tpu.memory_space<vmem>>, vector<8x128xf32>
      %c0_11 = arith.constant 0 : index
      %c0_12 = arith.constant 0 : index
      %13 = vector.load %arg5[%c0_11, %c0_12] : memref<1x128xf32, #tpu.memory_space<vmem>>, vector<1x128xf32>
      %c0_13 = arith.constant 0 : index
      %c0_14 = arith.constant 0 : index
      %14 = vector.load %arg6[%c0_13, %c0_14] : memref<8x128xbf16, #tpu.memory_space<vmem>>, vector<8x128xbf16>
      %15 = vector.broadcast %13 : vector<1x128xf32> to vector<8x128xf32>
      %16 = arith.addf %12, %15 : vector<8x128xf32>
      %17 = arith.extf %14 : vector<8x128xbf16> to vector<8x128xf32>
      %18 = arith.addf %16, %17 : vector<8x128xf32>
      %cst_15 = arith.constant 0.000000e+00 : f32
      %19 = vector.broadcast %cst_15 : f32 to vector<8x128xf32>
      %20 = arith.maximumf %18, %19 : vector<8x128xf32>
      %21 = arith.truncf %20 : vector<8x128xf32> to vector<8x128xbf16>
      %c0_16 = arith.constant 0 : index
      %c0_17 = arith.constant 0 : index
      %22 = vector.load %arg7[%c0_16, %c0_17] : memref<8x128xbf16, #tpu.memory_space<vmem>>, vector<8x128xbf16>
      tpu.vector_store %arg7[%c0_16, %c0_17], %21 {strides = array<i32>} : memref<8x128xbf16, #tpu.memory_space<vmem>>, vector<8x128xbf16>,
    } else {
    }
    return
  }
  func.func @transform_0(%arg0: i32, %arg1: i32, %arg2: i32) -> (i32, i32) {
    %c0_i32 = arith.constant 0 : i32
    return %arg0, %arg2 : i32, i32
  }
  func.func @transform_1(%arg0: i32, %arg1: i32, %arg2: i32) -> (i32, i32) {
    %c0_i32 = arith.constant 0 : i32
    return %arg2, %arg1 : i32, i32
  }
  func.func @transform_2(%arg0: i32, %arg1: i32, %arg2: i32) -> (i32, i32) {
    %c0_i32 = arith.constant 0 : i32
    %c0_i32_0 = arith.constant 0 : i32
    return %c0_i32, %arg1 : i32, i32
  }
  func.func @transform_3(%arg0: i32, %arg1: i32, %arg2: i32) -> (i32, i32) {
    %c0_i32 = arith.constant 0 : i32
    return %arg0, %arg1 : i32, i32
  }
  func.func @transform_4(%arg0: i32, %arg1: i32, %arg2: i32) -> (i32, i32) {
    %c0_i32 = arith.constant 0 : i32
    return %arg0, %arg1 : i32, i32
  }
}

module attributes {stable_mosaic.version = 11 : i64} {
  func.func @_gemm_kernel(%arg0: i32, %arg1: i32, %arg2: i32, %arg3: memref<8x384xbf16, #tpu.memory_space<vmem>>, %arg4: memref<384x128xbf16, #tpu.memory_space<vmem>>, %arg5: memref<1x128xf32, #tpu.memory_space<vmem>>, %arg6: memref<8x128xbf16, #tpu.memory_space<vmem>>, %arg7: memref<8x128xf32, #tpu.memory_space<vmem>>) attributes {dimension_semantics = [#tpu.dimension_semantics<parallel>, #tpu.dimension_semantics<parallel>, #tpu.dimension_semantics<arbitrary>], iteration_bounds = array<i64: 1, 2, 6>, scalar_prefetch = 0 : i64, scratch_operands = 1 : i64, tpu.core_type = #tpu.core_type<tc>, window_params = [{transform_indices = @transform_0, window_bounds = array<i64: 8, 384>}, {transform_indices = @transform_1, window_bounds = array<i64: 384, 128>}, {transform_indices = @transform_2, window_bounds = array<i64: 1, 128>}, {transform_indices = @transform_3, window_bounds = array<i64: 8, 128>}]} {
    %c0_i32 = arith.constant 0 : i32
    %0 = arith.cmpi eq, %arg2, %c0_i32 : i32
    %1 = arith.extui %0 : i1 to i32
    %c0_i32_0 = arith.constant 0 : i32
    %2 = arith.cmpi ne, %1, %c0_i32_0 : i32
    scf.if %2 {
      %cst_9 = arith.constant 0.000000e+00 : f32
      %12 = vector.broadcast %cst_9 : f32 to vector<8x128xf32>
      %c0_10 = arith.constant 0 : index
      %c0_11 = arith.constant 0 : index
      %13 = vector.load %arg7[%c0_10, %c0_11] : memref<8x128xf32, #tpu.memory_space<vmem>>, vector<8x128xf32>
      tpu.vector_store %arg7[%c0_10, %c0_11], %12 {strides = array<i32>} : memref<8x128xf32, #tpu.memory_space<vmem>>, vector<8x128xf32>,
    } else {
    }
    %c0 = arith.constant 0 : index
    %c0_1 = arith.constant 0 : index
    %3 = vector.load %arg7[%c0, %c0_1] : memref<8x128xf32, #tpu.memory_space<vmem>>, vector<8x128xf32>
    %c0_2 = arith.constant 0 : index
    %c0_3 = arith.constant 0 : index
    %4 = vector.load %arg3[%c0_2, %c0_3] : memref<8x384xbf16, #tpu.memory_space<vmem>>, vector<8x384xbf16>
    %c0_4 = arith.constant 0 : index
    %c0_5 = arith.constant 0 : index
    %5 = vector.load %arg4[%c0_4, %c0_5] : memref<384x128xbf16, #tpu.memory_space<vmem>>, vector<384x128xbf16>
    %cst = arith.constant dense<0.000000e+00> : vector<8x128xf32>
    %6 = tpu.matmul %4, %5, %cst {dimension_numbers = #tpu.dot_dimension_numbers<[1], [0], [0], [1], [0, 0, 1, 1], [], []>} : vector<8x384xbf16>, vector<384x128xbf16>, vector<8x128xf32> -> vector<8x128xf32>
    %7 = arith.addf %3, %6 : vector<8x128xf32>
    %c0_6 = arith.constant 0 : index
    %c0_7 = arith.constant 0 : index
    %8 = vector.load %arg7[%c0_6, %c0_7] : memref<8x128xf32, #tpu.memory_space<vmem>>, vector<8x128xf32>
    tpu.vector_store %arg7[%c0_6, %c0_7], %7 {strides = array<i32>} : memref<8x128xf32, #tpu.memory_space<vmem>>, vector<8x128xf32>,
    %c5_i32 = arith.constant 5 : i32
    %9 = arith.cmpi eq, %arg2, %c5_i32 : i32
    %10 = arith.extui %9 : i1 to i32
    %c0_i32_8 = arith.constant 0 : i32
    %11 = arith.cmpi ne, %10, %c0_i32_8 : i32
    scf.if %11 {
      %c0_9 = arith.constant 0 : index
      %c0_10 = arith.constant 0 : index
      %12 = vector.load %arg7[%c0_9, %c0_10] : memref<8x128xf32, #tpu.memory_space<vmem>>, vector<8x128xf32>
      %c0_11 = arith.constant 0 : index
      %c0_12 = arith.constant 0 : index
      %13 = vector.load %arg5[%c0_11, %c0_12] : memref<1x128xf32, #tpu.memory_space<vmem>>, vector<1x128xf32>
      %14 = vector.broadcast %13 : vector<1x128xf32> to vector<8x128xf32>
      %15 = arith.addf %12, %14 : vector<8x128xf32>
      %cst_13 = arith.constant 0.000000e+00 : f32
      %16 = vector.broadcast %cst_13 : f32 to vector<8x128xf32>
      %17 = arith.maximumf %15, %16 : vector<8x128xf32>
      %18 = arith.truncf %17 : vector<8x128xf32> to vector<8x128xbf16>
      %c0_14 = arith.constant 0 : index
      %c0_15 = arith.constant 0 : index
      %19 = vector.load %arg6[%c0_14, %c0_15] : memref<8x128xbf16, #tpu.memory_space<vmem>>, vector<8x128xbf16>
      tpu.vector_store %arg6[%c0_14, %c0_15], %18 {strides = array<i32>} : memref<8x128xbf16, #tpu.memory_space<vmem>>, vector<8x128xbf16>,
    } else {
    }
    return
  }
  func.func @transform_0(%arg0: i32, %arg1: i32, %arg2: i32) -> (i32, i32) {
    %c0_i32 = arith.constant 0 : i32
    return %arg0, %arg2 : i32, i32
  }
  func.func @transform_1(%arg0: i32, %arg1: i32, %arg2: i32) -> (i32, i32) {
    %c0_i32 = arith.constant 0 : i32
    return %arg2, %arg1 : i32, i32
  }
  func.func @transform_2(%arg0: i32, %arg1: i32, %arg2: i32) -> (i32, i32) {
    %c0_i32 = arith.constant 0 : i32
    %c0_i32_0 = arith.constant 0 : i32
    return %c0_i32, %arg1 : i32, i32
  }
  func.func @transform_3(%arg0: i32, %arg1: i32, %arg2: i32) -> (i32, i32) {
    %c0_i32 = arith.constant 0 : i32
    return %arg0, %arg1 : i32, i32
  }
}

module attributes {stable_mosaic.version = 11 : i64} {
  func.func @_gemm_res_kernel(%arg0: i32, %arg1: i32, %arg2: i32, %arg3: memref<8x384xbf16, #tpu.memory_space<vmem>>, %arg4: memref<384x128xbf16, #tpu.memory_space<vmem>>, %arg5: memref<1x128xf32, #tpu.memory_space<vmem>>, %arg6: memref<8x128xbf16, #tpu.memory_space<vmem>>, %arg7: memref<8x128xbf16, #tpu.memory_space<vmem>>, %arg8: memref<8x128xf32, #tpu.memory_space<vmem>>) attributes {dimension_semantics = [#tpu.dimension_semantics<parallel>, #tpu.dimension_semantics<parallel>, #tpu.dimension_semantics<arbitrary>], iteration_bounds = array<i64: 1, 2, 6>, scalar_prefetch = 0 : i64, scratch_operands = 1 : i64, tpu.core_type = #tpu.core_type<tc>, window_params = [{transform_indices = @transform_0, window_bounds = array<i64: 8, 384>}, {transform_indices = @transform_1, window_bounds = array<i64: 384, 128>}, {transform_indices = @transform_2, window_bounds = array<i64: 1, 128>}, {transform_indices = @transform_3, window_bounds = array<i64: 8, 128>}, {transform_indices = @transform_4, window_bounds = array<i64: 8, 128>}]} {
    %c0_i32 = arith.constant 0 : i32
    %0 = arith.cmpi eq, %arg2, %c0_i32 : i32
    %1 = arith.extui %0 : i1 to i32
    %c0_i32_0 = arith.constant 0 : i32
    %2 = arith.cmpi ne, %1, %c0_i32_0 : i32
    scf.if %2 {
      %cst_9 = arith.constant 0.000000e+00 : f32
      %12 = vector.broadcast %cst_9 : f32 to vector<8x128xf32>
      %c0_10 = arith.constant 0 : index
      %c0_11 = arith.constant 0 : index
      %13 = vector.load %arg8[%c0_10, %c0_11] : memref<8x128xf32, #tpu.memory_space<vmem>>, vector<8x128xf32>
      tpu.vector_store %arg8[%c0_10, %c0_11], %12 {strides = array<i32>} : memref<8x128xf32, #tpu.memory_space<vmem>>, vector<8x128xf32>,
    } else {
    }
    %c0 = arith.constant 0 : index
    %c0_1 = arith.constant 0 : index
    %3 = vector.load %arg8[%c0, %c0_1] : memref<8x128xf32, #tpu.memory_space<vmem>>, vector<8x128xf32>
    %c0_2 = arith.constant 0 : index
    %c0_3 = arith.constant 0 : index
    %4 = vector.load %arg3[%c0_2, %c0_3] : memref<8x384xbf16, #tpu.memory_space<vmem>>, vector<8x384xbf16>
    %c0_4 = arith.constant 0 : index
    %c0_5 = arith.constant 0 : index
    %5 = vector.load %arg4[%c0_4, %c0_5] : memref<384x128xbf16, #tpu.memory_space<vmem>>, vector<384x128xbf16>
    %cst = arith.constant dense<0.000000e+00> : vector<8x128xf32>
    %6 = tpu.matmul %4, %5, %cst {dimension_numbers = #tpu.dot_dimension_numbers<[1], [0], [0], [1], [0, 0, 1, 1], [], []>} : vector<8x384xbf16>, vector<384x128xbf16>, vector<8x128xf32> -> vector<8x128xf32>
    %7 = arith.addf %3, %6 : vector<8x128xf32>
    %c0_6 = arith.constant 0 : index
    %c0_7 = arith.constant 0 : index
    %8 = vector.load %arg8[%c0_6, %c0_7] : memref<8x128xf32, #tpu.memory_space<vmem>>, vector<8x128xf32>
    tpu.vector_store %arg8[%c0_6, %c0_7], %7 {strides = array<i32>} : memref<8x128xf32, #tpu.memory_space<vmem>>, vector<8x128xf32>,
    %c5_i32 = arith.constant 5 : i32
    %9 = arith.cmpi eq, %arg2, %c5_i32 : i32
    %10 = arith.extui %9 : i1 to i32
    %c0_i32_8 = arith.constant 0 : i32
    %11 = arith.cmpi ne, %10, %c0_i32_8 : i32
    scf.if %11 {
      %c0_9 = arith.constant 0 : index
      %c0_10 = arith.constant 0 : index
      %12 = vector.load %arg8[%c0_9, %c0_10] : memref<8x128xf32, #tpu.memory_space<vmem>>, vector<8x128xf32>
      %c0_11 = arith.constant 0 : index
      %c0_12 = arith.constant 0 : index
      %13 = vector.load %arg5[%c0_11, %c0_12] : memref<1x128xf32, #tpu.memory_space<vmem>>, vector<1x128xf32>
      %c0_13 = arith.constant 0 : index
      %c0_14 = arith.constant 0 : index
      %14 = vector.load %arg6[%c0_13, %c0_14] : memref<8x128xbf16, #tpu.memory_space<vmem>>, vector<8x128xbf16>
      %15 = vector.broadcast %13 : vector<1x128xf32> to vector<8x128xf32>
      %16 = arith.addf %12, %15 : vector<8x128xf32>
      %17 = arith.extf %14 : vector<8x128xbf16> to vector<8x128xf32>
      %18 = arith.addf %16, %17 : vector<8x128xf32>
      %cst_15 = arith.constant 0.000000e+00 : f32
      %19 = vector.broadcast %cst_15 : f32 to vector<8x128xf32>
      %20 = arith.maximumf %18, %19 : vector<8x128xf32>
      %21 = arith.truncf %20 : vector<8x128xf32> to vector<8x128xbf16>
      %c0_16 = arith.constant 0 : index
      %c0_17 = arith.constant 0 : index
      %22 = vector.load %arg7[%c0_16, %c0_17] : memref<8x128xbf16, #tpu.memory_space<vmem>>, vector<8x128xbf16>
      tpu.vector_store %arg7[%c0_16, %c0_17], %21 {strides = array<i32>} : memref<8x128xbf16, #tpu.memory_space<vmem>>, vector<8x128xbf16>,
    } else {
    }
    return
  }
  func.func @transform_0(%arg0: i32, %arg1: i32, %arg2: i32) -> (i32, i32) {
    %c0_i32 = arith.constant 0 : i32
    return %arg0, %arg2 : i32, i32
  }
  func.func @transform_1(%arg0: i32, %arg1: i32, %arg2: i32) -> (i32, i32) {
    %c0_i32 = arith.constant 0 : i32
    return %arg2, %arg1 : i32, i32
  }
  func.func @transform_2(%arg0: i32, %arg1: i32, %arg2: i32) -> (i32, i32) {
    %c0_i32 = arith.constant 0 : i32
    %c0_i32_0 = arith.constant 0 : i32
    return %c0_i32, %arg1 : i32, i32
  }
  func.func @transform_3(%arg0: i32, %arg1: i32, %arg2: i32) -> (i32, i32) {
    %c0_i32 = arith.constant 0 : i32
    return %arg0, %arg1 : i32, i32
  }
  func.func @transform_4(%arg0: i32, %arg1: i32, %arg2: i32) -> (i32, i32) {
    %c0_i32 = arith.constant 0 : i32
    return %arg0, %arg1 : i32, i32
  }
}

module attributes {stable_mosaic.version = 11 : i64} {
  func.func @_gemm_kernel(%arg0: i32, %arg1: i32, %arg2: i32, %arg3: memref<8x384xbf16, #tpu.memory_space<vmem>>, %arg4: memref<384x128xbf16, #tpu.memory_space<vmem>>, %arg5: memref<1x128xf32, #tpu.memory_space<vmem>>, %arg6: memref<8x128xbf16, #tpu.memory_space<vmem>>, %arg7: memref<8x128xf32, #tpu.memory_space<vmem>>) attributes {dimension_semantics = [#tpu.dimension_semantics<parallel>, #tpu.dimension_semantics<parallel>, #tpu.dimension_semantics<arbitrary>], iteration_bounds = array<i64: 1, 4, 6>, scalar_prefetch = 0 : i64, scratch_operands = 1 : i64, tpu.core_type = #tpu.core_type<tc>, window_params = [{transform_indices = @transform_0, window_bounds = array<i64: 8, 384>}, {transform_indices = @transform_1, window_bounds = array<i64: 384, 128>}, {transform_indices = @transform_2, window_bounds = array<i64: 1, 128>}, {transform_indices = @transform_3, window_bounds = array<i64: 8, 128>}]} {
    %c0_i32 = arith.constant 0 : i32
    %0 = arith.cmpi eq, %arg2, %c0_i32 : i32
    %1 = arith.extui %0 : i1 to i32
    %c0_i32_0 = arith.constant 0 : i32
    %2 = arith.cmpi ne, %1, %c0_i32_0 : i32
    scf.if %2 {
      %cst_9 = arith.constant 0.000000e+00 : f32
      %12 = vector.broadcast %cst_9 : f32 to vector<8x128xf32>
      %c0_10 = arith.constant 0 : index
      %c0_11 = arith.constant 0 : index
      %13 = vector.load %arg7[%c0_10, %c0_11] : memref<8x128xf32, #tpu.memory_space<vmem>>, vector<8x128xf32>
      tpu.vector_store %arg7[%c0_10, %c0_11], %12 {strides = array<i32>} : memref<8x128xf32, #tpu.memory_space<vmem>>, vector<8x128xf32>,
    } else {
    }
    %c0 = arith.constant 0 : index
    %c0_1 = arith.constant 0 : index
    %3 = vector.load %arg7[%c0, %c0_1] : memref<8x128xf32, #tpu.memory_space<vmem>>, vector<8x128xf32>
    %c0_2 = arith.constant 0 : index
    %c0_3 = arith.constant 0 : index
    %4 = vector.load %arg3[%c0_2, %c0_3] : memref<8x384xbf16, #tpu.memory_space<vmem>>, vector<8x384xbf16>
    %c0_4 = arith.constant 0 : index
    %c0_5 = arith.constant 0 : index
    %5 = vector.load %arg4[%c0_4, %c0_5] : memref<384x128xbf16, #tpu.memory_space<vmem>>, vector<384x128xbf16>
    %cst = arith.constant dense<0.000000e+00> : vector<8x128xf32>
    %6 = tpu.matmul %4, %5, %cst {dimension_numbers = #tpu.dot_dimension_numbers<[1], [0], [0], [1], [0, 0, 1, 1], [], []>} : vector<8x384xbf16>, vector<384x128xbf16>, vector<8x128xf32> -> vector<8x128xf32>
    %7 = arith.addf %3, %6 : vector<8x128xf32>
    %c0_6 = arith.constant 0 : index
    %c0_7 = arith.constant 0 : index
    %8 = vector.load %arg7[%c0_6, %c0_7] : memref<8x128xf32, #tpu.memory_space<vmem>>, vector<8x128xf32>
    tpu.vector_store %arg7[%c0_6, %c0_7], %7 {strides = array<i32>} : memref<8x128xf32, #tpu.memory_space<vmem>>, vector<8x128xf32>,
    %c5_i32 = arith.constant 5 : i32
    %9 = arith.cmpi eq, %arg2, %c5_i32 : i32
    %10 = arith.extui %9 : i1 to i32
    %c0_i32_8 = arith.constant 0 : i32
    %11 = arith.cmpi ne, %10, %c0_i32_8 : i32
    scf.if %11 {
      %c0_9 = arith.constant 0 : index
      %c0_10 = arith.constant 0 : index
      %12 = vector.load %arg7[%c0_9, %c0_10] : memref<8x128xf32, #tpu.memory_space<vmem>>, vector<8x128xf32>
      %c0_11 = arith.constant 0 : index
      %c0_12 = arith.constant 0 : index
      %13 = vector.load %arg5[%c0_11, %c0_12] : memref<1x128xf32, #tpu.memory_space<vmem>>, vector<1x128xf32>
      %14 = vector.broadcast %13 : vector<1x128xf32> to vector<8x128xf32>
      %15 = arith.addf %12, %14 : vector<8x128xf32>
      %cst_13 = arith.constant 0.000000e+00 : f32
      %16 = vector.broadcast %cst_13 : f32 to vector<8x128xf32>
      %17 = arith.maximumf %15, %16 : vector<8x128xf32>
      %18 = arith.truncf %17 : vector<8x128xf32> to vector<8x128xbf16>
      %c0_14 = arith.constant 0 : index
      %c0_15 = arith.constant 0 : index
      %19 = vector.load %arg6[%c0_14, %c0_15] : memref<8x128xbf16, #tpu.memory_space<vmem>>, vector<8x128xbf16>
      tpu.vector_store %arg6[%c0_14, %c0_15], %18 {strides = array<i32>} : memref<8x128xbf16, #tpu.memory_space<vmem>>, vector<8x128xbf16>,
    } else {
    }
    return
  }
  func.func @transform_0(%arg0: i32, %arg1: i32, %arg2: i32) -> (i32, i32) {
    %c0_i32 = arith.constant 0 : i32
    return %arg0, %arg2 : i32, i32
  }
  func.func @transform_1(%arg0: i32, %arg1: i32, %arg2: i32) -> (i32, i32) {
    %c0_i32 = arith.constant 0 : i32
    return %arg2, %arg1 : i32, i32
  }
  func.func @transform_2(%arg0: i32, %arg1: i32, %arg2: i32) -> (i32, i32) {
    %c0_i32 = arith.constant 0 : i32
    %c0_i32_0 = arith.constant 0 : i32
    return %c0_i32, %arg1 : i32, i32
  }
  func.func @transform_3(%arg0: i32, %arg1: i32, %arg2: i32) -> (i32, i32) {
    %c0_i32 = arith.constant 0 : i32
    return %arg0, %arg1 : i32, i32
  }
}

module attributes {stable_mosaic.version = 11 : i64} {
  func.func @_gemm_res_kernel(%arg0: i32, %arg1: i32, %arg2: i32, %arg3: memref<8x512xbf16, #tpu.memory_space<vmem>>, %arg4: memref<512x128xbf16, #tpu.memory_space<vmem>>, %arg5: memref<1x128xf32, #tpu.memory_space<vmem>>, %arg6: memref<8x128xbf16, #tpu.memory_space<vmem>>, %arg7: memref<8x128xbf16, #tpu.memory_space<vmem>>, %arg8: memref<8x128xf32, #tpu.memory_space<vmem>>) attributes {dimension_semantics = [#tpu.dimension_semantics<parallel>, #tpu.dimension_semantics<parallel>, #tpu.dimension_semantics<arbitrary>], iteration_bounds = array<i64: 1, 4, 9>, scalar_prefetch = 0 : i64, scratch_operands = 1 : i64, tpu.core_type = #tpu.core_type<tc>, window_params = [{transform_indices = @transform_0, window_bounds = array<i64: 8, 512>}, {transform_indices = @transform_1, window_bounds = array<i64: 512, 128>}, {transform_indices = @transform_2, window_bounds = array<i64: 1, 128>}, {transform_indices = @transform_3, window_bounds = array<i64: 8, 128>}, {transform_indices = @transform_4, window_bounds = array<i64: 8, 128>}]} {
    %c0_i32 = arith.constant 0 : i32
    %0 = arith.cmpi eq, %arg2, %c0_i32 : i32
    %1 = arith.extui %0 : i1 to i32
    %c0_i32_0 = arith.constant 0 : i32
    %2 = arith.cmpi ne, %1, %c0_i32_0 : i32
    scf.if %2 {
      %cst_9 = arith.constant 0.000000e+00 : f32
      %12 = vector.broadcast %cst_9 : f32 to vector<8x128xf32>
      %c0_10 = arith.constant 0 : index
      %c0_11 = arith.constant 0 : index
      %13 = vector.load %arg8[%c0_10, %c0_11] : memref<8x128xf32, #tpu.memory_space<vmem>>, vector<8x128xf32>
      tpu.vector_store %arg8[%c0_10, %c0_11], %12 {strides = array<i32>} : memref<8x128xf32, #tpu.memory_space<vmem>>, vector<8x128xf32>,
    } else {
    }
    %c0 = arith.constant 0 : index
    %c0_1 = arith.constant 0 : index
    %3 = vector.load %arg8[%c0, %c0_1] : memref<8x128xf32, #tpu.memory_space<vmem>>, vector<8x128xf32>
    %c0_2 = arith.constant 0 : index
    %c0_3 = arith.constant 0 : index
    %4 = vector.load %arg3[%c0_2, %c0_3] : memref<8x512xbf16, #tpu.memory_space<vmem>>, vector<8x512xbf16>
    %c0_4 = arith.constant 0 : index
    %c0_5 = arith.constant 0 : index
    %5 = vector.load %arg4[%c0_4, %c0_5] : memref<512x128xbf16, #tpu.memory_space<vmem>>, vector<512x128xbf16>
    %cst = arith.constant dense<0.000000e+00> : vector<8x128xf32>
    %6 = tpu.matmul %4, %5, %cst {dimension_numbers = #tpu.dot_dimension_numbers<[1], [0], [0], [1], [0, 0, 1, 1], [], []>} : vector<8x512xbf16>, vector<512x128xbf16>, vector<8x128xf32> -> vector<8x128xf32>
    %7 = arith.addf %3, %6 : vector<8x128xf32>
    %c0_6 = arith.constant 0 : index
    %c0_7 = arith.constant 0 : index
    %8 = vector.load %arg8[%c0_6, %c0_7] : memref<8x128xf32, #tpu.memory_space<vmem>>, vector<8x128xf32>
    tpu.vector_store %arg8[%c0_6, %c0_7], %7 {strides = array<i32>} : memref<8x128xf32, #tpu.memory_space<vmem>>, vector<8x128xf32>,
    %c8_i32 = arith.constant 8 : i32
    %9 = arith.cmpi eq, %arg2, %c8_i32 : i32
    %10 = arith.extui %9 : i1 to i32
    %c0_i32_8 = arith.constant 0 : i32
    %11 = arith.cmpi ne, %10, %c0_i32_8 : i32
    scf.if %11 {
      %c0_9 = arith.constant 0 : index
      %c0_10 = arith.constant 0 : index
      %12 = vector.load %arg8[%c0_9, %c0_10] : memref<8x128xf32, #tpu.memory_space<vmem>>, vector<8x128xf32>
      %c0_11 = arith.constant 0 : index
      %c0_12 = arith.constant 0 : index
      %13 = vector.load %arg5[%c0_11, %c0_12] : memref<1x128xf32, #tpu.memory_space<vmem>>, vector<1x128xf32>
      %c0_13 = arith.constant 0 : index
      %c0_14 = arith.constant 0 : index
      %14 = vector.load %arg6[%c0_13, %c0_14] : memref<8x128xbf16, #tpu.memory_space<vmem>>, vector<8x128xbf16>
      %15 = vector.broadcast %13 : vector<1x128xf32> to vector<8x128xf32>
      %16 = arith.addf %12, %15 : vector<8x128xf32>
      %17 = arith.extf %14 : vector<8x128xbf16> to vector<8x128xf32>
      %18 = arith.addf %16, %17 : vector<8x128xf32>
      %cst_15 = arith.constant 0.000000e+00 : f32
      %19 = vector.broadcast %cst_15 : f32 to vector<8x128xf32>
      %20 = arith.maximumf %18, %19 : vector<8x128xf32>
      %21 = arith.truncf %20 : vector<8x128xf32> to vector<8x128xbf16>
      %c0_16 = arith.constant 0 : index
      %c0_17 = arith.constant 0 : index
      %22 = vector.load %arg7[%c0_16, %c0_17] : memref<8x128xbf16, #tpu.memory_space<vmem>>, vector<8x128xbf16>
      tpu.vector_store %arg7[%c0_16, %c0_17], %21 {strides = array<i32>} : memref<8x128xbf16, #tpu.memory_space<vmem>>, vector<8x128xbf16>,
    } else {
    }
    return
  }
  func.func @transform_0(%arg0: i32, %arg1: i32, %arg2: i32) -> (i32, i32) {
    %c0_i32 = arith.constant 0 : i32
    return %arg0, %arg2 : i32, i32
  }
  func.func @transform_1(%arg0: i32, %arg1: i32, %arg2: i32) -> (i32, i32) {
    %c0_i32 = arith.constant 0 : i32
    return %arg2, %arg1 : i32, i32
  }
  func.func @transform_2(%arg0: i32, %arg1: i32, %arg2: i32) -> (i32, i32) {
    %c0_i32 = arith.constant 0 : i32
    %c0_i32_0 = arith.constant 0 : i32
    return %c0_i32, %arg1 : i32, i32
  }
  func.func @transform_3(%arg0: i32, %arg1: i32, %arg2: i32) -> (i32, i32) {
    %c0_i32 = arith.constant 0 : i32
    return %arg0, %arg1 : i32, i32
  }
  func.func @transform_4(%arg0: i32, %arg1: i32, %arg2: i32) -> (i32, i32) {
    %c0_i32 = arith.constant 0 : i32
    return %arg0, %arg1 : i32, i32
  }
}

module attributes {stable_mosaic.version = 11 : i64} {
  func.func @_gemm_kernel_1k(%arg0: i32, %arg1: i32, %arg2: i32, %arg3: memref<8x256xbf16, #tpu.memory_space<vmem>>, %arg4: memref<256x128xbf16, #tpu.memory_space<vmem>>, %arg5: memref<1x128xf32, #tpu.memory_space<vmem>>, %arg6: memref<8x128xbf16, #tpu.memory_space<vmem>>) attributes {dimension_semantics = [#tpu.dimension_semantics<parallel>, #tpu.dimension_semantics<parallel>, #tpu.dimension_semantics<arbitrary>], iteration_bounds = array<i64: 1, 4, 1>, scalar_prefetch = 0 : i64, scratch_operands = 0 : i64, tpu.core_type = #tpu.core_type<tc>, window_params = [{transform_indices = @transform_0, window_bounds = array<i64: 8, 256>}, {transform_indices = @transform_1, window_bounds = array<i64: 256, 128>}, {transform_indices = @transform_2, window_bounds = array<i64: 1, 128>}, {transform_indices = @transform_3, window_bounds = array<i64: 8, 128>}]} {
    %c0 = arith.constant 0 : index
    %c0_0 = arith.constant 0 : index
    %0 = vector.load %arg3[%c0, %c0_0] : memref<8x256xbf16, #tpu.memory_space<vmem>>, vector<8x256xbf16>
    %c0_1 = arith.constant 0 : index
    %c0_2 = arith.constant 0 : index
    %1 = vector.load %arg4[%c0_1, %c0_2] : memref<256x128xbf16, #tpu.memory_space<vmem>>, vector<256x128xbf16>
    %cst = arith.constant dense<0.000000e+00> : vector<8x128xf32>
    %2 = tpu.matmul %0, %1, %cst {dimension_numbers = #tpu.dot_dimension_numbers<[1], [0], [0], [1], [0, 0, 1, 1], [], []>} : vector<8x256xbf16>, vector<256x128xbf16>, vector<8x128xf32> -> vector<8x128xf32>
    %c0_3 = arith.constant 0 : index
    %c0_4 = arith.constant 0 : index
    %3 = vector.load %arg5[%c0_3, %c0_4] : memref<1x128xf32, #tpu.memory_space<vmem>>, vector<1x128xf32>
    %4 = vector.broadcast %3 : vector<1x128xf32> to vector<8x128xf32>
    %5 = arith.addf %2, %4 : vector<8x128xf32>
    %6 = arith.truncf %5 : vector<8x128xf32> to vector<8x128xbf16>
    %c0_5 = arith.constant 0 : index
    %c0_6 = arith.constant 0 : index
    %7 = vector.load %arg6[%c0_5, %c0_6] : memref<8x128xbf16, #tpu.memory_space<vmem>>, vector<8x128xbf16>
    tpu.vector_store %arg6[%c0_5, %c0_6], %6 {strides = array<i32>} : memref<8x128xbf16, #tpu.memory_space<vmem>>, vector<8x128xbf16>,
    return
  }
  func.func @transform_0(%arg0: i32, %arg1: i32, %arg2: i32) -> (i32, i32) {
    %c0_i32 = arith.constant 0 : i32
    return %arg0, %arg2 : i32, i32
  }
  func.func @transform_1(%arg0: i32, %arg1: i32, %arg2: i32) -> (i32, i32) {
    %c0_i32 = arith.constant 0 : i32
    return %arg2, %arg1 : i32, i32
  }
  func.func @transform_2(%arg0: i32, %arg1: i32, %arg2: i32) -> (i32, i32) {
    %c0_i32 = arith.constant 0 : i32
    %c0_i32_0 = arith.constant 0 : i32
    return %c0_i32, %arg1 : i32, i32
  }
  func.func @transform_3(%arg0: i32, %arg1: i32, %arg2: i32) -> (i32, i32) {
    %c0_i32 = arith.constant 0 : i32
    return %arg0, %arg1 : i32, i32
  }
}

module attributes {stable_mosaic.version = 11 : i64} {
  func.func @_gemm_kernel(%arg0: i32, %arg1: i32, %arg2: i32, %arg3: memref<8x512xbf16, #tpu.memory_space<vmem>>, %arg4: memref<512x128xbf16, #tpu.memory_space<vmem>>, %arg5: memref<1x128xf32, #tpu.memory_space<vmem>>, %arg6: memref<8x128xbf16, #tpu.memory_space<vmem>>, %arg7: memref<8x128xf32, #tpu.memory_space<vmem>>) attributes {dimension_semantics = [#tpu.dimension_semantics<parallel>, #tpu.dimension_semantics<parallel>, #tpu.dimension_semantics<arbitrary>], iteration_bounds = array<i64: 1, 4, 9>, scalar_prefetch = 0 : i64, scratch_operands = 1 : i64, tpu.core_type = #tpu.core_type<tc>, window_params = [{transform_indices = @transform_0, window_bounds = array<i64: 8, 512>}, {transform_indices = @transform_1, window_bounds = array<i64: 512, 128>}, {transform_indices = @transform_2, window_bounds = array<i64: 1, 128>}, {transform_indices = @transform_3, window_bounds = array<i64: 8, 128>}]} {
    %c0_i32 = arith.constant 0 : i32
    %0 = arith.cmpi eq, %arg2, %c0_i32 : i32
    %1 = arith.extui %0 : i1 to i32
    %c0_i32_0 = arith.constant 0 : i32
    %2 = arith.cmpi ne, %1, %c0_i32_0 : i32
    scf.if %2 {
      %cst_9 = arith.constant 0.000000e+00 : f32
      %12 = vector.broadcast %cst_9 : f32 to vector<8x128xf32>
      %c0_10 = arith.constant 0 : index
      %c0_11 = arith.constant 0 : index
      %13 = vector.load %arg7[%c0_10, %c0_11] : memref<8x128xf32, #tpu.memory_space<vmem>>, vector<8x128xf32>
      tpu.vector_store %arg7[%c0_10, %c0_11], %12 {strides = array<i32>} : memref<8x128xf32, #tpu.memory_space<vmem>>, vector<8x128xf32>,
    } else {
    }
    %c0 = arith.constant 0 : index
    %c0_1 = arith.constant 0 : index
    %3 = vector.load %arg7[%c0, %c0_1] : memref<8x128xf32, #tpu.memory_space<vmem>>, vector<8x128xf32>
    %c0_2 = arith.constant 0 : index
    %c0_3 = arith.constant 0 : index
    %4 = vector.load %arg3[%c0_2, %c0_3] : memref<8x512xbf16, #tpu.memory_space<vmem>>, vector<8x512xbf16>
    %c0_4 = arith.constant 0 : index
    %c0_5 = arith.constant 0 : index
    %5 = vector.load %arg4[%c0_4, %c0_5] : memref<512x128xbf16, #tpu.memory_space<vmem>>, vector<512x128xbf16>
    %cst = arith.constant dense<0.000000e+00> : vector<8x128xf32>
    %6 = tpu.matmul %4, %5, %cst {dimension_numbers = #tpu.dot_dimension_numbers<[1], [0], [0], [1], [0, 0, 1, 1], [], []>} : vector<8x512xbf16>, vector<512x128xbf16>, vector<8x128xf32> -> vector<8x128xf32>
    %7 = arith.addf %3, %6 : vector<8x128xf32>
    %c0_6 = arith.constant 0 : index
    %c0_7 = arith.constant 0 : index
    %8 = vector.load %arg7[%c0_6, %c0_7] : memref<8x128xf32, #tpu.memory_space<vmem>>, vector<8x128xf32>
    tpu.vector_store %arg7[%c0_6, %c0_7], %7 {strides = array<i32>} : memref<8x128xf32, #tpu.memory_space<vmem>>, vector<8x128xf32>,
    %c8_i32 = arith.constant 8 : i32
    %9 = arith.cmpi eq, %arg2, %c8_i32 : i32
    %10 = arith.extui %9 : i1 to i32
    %c0_i32_8 = arith.constant 0 : i32
    %11 = arith.cmpi ne, %10, %c0_i32_8 : i32
    scf.if %11 {
      %c0_9 = arith.constant 0 : index
      %c0_10 = arith.constant 0 : index
      %12 = vector.load %arg7[%c0_9, %c0_10] : memref<8x128xf32, #tpu.memory_space<vmem>>, vector<8x128xf32>
      %c0_11 = arith.constant 0 : index
      %c0_12 = arith.constant 0 : index
      %13 = vector.load %arg5[%c0_11, %c0_12] : memref<1x128xf32, #tpu.memory_space<vmem>>, vector<1x128xf32>
      %14 = vector.broadcast %13 : vector<1x128xf32> to vector<8x128xf32>
      %15 = arith.addf %12, %14 : vector<8x128xf32>
      %cst_13 = arith.constant 0.000000e+00 : f32
      %16 = vector.broadcast %cst_13 : f32 to vector<8x128xf32>
      %17 = arith.maximumf %15, %16 : vector<8x128xf32>
      %18 = arith.truncf %17 : vector<8x128xf32> to vector<8x128xbf16>
      %c0_14 = arith.constant 0 : index
      %c0_15 = arith.constant 0 : index
      %19 = vector.load %arg6[%c0_14, %c0_15] : memref<8x128xbf16, #tpu.memory_space<vmem>>, vector<8x128xbf16>
      tpu.vector_store %arg6[%c0_14, %c0_15], %18 {strides = array<i32>} : memref<8x128xbf16, #tpu.memory_space<vmem>>, vector<8x128xbf16>,
    } else {
    }
    return
  }
  func.func @transform_0(%arg0: i32, %arg1: i32, %arg2: i32) -> (i32, i32) {
    %c0_i32 = arith.constant 0 : i32
    return %arg0, %arg2 : i32, i32
  }
  func.func @transform_1(%arg0: i32, %arg1: i32, %arg2: i32) -> (i32, i32) {
    %c0_i32 = arith.constant 0 : i32
    return %arg2, %arg1 : i32, i32
  }
  func.func @transform_2(%arg0: i32, %arg1: i32, %arg2: i32) -> (i32, i32) {
    %c0_i32 = arith.constant 0 : i32
    %c0_i32_0 = arith.constant 0 : i32
    return %c0_i32, %arg1 : i32, i32
  }
  func.func @transform_3(%arg0: i32, %arg1: i32, %arg2: i32) -> (i32, i32) {
    %c0_i32 = arith.constant 0 : i32
    return %arg0, %arg1 : i32, i32
  }
}

module attributes {stable_mosaic.version = 11 : i64} {
  func.func @_gap_fc_kernel(%arg0: memref<2x1x512xbf16, #tpu.memory_space<vmem>>, %arg1: memref<512x128xf32, #tpu.memory_space<vmem>>, %arg2: memref<1x128xf32, #tpu.memory_space<vmem>>, %arg3: memref<2x128xf32, #tpu.memory_space<vmem>>) attributes {dimension_semantics = [], scalar_prefetch = 0 : i64, scratch_operands = 0 : i64, tpu.core_type = #tpu.core_type<tc>} {
    %c0 = arith.constant 0 : index
    %c0_0 = arith.constant 0 : index
    %c0_1 = arith.constant 0 : index
    %0 = vector.load %arg0[%c0, %c0_0, %c0_1] : memref<2x1x512xbf16, #tpu.memory_space<vmem>>, vector<2x1x512xbf16>
    %1 = arith.extf %0 : vector<2x1x512xbf16> to vector<2x1x512xf32>
    %cst = arith.constant dense<0.000000e+00> : vector<2x512xf32>
    %2 = vector.multi_reduction <add>, %1, %cst [1] : vector<2x1x512xf32> to vector<2x512xf32>
    %cst_2 = arith.constant 1.000000e+00 : f32
    %3 = vector.broadcast %cst_2 : f32 to vector<2x512xf32>
    %4 = arith.mulf %2, %3 : vector<2x512xf32>
    %c0_3 = arith.constant 0 : index
    %c0_4 = arith.constant 0 : index
    %5 = vector.load %arg1[%c0_3, %c0_4] : memref<512x128xf32, #tpu.memory_space<vmem>>, vector<512x128xf32>
    %cst_5 = arith.constant dense<0.000000e+00> : vector<2x128xf32>
    %6 = tpu.matmul %4, %5, %cst_5 {dimension_numbers = #tpu.dot_dimension_numbers<[1], [0], [0], [1], [0, 0, 1, 1], [], []>} : vector<2x512xf32>, vector<512x128xf32>, vector<2x128xf32> -> vector<2x128xf32>
    %c0_6 = arith.constant 0 : index
    %c0_7 = arith.constant 0 : index
    %7 = vector.load %arg2[%c0_6, %c0_7] : memref<1x128xf32, #tpu.memory_space<vmem>>, vector<1x128xf32>
    %8 = vector.broadcast %7 : vector<1x128xf32> to vector<2x128xf32>
    %9 = arith.addf %6, %8 : vector<2x128xf32>
    %c0_8 = arith.constant 0 : index
    %c0_9 = arith.constant 0 : index
    %10 = vector.load %arg3[%c0_8, %c0_9] : memref<2x128xf32, #tpu.memory_space<vmem>>, vector<2x128xf32>
    tpu.vector_store %arg3[%c0_8, %c0_9], %9 {strides = array<i32>} : memref<2x128xf32, #tpu.memory_space<vmem>>, vector<2x128xf32>,
    return
  }
}

</mosaic_0001>

<bundles_post_ra>
// kernel: transfer_learning_resnet18_forward.23
= control target key start
LH: loop header
LB: loop body
LE: loop exit
PB: predicated region body
PF: predicated region fallthrough
CT: control target
= control target key end

     0   :  { %s1150_s15 = smov 0   ;;  %s1152_s16 = smov 0   ;;  %s1272_s0 = inlined_call_operand.vmem [shape: bf16[32,1152], index: 0, kind: input, shape index: {}]   ;;  %s1273_s1 = inlined_call_operand.vmem [shape: bf16[1152,128], index: 1, kind: input, shape index: {}]   ;;  %s1274_s2 = inlined_call_operand.vmem [shape: f32[1,128], index: 2, kind: input, shape index: {}]   ;;  %s1275_s3 = inlined_call_operand.vmem [shape: bf16[32,128], index: 3, kind: input, shape index: {}]   ;;  %s1276_s4 = inlined_call_operand.vmem [shape: bf16[32,128], index: 4, kind: output, shape index: {}]  }
   0x1   :  { %s1154_s17 = smov 0   ;;  %s1156_s18 = smov 0  }
   0x2   :  { %s1158_s19 = smov 0  }
   0x3 LB: > { %s26_s20 = sadd.s32 1, %s1118_s18  ;;  %p49_p1 = scmp.ne.s32.totalorder %s1110_s16, %s1106_s15  ;;  %s1122_s19 = sphi %s1158_s19, %s14_s19   ;;  %s1118_s18 = sphi %s1156_s18, %s1280_s18   ;;  %s1114_s17 = sphi %s1154_s17, %s1279_s17   ;;  %s1110_s16 = sphi %s1152_s16, %s1278_s16   ;;  %s1106_s15 = sphi %s1150_s15, %s1277_s15  }
   0x4   : > { %p27_p0 = scmp.ge.s32.totalorder %s26_s20, 3  ;;  %p50_p2 = scmp.eq.s32.totalorder %s1122_s19, 0 }
   0x5   : > { %s42_s22 = sadd.s32 1, %s1110_s16  ;;  %p843_p5 = scmp.ge.s32.totalorder %s1122_s19, 3 }
   0x6   : > { %s1282_s20 = smov (%p27_p0, %s26_s20), 0  ;;  %p51_p3 = por %p50_p2, %p49_p1 }
   0x7   : > { %s38_s21 = ssub.s32 %s1118_s18, %s1282_s20  ;;  %203 = sbr.rel (%p843_p5) target bundleno = 25 (0x19), region = 24 }
   0x8   : > { %p40_p4 = scmp.eq.s32.totalorder %s38_s21, 0 }
   0xa   : > { %s1185_s23 = scalar_select %p40_p4, %s1110_s16, %s42_s22  }
   0xc   : > { %206 = sbr.rel (!%p51_p3) target bundleno = 25 (0x19), region = 28  ;;  %s208_s24 = sand.u32 (%p51_p3), 1, %s1110_s16  }
   0xd   : > { %s981_s25 = smul.u32 (%p51_p3), 12, %s1118_s18 }
   0xe   : > { %s1040_s26 = smul.u32 (%p51_p3), 48, %s208_s24 }
   0xf   : > { %s216_s29 = scalar_lea.vmem (%p51_p3), %s1272_s0, %s981_s25 }
  0x10   : > { %v231_v0 = vld [vmem:[%s216_s29] sm:$0xff] (%p51_p3)  ;;  %v235_v2 = vld [vmem:[%s216_s29 + $0x48] sm:$0xff] (%p51_p3)  ;;  %s210_s30 = scalar_lea.vmem (%p51_p3), [#allocation3], %s1040_s26  ;;  %v849_v6 = vld [vmem:[%s216_s29 + $0x50] sm:$0xf] (%p51_p3) }
  0x11   : > { %v233_v1 = vld [vmem:[%s216_s29 + $0x24] sm:$0xff]  ;;  %232 = vst [vmem:[%s210_s30] sm:$0xff] %v231_v0  ;;  %v237_v3 = vld [vmem:[%s216_s29 + $0x6c] sm:$0xff]  ;;  %v851_v7 = vld [vmem:[%s216_s29 + $0x74] sm:$0xf] }
  0x12   : > { %234 = vst [vmem:[%s210_s30 + $0xc] sm:$0xff] %v233_v1  ;;  %v845_v4 = vld [vmem:[%s216_s29 + $0x8] sm:$0xf]  ;;  %v847_v5 = vld [vmem:[%s216_s29 + $0x2c] sm:$0xf] }
  0x13   : > { %236 = vst [vmem:[%s210_s30 + $0x18] sm:$0xff] %v235_v2 }
  0x14   : > { %238 = vst [vmem:[%s210_s30 + $0x24] sm:$0xff] %v237_v3 }
  0x15   : > { %846 = vst [vmem:[%s210_s30 + $0x8] sm:$0xf] %v845_v4 }
  0x16   : > { %848 = vst [vmem:[%s210_s30 + $0x14] sm:$0xf] %v847_v5 }
  0x17   : > { %850 = vst [vmem:[%s210_s30 + $0x20] sm:$0xf] %v849_v6 }
  0x18   : > { %852 = vst [vmem:[%s210_s30 + $0x2c] sm:$0xf] %v851_v7 }
  0x19 PF: > { %p853_p6 = scmp.ge.s32.totalorder %s1122_s19, 1  ;;  %p271_p7 = scmp.lt.s32.totalorder %s1122_s19, 4 }
  0x1b   : > { %p272_p8 = pnand %p853_p6, %p271_p7 }
  0x1c   : > { %s278_s5 = sand.u32 (!%p272_p8), 1, %s1106_s15   ;;  %s327_s6 = smul.u32 (!%p272_p8), 48, %s1114_s17 }
  0x1d   : > { %275 = sbr.rel (%p272_p8) target bundleno = 255 (0xff), region = 58  ;;  %p855_p10 = scmp.ne.s32.totalorder (!%p272_p8), %s1114_s17, 0 }
  0x1e   : > { %s1041_s7 = smul.u32 (!%p272_p8), 48, %s278_s5  ;;  %p328_p9 = scmp.lt.s32.totalorder (!%p272_p8), %s327_s6, 143 }
  0x20   : > { %s1202_s12 = scalar_lea.vmem (!%p272_p8), [#allocation3], %s1041_s7 }
  0x22   : > { %s1284_s6 = smov (!%p328_p9, %s327_s6), 143  ;;  %360 = sbr.rel (%p855_p10) target bundleno = 44 (0x2c), region = 66 }
  0x23   : > { %s854_s8 = sshll.u32 %s1284_s6, 2 }
  0x24   : > { %s1200_s11 = scalar_lea.vmem %s1273_s1, %s854_s8 }
  0x27   : > { %v1124_v8 = vmov 0.0  }
  0x28   : > { %361 = vst [vmem:[#allocation2 + $0x10] sm:$0xff] %v1124_v8 }
  0x29   : > { %362 = vst [vmem:[#allocation2] sm:$0xff] %v1124_v8 }
  0x2a   : > { %363 = vst [vmem:[#allocation2 + $0x18] sm:$0xff] %v1124_v8 }
  0x2b   : > { %364 = vst [vmem:[#allocation2 + $0x8] sm:$0xff] %v1124_v8 }
  0x2c PF: > { %v995_v9 = vld [vmem:[%s1200_s11 + $0x38] sm:$0xff]  ;;  %v994_v12 = vld [vmem:[%s1200_s11 + $0x30] sm:$0xff]  ;;  %v993_v15 = vld [vmem:[%s1200_s11 + $0x28] sm:$0xff]  ;;  %p976_p11 = scmp.ne.s32.totalorder %s1114_s17, 2 }
  0x2d   : > { %v1003_v10 = vld [vmem:[%s1200_s11 + $0x78] sm:$0xff]  ;;  %601 = vmatpush.bf16.msra.mxu0 %v995_v9  ;;  %v1002_v13 = vld [vmem:[%s1200_s11 + $0x70] sm:$0xff]  ;;  %1032 = vmatpush.bf16.msra.mxu3 %v995_v9  ;;  %v1001_v16 = vld [vmem:[%s1200_s11 + $0x68] sm:$0xff] }
  0x2e   : > { %v1011_v11 = vld [vmem:[%s1200_s11 + $0xb8] sm:$0xff]  ;;  %620 = vmatpush.bf16.msra.mxu1 %v1003_v10  ;;  %v1010_v14 = vld [vmem:[%s1200_s11 + $0xb0] sm:$0xff]  ;;  %v1009_v17 = vld [vmem:[%s1200_s11 + $0xa8] sm:$0xff] }
  0x2f   : > { %639 = vmatpush.bf16.msra.mxu2 %v1011_v11  ;;  %v992_v18 = vld [vmem:[%s1200_s11 + $0x20] sm:$0xff]  ;;  %v991_v21 = vld [vmem:[%s1200_s11 + $0x18] sm:$0xff]  ;;  %v990_v24 = vld [vmem:[%s1200_s11 + $0x10] sm:$0xff] }
  0x30   : > { %v1000_v19 = vld [vmem:[%s1200_s11 + $0x60] sm:$0xff]  ;;  %v999_v22 = vld [vmem:[%s1200_s11 + $0x58] sm:$0xff]  ;;  %v998_v25 = vld [vmem:[%s1200_s11 + $0x50] sm:$0xff] }
  0x31   : > { %602 = vmatpush.bf16.msra.mxu0 %v994_v12  ;;  %1033 = vmatpush.bf16.msra.mxu3 %v994_v12  ;;  %v1008_v20 = vld [vmem:[%s1200_s11 + $0xa0] sm:$0xff]  ;;  %v1007_v23 = vld [vmem:[%s1200_s11 + $0x98] sm:$0xff]  ;;  %v1006_v26 = vld [vmem:[%s1200_s11 + $0x90] sm:$0xff] }
  0x32   : > { %621 = vmatpush.bf16.msra.mxu1 %v1002_v13  ;;  %v989_v27 = vld [vmem:[%s1200_s11 + $0x8] sm:$0xff]  ;;  %v988_v30 = vld [vmem:[%s1200_s11] sm:$0xff]  ;;  %v365_v54 = vld [vmem:[#allocation2 + $0x10] sm:$0xff] }
  0x33   : > { %640 = vmatpush.bf16.msra.mxu2 %v1010_v14  ;;  %v997_v28 = vld [vmem:[%s1200_s11 + $0x48] sm:$0xff]  ;;  %v996_v31 = vld [vmem:[%s1200_s11 + $0x40] sm:$0xff]  ;;  %v367_v4 = vld [vmem:[#allocation2 + $0x18] sm:$0xff] }
  0x34   : > { %v1005_v29 = vld [vmem:[%s1200_s11 + $0x88] sm:$0xff]  ;;  %v1004_v32 = vld [vmem:[%s1200_s11 + $0x80] sm:$0xff] }
  0x35   : > { %603 = vmatpush.bf16.msra.mxu0 %v993_v15  ;;  %1034 = vmatpush.bf16.msra.mxu3 %v993_v15  ;;  %v858_v33 = vld [vmem:[%s1202_s12] sm:$0xf]  ;;  %v983_v34 = vld [vmem:[%s1202_s12 + $0x8] sm:$0xf0]  ;;  %v982_v35 = vld [vmem:[%s1202_s12 + $0x4] sm:$0xf] }
  0x36   : > { %622 = vmatpush.bf16.msra.mxu1 %v1001_v16  ;;  %v860_v36 = vld [vmem:[%s1202_s12 + $0xc] sm:$0xf0]  ;;  %v866_v37 = vld [vmem:[%s1202_s12 + $0x8] sm:$0xf]  ;;  %v984_v38 = vld [vmem:[%s1202_s12 + $0x10] sm:$0xf0]  ;;  %v859_v41 = vor.u32 %v983_v34, %v858_v33 }
  0x37   : > { %641 = vmatpush.bf16.msra.mxu2 %v1009_v17  ;;  %v870_v39 = vld [vmem:[%s1202_s12 + $0x18] sm:$0xf]  ;;  %v986_v40 = vld [vmem:[%s1202_s12 + $0x20] sm:$0xf0]  ;;  %v863_v42 = vor.u32 %v982_v35, %v860_v36  ;;  %v867_v43 = vor.u32 %v984_v38, %v866_v37  ;;  %v985_v45 = vld [vmem:[%s1202_s12 + $0x1c] sm:$0xf] }
  0x38   : > { %v871_v44 = vor.u32 %v986_v40, %v870_v39  ;;  %v872_v46 = vld [vmem:[%s1202_s12 + $0x24] sm:$0xf0]  ;;  %v878_v47 = vld [vmem:[%s1202_s12 + $0x20] sm:$0xf]  ;;  %v987_v48 = vld [vmem:[%s1202_s12 + $0x28] sm:$0xf0] }
  0x39   : > { %604 = vmatpush.bf16.msra.mxu0 %v992_v18  ;;  %1035 = vmatpush.bf16.msra.mxu3 %v992_v18  ;;  %v875_v49 = vor.u32 %v985_v45, %v872_v46  ;;  %v879_v50 = vor.u32 %v987_v48, %v878_v47  ;;  %v366_v61 = vld [vmem:[#allocation2] sm:$0xff]  ;;  %v368_v11 = vld [vmem:[#allocation2 + $0x8] sm:$0xff] }
  0x3a   : > { %623 = vmatpush.bf16.msra.mxu1 %v1000_v19 }
  0x3b   : > { %642 = vmatpush.bf16.msra.mxu2 %v1008_v20 }
  0x3d   : > { %605 = vmatpush.bf16.msra.mxu0 %v991_v21  ;;  %1036 = vmatpush.bf16.msra.mxu3 %v991_v21 }
  0x3e   : > { %624 = vmatpush.bf16.msra.mxu1 %v999_v22 }
  0x3f   : > { %643 = vmatpush.bf16.msra.mxu2 %v1007_v23 }
  0x41   : > { %606 = vmatpush.bf16.msra.mxu0 %v990_v24  ;;  %1037 = vmatpush.bf16.msra.mxu3 %v990_v24 }
  0x42   : > { %625 = vmatpush.bf16.msra.mxu1 %v998_v25 }
  0x43   : > { %644 = vmatpush.bf16.msra.mxu2 %v1006_v26 }
  0x45   : > { %607 = vmatpush.bf16.msra.mxu0 %v989_v27  ;;  %1038 = vmatpush.bf16.msra.mxu3 %v989_v27 }
  0x46   : > { %626 = vmatpush.bf16.msra.mxu1 %v997_v28 }
  0x47   : > { %645 = vmatpush.bf16.msra.mxu2 %v1005_v29 }
  0x49   : > { %608 = vmatpush.bf16.msra.mxu0 %v988_v30  ;;  %1039 = vmatpush.bf16.msra.mxu3 %v988_v30 }
  0x4a   : > { %627 = vmatpush.bf16.msra.mxu1 %v996_v31 }
  0x4b   : > { %646 = vmatpush.bf16.msra.mxu2 %v1004_v32 }
  0x4c   : > { %609 = vmatmul.bf16.vlgmr.msra.gmra.mxu0 %v859_v41  ;;  %614 = vmatmul.bf16.vlgmr.msra.gmra.mxu3 %v871_v44 }
  0x4d   : > { %628 = vmatmul.bf16.vlgmr.msra.gmra.mxu1 %v863_v42 }
  0x4e   : > { %647 = vmatmul.bf16.vlgmr.msra.gmra.mxu2 %v867_v43 }
  0x5d   : > { %633 = vmatmul.bf16.gmra.mxu1 %v875_v49 }
  0x5e   : > { %652 = vmatmul.bf16.gmra.mxu2 %v879_v50 }
  0xc9   : > { %v610_v52 = vpop.f32.mrf.mxu0 }
  0xca   : > { %v629_v51 = vpop.f32.mrf.mxu1 }
  0xcb   : > { %v630_v53 = vadd.f32 %v629_v51, %v610_v52 }
  0xcf   : > { %v615_v2 = vpop.f32.mrf.mxu3 }
  0xd1   : > { %v648_v55 = vpop.f32.mrf.mxu2  ;;  %v612_v59 = vpop.f32.mrf.mxu0 }
  0xd2   : > { %v649_v56 = vadd.f32 %v648_v55, %v630_v53  ;;  %v631_v57 = vpop.f32.mrf.mxu1 }
  0xd3   : > { %v632_v60 = vadd.f32 %v631_v57, %v612_v59 }
  0xd4   : > { %v658_v58 = vadd.f32 %v649_v56, %v365_v54 }
  0xd6   : > { %662 = vst [vmem:[#allocation2 + $0x10] sm:$0xff] %v658_v58 }
  0xd7   : > { %v617_v9 = vpop.f32.mrf.mxu3 }
  0xd9   : > { %v650_v62 = vpop.f32.mrf.mxu2 }
  0xda   : > { %v651_v63 = vadd.f32 %v650_v62, %v632_v60  ;;  %v634_v0 = vpop.f32.mrf.mxu1 }
  0xdb   : > { %v635_v3 = vadd.f32 %v634_v0, %v615_v2 }
  0xdc   : > { %v659_v1 = vadd.f32 %v651_v63, %v366_v61 }
  0xde   : > { %663 = vst [vmem:[#allocation2] sm:$0xff] %v659_v1 }
  0xe1   : > { %v653_v5 = vpop.f32.mrf.mxu2 }
  0xe2   : > { %v654_v6 = vadd.f32 %v653_v5, %v635_v3  ;;  %v636_v8 = vpop.f32.mrf.mxu1 }
  0xe3   : > { %v637_v10 = vadd.f32 %v636_v8, %v617_v9 }
  0xe4   : > { %v660_v7 = vadd.f32 %v654_v6, %v367_v4 }
  0xe6   : > { %664 = vst [vmem:[#allocation2 + $0x18] sm:$0xff] %v660_v7 }
  0xe9   : > { %v655_v12 = vpop.f32.mrf.mxu2 }
  0xea   : > { %v656_v13 = vadd.f32 %v655_v12, %v637_v10  ;;  %669 = sbr.rel (%p976_p11) target bundleno = 255 (0xff), region = 70 }
  0xec   : > { %v661_v14 = vadd.f32 %v656_v13, %v368_v11 }
  0xee   : > { %665 = vst [vmem:[#allocation2 + $0x8] sm:$0xff] %v661_v14 }
  0xef   : > { %v670_v15 = vld [vmem:[#allocation2 + $0x10] sm:$0xff]  ;;  %v671_v16 = vld [vmem:[#allocation2] sm:$0xff]  ;;  %v672_v19 = vld [vmem:[#allocation2 + $0x18] sm:$0xff] }
  0xf0   : > { %v1013_v17 = vld [vmem:[%s1275_s3] sm:$0xff]   ;;  %v1030_v23 = vld [vmem:[%s1275_s3 + $0x8] sm:$0xff]  }
  0xf1   : > { %v1083_v18 = vld [vmem:[%s1274_s2] ss:$0 sm:$0xff]  ;;  %v1014_v20 = vunpack.c.l.bf16 %v1013_v17  ;;  %v1015_v21 = vunpack.c.h.bf16 %v1013_v17  ;;  %v1018_v26 = vunpack.c.l.bf16 %v1030_v23  ;;  %v1019_v27 = vunpack.c.h.bf16 %v1030_v23 }
  0xf2   : > { %v682_v24 = vadd.f32 %v1083_v18, %v670_v15  ;;  %v683_v25 = vadd.f32 %v1083_v18, %v671_v16  ;;  %v684_v28 = vadd.f32 %v1083_v18, %v672_v19 }
  0xf4   : > { %v690_v30 = vadd.f32 %v1014_v20, %v682_v24  ;;  %v691_v31 = vadd.f32 %v1015_v21, %v683_v25  ;;  %v692_v32 = vadd.f32 %v1018_v26, %v684_v28 }
  0xf5   : > { %v673_v22 = vld [vmem:[#allocation2 + $0x8] sm:$0xff] }
  0xf6   : > { %v685_v29 = vadd.f32 %v1083_v18, %v673_v22  ;;  %v694_v34 = vmax.f32 %v690_v30, 0.0  ;;  %v695_v35 = vmax.f32 %v691_v31, 0.0  ;;  %v696_v36 = vmax.f32 %v692_v32, 0.0 }
  0xf8   : > { %v693_v33 = vadd.f32 %v1019_v27, %v685_v29  ;;  %v1023_v38 = vpack.c.bf16 %v695_v35, %v694_v34 }
  0xfa   : > { %v697_v37 = vmax.f32 %v693_v33, 0.0  ;;  %1024 = vst [vmem:[%s1276_s4] sm:$0xff] %v1023_v38  }
  0xfc   : > { %v1028_v39 = vpack.c.bf16 %v697_v37, %v696_v36 }
  0xfe   : > { %1031 = vst [vmem:[%s1276_s4 + $0x8] sm:$0xff] %v1028_v39  }
  0xff PF: > { %s14_s19 = sadd.s32 1, %s1122_s19   ;;  %s1277_s15 = smov %s1110_s16 }
 0x100   : > { %p11_p12 = scmp.ge.s32.totalorder %s14_s19, 5   ;;  %s1278_s16 = smov %s1185_s23 }
 0x101   : > { %s1279_s17 = smov %s1118_s18  ;;  %s1280_s18 = smov %s1282_s20 }
 0x102   :  { %13 = sbr.rel (!%p11_p12) target bundleno = 3 (0x3), region = 120 }

// kernel: transfer_learning_resnet18_forward.21
= control target key start
LH: loop header
LB: loop body
LE: loop exit
PB: predicated region body
PF: predicated region fallthrough
CT: control target
= control target key end

     0   :  { %8 = vsyncpa [#allocation3], 0  ;;  %s441_s15 = smov [#allocation2]   ;;  %s537_s0 = inlined_call_operand.vmem [shape: bf16[128,128], index: 0, kind: input, shape index: {}]   ;;  %s538_s1 = inlined_call_operand.vmem [shape: bf16[128,128], index: 1, kind: input, shape index: {}]   ;;  %s539_s2 = inlined_call_operand.hbm [shape: f32[1,128], index: 2, kind: input, shape index: {}]   ;;  %s540_s3 = inlined_call_operand.vmem [shape: bf16[128,128], index: 3, kind: output, shape index: {}]  }
   0x1   :  { %s18_s14 = sshll.u32 %s539_s2, 4  ;;  %s20_s16 = sshll.u32 %s441_s15, 4  ;;  %s19_s14 = int_to_ptr.hbm [resolvable:$true] %s18_s14  ;;  %s21_s16 = int_to_ptr.vmem [resolvable:$true] %s20_s16 }
   0x2   :  { %23 = dma.hbm_to_vmem [thread:$0]  %s19_s14, 16, %s21_s16, [#allocation3]  }
   0x3   :  { %439 = dma.done.wait [#allocation3], 16  }
   0x4   :  { %440 = vsyncadd [#allocation3], 4294967280  ;;  %v341_v0 = vld [vmem:[%s538_s1 + $0x38] sm:$0xff]  ;;  %v340_v1 = vld [vmem:[%s538_s1 + $0x30] sm:$0xff] }
   0x5   :  { %160 = vmatpush.bf16.msra.mxu0 %v341_v0  ;;  %389 = vmatpush.bf16.msra.mxu1 %v341_v0  ;;  %v339_v2 = vld [vmem:[%s538_s1 + $0x28] sm:$0xff]  ;;  %v338_v3 = vld [vmem:[%s538_s1 + $0x20] sm:$0xff]  ;;  %v337_v4 = vld [vmem:[%s538_s1 + $0x18] sm:$0xff] }
   0x6   :  { %390 = vmatpush.bf16.msra.mxu2 %v341_v0  ;;  %391 = vmatpush.bf16.msra.mxu3 %v341_v0  ;;  %v336_v5 = vld [vmem:[%s538_s1 + $0x10] sm:$0xff]  ;;  %v335_v6 = vld [vmem:[%s538_s1 + $0x8] sm:$0xff]  ;;  %v334_v7 = vld [vmem:[%s538_s1] sm:$0xff] }
   0x7   :  { %v326_v8 = vld [vmem:[%s537_s0] sm:$0xff]  ;;  %v328_v9 = vld [vmem:[%s537_s0 + $0x10] sm:$0xff]  ;;  %v327_v12 = vld [vmem:[%s537_s0 + $0x8] sm:$0xff] }
   0x8   :  { %v330_v10 = vld [vmem:[%s537_s0 + $0x20] sm:$0xff]  ;;  %v332_v11 = vld [vmem:[%s537_s0 + $0x30] sm:$0xff]  ;;  %v329_v13 = vld [vmem:[%s537_s0 + $0x18] sm:$0xff] }
   0x9   :  { %161 = vmatpush.bf16.msra.mxu0 %v340_v1  ;;  %392 = vmatpush.bf16.msra.mxu1 %v340_v1  ;;  %v331_v14 = vld [vmem:[%s537_s0 + $0x28] sm:$0xff]  ;;  %v333_v15 = vld [vmem:[%s537_s0 + $0x38] sm:$0xff]  ;;  %v414_v18 = vld [vmem:[#allocation2] ss:$0 sm:$0xff] }
   0xa   :  { %393 = vmatpush.bf16.msra.mxu2 %v340_v1  ;;  %394 = vmatpush.bf16.msra.mxu3 %v340_v1 }
   0xd   :  { %162 = vmatpush.bf16.msra.mxu0 %v339_v2  ;;  %395 = vmatpush.bf16.msra.mxu1 %v339_v2 }
   0xe   :  { %396 = vmatpush.bf16.msra.mxu2 %v339_v2  ;;  %397 = vmatpush.bf16.msra.mxu3 %v339_v2 }
  0x11   :  { %163 = vmatpush.bf16.msra.mxu0 %v338_v3  ;;  %398 = vmatpush.bf16.msra.mxu1 %v338_v3 }
  0x12   :  { %399 = vmatpush.bf16.msra.mxu2 %v338_v3  ;;  %400 = vmatpush.bf16.msra.mxu3 %v338_v3 }
  0x15   :  { %164 = vmatpush.bf16.msra.mxu0 %v337_v4  ;;  %401 = vmatpush.bf16.msra.mxu1 %v337_v4 }
  0x16   :  { %402 = vmatpush.bf16.msra.mxu2 %v337_v4  ;;  %403 = vmatpush.bf16.msra.mxu3 %v337_v4 }
  0x19   :  { %165 = vmatpush.bf16.msra.mxu0 %v336_v5  ;;  %404 = vmatpush.bf16.msra.mxu1 %v336_v5 }
  0x1a   :  { %405 = vmatpush.bf16.msra.mxu2 %v336_v5  ;;  %406 = vmatpush.bf16.msra.mxu3 %v336_v5 }
  0x1d   :  { %166 = vmatpush.bf16.msra.mxu0 %v335_v6  ;;  %407 = vmatpush.bf16.msra.mxu1 %v335_v6 }
  0x1e   :  { %408 = vmatpush.bf16.msra.mxu2 %v335_v6  ;;  %409 = vmatpush.bf16.msra.mxu3 %v335_v6 }
  0x21   :  { %167 = vmatpush.bf16.msra.mxu0 %v334_v7  ;;  %410 = vmatpush.bf16.msra.mxu1 %v334_v7 }
  0x22   :  { %411 = vmatpush.bf16.msra.mxu2 %v334_v7  ;;  %412 = vmatpush.bf16.msra.mxu3 %v334_v7 }
  0x24   :  { %168 = vmatmul.bf16.vlgmr.msra.gmra.mxu0 %v326_v8  ;;  %178 = vmatmul.bf16.vlgmr.msra.gmra.mxu1 %v328_v9 }
  0x25   :  { %188 = vmatmul.bf16.vlgmr.msra.gmra.mxu2 %v330_v10  ;;  %198 = vmatmul.bf16.vlgmr.msra.gmra.mxu3 %v332_v11 }
  0x34   :  { %173 = vmatmul.bf16.gmra.mxu0 %v327_v12  ;;  %183 = vmatmul.bf16.gmra.mxu1 %v329_v13 }
  0x35   :  { %193 = vmatmul.bf16.gmra.mxu2 %v331_v14  ;;  %203 = vmatmul.bf16.gmra.mxu3 %v333_v15 }
  0xa1   :  { %v169_v16 = vpop.f32.mrf.mxu0  ;;  %v179_v17 = vpop.f32.mrf.mxu1 }
  0xa2   :  { %v170_v19 = vadd.f32 %v414_v18, %v169_v16  ;;  %v180_v20 = vadd.f32 %v414_v18, %v179_v17 }
  0xa4   :  { %v209_v27 = vmax.f32 %v170_v19, 0.0  ;;  %v213_v28 = vmax.f32 %v180_v20, 0.0 }
  0xa8   :  { %v189_v21 = vpop.f32.mrf.mxu2  ;;  %v199_v22 = vpop.f32.mrf.mxu3 }
  0xa9   :  { %v171_v23 = vpop.f32.mrf.mxu0  ;;  %v181_v24 = vpop.f32.mrf.mxu1  ;;  %v190_v33 = vadd.f32 %v414_v18, %v189_v21  ;;  %v200_v34 = vadd.f32 %v414_v18, %v199_v22 }
  0xaa   :  { %v172_v25 = vadd.f32 %v414_v18, %v171_v23  ;;  %v182_v26 = vadd.f32 %v414_v18, %v181_v24 }
  0xab   :  { %v217_v41 = vmax.f32 %v190_v33, 0.0  ;;  %v221_v42 = vmax.f32 %v200_v34, 0.0 }
  0xac   :  { %v210_v29 = vmax.f32 %v172_v25, 0.0  ;;  %v214_v30 = vmax.f32 %v182_v26, 0.0 }
  0xae   :  { %v345_v31 = vpack.c.bf16 %v210_v29, %v209_v27  ;;  %v355_v32 = vpack.c.bf16 %v214_v30, %v213_v28 }
  0xb0   :  { %346 = vst [vmem:[%s540_s3] sm:$0xff] %v345_v31   ;;  %v191_v35 = vpop.f32.mrf.mxu2  ;;  %v201_v36 = vpop.f32.mrf.mxu3 }
  0xb1   :  { %383 = vst [vmem:[%s540_s3 + $0x10] sm:$0xff] %v355_v32   ;;  %v192_v37 = vadd.f32 %v414_v18, %v191_v35  ;;  %v202_v38 = vadd.f32 %v414_v18, %v201_v36  ;;  %v174_v39 = vpop.f32.mrf.mxu0  ;;  %v184_v40 = vpop.f32.mrf.mxu1 }
  0xb2   :  { %v175_v47 = vadd.f32 %v414_v18, %v174_v39  ;;  %v185_v48 = vadd.f32 %v414_v18, %v184_v40 }
  0xb3   :  { %v218_v43 = vmax.f32 %v192_v37, 0.0  ;;  %v222_v44 = vmax.f32 %v202_v38, 0.0 }
  0xb4   :  { %v211_v55 = vmax.f32 %v175_v47, 0.0  ;;  %v215_v56 = vmax.f32 %v185_v48, 0.0 }
  0xb5   :  { %v365_v45 = vpack.c.bf16 %v218_v43, %v217_v41  ;;  %v375_v46 = vpack.c.bf16 %v222_v44, %v221_v42 }
  0xb7   :  { %385 = vst [vmem:[%s540_s3 + $0x20] sm:$0xff] %v365_v45  }
  0xb8   :  { %387 = vst [vmem:[%s540_s3 + $0x30] sm:$0xff] %v375_v46   ;;  %v194_v49 = vpop.f32.mrf.mxu2  ;;  %v204_v50 = vpop.f32.mrf.mxu3 }
  0xb9   :  { %v176_v51 = vpop.f32.mrf.mxu0  ;;  %v186_v52 = vpop.f32.mrf.mxu1  ;;  %v195_v61 = vadd.f32 %v414_v18, %v194_v49  ;;  %v205_v62 = vadd.f32 %v414_v18, %v204_v50 }
  0xba   :  { %v177_v53 = vadd.f32 %v414_v18, %v176_v51  ;;  %v187_v54 = vadd.f32 %v414_v18, %v186_v52 }
  0xbb   :  { %v219_v3 = vmax.f32 %v195_v61, 0.0  ;;  %v223_v4 = vmax.f32 %v205_v62, 0.0 }
  0xbc   :  { %v212_v57 = vmax.f32 %v177_v53, 0.0  ;;  %v216_v58 = vmax.f32 %v187_v54, 0.0 }
  0xbe   :  { %v350_v59 = vpack.c.bf16 %v212_v57, %v211_v55  ;;  %v360_v60 = vpack.c.bf16 %v216_v58, %v215_v56 }
  0xc0   :  { %382 = vst [vmem:[%s540_s3 + $0x8] sm:$0xff] %v350_v59   ;;  %v196_v63 = vpop.f32.mrf.mxu2  ;;  %v206_v0 = vpop.f32.mrf.mxu3 }
  0xc1   :  { %384 = vst [vmem:[%s540_s3 + $0x18] sm:$0xff] %v360_v60   ;;  %v197_v1 = vadd.f32 %v414_v18, %v196_v63  ;;  %v207_v2 = vadd.f32 %v414_v18, %v206_v0 }
  0xc3   :  { %v220_v5 = vmax.f32 %v197_v1, 0.0  ;;  %v224_v6 = vmax.f32 %v207_v2, 0.0 }
  0xc5   :  { %v370_v7 = vpack.c.bf16 %v220_v5, %v219_v3  ;;  %v380_v8 = vpack.c.bf16 %v224_v6, %v223_v4 }
  0xc7   :  { %386 = vst [vmem:[%s540_s3 + $0x28] sm:$0xff] %v370_v7  }
  0xc8   :  { %388 = vst [vmem:[%s540_s3 + $0x38] sm:$0xff] %v380_v8  }
  0xc9   :  { %261 = vsyncpa [#allocation3], 1 }

// kernel: transfer_learning_resnet18_forward.22
= control target key start
LH: loop header
LB: loop body
LE: loop exit
PB: predicated region body
PF: predicated region fallthrough
CT: control target
= control target key end

     0   :  { %8 = vsyncpa [#allocation5], 0  ;;  %s1339_s0 = inlined_call_operand.vmem [shape: bf16[32,1152], index: 0, kind: input, shape index: {}]   ;;  %s1340_s1 = inlined_call_operand.hbm [shape: bf16[1152,128], index: 1, kind: input, shape index: {}]   ;;  %s1341_s2 = inlined_call_operand.hbm [shape: f32[1,128], index: 2, kind: input, shape index: {}]   ;;  %s1342_s3 = inlined_call_operand.vmem [shape: bf16[32,128], index: 3, kind: output, shape index: {}]  }
   0x1   :  { %10 = vsyncpa [#allocation5 + $0x1], 0 }
   0x2   :  { %11 = vsyncpa [#allocation7], 0  ;;  %s1178_s12 = smov 0   ;;  %s1180_s13 = smov 0  }
   0x3   :  { %s1182_s14 = smov 0   ;;  %s1184_s15 = smov 0  }
   0x4   :  { %s1186_s16 = smov 0   ;;  %s1188_s17 = smov 0  }
   0x5 LB: > { %s778_s18 = sadd.s32 4294967295, %s1152_s17   ;;  %s29_s19 = sadd.s32 1, %s1148_s16  ;;  %s1152_s17 = sphi %s1188_s17, %s17_s17   ;;  %s1148_s16 = sphi %s1186_s16, %s1351_s16   ;;  %s1144_s15 = sphi %s1184_s15, %s1350_s15   ;;  %s1140_s14 = sphi %s1182_s14, %s1349_s14   ;;  %s1136_s13 = sphi %s1180_s13, %s1348_s13   ;;  %s1132_s12 = sphi %s1178_s12, %s1347_s12  }
   0x6   : > { %p30_p0 = scmp.ge.s32.totalorder %s29_s19, 3  ;;  %s45_s20 = sadd.s32 1, %s1140_s14 }
   0x7   : > { %p52_p1 = scmp.ne.s32.totalorder %s1140_s14, %s1136_s13  ;;  %p53_p2 = scmp.eq.s32.totalorder %s1152_s17, 0 }
   0x8   : > { %s1353_s19 = smov (%p30_p0, %s29_s19), 0  ;;  %p86_p4 = scmp.ne.s32.totalorder %s1136_s13, %s1132_s12 }
   0x9   : > { %p1214_p3 = por %p53_p2, %p52_p1  ;;  %s41_s22 = ssub.s32 %s1148_s16, %s1353_s19 }
   0xa   : > { %p1221_p5 = scmp.eq.s32.totalorder %s778_s18, 0  ;;  %p43_p6 = scmp.eq.s32.totalorder %s41_s22, 0 }
   0xb   : > { %p779_p7 = scmp.ge.s32.totalorder %s1152_s17, 1  ;;  %p151_p9 = scmp.lt.s32.totalorder %s1152_s17, 4 }
   0xc   : > { %p1228_p8 = por %p1221_p5, %p86_p4  ;;  %s164_s29 = sshll.u32 %s1341_s2, 4  ;;  %s165_s29 = int_to_ptr.hbm [resolvable:$true] %s164_s29 }
   0xd   : > { %s1234_s25 = scalar_select %p43_p6, %s1140_s14, %s45_s20  }
   0xe   : > { %p1236_p10 = pnand %p779_p7, %p151_p9  ;;  %s1154_s30 = smov [#allocation6]  }
   0xf   : > { %s166_s4 = sshll.u32 %s1154_s30, 4  ;;  %p781_p13 = scmp.ge.s32.totalorder %s1152_s17, 3  ;;  %s167_s4 = int_to_ptr.vmem [resolvable:$true] %s166_s4 }
  0x10   : > { %p981_p11 = pneg %p1236_p10 }
  0x11   : > { %173 = sbr.rel (%p781_p13) target bundleno = 41 (0x29), region = 20 }
  0x12   : > { %p982_p12 = pnand %p981_p11, %p1221_p5 }
  0x14   : > { %984 = dma.hbm_to_vmem [thread:$0]  (!%p982_p12), %s165_s29, 16, %s167_s4, [#allocation7]  }
  0x16   : > { %176 = sbr.rel (!%p1214_p3) target bundleno = 35 (0x23), region = 24  ;;  %s178_s5 = sand.u32 (%p1214_p3), 1, %s1140_s14  }
  0x17   : > { %s920_s6 = smul.u32 (%p1214_p3), 12, %s1148_s16 }
  0x18   : > { %s971_s7 = smul.u32 (%p1214_p3), 48, %s178_s5 }
  0x19   : > { %s186_s10 = scalar_lea.vmem (%p1214_p3), %s1339_s0, %s920_s6 }
  0x1a   : > { %v201_v0 = vld [vmem:[%s186_s10] sm:$0xff] (%p1214_p3)  ;;  %v205_v2 = vld [vmem:[%s186_s10 + $0x48] sm:$0xff] (%p1214_p3)  ;;  %s180_s11 = scalar_lea.vmem (%p1214_p3), [#allocation3], %s971_s7  ;;  %v787_v6 = vld [vmem:[%s186_s10 + $0x50] sm:$0xf] (%p1214_p3) }
  0x1b   : > { %v203_v1 = vld [vmem:[%s186_s10 + $0x24] sm:$0xff]  ;;  %202 = vst [vmem:[%s180_s11] sm:$0xff] %v201_v0  ;;  %v207_v3 = vld [vmem:[%s186_s10 + $0x6c] sm:$0xff]  ;;  %v789_v7 = vld [vmem:[%s186_s10 + $0x74] sm:$0xf] }
  0x1c   : > { %204 = vst [vmem:[%s180_s11 + $0xc] sm:$0xff] %v203_v1  ;;  %v783_v4 = vld [vmem:[%s186_s10 + $0x8] sm:$0xf]  ;;  %v785_v5 = vld [vmem:[%s186_s10 + $0x2c] sm:$0xf] }
  0x1d   : > { %206 = vst [vmem:[%s180_s11 + $0x18] sm:$0xff] %v205_v2 }
  0x1e   : > { %208 = vst [vmem:[%s180_s11 + $0x24] sm:$0xff] %v207_v3 }
  0x1f   : > { %784 = vst [vmem:[%s180_s11 + $0x8] sm:$0xf] %v783_v4 }
  0x20   : > { %786 = vst [vmem:[%s180_s11 + $0x14] sm:$0xf] %v785_v5 }
  0x21   : > { %788 = vst [vmem:[%s180_s11 + $0x20] sm:$0xf] %v787_v6 }
  0x22   : > { %790 = vst [vmem:[%s180_s11 + $0x2c] sm:$0xf] %v789_v7 }
  0x23 PF: > { %s231_s12 = sand.u32 1, %s1140_s14   ;;  %s921_s18 = smul.u32 192, %s1148_s16 }
  0x24   : > { %s972_s20 = smul.u32 192, %s231_s12  ;;  %s232_s5 = scalar_lea.sflag [#allocation5], %s231_s12 }
  0x25   : > { %s241_s28 = scalar_lea.hbm %s1340_s1, %s921_s18  ;;  %s1155_s6 = smov 64  }
  0x26   : > { %s242_s29 = sshll.u32 %s241_s28, 4  ;;  %s235_s30 = scalar_lea.vmem [#allocation4], %s972_s20  ;;  %s243_s29 = int_to_ptr.hbm [resolvable:$true] %s242_s29 }
  0x27   : > { %s244_s4 = sshll.u32 %s235_s30, 4  ;;  %s1156_s7 = smov 4   ;;  %s245_s4 = int_to_ptr.vmem [resolvable:$true] %s244_s4 }
  0x28   : > { %977 = dma.hbm_to_vmem [thread:$0]  (%p1214_p3), %s243_s29, 3072, %s245_s4, %s232_s5, %s1155_s6, %s1155_s6, %s1156_s7  }
  0x29 PF: > { %256 = sbr.rel (%p1236_p10) target bundleno = 270 (0x10e), region = 54  ;;  %s259_s8 = sand.u32 (!%p1236_p10), 1, %s1136_s13  }
  0x2a   : > { %s973_s9 = smul.u32 (!%p1236_p10), 48, %s259_s8  ;;  %s266_s18 = scalar_lea.sflag (!%p1236_p10), [#allocation5], %s259_s8 }
  0x2b   : > { %s974_s10 = smul.u32 (!%p1236_p10), 192, %s259_s8 }
  0x2c   : > { %s1265_s11 = scalar_lea.vmem (!%p1236_p10), [#allocation3], %s973_s9 }
  0x2d   : > { %s1267_s20 = scalar_lea.vmem (!%p1236_p10), [#allocation4], %s974_s10 }
  0x2e   : > { %1123 = dma.done.wait (%p1228_p8), %s266_s18, 3072  }
  0x2f   : > { %1125 = vsyncadd (%p1228_p8), %s266_s18, 4294964224 }
  0x30   : > { %1127 = dma.done.wait (%p1221_p5), [#allocation7], 16  }
  0x31   : > { %1129 = vsyncadd (%p1221_p5), [#allocation7], 4294967280  ;;  %p794_p0 = scmp.ne.s32.totalorder %s1144_s15, 0 }
  0x33   : > { %320 = sbr.rel (%p794_p0) target bundleno = 61 (0x3d), region = 70 }
  0x38   : > { %v1157_v8 = vmov 0.0  }
  0x39   : > { %321 = vst [vmem:[#allocation2 + $0x10] sm:$0xff] %v1157_v8 }
  0x3a   : > { %322 = vst [vmem:[#allocation2] sm:$0xff] %v1157_v8 }
  0x3b   : > { %323 = vst [vmem:[#allocation2 + $0x18] sm:$0xff] %v1157_v8 }
  0x3c   : > { %324 = vst [vmem:[#allocation2 + $0x8] sm:$0xff] %v1157_v8 }
  0x3d PF: > { %v935_v9 = vld [vmem:[%s1267_s20 + $0x38] sm:$0xff]  ;;  %v934_v12 = vld [vmem:[%s1267_s20 + $0x30] sm:$0xff]  ;;  %v933_v15 = vld [vmem:[%s1267_s20 + $0x28] sm:$0xff]  ;;  %p915_p1 = scmp.ne.s32.totalorder %s1144_s15, 2 }
  0x3e   : > { %v943_v10 = vld [vmem:[%s1267_s20 + $0x78] sm:$0xff]  ;;  %561 = vmatpush.bf16.msra.mxu0 %v935_v9  ;;  %v942_v13 = vld [vmem:[%s1267_s20 + $0x70] sm:$0xff]  ;;  %963 = vmatpush.bf16.msra.mxu3 %v935_v9  ;;  %v941_v16 = vld [vmem:[%s1267_s20 + $0x68] sm:$0xff] }
  0x3f   : > { %v951_v11 = vld [vmem:[%s1267_s20 + $0xb8] sm:$0xff]  ;;  %580 = vmatpush.bf16.msra.mxu1 %v943_v10  ;;  %v950_v14 = vld [vmem:[%s1267_s20 + $0xb0] sm:$0xff]  ;;  %v949_v17 = vld [vmem:[%s1267_s20 + $0xa8] sm:$0xff] }
  0x40   : > { %599 = vmatpush.bf16.msra.mxu2 %v951_v11  ;;  %v932_v18 = vld [vmem:[%s1267_s20 + $0x20] sm:$0xff]  ;;  %v931_v21 = vld [vmem:[%s1267_s20 + $0x18] sm:$0xff]  ;;  %v930_v24 = vld [vmem:[%s1267_s20 + $0x10] sm:$0xff] }
  0x41   : > { %v940_v19 = vld [vmem:[%s1267_s20 + $0x60] sm:$0xff]  ;;  %v939_v22 = vld [vmem:[%s1267_s20 + $0x58] sm:$0xff]  ;;  %v938_v25 = vld [vmem:[%s1267_s20 + $0x50] sm:$0xff] }
  0x42   : > { %562 = vmatpush.bf16.msra.mxu0 %v934_v12  ;;  %964 = vmatpush.bf16.msra.mxu3 %v934_v12  ;;  %v948_v20 = vld [vmem:[%s1267_s20 + $0xa0] sm:$0xff]  ;;  %v947_v23 = vld [vmem:[%s1267_s20 + $0x98] sm:$0xff]  ;;  %v946_v26 = vld [vmem:[%s1267_s20 + $0x90] sm:$0xff] }
  0x43   : > { %581 = vmatpush.bf16.msra.mxu1 %v942_v13  ;;  %v929_v27 = vld [vmem:[%s1267_s20 + $0x8] sm:$0xff]  ;;  %v928_v30 = vld [vmem:[%s1267_s20] sm:$0xff]  ;;  %v325_v54 = vld [vmem:[#allocation2 + $0x10] sm:$0xff] }
  0x44   : > { %600 = vmatpush.bf16.msra.mxu2 %v950_v14  ;;  %v937_v28 = vld [vmem:[%s1267_s20 + $0x48] sm:$0xff]  ;;  %v936_v31 = vld [vmem:[%s1267_s20 + $0x40] sm:$0xff]  ;;  %v327_v4 = vld [vmem:[#allocation2 + $0x18] sm:$0xff] }
  0x45   : > { %v945_v29 = vld [vmem:[%s1267_s20 + $0x88] sm:$0xff]  ;;  %v944_v32 = vld [vmem:[%s1267_s20 + $0x80] sm:$0xff] }
  0x46   : > { %563 = vmatpush.bf16.msra.mxu0 %v933_v15  ;;  %965 = vmatpush.bf16.msra.mxu3 %v933_v15  ;;  %v797_v33 = vld [vmem:[%s1265_s11] sm:$0xf]  ;;  %v923_v34 = vld [vmem:[%s1265_s11 + $0x8] sm:$0xf0]  ;;  %v922_v35 = vld [vmem:[%s1265_s11 + $0x4] sm:$0xf] }
  0x47   : > { %582 = vmatpush.bf16.msra.mxu1 %v941_v16  ;;  %v799_v36 = vld [vmem:[%s1265_s11 + $0xc] sm:$0xf0]  ;;  %v805_v37 = vld [vmem:[%s1265_s11 + $0x8] sm:$0xf]  ;;  %v924_v38 = vld [vmem:[%s1265_s11 + $0x10] sm:$0xf0]  ;;  %v798_v41 = vor.u32 %v923_v34, %v797_v33 }
  0x48   : > { %601 = vmatpush.bf16.msra.mxu2 %v949_v17  ;;  %v809_v39 = vld [vmem:[%s1265_s11 + $0x18] sm:$0xf]  ;;  %v926_v40 = vld [vmem:[%s1265_s11 + $0x20] sm:$0xf0]  ;;  %v802_v42 = vor.u32 %v922_v35, %v799_v36  ;;  %v806_v43 = vor.u32 %v924_v38, %v805_v37  ;;  %v925_v45 = vld [vmem:[%s1265_s11 + $0x1c] sm:$0xf] }
  0x49   : > { %v810_v44 = vor.u32 %v926_v40, %v809_v39  ;;  %v811_v46 = vld [vmem:[%s1265_s11 + $0x24] sm:$0xf0]  ;;  %v817_v47 = vld [vmem:[%s1265_s11 + $0x20] sm:$0xf]  ;;  %v927_v48 = vld [vmem:[%s1265_s11 + $0x28] sm:$0xf0] }
  0x4a   : > { %564 = vmatpush.bf16.msra.mxu0 %v932_v18  ;;  %966 = vmatpush.bf16.msra.mxu3 %v932_v18  ;;  %v814_v49 = vor.u32 %v925_v45, %v811_v46  ;;  %v818_v50 = vor.u32 %v927_v48, %v817_v47  ;;  %v326_v61 = vld [vmem:[#allocation2] sm:$0xff]  ;;  %v328_v11 = vld [vmem:[#allocation2 + $0x8] sm:$0xff] }
  0x4b   : > { %583 = vmatpush.bf16.msra.mxu1 %v940_v19 }
  0x4c   : > { %602 = vmatpush.bf16.msra.mxu2 %v948_v20 }
  0x4e   : > { %565 = vmatpush.bf16.msra.mxu0 %v931_v21  ;;  %967 = vmatpush.bf16.msra.mxu3 %v931_v21 }
  0x4f   : > { %584 = vmatpush.bf16.msra.mxu1 %v939_v22 }
  0x50   : > { %603 = vmatpush.bf16.msra.mxu2 %v947_v23 }
  0x52   : > { %566 = vmatpush.bf16.msra.mxu0 %v930_v24  ;;  %968 = vmatpush.bf16.msra.mxu3 %v930_v24 }
  0x53   : > { %585 = vmatpush.bf16.msra.mxu1 %v938_v25 }
  0x54   : > { %604 = vmatpush.bf16.msra.mxu2 %v946_v26 }
  0x56   : > { %567 = vmatpush.bf16.msra.mxu0 %v929_v27  ;;  %969 = vmatpush.bf16.msra.mxu3 %v929_v27 }
  0x57   : > { %586 = vmatpush.bf16.msra.mxu1 %v937_v28 }
  0x58   : > { %605 = vmatpush.bf16.msra.mxu2 %v945_v29 }
  0x5a   : > { %568 = vmatpush.bf16.msra.mxu0 %v928_v30  ;;  %970 = vmatpush.bf16.msra.mxu3 %v928_v30 }
  0x5b   : > { %587 = vmatpush.bf16.msra.mxu1 %v936_v31 }
  0x5c   : > { %606 = vmatpush.bf16.msra.mxu2 %v944_v32 }
  0x5d   : > { %569 = vmatmul.bf16.vlgmr.msra.gmra.mxu0 %v798_v41  ;;  %574 = vmatmul.bf16.vlgmr.msra.gmra.mxu3 %v810_v44 }
  0x5e   : > { %588 = vmatmul.bf16.vlgmr.msra.gmra.mxu1 %v802_v42 }
  0x5f   : > { %607 = vmatmul.bf16.vlgmr.msra.gmra.mxu2 %v806_v43 }
  0x6e   : > { %593 = vmatmul.bf16.gmra.mxu1 %v814_v49 }
  0x6f   : > { %612 = vmatmul.bf16.gmra.mxu2 %v818_v50 }
  0xda   : > { %v570_v52 = vpop.f32.mrf.mxu0 }
  0xdb   : > { %v589_v51 = vpop.f32.mrf.mxu1 }
  0xdc   : > { %v590_v53 = vadd.f32 %v589_v51, %v570_v52 }
  0xe0   : > { %v575_v2 = vpop.f32.mrf.mxu3 }
  0xe2   : > { %v608_v55 = vpop.f32.mrf.mxu2  ;;  %v572_v59 = vpop.f32.mrf.mxu0 }
  0xe3   : > { %v609_v56 = vadd.f32 %v608_v55, %v590_v53  ;;  %v591_v57 = vpop.f32.mrf.mxu1 }
  0xe4   : > { %v592_v60 = vadd.f32 %v591_v57, %v572_v59 }
  0xe5   : > { %v618_v58 = vadd.f32 %v609_v56, %v325_v54 }
  0xe7   : > { %622 = vst [vmem:[#allocation2 + $0x10] sm:$0xff] %v618_v58 }
  0xe8   : > { %v577_v9 = vpop.f32.mrf.mxu3 }
  0xea   : > { %v610_v62 = vpop.f32.mrf.mxu2 }
  0xeb   : > { %v611_v63 = vadd.f32 %v610_v62, %v592_v60  ;;  %v594_v0 = vpop.f32.mrf.mxu1 }
  0xec   : > { %v595_v3 = vadd.f32 %v594_v0, %v575_v2 }
  0xed   : > { %v619_v1 = vadd.f32 %v611_v63, %v326_v61 }
  0xef   : > { %623 = vst [vmem:[#allocation2] sm:$0xff] %v619_v1 }
  0xf2   : > { %v613_v5 = vpop.f32.mrf.mxu2 }
  0xf3   : > { %v614_v6 = vadd.f32 %v613_v5, %v595_v3  ;;  %v596_v8 = vpop.f32.mrf.mxu1 }
  0xf4   : > { %v597_v10 = vadd.f32 %v596_v8, %v577_v9 }
  0xf5   : > { %v620_v7 = vadd.f32 %v614_v6, %v327_v4 }
  0xf7   : > { %624 = vst [vmem:[#allocation2 + $0x18] sm:$0xff] %v620_v7 }
  0xfa   : > { %v615_v12 = vpop.f32.mrf.mxu2 }
  0xfb   : > { %v616_v13 = vadd.f32 %v615_v12, %v597_v10  ;;  %629 = sbr.rel (%p915_p1) target bundleno = 270 (0x10e), region = 74 }
  0xfd   : > { %v621_v14 = vadd.f32 %v616_v13, %v328_v11 }
  0xff   : > { %625 = vst [vmem:[#allocation2 + $0x8] sm:$0xff] %v621_v14 }
 0x100   : > { %v630_v15 = vld [vmem:[#allocation2 + $0x10] sm:$0xff]  ;;  %v631_v16 = vld [vmem:[#allocation2] sm:$0xff]  ;;  %v632_v18 = vld [vmem:[#allocation2 + $0x18] sm:$0xff] }
 0x101   : > { %v1039_v17 = vld [vmem:[#allocation6] ss:$0 sm:$0xff] }
 0x102   : > { %v638_v20 = vadd.f32 %v1039_v17, %v630_v15  ;;  %v639_v21 = vadd.f32 %v1039_v17, %v631_v16  ;;  %v640_v22 = vadd.f32 %v1039_v17, %v632_v18 }
 0x104   : > { %v642_v24 = vmax.f32 %v638_v20, 0.0  ;;  %v643_v25 = vmax.f32 %v639_v21, 0.0  ;;  %v644_v26 = vmax.f32 %v640_v22, 0.0 }
 0x106   : > { %v633_v19 = vld [vmem:[#allocation2 + $0x8] sm:$0xff]  ;;  %v955_v28 = vpack.c.bf16 %v643_v25, %v642_v24 }
 0x107   : > { %v641_v23 = vadd.f32 %v1039_v17, %v633_v19 }
 0x108   : > { %956 = vst [vmem:[%s1342_s3] sm:$0xff] %v955_v28  }
 0x109   : > { %v645_v27 = vmax.f32 %v641_v23, 0.0 }
 0x10b   : > { %v960_v29 = vpack.c.bf16 %v645_v27, %v644_v26 }
 0x10d   : > { %962 = vst [vmem:[%s1342_s3 + $0x8] sm:$0xff] %v960_v29  }
 0x10e PF: > { %s17_s17 = sadd.s32 1, %s1152_s17   ;;  %s1347_s12 = smov %s1136_s13 }
 0x10f   : > { %p14_p2 = scmp.ge.s32.totalorder %s17_s17, 5   ;;  %s1348_s13 = smov %s1140_s14 }
 0x110   : > { %s1349_s14 = smov %s1234_s25  ;;  %s1350_s15 = smov %s1148_s16 }
 0x111   : > { %s1351_s16 = smov %s1353_s19  ;;  %16 = sbr.rel (!%p14_p2) target bundleno = 5 (0x5), region = 125 }
 0x116   :  { %682 = vsyncpa [#allocation5], 1 }
 0x117   :  { %684 = vsyncpa [#allocation5 + $0x1], 1 }
 0x118   :  { %685 = vsyncpa [#allocation7], 1 }

// kernel: transfer_learning_resnet18_forward.25
= control target key start
LH: loop header
LB: loop body
LE: loop exit
PB: predicated region body
PF: predicated region fallthrough
CT: control target
= control target key end

     0   :  { %9 = vsyncpa [#allocation5], 0  ;;  %s1450_s0 = inlined_call_operand.vmem [shape: bf16[32,1152], index: 0, kind: input, shape index: {}]   ;;  %s1451_s1 = inlined_call_operand.hbm [shape: bf16[1152,128], index: 1, kind: input, shape index: {}]   ;;  %s1452_s2 = inlined_call_operand.hbm [shape: f32[1,128], index: 2, kind: input, shape index: {}]   ;;  %s1453_s3 = inlined_call_operand.vmem [shape: bf16[32,128], index: 3, kind: input, shape index: {}]   ;;  %s1454_s4 = inlined_call_operand.vmem [shape: bf16[32,128], index: 4, kind: output, shape index: {}]  }
   0x1   :  { %11 = vsyncpa [#allocation5 + $0x1], 0 }
   0x2   :  { %12 = vsyncpa [#allocation7], 0  ;;  %s1283_s15 = smov 0   ;;  %s1285_s16 = smov 0  }
   0x3   :  { %s1287_s17 = smov 0   ;;  %s1289_s18 = smov 0  }
   0x4   :  { %s1291_s19 = smov 0   ;;  %s1293_s20 = smov 0  }
   0x5 LB: > { %s868_s21 = sadd.s32 4294967295, %s1252_s20   ;;  %s30_s22 = sadd.s32 1, %s1248_s19  ;;  %s1252_s20 = sphi %s1293_s20, %s18_s20   ;;  %s1248_s19 = sphi %s1291_s19, %s1463_s19   ;;  %s1244_s18 = sphi %s1289_s18, %s1462_s18   ;;  %s1240_s17 = sphi %s1287_s17, %s1461_s17   ;;  %s1236_s16 = sphi %s1285_s16, %s1460_s16   ;;  %s1232_s15 = sphi %s1283_s15, %s1459_s15  }
   0x6   : > { %p31_p0 = scmp.ge.s32.totalorder %s30_s22, 3  ;;  %s46_s23 = sadd.s32 1, %s1240_s17 }
   0x7   : > { %p53_p1 = scmp.ne.s32.totalorder %s1240_s17, %s1236_s16  ;;  %p54_p2 = scmp.eq.s32.totalorder %s1252_s20, 0 }
   0x8   : > { %s1465_s22 = smov (%p31_p0, %s30_s22), 0  ;;  %p87_p4 = scmp.ne.s32.totalorder %s1236_s16, %s1232_s15 }
   0x9   : > { %p1319_p3 = por %p54_p2, %p53_p1  ;;  %s42_s25 = ssub.s32 %s1248_s19, %s1465_s22 }
   0xa   : > { %p1326_p5 = scmp.eq.s32.totalorder %s868_s21, 0  ;;  %p44_p6 = scmp.eq.s32.totalorder %s42_s25, 0 }
   0xb   : > { %p869_p7 = scmp.ge.s32.totalorder %s1252_s20, 1  ;;  %p180_p9 = scmp.lt.s32.totalorder %s1252_s20, 4 }
   0xc   : > { %p1333_p8 = por %p1326_p5, %p87_p4  ;;  %s193_s6 = sshll.u32 %s1452_s2, 4  ;;  %s194_s6 = int_to_ptr.hbm [resolvable:$true] %s193_s6 }
   0xd   : > { %s1339_s28 = scalar_select %p44_p6, %s1240_s17, %s46_s23  }
   0xe   : > { %p1341_p10 = pnand %p869_p7, %p180_p9  ;;  %s1254_s7 = smov [#allocation6]  }
   0xf   : > { %s195_s8 = sshll.u32 %s1254_s7, 4  ;;  %p872_p13 = scmp.ge.s32.totalorder %s1252_s20, 3  ;;  %s196_s8 = int_to_ptr.vmem [resolvable:$true] %s195_s8 }
  0x10   : > { %p1081_p11 = pneg %p1341_p10 }
  0x11   : > { %214 = sbr.rel (%p872_p13) target bundleno = 41 (0x29), region = 24 }
  0x12   : > { %p1082_p12 = pnand %p1081_p11, %p1326_p5 }
  0x14   : > { %1084 = dma.hbm_to_vmem [thread:$0]  (!%p1082_p12), %s194_s6, 16, %s196_s8, [#allocation7]  }
  0x16   : > { %217 = sbr.rel (!%p1319_p3) target bundleno = 35 (0x23), region = 28  ;;  %s219_s9 = sand.u32 (%p1319_p3), 1, %s1240_s17  }
  0x17   : > { %s1011_s10 = smul.u32 (%p1319_p3), 12, %s1248_s19 }
  0x18   : > { %s1071_s11 = smul.u32 (%p1319_p3), 48, %s219_s9 }
  0x19   : > { %s227_s14 = scalar_lea.vmem (%p1319_p3), %s1450_s0, %s1011_s10 }
  0x1a   : > { %v242_v0 = vld [vmem:[%s227_s14] sm:$0xff] (%p1319_p3)  ;;  %v246_v2 = vld [vmem:[%s227_s14 + $0x48] sm:$0xff] (%p1319_p3)  ;;  %s221_s15 = scalar_lea.vmem (%p1319_p3), [#allocation3], %s1071_s11  ;;  %v878_v6 = vld [vmem:[%s227_s14 + $0x50] sm:$0xf] (%p1319_p3) }
  0x1b   : > { %v244_v1 = vld [vmem:[%s227_s14 + $0x24] sm:$0xff]  ;;  %243 = vst [vmem:[%s221_s15] sm:$0xff] %v242_v0  ;;  %v248_v3 = vld [vmem:[%s227_s14 + $0x6c] sm:$0xff]  ;;  %v880_v7 = vld [vmem:[%s227_s14 + $0x74] sm:$0xf] }
  0x1c   : > { %245 = vst [vmem:[%s221_s15 + $0xc] sm:$0xff] %v244_v1  ;;  %v874_v4 = vld [vmem:[%s227_s14 + $0x8] sm:$0xf]  ;;  %v876_v5 = vld [vmem:[%s227_s14 + $0x2c] sm:$0xf] }
  0x1d   : > { %247 = vst [vmem:[%s221_s15 + $0x18] sm:$0xff] %v246_v2 }
  0x1e   : > { %249 = vst [vmem:[%s221_s15 + $0x24] sm:$0xff] %v248_v3 }
  0x1f   : > { %875 = vst [vmem:[%s221_s15 + $0x8] sm:$0xf] %v874_v4 }
  0x20   : > { %877 = vst [vmem:[%s221_s15 + $0x14] sm:$0xf] %v876_v5 }
  0x21   : > { %879 = vst [vmem:[%s221_s15 + $0x20] sm:$0xf] %v878_v6 }
  0x22   : > { %881 = vst [vmem:[%s221_s15 + $0x2c] sm:$0xf] %v880_v7 }
  0x23 PF: > { %s272_s21 = sand.u32 1, %s1240_s17   ;;  %s1012_s23 = smul.u32 192, %s1248_s19 }
  0x24   : > { %s1072_s25 = smul.u32 192, %s272_s21  ;;  %s273_s10 = scalar_lea.sflag [#allocation5], %s272_s21 }
  0x25   : > { %s282_s6 = scalar_lea.hbm %s1451_s1, %s1012_s23  ;;  %s1255_s11 = smov 64  }
  0x26   : > { %s283_s7 = sshll.u32 %s282_s6, 4  ;;  %s276_s8 = scalar_lea.vmem [#allocation4], %s1072_s25  ;;  %s284_s7 = int_to_ptr.hbm [resolvable:$true] %s283_s7 }
  0x27   : > { %s285_s9 = sshll.u32 %s276_s8, 4  ;;  %s1256_s12 = smov 4   ;;  %s286_s9 = int_to_ptr.vmem [resolvable:$true] %s285_s9 }
  0x28   : > { %1077 = dma.hbm_to_vmem [thread:$0]  (%p1319_p3), %s284_s7, 3072, %s286_s9, %s273_s10, %s1255_s11, %s1255_s11, %s1256_s12  }
  0x29 PF: > { %297 = sbr.rel (%p1341_p10) target bundleno = 272 (0x110), region = 58  ;;  %s300_s13 = sand.u32 (!%p1341_p10), 1, %s1236_s16  }
  0x2a   : > { %s1073_s14 = smul.u32 (!%p1341_p10), 48, %s300_s13  ;;  %s307_s30 = scalar_lea.sflag (!%p1341_p10), [#allocation5], %s300_s13 }
  0x2b   : > { %s1074_s15 = smul.u32 (!%p1341_p10), 192, %s300_s13 }
  0x2c   : > { %s1370_s23 = scalar_lea.vmem (!%p1341_p10), [#allocation3], %s1073_s14 }
  0x2d   : > { %s1372_s25 = scalar_lea.vmem (!%p1341_p10), [#allocation4], %s1074_s15 }
  0x2e   : > { %1223 = dma.done.wait (%p1333_p8), %s307_s30, 3072  }
  0x2f   : > { %1225 = vsyncadd (%p1333_p8), %s307_s30, 4294964224 }
  0x30   : > { %1227 = dma.done.wait (%p1326_p5), [#allocation7], 16  }
  0x31   : > { %1229 = vsyncadd (%p1326_p5), [#allocation7], 4294967280  ;;  %p885_p0 = scmp.ne.s32.totalorder %s1244_s18, 0 }
  0x33   : > { %380 = sbr.rel (%p885_p0) target bundleno = 61 (0x3d), region = 74 }
  0x38   : > { %v1257_v8 = vmov 0.0  }
  0x39   : > { %381 = vst [vmem:[#allocation2 + $0x10] sm:$0xff] %v1257_v8 }
  0x3a   : > { %382 = vst [vmem:[#allocation2] sm:$0xff] %v1257_v8 }
  0x3b   : > { %383 = vst [vmem:[#allocation2 + $0x18] sm:$0xff] %v1257_v8 }
  0x3c   : > { %384 = vst [vmem:[#allocation2 + $0x8] sm:$0xff] %v1257_v8 }
  0x3d PF: > { %v1026_v9 = vld [vmem:[%s1372_s25 + $0x38] sm:$0xff]  ;;  %v1025_v12 = vld [vmem:[%s1372_s25 + $0x30] sm:$0xff]  ;;  %v1024_v15 = vld [vmem:[%s1372_s25 + $0x28] sm:$0xff]  ;;  %p1006_p1 = scmp.ne.s32.totalorder %s1244_s18, 2 }
  0x3e   : > { %v1034_v10 = vld [vmem:[%s1372_s25 + $0x78] sm:$0xff]  ;;  %621 = vmatpush.bf16.msra.mxu0 %v1026_v9  ;;  %v1033_v13 = vld [vmem:[%s1372_s25 + $0x70] sm:$0xff]  ;;  %1063 = vmatpush.bf16.msra.mxu3 %v1026_v9  ;;  %v1032_v16 = vld [vmem:[%s1372_s25 + $0x68] sm:$0xff] }
  0x3f   : > { %v1042_v11 = vld [vmem:[%s1372_s25 + $0xb8] sm:$0xff]  ;;  %640 = vmatpush.bf16.msra.mxu1 %v1034_v10  ;;  %v1041_v14 = vld [vmem:[%s1372_s25 + $0xb0] sm:$0xff]  ;;  %v1040_v17 = vld [vmem:[%s1372_s25 + $0xa8] sm:$0xff] }
  0x40   : > { %659 = vmatpush.bf16.msra.mxu2 %v1042_v11  ;;  %v1023_v18 = vld [vmem:[%s1372_s25 + $0x20] sm:$0xff]  ;;  %v1022_v21 = vld [vmem:[%s1372_s25 + $0x18] sm:$0xff]  ;;  %v1021_v24 = vld [vmem:[%s1372_s25 + $0x10] sm:$0xff] }
  0x41   : > { %v1031_v19 = vld [vmem:[%s1372_s25 + $0x60] sm:$0xff]  ;;  %v1030_v22 = vld [vmem:[%s1372_s25 + $0x58] sm:$0xff]  ;;  %v1029_v25 = vld [vmem:[%s1372_s25 + $0x50] sm:$0xff] }
  0x42   : > { %622 = vmatpush.bf16.msra.mxu0 %v1025_v12  ;;  %1064 = vmatpush.bf16.msra.mxu3 %v1025_v12  ;;  %v1039_v20 = vld [vmem:[%s1372_s25 + $0xa0] sm:$0xff]  ;;  %v1038_v23 = vld [vmem:[%s1372_s25 + $0x98] sm:$0xff]  ;;  %v1037_v26 = vld [vmem:[%s1372_s25 + $0x90] sm:$0xff] }
  0x43   : > { %641 = vmatpush.bf16.msra.mxu1 %v1033_v13  ;;  %v1020_v27 = vld [vmem:[%s1372_s25 + $0x8] sm:$0xff]  ;;  %v1019_v30 = vld [vmem:[%s1372_s25] sm:$0xff]  ;;  %v385_v54 = vld [vmem:[#allocation2 + $0x10] sm:$0xff] }
  0x44   : > { %660 = vmatpush.bf16.msra.mxu2 %v1041_v14  ;;  %v1028_v28 = vld [vmem:[%s1372_s25 + $0x48] sm:$0xff]  ;;  %v1027_v31 = vld [vmem:[%s1372_s25 + $0x40] sm:$0xff]  ;;  %v387_v4 = vld [vmem:[#allocation2 + $0x18] sm:$0xff] }
  0x45   : > { %v1036_v29 = vld [vmem:[%s1372_s25 + $0x88] sm:$0xff]  ;;  %v1035_v32 = vld [vmem:[%s1372_s25 + $0x80] sm:$0xff] }
  0x46   : > { %623 = vmatpush.bf16.msra.mxu0 %v1024_v15  ;;  %1065 = vmatpush.bf16.msra.mxu3 %v1024_v15  ;;  %v888_v33 = vld [vmem:[%s1370_s23] sm:$0xf]  ;;  %v1014_v34 = vld [vmem:[%s1370_s23 + $0x8] sm:$0xf0]  ;;  %v1013_v35 = vld [vmem:[%s1370_s23 + $0x4] sm:$0xf] }
  0x47   : > { %642 = vmatpush.bf16.msra.mxu1 %v1032_v16  ;;  %v890_v36 = vld [vmem:[%s1370_s23 + $0xc] sm:$0xf0]  ;;  %v896_v37 = vld [vmem:[%s1370_s23 + $0x8] sm:$0xf]  ;;  %v1015_v38 = vld [vmem:[%s1370_s23 + $0x10] sm:$0xf0]  ;;  %v889_v41 = vor.u32 %v1014_v34, %v888_v33 }
  0x48   : > { %661 = vmatpush.bf16.msra.mxu2 %v1040_v17  ;;  %v900_v39 = vld [vmem:[%s1370_s23 + $0x18] sm:$0xf]  ;;  %v1017_v40 = vld [vmem:[%s1370_s23 + $0x20] sm:$0xf0]  ;;  %v893_v42 = vor.u32 %v1013_v35, %v890_v36  ;;  %v897_v43 = vor.u32 %v1015_v38, %v896_v37  ;;  %v1016_v45 = vld [vmem:[%s1370_s23 + $0x1c] sm:$0xf] }
  0x49   : > { %v901_v44 = vor.u32 %v1017_v40, %v900_v39  ;;  %v902_v46 = vld [vmem:[%s1370_s23 + $0x24] sm:$0xf0]  ;;  %v908_v47 = vld [vmem:[%s1370_s23 + $0x20] sm:$0xf]  ;;  %v1018_v48 = vld [vmem:[%s1370_s23 + $0x28] sm:$0xf0] }
  0x4a   : > { %624 = vmatpush.bf16.msra.mxu0 %v1023_v18  ;;  %1066 = vmatpush.bf16.msra.mxu3 %v1023_v18  ;;  %v905_v49 = vor.u32 %v1016_v45, %v902_v46  ;;  %v909_v50 = vor.u32 %v1018_v48, %v908_v47  ;;  %v386_v61 = vld [vmem:[#allocation2] sm:$0xff]  ;;  %v388_v11 = vld [vmem:[#allocation2 + $0x8] sm:$0xff] }
  0x4b   : > { %643 = vmatpush.bf16.msra.mxu1 %v1031_v19 }
  0x4c   : > { %662 = vmatpush.bf16.msra.mxu2 %v1039_v20 }
  0x4e   : > { %625 = vmatpush.bf16.msra.mxu0 %v1022_v21  ;;  %1067 = vmatpush.bf16.msra.mxu3 %v1022_v21 }
  0x4f   : > { %644 = vmatpush.bf16.msra.mxu1 %v1030_v22 }
  0x50   : > { %663 = vmatpush.bf16.msra.mxu2 %v1038_v23 }
  0x52   : > { %626 = vmatpush.bf16.msra.mxu0 %v1021_v24  ;;  %1068 = vmatpush.bf16.msra.mxu3 %v1021_v24 }
  0x53   : > { %645 = vmatpush.bf16.msra.mxu1 %v1029_v25 }
  0x54   : > { %664 = vmatpush.bf16.msra.mxu2 %v1037_v26 }
  0x56   : > { %627 = vmatpush.bf16.msra.mxu0 %v1020_v27  ;;  %1069 = vmatpush.bf16.msra.mxu3 %v1020_v27 }
  0x57   : > { %646 = vmatpush.bf16.msra.mxu1 %v1028_v28 }
  0x58   : > { %665 = vmatpush.bf16.msra.mxu2 %v1036_v29 }
  0x5a   : > { %628 = vmatpush.bf16.msra.mxu0 %v1019_v30  ;;  %1070 = vmatpush.bf16.msra.mxu3 %v1019_v30 }
  0x5b   : > { %647 = vmatpush.bf16.msra.mxu1 %v1027_v31 }
  0x5c   : > { %666 = vmatpush.bf16.msra.mxu2 %v1035_v32 }
  0x5d   : > { %629 = vmatmul.bf16.vlgmr.msra.gmra.mxu0 %v889_v41  ;;  %634 = vmatmul.bf16.vlgmr.msra.gmra.mxu3 %v901_v44 }
  0x5e   : > { %648 = vmatmul.bf16.vlgmr.msra.gmra.mxu1 %v893_v42 }
  0x5f   : > { %667 = vmatmul.bf16.vlgmr.msra.gmra.mxu2 %v897_v43 }
  0x6e   : > { %653 = vmatmul.bf16.gmra.mxu1 %v905_v49 }
  0x6f   : > { %672 = vmatmul.bf16.gmra.mxu2 %v909_v50 }
  0xda   : > { %v630_v52 = vpop.f32.mrf.mxu0 }
  0xdb   : > { %v649_v51 = vpop.f32.mrf.mxu1 }
  0xdc   : > { %v650_v53 = vadd.f32 %v649_v51, %v630_v52 }
  0xe0   : > { %v635_v2 = vpop.f32.mrf.mxu3 }
  0xe2   : > { %v668_v55 = vpop.f32.mrf.mxu2  ;;  %v632_v59 = vpop.f32.mrf.mxu0 }
  0xe3   : > { %v669_v56 = vadd.f32 %v668_v55, %v650_v53  ;;  %v651_v57 = vpop.f32.mrf.mxu1 }
  0xe4   : > { %v652_v60 = vadd.f32 %v651_v57, %v632_v59 }
  0xe5   : > { %v678_v58 = vadd.f32 %v669_v56, %v385_v54 }
  0xe7   : > { %682 = vst [vmem:[#allocation2 + $0x10] sm:$0xff] %v678_v58 }
  0xe8   : > { %v637_v9 = vpop.f32.mrf.mxu3 }
  0xea   : > { %v670_v62 = vpop.f32.mrf.mxu2 }
  0xeb   : > { %v671_v63 = vadd.f32 %v670_v62, %v652_v60  ;;  %v654_v0 = vpop.f32.mrf.mxu1 }
  0xec   : > { %v655_v3 = vadd.f32 %v654_v0, %v635_v2 }
  0xed   : > { %v679_v1 = vadd.f32 %v671_v63, %v386_v61 }
  0xef   : > { %683 = vst [vmem:[#allocation2] sm:$0xff] %v679_v1 }
  0xf2   : > { %v673_v5 = vpop.f32.mrf.mxu2 }
  0xf3   : > { %v674_v6 = vadd.f32 %v673_v5, %v655_v3  ;;  %v656_v8 = vpop.f32.mrf.mxu1 }
  0xf4   : > { %v657_v10 = vadd.f32 %v656_v8, %v637_v9 }
  0xf5   : > { %v680_v7 = vadd.f32 %v674_v6, %v387_v4 }
  0xf7   : > { %684 = vst [vmem:[#allocation2 + $0x18] sm:$0xff] %v680_v7 }
  0xfa   : > { %v675_v12 = vpop.f32.mrf.mxu2 }
  0xfb   : > { %v676_v13 = vadd.f32 %v675_v12, %v657_v10  ;;  %689 = sbr.rel (%p1006_p1) target bundleno = 272 (0x110), region = 78 }
  0xfd   : > { %v681_v14 = vadd.f32 %v676_v13, %v388_v11 }
  0xff   : > { %685 = vst [vmem:[#allocation2 + $0x8] sm:$0xff] %v681_v14 }
 0x100   : > { %v690_v15 = vld [vmem:[#allocation2 + $0x10] sm:$0xff]  ;;  %v691_v16 = vld [vmem:[#allocation2] sm:$0xff]  ;;  %v692_v19 = vld [vmem:[#allocation2 + $0x18] sm:$0xff] }
 0x101   : > { %v1044_v17 = vld [vmem:[%s1453_s3] sm:$0xff]   ;;  %v1061_v23 = vld [vmem:[%s1453_s3 + $0x8] sm:$0xff]  }
 0x102   : > { %v1139_v18 = vld [vmem:[#allocation6] ss:$0 sm:$0xff]  ;;  %v1045_v20 = vunpack.c.l.bf16 %v1044_v17  ;;  %v1046_v21 = vunpack.c.h.bf16 %v1044_v17  ;;  %v1049_v26 = vunpack.c.l.bf16 %v1061_v23  ;;  %v1050_v27 = vunpack.c.h.bf16 %v1061_v23 }
 0x103   : > { %v702_v24 = vadd.f32 %v1139_v18, %v690_v15  ;;  %v703_v25 = vadd.f32 %v1139_v18, %v691_v16  ;;  %v704_v28 = vadd.f32 %v1139_v18, %v692_v19 }
 0x105   : > { %v710_v30 = vadd.f32 %v1045_v20, %v702_v24  ;;  %v711_v31 = vadd.f32 %v1046_v21, %v703_v25  ;;  %v712_v32 = vadd.f32 %v1049_v26, %v704_v28 }
 0x106   : > { %v693_v22 = vld [vmem:[#allocation2 + $0x8] sm:$0xff] }
 0x107   : > { %v705_v29 = vadd.f32 %v1139_v18, %v693_v22  ;;  %v714_v34 = vmax.f32 %v710_v30, 0.0  ;;  %v715_v35 = vmax.f32 %v711_v31, 0.0  ;;  %v716_v36 = vmax.f32 %v712_v32, 0.0 }
 0x109   : > { %v713_v33 = vadd.f32 %v1050_v27, %v705_v29  ;;  %v1054_v38 = vpack.c.bf16 %v715_v35, %v714_v34 }
 0x10b   : > { %v717_v37 = vmax.f32 %v713_v33, 0.0  ;;  %1055 = vst [vmem:[%s1454_s4] sm:$0xff] %v1054_v38  }
 0x10d   : > { %v1059_v39 = vpack.c.bf16 %v717_v37, %v716_v36 }
 0x10f   : > { %1062 = vst [vmem:[%s1454_s4 + $0x8] sm:$0xff] %v1059_v39  }
 0x110 PF: > { %s18_s20 = sadd.s32 1, %s1252_s20   ;;  %s1459_s15 = smov %s1236_s16 }
 0x111   : > { %p15_p2 = scmp.ge.s32.totalorder %s18_s20, 5   ;;  %s1460_s16 = smov %s1240_s17 }
 0x112   : > { %s1461_s17 = smov %s1339_s28  ;;  %s1462_s18 = smov %s1248_s19 }
 0x113   : > { %s1463_s19 = smov %s1465_s22  ;;  %17 = sbr.rel (!%p15_p2) target bundleno = 5 (0x5), region = 132 }
 0x118   :  { %754 = vsyncpa [#allocation5], 1 }
 0x119   :  { %756 = vsyncpa [#allocation5 + $0x1], 1 }
 0x11a   :  { %757 = vsyncpa [#allocation7], 1 }

// kernel: transfer_learning_resnet18_forward.26
= control target key start
LH: loop header
LB: loop body
LE: loop exit
PB: predicated region body
PF: predicated region fallthrough
CT: control target
= control target key end

     0   :  { %8 = vsyncpa [#allocation4], 0  ;;  %s1157_s0 = inlined_call_operand.vmem [shape: bf16[8,1152], index: 0, kind: input, shape index: {}]   ;;  %s1158_s1 = inlined_call_operand.hbm [shape: bf16[1152,128], index: 1, kind: input, shape index: {}]   ;;  %s1159_s2 = inlined_call_operand.hbm [shape: f32[1,128], index: 2, kind: input, shape index: {}]   ;;  %s1160_s3 = inlined_call_operand.vmem [shape: bf16[8,128], index: 3, kind: output, shape index: {}]  }
   0x1   :  { %10 = vsyncpa [#allocation4 + $0x1], 0 }
   0x2   :  { %11 = vsyncpa [#allocation6], 0  ;;  %s1004_s12 = smov 0   ;;  %s1006_s13 = smov 0  }
   0x3   :  { %s1008_s14 = smov 0   ;;  %s1010_s15 = smov 0  }
   0x4   :  { %s1012_s16 = smov 0   ;;  %s1014_s17 = smov 0  }
   0x5 LB: > { %s658_s18 = sadd.s32 4294967295, %s978_s17   ;;  %s73_s19 = sadd.s32 1, %s966_s14  ;;  %s978_s17 = sphi %s1014_s17, %s17_s17   ;;  %s974_s16 = sphi %s1012_s16, %s1170_s16   ;;  %s970_s15 = sphi %s1010_s15, %s1169_s15   ;;  %s966_s14 = sphi %s1008_s14, %s1168_s14   ;;  %s962_s13 = sphi %s1006_s13, %s1167_s13   ;;  %s958_s12 = sphi %s1004_s12, %s1166_s12  }
   0x6   : > { %p80_p0 = scmp.ne.s32.totalorder %s966_s14, %s962_s13  ;;  %p81_p1 = scmp.eq.s32.totalorder %s978_s17, 0 }
   0x7   : > { %p86_p2 = scmp.ne.s32.totalorder %s962_s13, %s958_s12  ;;  %p1038_p3 = scmp.eq.s32.totalorder %s658_s18, 0 }
   0x8   : > { %p1042_p4 = por %p81_p1, %p80_p0  ;;  %p659_p5 = scmp.ge.s32.totalorder %s978_s17, 1 }
   0x9   : > { %p1049_p6 = por %p1038_p3, %p86_p2  ;;  %p151_p7 = scmp.lt.s32.totalorder %s978_s17, 4 }
   0xa   : > { %s164_s25 = sshll.u32 %s1159_s2, 4  ;;  %s980_s27 = smov [#allocation5]   ;;  %s165_s25 = int_to_ptr.hbm [resolvable:$true] %s164_s25 }
   0xb   : > { %p1057_p8 = pnand %p659_p5, %p151_p7  ;;  %s166_s28 = sshll.u32 %s980_s27, 4  ;;  %s167_s28 = int_to_ptr.vmem [resolvable:$true] %s166_s28 }
   0xc   : > { %p809_p10 = scmp.lt.s32.totalorder %s978_s17, 3  ;;  %s29_s30 = sadd.s32 1, %s974_s16 }
   0xd   : > { %p800_p9 = pneg %p1057_p8  ;;  %p30_p13 = scmp.ge.s32.totalorder %s29_s30, 3 }
   0xe   : > { %p1068_p12 = pnand %p809_p10, %p1042_p4  ;;  %s190_s4 = sand.u32 1, %s966_s14  }
   0xf   : > { %p801_p11 = pnand %p800_p9, %p1038_p3  ;;  %s767_s5 = smul.u32 192, %s974_s16 }
  0x10   : > { %s1172_s30 = smov (%p30_p13, %s29_s30), 0  ;;  %s792_s6 = smul.u32 192, %s190_s4 }
  0x11   : > { %803 = dma.hbm_to_vmem [thread:$0]  (!%p801_p11), %s165_s25, 16, %s167_s28, [#allocation6]  }
  0x12   : > { %s68_s7 = ssub.s32 %s974_s16, %s1172_s30  ;;  %s200_s10 = scalar_lea.hbm %s1158_s1, %s767_s5 }
  0x13   : > { %p71_p0 = scmp.eq.s32.totalorder %s68_s7, 0  ;;  %s201_s11 = sshll.u32 %s200_s10, 4  ;;  %s202_s11 = int_to_ptr.hbm [resolvable:$true] %s201_s11 }
  0x14   : > { %s194_s12 = scalar_lea.vmem [#allocation3], %s792_s6  ;;  %s191_s23 = scalar_lea.sflag [#allocation4], %s190_s4 }
  0x15   : > { %s203_s18 = sshll.u32 %s194_s12, 4  ;;  %s981_s24 = smov 64   ;;  %s204_s18 = int_to_ptr.vmem [resolvable:$true] %s203_s18 }
  0x16   : > { %s1085_s21 = scalar_select %p71_p0, %s966_s14, %s73_s19  }
  0x17   : > { %s982_s25 = smov 4   ;;  %215 = sbr.rel (%p1057_p8) target bundleno = 226 (0xe2), region = 32 }
  0x18   : > { %807 = dma.hbm_to_vmem [thread:$0]  (!%p1068_p12), %s202_s11, 3072, %s204_s18, %s191_s23, %s981_s24, %s981_s24, %s982_s25  }
  0x19   : > { %s217_s27 = sand.u32 (!%p1057_p8), 1, %s962_s13  }
  0x1a   : > { %s793_s28 = smul.u32 (!%p1057_p8), 192, %s217_s27  ;;  %s218_s5 = scalar_lea.sflag (!%p1057_p8), [#allocation4], %s217_s27 }
  0x1c   : > { %s1092_s6 = scalar_lea.vmem [#allocation3], %s793_s28 }
  0x1d   : > { %949 = dma.done.wait (%p1049_p6), %s218_s5, 3072  }
  0x1e   : > { %951 = vsyncadd (%p1049_p6), %s218_s5, 4294964224 }
  0x1f   : > { %953 = dma.done.wait (%p1038_p3), [#allocation6], 16  }
  0x20   : > { %955 = vsyncadd (%p1038_p3), [#allocation6], 4294967280  ;;  %s261_s19 = smul.u32 3, %s970_s15  ;;  %p666_p2 = scmp.ne.s32.totalorder %s970_s15, 0 }
  0x22   : > { %p264_p1 = scmp.lt.s32.totalorder %s261_s19, 8  ;;  %282 = sbr.rel (%p666_p2) target bundleno = 41 (0x29), region = 44 }
  0x24   : > { %s1174_s19 = smov (!%p264_p1, %s261_s19), 8 }
  0x25   : > { %s665_s26 = sshll.u32 %s1174_s19, 2 }
  0x26   : > { %s1106_s7 = scalar_lea.vmem %s1157_s0, %s665_s26 }
  0x27   : > { %v983_v0 = vmov 0.0  }
  0x28   : > { %283 = vst [vmem:[#allocation2] sm:$0xff] %v983_v0 }
  0x29 PF: > { %v775_v1 = vld [vmem:[%s1092_s6 + $0x38] sm:$0xff]  ;;  %v774_v4 = vld [vmem:[%s1092_s6 + $0x30] sm:$0xff]  ;;  %v773_v7 = vld [vmem:[%s1092_s6 + $0x28] sm:$0xff]  ;;  %p763_p3 = scmp.ne.s32.totalorder %s970_s15, 2 }
  0x2a   : > { %v783_v2 = vld [vmem:[%s1092_s6 + $0x78] sm:$0xff]  ;;  %490 = vmatpush.bf16.msra.mxu0 %v775_v1  ;;  %v782_v5 = vld [vmem:[%s1092_s6 + $0x70] sm:$0xff]  ;;  %v781_v8 = vld [vmem:[%s1092_s6 + $0x68] sm:$0xff] }
  0x2b   : > { %v791_v3 = vld [vmem:[%s1092_s6 + $0xb8] sm:$0xff]  ;;  %503 = vmatpush.bf16.msra.mxu1 %v783_v2  ;;  %v790_v6 = vld [vmem:[%s1092_s6 + $0xb0] sm:$0xff]  ;;  %v789_v9 = vld [vmem:[%s1092_s6 + $0xa8] sm:$0xff] }
  0x2c   : > { %516 = vmatpush.bf16.msra.mxu2 %v791_v3  ;;  %v772_v10 = vld [vmem:[%s1092_s6 + $0x20] sm:$0xff]  ;;  %v771_v13 = vld [vmem:[%s1092_s6 + $0x18] sm:$0xff]  ;;  %v770_v16 = vld [vmem:[%s1092_s6 + $0x10] sm:$0xff] }
  0x2d   : > { %v780_v11 = vld [vmem:[%s1092_s6 + $0x60] sm:$0xff]  ;;  %v779_v14 = vld [vmem:[%s1092_s6 + $0x58] sm:$0xff]  ;;  %v778_v17 = vld [vmem:[%s1092_s6 + $0x50] sm:$0xff] }
  0x2e   : > { %491 = vmatpush.bf16.msra.mxu0 %v774_v4  ;;  %v788_v12 = vld [vmem:[%s1092_s6 + $0xa0] sm:$0xff]  ;;  %v787_v15 = vld [vmem:[%s1092_s6 + $0x98] sm:$0xff]  ;;  %v786_v18 = vld [vmem:[%s1092_s6 + $0x90] sm:$0xff] }
  0x2f   : > { %504 = vmatpush.bf16.msra.mxu1 %v782_v5  ;;  %v769_v19 = vld [vmem:[%s1092_s6 + $0x8] sm:$0xff]  ;;  %v285_v21 = vld [vmem:[%s1106_s7] sm:$0xff]  ;;  %v286_v23 = vld [vmem:[%s1106_s7 + $0x8] sm:$0xf] }
  0x30   : > { %517 = vmatpush.bf16.msra.mxu2 %v790_v6  ;;  %v777_v20 = vld [vmem:[%s1092_s6 + $0x48] sm:$0xff]  ;;  %v337_v24 = vunpack.c.l.b16 %v285_v21  ;;  %v338_v25 = vunpack.c.h.b16 %v285_v21  ;;  %v768_v26 = vld [vmem:[%s1092_s6] sm:$0xff]  ;;  %v339_v28 = vunpack.c.l.b16 %v286_v23  ;;  %v284_v36 = vld [vmem:[#allocation2] sm:$0xff] }
  0x31   : > { %v785_v22 = vld [vmem:[%s1092_s6 + $0x88] sm:$0xff]  ;;  %v776_v27 = vld [vmem:[%s1092_s6 + $0x40] sm:$0xff] }
  0x32   : > { %492 = vmatpush.bf16.msra.mxu0 %v773_v7  ;;  %v784_v29 = vld [vmem:[%s1092_s6 + $0x80] sm:$0xff]  ;;  %v340_v30 = vpack.c.b16 %v337_v24, %v337_v24  ;;  %v341_v31 = vpack.c.b16 %v338_v25, %v338_v25  ;;  %v342_v32 = vpack.c.b16 %v339_v28, %v339_v28 }
  0x33   : > { %505 = vmatpush.bf16.msra.mxu1 %v781_v8 }
  0x34   : > { %518 = vmatpush.bf16.msra.mxu2 %v789_v9 }
  0x36   : > { %493 = vmatpush.bf16.msra.mxu0 %v772_v10 }
  0x37   : > { %506 = vmatpush.bf16.msra.mxu1 %v780_v11 }
  0x38   : > { %519 = vmatpush.bf16.msra.mxu2 %v788_v12 }
  0x3a   : > { %494 = vmatpush.bf16.msra.mxu0 %v771_v13 }
  0x3b   : > { %507 = vmatpush.bf16.msra.mxu1 %v779_v14 }
  0x3c   : > { %520 = vmatpush.bf16.msra.mxu2 %v787_v15 }
  0x3e   : > { %495 = vmatpush.bf16.msra.mxu0 %v770_v16 }
  0x3f   : > { %508 = vmatpush.bf16.msra.mxu1 %v778_v17 }
  0x40   : > { %521 = vmatpush.bf16.msra.mxu2 %v786_v18 }
  0x42   : > { %496 = vmatpush.bf16.msra.mxu0 %v769_v19 }
  0x43   : > { %509 = vmatpush.bf16.msra.mxu1 %v777_v20 }
  0x44   : > { %522 = vmatpush.bf16.msra.mxu2 %v785_v22 }
  0x46   : > { %497 = vmatpush.bf16.msra.mxu0 %v768_v26 }
  0x47   : > { %510 = vmatpush.bf16.msra.mxu1 %v776_v27 }
  0x48   : > { %523 = vmatpush.bf16.msra.mxu2 %v784_v29 }
  0x49   : > { %498 = vmatmul.bf16.vlgmr.msra.gmra.mxu0 %v340_v30 }
  0x4a   : > { %511 = vmatmul.bf16.vlgmr.msra.gmra.mxu1 %v341_v31 }
  0x4b   : > { %524 = vmatmul.bf16.vlgmr.msra.gmra.mxu2 %v342_v32 }
  0xc6   : > { %v499_v33 = vpop.f32.mrf.mxu0 }
  0xc7   : > { %v512_v34 = vpop.f32.mrf.mxu1 }
  0xc8   : > { %v513_v35 = vadd.f32 %v512_v34, %v499_v33 }
  0xce   : > { %v525_v37 = vpop.f32.mrf.mxu2  ;;  %v501_v39 = vpop.f32.mrf.mxu0 }
  0xcf   : > { %v526_v38 = vadd.f32 %v525_v37, %v513_v35  ;;  %v514_v40 = vpop.f32.mrf.mxu1 }
  0xd1   : > { %v529_v41 = vadd.f32 %v526_v38, %v284_v36 }
  0xd2   : > { %534 = sbr.rel (%p763_p3) target bundleno = 226 (0xe2), region = 48 }
  0xd3   : > { %530 = vst [vmem:[#allocation2] sm:$0xff] %v529_v41 }
  0xd6   : > { %v527_v42 = vpop.f32.mrf.mxu2 }
  0xd7   : > { %v863_v44 = vld [vmem:[#allocation5] ss:$0 sm:$0xff] }
  0xda   : > { %v535_v43 = vld [vmem:[#allocation2] sm:$0xff] }
  0xdb   : > { %v540_v45 = vadd.f32 %v863_v44, %v535_v43 }
  0xdd   : > { %v541_v46 = vmax.f32 %v540_v45, 0.0 }
  0xdf   : > { %v542_v47 = vpack.c.bf16 %v541_v46, %v541_v46 }
  0xe1   : > { %543 = vst [vmem:[%s1160_s3] sm:$0xf] %v542_v47 }
  0xe2 PF: > { %s17_s17 = sadd.s32 1, %s978_s17   ;;  %s1166_s12 = smov %s962_s13 }
  0xe3   : > { %p14_p4 = scmp.ge.s32.totalorder %s17_s17, 5   ;;  %s1167_s13 = smov %s966_s14 }
  0xe4   : > { %s1168_s14 = smov %s1085_s21  ;;  %s1169_s15 = smov %s974_s16 }
  0xe5   : > { %s1170_s16 = smov %s1172_s30  ;;  %16 = sbr.rel (!%p14_p4) target bundleno = 5 (0x5), region = 88 }
  0xea   :  { %569 = vsyncpa [#allocation4], 1 }
  0xeb   :  { %571 = vsyncpa [#allocation4 + $0x1], 1 }
  0xec   :  { %572 = vsyncpa [#allocation6], 1 }

// kernel: transfer_learning_resnet18_forward.27
= control target key start
LH: loop header
LB: loop body
LE: loop exit
PB: predicated region body
PF: predicated region fallthrough
CT: control target
= control target key end

     0   :  { %8 = vsyncpa [#allocation3], 0  ;;  %s267_s0 = inlined_call_operand.vmem [shape: bf16[8,128], index: 0, kind: input, shape index: {}]   ;;  %s268_s1 = inlined_call_operand.hbm [shape: bf16[128,128], index: 1, kind: input, shape index: {}]   ;;  %s269_s2 = inlined_call_operand.hbm [shape: f32[1,128], index: 2, kind: input, shape index: {}]   ;;  %s270_s3 = inlined_call_operand.vmem [shape: bf16[8,128], index: 3, kind: output, shape index: {}]  }
   0x1   :  { %s16_s14 = sshll.u32 %s268_s1, 4  ;;  %s17_s14 = int_to_ptr.hbm [resolvable:$true] %s16_s14 }
   0x2   :  { %9 = vsyncpa [#allocation5], 0  ;;  %s231_s15 = smov [#allocation2]   ;;  %s30_s19 = sshll.u32 %s269_s2, 4  ;;  %s31_s19 = int_to_ptr.hbm [resolvable:$true] %s30_s19 }
   0x3   :  { %s18_s16 = sshll.u32 %s231_s15, 4  ;;  %s232_s20 = smov 64   ;;  %s19_s16 = int_to_ptr.vmem [resolvable:$true] %s18_s16 }
   0x4   :  { %s233_s21 = smov 4   ;;  %s234_s22 = smov [#allocation4]  }
   0x5   :  { %24 = dma.hbm_to_vmem [thread:$0]  %s17_s14, 1024, %s19_s16, [#allocation3], %s232_s20, %s232_s20, %s233_s21  }
   0x6   :  { %s32_s23 = sshll.u32 %s234_s22, 4  ;;  %s33_s23 = int_to_ptr.vmem [resolvable:$true] %s32_s23 }
   0x7   :  { %35 = dma.hbm_to_vmem [thread:$0]  %s31_s19, 16, %s33_s23, [#allocation5]  }
   0x8   :  { %227 = dma.done.wait [#allocation3], 1024  }
   0x9   :  { %228 = vsyncadd [#allocation3], 4294966272 }
   0xa   :  { %229 = dma.done.wait [#allocation5], 16  }
   0xb   :  { %230 = vsyncadd [#allocation5], 4294967280  ;;  %v173_v0 = vld [vmem:[#allocation2 + $0x38] sm:$0xff]  ;;  %v172_v1 = vld [vmem:[#allocation2 + $0x30] sm:$0xff] }
   0xc   :  { %113 = vmatpush.bf16.msra.mxu0 %v173_v0  ;;  %v171_v2 = vld [vmem:[#allocation2 + $0x28] sm:$0xff]  ;;  %v170_v3 = vld [vmem:[#allocation2 + $0x20] sm:$0xff]  ;;  %v169_v4 = vld [vmem:[#allocation2 + $0x18] sm:$0xff] }
   0xd   :  { %v168_v5 = vld [vmem:[#allocation2 + $0x10] sm:$0xff]  ;;  %v167_v6 = vld [vmem:[#allocation2 + $0x8] sm:$0xff]  ;;  %v166_v7 = vld [vmem:[#allocation2] sm:$0xff] }
   0xe   :  { %v44_v8 = vld [vmem:[%s267_s0] sm:$0xf] }
   0xf   :  { %v178_v9 = vld [vmem:[#allocation4] ss:$0 sm:$0xff] }
  0x10   :  { %114 = vmatpush.bf16.msra.mxu0 %v172_v1 }
  0x14   :  { %115 = vmatpush.bf16.msra.mxu0 %v171_v2 }
  0x18   :  { %116 = vmatpush.bf16.msra.mxu0 %v170_v3 }
  0x1c   :  { %117 = vmatpush.bf16.msra.mxu0 %v169_v4 }
  0x20   :  { %118 = vmatpush.bf16.msra.mxu0 %v168_v5 }
  0x24   :  { %119 = vmatpush.bf16.msra.mxu0 %v167_v6 }
  0x28   :  { %120 = vmatpush.bf16.msra.mxu0 %v166_v7 }
  0x2b   :  { %121 = vmatmul.bf16.vlgmr.msra.gmra.mxu0 %v44_v8 }
  0xa8   :  { %v122_v10 = vpop.f32.mrf.mxu0 }
  0xa9   :  { %v123_v11 = vadd.f32 %v178_v9, %v122_v10 }
  0xab   :  { %v126_v12 = vpack.c.bf16 %v123_v11, %v123_v11 }
  0xad   :  { %127 = vst [vmem:[%s270_s3] sm:$0xf] %v126_v12 }
  0xb0   :  { %v124_v13 = vpop.f32.mrf.mxu0 }
  0xb1   :  { %132 = vsyncpa [#allocation3], 1 }
  0xb2   :  { %133 = vsyncpa [#allocation5], 1 }

// kernel: transfer_learning_resnet18_forward.32
= control target key start
LH: loop header
LB: loop body
LE: loop exit
PB: predicated region body
PF: predicated region fallthrough
CT: control target
= control target key end

     0   :  { %8 = vsyncpa [#allocation4], 0  ;;  %s899_s0 = inlined_call_operand.vmem [shape: bf16[8,128], index: 0, kind: input, shape index: {}]   ;;  %s900_s1 = inlined_call_operand.vmem [shape: bf16[128,256], index: 1, kind: input, shape index: {}]   ;;  %s901_s2 = inlined_call_operand.hbm [shape: f32[1,256], index: 2, kind: input, shape index: {}]   ;;  %s902_s3 = inlined_call_operand.vmem [shape: bf16[8,256], index: 3, kind: output, shape index: {}]  }
   0x1   :  { %10 = vsyncpa [#allocation4 + $0x1], 0  ;;  %s783_s12 = smov 0   ;;  %s785_s13 = smov 0  }
   0x2   :  { %s787_s14 = smov 0   ;;  %s789_s15 = smov 0  }
   0x3   :  { %s791_s16 = smov 0   ;;  %s793_s17 = smov 0  }
   0x4 LB: > { %s580_s18 = sadd.s32 4294967295, %s761_s17   ;;  %s31_s19 = sadd.s32 1, %s757_s16  ;;  %s761_s17 = sphi %s793_s17, %s16_s17   ;;  %s757_s16 = sphi %s791_s16, %s909_s16   ;;  %s753_s15 = sphi %s789_s15, %s908_s15   ;;  %s749_s14 = sphi %s787_s14, %s907_s14   ;;  %s745_s13 = sphi %s785_s13, %s906_s13   ;;  %s741_s12 = sphi %s783_s12, %s905_s12  }
   0x5   : > { %p33_p0 = scmp.ge.s32.totalorder %s31_s19, 2  ;;  %s72_s20 = sadd.s32 1, %s749_s14 }
   0x6   : > { %p79_p1 = scmp.ne.s32.totalorder %s749_s14, %s745_s13  ;;  %p80_p2 = scmp.eq.s32.totalorder %s761_s17, 0 }
   0x7   : > { %s911_s19 = smov (%p33_p0, %s31_s19), 0  ;;  %p111_p4 = scmp.ne.s32.totalorder %s745_s13, %s741_s12 }
   0x8   : > { %p819_p3 = por %p80_p2, %p79_p1  ;;  %s68_s22 = ssub.s32 %s757_s16, %s911_s19 }
   0x9   : > { %p112_p5 = scmp.eq.s32.totalorder %s580_s18, 0  ;;  %p70_p6 = scmp.eq.s32.totalorder %s68_s22, 0 }
   0xa   : > { %p584_p8 = scmp.ge.s32.totalorder %s761_s17, 2 }
   0xb   : > { %p826_p7 = por %p112_p5, %p111_p4 }
   0xc   : > { %s831_s24 = scalar_select %p70_p6, %s749_s14, %s72_s20  }
   0xd   : > { %169 = sbr.rel (%p584_p8) target bundleno = 42 (0x2a), region = 20 }
  0x12   : > { %172 = sbr.rel (!%p819_p3) target bundleno = 38 (0x26), region = 24  ;;  %s174_s25 = sand.u32 (%p819_p3), 1, %s749_s14  }
  0x13   : > { %s586_s26 = sshll.u32 (%p819_p3), %s757_s16, 2  ;;  %s585_s27 = sshll.u32 (%p819_p3), %s174_s25, 6 }
  0x14   : > { %s841_s30 = scalar_lea.vmem (%p819_p3), %s900_s1, %s586_s26  ;;  %s176_s4 = scalar_lea.vmem (%p819_p3), [#allocation2], %s585_s27 }
  0x15   : > { %v198_v0 = vld [vmem:[%s841_s30] sm:$0xf] (%p819_p3)  ;;  %v200_v1 = vld [vmem:[%s841_s30 + $0x8] sm:$0xf] (%p819_p3)  ;;  %v202_v2 = vld [vmem:[%s841_s30 + $0x10] sm:$0xf] (%p819_p3) }
  0x16   : > { %199 = vst [vmem:[%s176_s4] sm:$0xf] (%p819_p3), %v198_v0  ;;  %v204_v3 = vld [vmem:[%s841_s30 + $0x18] sm:$0xf] (%p819_p3)  ;;  %v206_v4 = vld [vmem:[%s841_s30 + $0x20] sm:$0xf] (%p819_p3) }
  0x17   : > { %201 = vst [vmem:[%s176_s4 + $0x4] sm:$0xf] %v200_v1  ;;  %v208_v5 = vld [vmem:[%s841_s30 + $0x28] sm:$0xf]  ;;  %v210_v6 = vld [vmem:[%s841_s30 + $0x30] sm:$0xf] }
  0x18   : > { %203 = vst [vmem:[%s176_s4 + $0x8] sm:$0xf] %v202_v2  ;;  %v212_v7 = vld [vmem:[%s841_s30 + $0x38] sm:$0xf]  ;;  %v214_v8 = vld [vmem:[%s841_s30 + $0x40] sm:$0xf] }
  0x19   : > { %205 = vst [vmem:[%s176_s4 + $0xc] sm:$0xf] %v204_v3  ;;  %v216_v9 = vld [vmem:[%s841_s30 + $0x48] sm:$0xf]  ;;  %v218_v10 = vld [vmem:[%s841_s30 + $0x50] sm:$0xf] }
  0x1a   : > { %207 = vst [vmem:[%s176_s4 + $0x10] sm:$0xf] %v206_v4  ;;  %v220_v11 = vld [vmem:[%s841_s30 + $0x58] sm:$0xf]  ;;  %v222_v12 = vld [vmem:[%s841_s30 + $0x60] sm:$0xf] }
  0x1b   : > { %209 = vst [vmem:[%s176_s4 + $0x14] sm:$0xf] %v208_v5  ;;  %v224_v13 = vld [vmem:[%s841_s30 + $0x68] sm:$0xf]  ;;  %v226_v14 = vld [vmem:[%s841_s30 + $0x70] sm:$0xf] }
  0x1c   : > { %211 = vst [vmem:[%s176_s4 + $0x18] sm:$0xf] %v210_v6  ;;  %v228_v15 = vld [vmem:[%s841_s30 + $0x78] sm:$0xf] }
  0x1d   : > { %213 = vst [vmem:[%s176_s4 + $0x1c] sm:$0xf] %v212_v7 }
  0x1e   : > { %215 = vst [vmem:[%s176_s4 + $0x20] sm:$0xf] %v214_v8 }
  0x1f   : > { %217 = vst [vmem:[%s176_s4 + $0x24] sm:$0xf] %v216_v9 }
  0x20   : > { %219 = vst [vmem:[%s176_s4 + $0x28] sm:$0xf] %v218_v10 }
  0x21   : > { %221 = vst [vmem:[%s176_s4 + $0x2c] sm:$0xf] %v220_v11 }
  0x22   : > { %223 = vst [vmem:[%s176_s4 + $0x30] sm:$0xf] %v222_v12 }
  0x23   : > { %225 = vst [vmem:[%s176_s4 + $0x34] sm:$0xf] %v224_v13 }
  0x24   : > { %227 = vst [vmem:[%s176_s4 + $0x38] sm:$0xf] %v226_v14 }
  0x25   : > { %229 = vst [vmem:[%s176_s4 + $0x3c] sm:$0xf] %v228_v15 }
  0x26 PF: > { %s286_s5 = sand.u32 1, %s749_s14   ;;  %s292_s8 = scalar_lea.hbm %s901_s2, %s757_s16 }
  0x27   : > { %s294_s9 = sshll.u32 %s292_s8, 4  ;;  %s289_s10 = scalar_lea.vmem [#allocation3], %s286_s5  ;;  %s295_s9 = int_to_ptr.hbm [resolvable:$true] %s294_s9 }
  0x28   : > { %s296_s11 = sshll.u32 %s289_s10, 4  ;;  %s287_s12 = scalar_lea.sflag [#allocation4], %s286_s5  ;;  %s297_s11 = int_to_ptr.vmem [resolvable:$true] %s296_s11 }
  0x29   : > { %632 = dma.hbm_to_vmem [thread:$0]  (%p819_p3), %s295_s9, 16, %s297_s11, %s287_s12  }
  0x2a PF: > { %p587_p9 = scmp.ge.s32.totalorder %s761_s17, 1  ;;  %p301_p10 = scmp.lt.s32.totalorder %s761_s17, 3 }
  0x2c   : > { %p302_p11 = pnand %p587_p9, %p301_p10 }
  0x2d   : > { %s308_s18 = sand.u32 (!%p302_p11), 1, %s745_s13  }
  0x2e   : > { %305 = sbr.rel (%p302_p11) target bundleno = 218 (0xda), region = 69  ;;  %s588_s20 = sshll.u32 (!%p302_p11), %s308_s18, 6 }
  0x2f   : > { %s310_s22 = scalar_lea.vmem (!%p302_p11), [#allocation2], %s588_s20  ;;  %s315_s25 = scalar_lea.sflag (!%p302_p11), [#allocation4], %s308_s18 }
  0x30   : > { %s317_s26 = scalar_lea.vmem (!%p302_p11), [#allocation3], %s308_s18 }
  0x33   : > { %736 = dma.done.wait (%p826_p7), %s315_s25, 16  }
  0x34   : > { %738 = vsyncadd (%p826_p7), %s315_s25, 4294967280  ;;  %v631_v16 = vld [vmem:[%s310_s22 + $0x38] sm:$0xff]  ;;  %v630_v17 = vld [vmem:[%s310_s22 + $0x30] sm:$0xff]  ;;  %p364_p12 = scmp.lt.s32.totalorder %s753_s15, 1 }
  0x35   : > { %439 = vmatpush.bf16.msra.mxu0 %v631_v16  ;;  %v629_v18 = vld [vmem:[%s310_s22 + $0x28] sm:$0xff]  ;;  %v628_v19 = vld [vmem:[%s310_s22 + $0x20] sm:$0xff]  ;;  %v627_v20 = vld [vmem:[%s310_s22 + $0x18] sm:$0xff] }
  0x36   : > { %v626_v21 = vld [vmem:[%s310_s22 + $0x10] sm:$0xff]  ;;  %v625_v22 = vld [vmem:[%s310_s22 + $0x8] sm:$0xff]  ;;  %v624_v23 = vld [vmem:[%s310_s22] sm:$0xff]  ;;  %s913_s15 = smov (!%p364_p12, %s753_s15), 1 }
  0x37   : > { %v370_v24 = vld [vmem:[%s899_s0] sm:$0xf]  ;;  %s589_s27 = sshll.u32 %s913_s15, 2 }
  0x38   : > { %v682_v25 = vld [vmem:[%s317_s26] ss:$0 sm:$0xff]  ;;  %s369_s30 = scalar_lea.vmem %s902_s3, %s589_s27 }
  0x39   : > { %440 = vmatpush.bf16.msra.mxu0 %v630_v17 }
  0x3d   : > { %441 = vmatpush.bf16.msra.mxu0 %v629_v18 }
  0x41   : > { %442 = vmatpush.bf16.msra.mxu0 %v628_v19 }
  0x45   : > { %443 = vmatpush.bf16.msra.mxu0 %v627_v20 }
  0x49   : > { %444 = vmatpush.bf16.msra.mxu0 %v626_v21 }
  0x4d   : > { %445 = vmatpush.bf16.msra.mxu0 %v625_v22 }
  0x51   : > { %446 = vmatpush.bf16.msra.mxu0 %v624_v23 }
  0x54   : > { %447 = vmatmul.bf16.vlgmr.msra.gmra.mxu0 %v370_v24 }
  0xd1   : > { %v448_v26 = vpop.f32.mrf.mxu0 }
  0xd2   : > { %v449_v27 = vadd.f32 %v682_v25, %v448_v26 }
  0xd4   : > { %v452_v28 = vpack.c.bf16 %v449_v27, %v449_v27 }
  0xd6   : > { %453 = vst [vmem:[%s369_s30] sm:$0xf] %v452_v28 }
  0xd9   : > { %v450_v29 = vpop.f32.mrf.mxu0 }
  0xda PF: > { %s16_s17 = sadd.s32 1, %s761_s17   ;;  %s905_s12 = smov %s745_s13 }
  0xdb   : > { %p13_p13 = scmp.ge.s32.totalorder %s16_s17, 4   ;;  %s906_s13 = smov %s749_s14 }
  0xdc   : > { %s907_s14 = smov %s831_s24  ;;  %s908_s15 = smov %s757_s16 }
  0xdd   : > { %s909_s16 = smov %s911_s19  ;;  %15 = sbr.rel (!%p13_p13) target bundleno = 4 (0x4), region = 124 }
  0xe2   :  { %481 = vsyncpa [#allocation4], 1 }
  0xe3   :  { %483 = vsyncpa [#allocation4 + $0x1], 1 }

// kernel: transfer_learning_resnet18_forward.28
= control target key start
LH: loop header
LB: loop body
LE: loop exit
PB: predicated region body
PF: predicated region fallthrough
CT: control target
= control target key end

     0   :  { %9 = vsyncpa [#allocation4], 0  ;;  %s1242_s0 = inlined_call_operand.vmem [shape: bf16[8,1152], index: 0, kind: input, shape index: {}]   ;;  %s1243_s1 = inlined_call_operand.hbm [shape: bf16[1152,128], index: 1, kind: input, shape index: {}]   ;;  %s1244_s2 = inlined_call_operand.hbm [shape: f32[1,128], index: 2, kind: input, shape index: {}]   ;;  %s1245_s3 = inlined_call_operand.vmem [shape: bf16[8,128], index: 3, kind: input, shape index: {}]   ;;  %s1246_s4 = inlined_call_operand.vmem [shape: bf16[8,128], index: 4, kind: output, shape index: {}]  }
   0x1   :  { %11 = vsyncpa [#allocation4 + $0x1], 0 }
   0x2   :  { %12 = vsyncpa [#allocation6], 0  ;;  %s1086_s15 = smov 0   ;;  %s1088_s16 = smov 0  }
   0x3   :  { %s1090_s17 = smov 0   ;;  %s1092_s18 = smov 0  }
   0x4   :  { %s1094_s19 = smov 0   ;;  %s1096_s20 = smov 0  }
   0x5 LB: > { %s734_s21 = sadd.s32 4294967295, %s1055_s20   ;;  %s74_s22 = sadd.s32 1, %s1043_s17  ;;  %s1055_s20 = sphi %s1096_s20, %s18_s20   ;;  %s1051_s19 = sphi %s1094_s19, %s1256_s19   ;;  %s1047_s18 = sphi %s1092_s18, %s1255_s18   ;;  %s1043_s17 = sphi %s1090_s17, %s1254_s17   ;;  %s1039_s16 = sphi %s1088_s16, %s1253_s16   ;;  %s1035_s15 = sphi %s1086_s15, %s1252_s15  }
   0x6   : > { %p81_p0 = scmp.ne.s32.totalorder %s1043_s17, %s1039_s16  ;;  %p82_p1 = scmp.eq.s32.totalorder %s1055_s20, 0 }
   0x7   : > { %p87_p2 = scmp.ne.s32.totalorder %s1039_s16, %s1035_s15  ;;  %p1120_p3 = scmp.eq.s32.totalorder %s734_s21, 0 }
   0x8   : > { %p1124_p4 = por %p82_p1, %p81_p0  ;;  %p735_p5 = scmp.ge.s32.totalorder %s1055_s20, 1 }
   0x9   : > { %p1131_p6 = por %p1120_p3, %p87_p2  ;;  %p180_p7 = scmp.lt.s32.totalorder %s1055_s20, 4 }
   0xa   : > { %s193_s28 = sshll.u32 %s1244_s2, 4  ;;  %s1057_s30 = smov [#allocation5]   ;;  %s194_s28 = int_to_ptr.hbm [resolvable:$true] %s193_s28 }
   0xb   : > { %p1139_p8 = pnand %p735_p5, %p180_p7  ;;  %s195_s5 = sshll.u32 %s1057_s30, 4  ;;  %s196_s5 = int_to_ptr.vmem [resolvable:$true] %s195_s5 }
   0xc   : > { %p886_p10 = scmp.lt.s32.totalorder %s1055_s20, 3  ;;  %s30_s7 = sadd.s32 1, %s1051_s19 }
   0xd   : > { %p877_p9 = pneg %p1139_p8  ;;  %p31_p13 = scmp.ge.s32.totalorder %s30_s7, 3 }
   0xe   : > { %p1150_p12 = pnand %p886_p10, %p1124_p4  ;;  %s229_s8 = sand.u32 1, %s1043_s17  }
   0xf   : > { %p878_p11 = pnand %p877_p9, %p1120_p3  ;;  %s844_s9 = smul.u32 192, %s1051_s19 }
  0x10   : > { %s1258_s7 = smov (%p31_p13, %s30_s7), 0  ;;  %s869_s10 = smul.u32 192, %s229_s8 }
  0x11   : > { %880 = dma.hbm_to_vmem [thread:$0]  (!%p878_p11), %s194_s28, 16, %s196_s5, [#allocation6]  }
  0x12   : > { %s69_s11 = ssub.s32 %s1051_s19, %s1258_s7  ;;  %s239_s14 = scalar_lea.hbm %s1243_s1, %s844_s9 }
  0x13   : > { %p72_p0 = scmp.eq.s32.totalorder %s69_s11, 0  ;;  %s240_s15 = sshll.u32 %s239_s14, 4  ;;  %s241_s15 = int_to_ptr.hbm [resolvable:$true] %s240_s15 }
  0x14   : > { %s233_s21 = scalar_lea.vmem [#allocation3], %s869_s10  ;;  %s230_s27 = scalar_lea.sflag [#allocation4], %s229_s8 }
  0x15   : > { %s242_s24 = sshll.u32 %s233_s21, 4  ;;  %s1058_s28 = smov 64   ;;  %s243_s24 = int_to_ptr.vmem [resolvable:$true] %s242_s24 }
  0x16   : > { %s1167_s26 = scalar_select %p72_p0, %s1043_s17, %s74_s22  }
  0x17   : > { %s1059_s30 = smov 4   ;;  %254 = sbr.rel (%p1139_p8) target bundleno = 228 (0xe4), region = 36 }
  0x18   : > { %884 = dma.hbm_to_vmem [thread:$0]  (!%p1150_p12), %s241_s15, 3072, %s243_s24, %s230_s27, %s1058_s28, %s1058_s28, %s1059_s30  }
  0x19   : > { %s256_s5 = sand.u32 (!%p1139_p8), 1, %s1039_s16  }
  0x1a   : > { %s870_s9 = smul.u32 (!%p1139_p8), 192, %s256_s5  ;;  %s257_s11 = scalar_lea.sflag (!%p1139_p8), [#allocation4], %s256_s5 }
  0x1c   : > { %s1174_s10 = scalar_lea.vmem [#allocation3], %s870_s9 }
  0x1d   : > { %1026 = dma.done.wait (%p1131_p6), %s257_s11, 3072  }
  0x1e   : > { %1028 = vsyncadd (%p1131_p6), %s257_s11, 4294964224 }
  0x1f   : > { %1030 = dma.done.wait (%p1120_p3), [#allocation6], 16  }
  0x20   : > { %1032 = vsyncadd (%p1120_p3), [#allocation6], 4294967280  ;;  %s309_s22 = smul.u32 3, %s1047_s18  ;;  %p743_p2 = scmp.ne.s32.totalorder %s1047_s18, 0 }
  0x22   : > { %p312_p1 = scmp.lt.s32.totalorder %s309_s22, 8  ;;  %337 = sbr.rel (%p743_p2) target bundleno = 41 (0x29), region = 48 }
  0x24   : > { %s1260_s22 = smov (!%p312_p1, %s309_s22), 8 }
  0x25   : > { %s742_s29 = sshll.u32 %s1260_s22, 2 }
  0x26   : > { %s1188_s12 = scalar_lea.vmem %s1242_s0, %s742_s29 }
  0x27   : > { %v1060_v0 = vmov 0.0  }
  0x28   : > { %338 = vst [vmem:[#allocation2] sm:$0xff] %v1060_v0 }
  0x29 PF: > { %v852_v1 = vld [vmem:[%s1174_s10 + $0x38] sm:$0xff]  ;;  %v851_v4 = vld [vmem:[%s1174_s10 + $0x30] sm:$0xff]  ;;  %v850_v7 = vld [vmem:[%s1174_s10 + $0x28] sm:$0xff]  ;;  %p840_p3 = scmp.ne.s32.totalorder %s1047_s18, 2 }
  0x2a   : > { %v860_v2 = vld [vmem:[%s1174_s10 + $0x78] sm:$0xff]  ;;  %545 = vmatpush.bf16.msra.mxu0 %v852_v1  ;;  %v859_v5 = vld [vmem:[%s1174_s10 + $0x70] sm:$0xff]  ;;  %v858_v8 = vld [vmem:[%s1174_s10 + $0x68] sm:$0xff] }
  0x2b   : > { %v868_v3 = vld [vmem:[%s1174_s10 + $0xb8] sm:$0xff]  ;;  %558 = vmatpush.bf16.msra.mxu1 %v860_v2  ;;  %v867_v6 = vld [vmem:[%s1174_s10 + $0xb0] sm:$0xff]  ;;  %v866_v9 = vld [vmem:[%s1174_s10 + $0xa8] sm:$0xff] }
  0x2c   : > { %571 = vmatpush.bf16.msra.mxu2 %v868_v3  ;;  %v849_v10 = vld [vmem:[%s1174_s10 + $0x20] sm:$0xff]  ;;  %v848_v13 = vld [vmem:[%s1174_s10 + $0x18] sm:$0xff]  ;;  %v847_v16 = vld [vmem:[%s1174_s10 + $0x10] sm:$0xff] }
  0x2d   : > { %v857_v11 = vld [vmem:[%s1174_s10 + $0x60] sm:$0xff]  ;;  %v856_v14 = vld [vmem:[%s1174_s10 + $0x58] sm:$0xff]  ;;  %v855_v17 = vld [vmem:[%s1174_s10 + $0x50] sm:$0xff] }
  0x2e   : > { %546 = vmatpush.bf16.msra.mxu0 %v851_v4  ;;  %v865_v12 = vld [vmem:[%s1174_s10 + $0xa0] sm:$0xff]  ;;  %v864_v15 = vld [vmem:[%s1174_s10 + $0x98] sm:$0xff]  ;;  %v863_v18 = vld [vmem:[%s1174_s10 + $0x90] sm:$0xff] }
  0x2f   : > { %559 = vmatpush.bf16.msra.mxu1 %v859_v5  ;;  %v846_v19 = vld [vmem:[%s1174_s10 + $0x8] sm:$0xff]  ;;  %v340_v21 = vld [vmem:[%s1188_s12] sm:$0xff]  ;;  %v341_v23 = vld [vmem:[%s1188_s12 + $0x8] sm:$0xf] }
  0x30   : > { %572 = vmatpush.bf16.msra.mxu2 %v867_v6  ;;  %v854_v20 = vld [vmem:[%s1174_s10 + $0x48] sm:$0xff]  ;;  %v392_v24 = vunpack.c.l.b16 %v340_v21  ;;  %v393_v25 = vunpack.c.h.b16 %v340_v21  ;;  %v845_v26 = vld [vmem:[%s1174_s10] sm:$0xff]  ;;  %v394_v28 = vunpack.c.l.b16 %v341_v23  ;;  %v339_v36 = vld [vmem:[#allocation2] sm:$0xff] }
  0x31   : > { %v862_v22 = vld [vmem:[%s1174_s10 + $0x88] sm:$0xff]  ;;  %v853_v27 = vld [vmem:[%s1174_s10 + $0x40] sm:$0xff] }
  0x32   : > { %547 = vmatpush.bf16.msra.mxu0 %v850_v7  ;;  %v861_v29 = vld [vmem:[%s1174_s10 + $0x80] sm:$0xff]  ;;  %v395_v30 = vpack.c.b16 %v392_v24, %v392_v24  ;;  %v396_v31 = vpack.c.b16 %v393_v25, %v393_v25  ;;  %v397_v32 = vpack.c.b16 %v394_v28, %v394_v28 }
  0x33   : > { %560 = vmatpush.bf16.msra.mxu1 %v858_v8 }
  0x34   : > { %573 = vmatpush.bf16.msra.mxu2 %v866_v9 }
  0x36   : > { %548 = vmatpush.bf16.msra.mxu0 %v849_v10 }
  0x37   : > { %561 = vmatpush.bf16.msra.mxu1 %v857_v11 }
  0x38   : > { %574 = vmatpush.bf16.msra.mxu2 %v865_v12 }
  0x3a   : > { %549 = vmatpush.bf16.msra.mxu0 %v848_v13 }
  0x3b   : > { %562 = vmatpush.bf16.msra.mxu1 %v856_v14 }
  0x3c   : > { %575 = vmatpush.bf16.msra.mxu2 %v864_v15 }
  0x3e   : > { %550 = vmatpush.bf16.msra.mxu0 %v847_v16 }
  0x3f   : > { %563 = vmatpush.bf16.msra.mxu1 %v855_v17 }
  0x40   : > { %576 = vmatpush.bf16.msra.mxu2 %v863_v18 }
  0x42   : > { %551 = vmatpush.bf16.msra.mxu0 %v846_v19 }
  0x43   : > { %564 = vmatpush.bf16.msra.mxu1 %v854_v20 }
  0x44   : > { %577 = vmatpush.bf16.msra.mxu2 %v862_v22 }
  0x46   : > { %552 = vmatpush.bf16.msra.mxu0 %v845_v26 }
  0x47   : > { %565 = vmatpush.bf16.msra.mxu1 %v853_v27 }
  0x48   : > { %578 = vmatpush.bf16.msra.mxu2 %v861_v29 }
  0x49   : > { %553 = vmatmul.bf16.vlgmr.msra.gmra.mxu0 %v395_v30 }
  0x4a   : > { %566 = vmatmul.bf16.vlgmr.msra.gmra.mxu1 %v396_v31 }
  0x4b   : > { %579 = vmatmul.bf16.vlgmr.msra.gmra.mxu2 %v397_v32 }
  0xc6   : > { %v554_v33 = vpop.f32.mrf.mxu0 }
  0xc7   : > { %v567_v34 = vpop.f32.mrf.mxu1 }
  0xc8   : > { %v568_v35 = vadd.f32 %v567_v34, %v554_v33 }
  0xce   : > { %v580_v37 = vpop.f32.mrf.mxu2  ;;  %v556_v39 = vpop.f32.mrf.mxu0 }
  0xcf   : > { %v581_v38 = vadd.f32 %v580_v37, %v568_v35  ;;  %v569_v40 = vpop.f32.mrf.mxu1 }
  0xd1   : > { %v584_v41 = vadd.f32 %v581_v38, %v339_v36 }
  0xd2   : > { %589 = sbr.rel (%p840_p3) target bundleno = 228 (0xe4), region = 52 }
  0xd3   : > { %585 = vst [vmem:[#allocation2] sm:$0xff] %v584_v41 }
  0xd6   : > { %v582_v42 = vpop.f32.mrf.mxu2 }
  0xd7   : > { %v592_v44 = vld [vmem:[%s1245_s3] sm:$0xf]  ;;  %v940_v45 = vld [vmem:[#allocation5] ss:$0 sm:$0xff] }
  0xd8   : > { %v597_v46 = vunpack.c.l.bf16 %v592_v44 }
  0xda   : > { %v590_v43 = vld [vmem:[#allocation2] sm:$0xff] }
  0xdb   : > { %v596_v47 = vadd.f32 %v940_v45, %v590_v43 }
  0xdd   : > { %v598_v48 = vadd.f32 %v597_v46, %v596_v47 }
  0xdf   : > { %v599_v49 = vmax.f32 %v598_v48, 0.0 }
  0xe1   : > { %v600_v50 = vpack.c.bf16 %v599_v49, %v599_v49 }
  0xe3   : > { %601 = vst [vmem:[%s1246_s4] sm:$0xf] %v600_v50 }
  0xe4 PF: > { %s18_s20 = sadd.s32 1, %s1055_s20   ;;  %s1252_s15 = smov %s1039_s16 }
  0xe5   : > { %p15_p4 = scmp.ge.s32.totalorder %s18_s20, 5   ;;  %s1253_s16 = smov %s1043_s17 }
  0xe6   : > { %s1254_s17 = smov %s1167_s26  ;;  %s1255_s18 = smov %s1051_s19 }
  0xe7   : > { %s1256_s19 = smov %s1258_s7  ;;  %17 = sbr.rel (!%p15_p4) target bundleno = 5 (0x5), region = 95 }
  0xec   :  { %627 = vsyncpa [#allocation4], 1 }
  0xed   :  { %629 = vsyncpa [#allocation4 + $0x1], 1 }
  0xee   :  { %630 = vsyncpa [#allocation6], 1 }

// kernel: transfer_learning_resnet18_forward.31
= control target key start
LH: loop header
LB: loop body
LE: loop exit
PB: predicated region body
PF: predicated region fallthrough
CT: control target
= control target key end

     0   :  { %8 = vsyncpa [#allocation4], 0  ;;  %s1160_s0 = inlined_call_operand.vmem [shape: bf16[8,1152], index: 0, kind: input, shape index: {}]   ;;  %s1161_s1 = inlined_call_operand.hbm [shape: bf16[1152,256], index: 1, kind: input, shape index: {}]   ;;  %s1162_s2 = inlined_call_operand.vmem [shape: f32[1,256], index: 2, kind: input, shape index: {}]   ;;  %s1163_s3 = inlined_call_operand.vmem [shape: bf16[8,256], index: 3, kind: output, shape index: {}]  }
   0x1   :  { %10 = vsyncpa [#allocation4 + $0x1], 0  ;;  %s998_s12 = smov 0   ;;  %s1000_s13 = smov 0  }
   0x2   :  { %s1002_s14 = smov 0   ;;  %s1004_s15 = smov 0  }
   0x3   :  { %s1006_s16 = smov 0   ;;  %s1008_s17 = smov 0  }
   0x4   :  { %s1010_s18 = smov 0   ;;  %s1012_s19 = smov 0  }
   0x5 LB: > { %s664_s20 = sadd.s32 4294967295, %s972_s19   ;;  %s28_s21 = sadd.s32 1, %s964_s17  ;;  %s972_s19 = sphi %s1012_s19, %s16_s19   ;;  %s968_s18 = sphi %s1010_s18, %s1175_s18   ;;  %s964_s17 = sphi %s1008_s17, %s1174_s17   ;;  %s960_s16 = sphi %s1006_s16, %s1173_s16   ;;  %s956_s15 = sphi %s1004_s15, %s1172_s15   ;;  %s952_s14 = sphi %s1002_s14, %s1171_s14   ;;  %s948_s13 = sphi %s1000_s13, %s1170_s13   ;;  %s944_s12 = sphi %s998_s12, %s1169_s12  }
   0x6   : > { %p29_p0 = scmp.ge.s32.totalorder %s28_s21, 3  ;;  %s31_s22 = sadd.s32 1, %s968_s18 }
   0x7   : > { %s72_s23 = sadd.s32 1, %s952_s14  ;;  %p79_p1 = scmp.ne.s32.totalorder %s952_s14, %s948_s13 }
   0x8   : > { %s1177_s21 = smov (%p29_p0, %s28_s21), 0  ;;  %s1179_s22 = smov (!%p29_p0, %s31_s22), %s968_s18 }
   0x9   : > { %s67_s24 = ssub.s32 %s964_s17, %s1177_s21  ;;  %p80_p2 = scmp.eq.s32.totalorder %s972_s19, 0 }
   0xa   : > { %p33_p3 = scmp.ge.s32.totalorder %s1179_s22, 2  ;;  %p85_p4 = scmp.ne.s32.totalorder %s948_s13, %s944_s12 }
   0xb   : > { %p81_p5 = por %p80_p2, %p79_p1  ;;  %p86_p6 = scmp.eq.s32.totalorder %s664_s20, 0 }
   0xc   : > { %s1181_s22 = smov (%p33_p3, %s1179_s22), 0  ;;  %p806_p8 = scmp.lt.s32.totalorder %s972_s19, 6 }
   0xd   : > { %1165 = sst [smem:[#allocation6_spill]] %s1181_s22  ;;  %p1051_p7 = por %p86_p6, %p85_p4 }
   0xe   : > { %s68_s26 = ssub.s32 %s968_s18, %s1181_s22  ;;  %s176_s28 = sand.u32 1, %s952_s14  }
   0xf   : > { %s69_s27 = sor.u32 %s68_s26, %s67_s24  ;;  %s798_s29 = smul.u32 192, %s176_s28 }
  0x10   : > { %p70_p9 = scmp.eq.s32.totalorder %s69_s27, 0  ;;  %p1059_p10 = pnand %p806_p8, %p81_p5 }
  0x11   : > { %s773_s5 = smul.u32 96, %s964_s17  ;;  %s180_s6 = scalar_lea.vmem [#allocation3], %s798_s29 }
  0x12   : > { %s1064_s4 = scalar_select %p70_p9, %s952_s14, %s72_s23  }
  0x13   : > { %s190_s7 = sshll.u32 %s180_s6, 4  ;;  %s185_s8 = sadd.s32 %s968_s18, %s773_s5  ;;  %s191_s7 = int_to_ptr.vmem [resolvable:$true] %s190_s7 }
  0x14   : > { %s669_s9 = sshll.u32 %s185_s8, 2  ;;  %p670_p11 = scmp.ge.s32.totalorder %s972_s19, 1 }
  0x15   : > { %s187_s12 = scalar_lea.hbm %s1161_s1, %s669_s9  ;;  %s177_s24 = scalar_lea.sflag [#allocation4], %s176_s28 }
  0x16   : > { %s188_s20 = sshll.u32 %s187_s12, 4  ;;  %s974_s26 = smov 128   ;;  %s189_s20 = int_to_ptr.hbm [resolvable:$true] %s188_s20 }
  0x17   : > { %s975_s27 = smov 64   ;;  %s976_s22 = smov 4  }
  0x18   : > { %805 = dma.hbm_to_vmem [thread:$0]  (!%p1059_p10), %s189_s20, 3072, %s191_s7, %s177_s24, %s974_s26, %s975_s27, %s976_s22  }
  0x19   : > { %p204_p12 = scmp.lt.s32.totalorder %s972_s19, 7 }
  0x1b   : > { %p205_p13 = pnand %p670_p11, %p204_p12 }
  0x1c   : > { %s210_s23 = sand.u32 (!%p205_p13), 1, %s948_s13  }
  0x1d   : > { %208 = sbr.rel (%p205_p13) target bundleno = 232 (0xe8), region = 32  ;;  %s211_s5 = scalar_lea.sflag (!%p205_p13), [#allocation4], %s210_s23 }
  0x1e   : > { %s799_s29 = smul.u32 (!%p205_p13), 192, %s210_s23 }
  0x20   : > { %s1076_s6 = scalar_lea.vmem (!%p205_p13), [#allocation3], %s799_s29 }
  0x22   : > { %939 = dma.done.wait (%p1051_p7), %s211_s5, 3072  }
  0x23   : > { %941 = vsyncadd (%p1051_p7), %s211_s5, 4294964224  ;;  %s253_s28 = smul.u32 3, %s956_s15  ;;  %p264_p0 = scmp.lt.s32.totalorder %s960_s16, 1 }
  0x24   : > { %p673_p2 = scmp.ne.s32.totalorder %s956_s15, 0 }
  0x25   : > { %p256_p1 = scmp.lt.s32.totalorder %s253_s28, 8  ;;  %s1183_s16 = smov (!%p264_p0, %s960_s16), 1 }
  0x26   : > { %s266_s7 = scalar_lea.vmem %s1162_s2, %s1183_s16  ;;  %s672_s8 = sshll.u32 %s1183_s16, 2 }
  0x27   : > { %s1185_s28 = smov (!%p256_p1, %s253_s28), 8  ;;  %s1095_s11 = scalar_lea.vmem %s1163_s3, %s672_s8 }
  0x28   : > { %s671_s9 = sshll.u32 %s1185_s28, 2  ;;  %278 = sbr.rel (%p673_p2) target bundleno = 47 (0x2f), region = 40 }
  0x29   : > { %s1100_s24 = scalar_lea.vmem %s1160_s0, %s671_s9 }
  0x2d   : > { %v977_v0 = vmov 0.0  }
  0x2e   : > { %279 = vst [vmem:[#allocation2] sm:$0xff] %v977_v0 }
  0x2f PF: > { %v781_v1 = vld [vmem:[%s1076_s6 + $0x38] sm:$0xff]  ;;  %v780_v4 = vld [vmem:[%s1076_s6 + $0x30] sm:$0xff]  ;;  %v779_v7 = vld [vmem:[%s1076_s6 + $0x28] sm:$0xff]  ;;  %p770_p3 = scmp.ne.s32.totalorder %s956_s15, 2 }
  0x30   : > { %v789_v2 = vld [vmem:[%s1076_s6 + $0x78] sm:$0xff]  ;;  %486 = vmatpush.bf16.msra.mxu0 %v781_v1  ;;  %v788_v5 = vld [vmem:[%s1076_s6 + $0x70] sm:$0xff]  ;;  %v787_v8 = vld [vmem:[%s1076_s6 + $0x68] sm:$0xff] }
  0x31   : > { %v797_v3 = vld [vmem:[%s1076_s6 + $0xb8] sm:$0xff]  ;;  %499 = vmatpush.bf16.msra.mxu1 %v789_v2  ;;  %v796_v6 = vld [vmem:[%s1076_s6 + $0xb0] sm:$0xff]  ;;  %v795_v9 = vld [vmem:[%s1076_s6 + $0xa8] sm:$0xff] }
  0x32   : > { %512 = vmatpush.bf16.msra.mxu2 %v797_v3  ;;  %v778_v10 = vld [vmem:[%s1076_s6 + $0x20] sm:$0xff]  ;;  %v777_v13 = vld [vmem:[%s1076_s6 + $0x18] sm:$0xff]  ;;  %v776_v16 = vld [vmem:[%s1076_s6 + $0x10] sm:$0xff] }
  0x33   : > { %v786_v11 = vld [vmem:[%s1076_s6 + $0x60] sm:$0xff]  ;;  %v785_v14 = vld [vmem:[%s1076_s6 + $0x58] sm:$0xff]  ;;  %v784_v17 = vld [vmem:[%s1076_s6 + $0x50] sm:$0xff] }
  0x34   : > { %487 = vmatpush.bf16.msra.mxu0 %v780_v4  ;;  %v794_v12 = vld [vmem:[%s1076_s6 + $0xa0] sm:$0xff]  ;;  %v793_v15 = vld [vmem:[%s1076_s6 + $0x98] sm:$0xff]  ;;  %v792_v18 = vld [vmem:[%s1076_s6 + $0x90] sm:$0xff] }
  0x35   : > { %500 = vmatpush.bf16.msra.mxu1 %v788_v5  ;;  %v775_v19 = vld [vmem:[%s1076_s6 + $0x8] sm:$0xff]  ;;  %v281_v21 = vld [vmem:[%s1100_s24] sm:$0xff]  ;;  %v282_v23 = vld [vmem:[%s1100_s24 + $0x8] sm:$0xf] }
  0x36   : > { %513 = vmatpush.bf16.msra.mxu2 %v796_v6  ;;  %v783_v20 = vld [vmem:[%s1076_s6 + $0x48] sm:$0xff]  ;;  %v333_v24 = vunpack.c.l.b16 %v281_v21  ;;  %v334_v25 = vunpack.c.h.b16 %v281_v21  ;;  %v774_v26 = vld [vmem:[%s1076_s6] sm:$0xff]  ;;  %v335_v28 = vunpack.c.l.b16 %v282_v23  ;;  %v280_v36 = vld [vmem:[#allocation2] sm:$0xff] }
  0x37   : > { %v791_v22 = vld [vmem:[%s1076_s6 + $0x88] sm:$0xff]  ;;  %v782_v27 = vld [vmem:[%s1076_s6 + $0x40] sm:$0xff] }
  0x38   : > { %488 = vmatpush.bf16.msra.mxu0 %v779_v7  ;;  %v790_v29 = vld [vmem:[%s1076_s6 + $0x80] sm:$0xff]  ;;  %v336_v30 = vpack.c.b16 %v333_v24, %v333_v24  ;;  %v337_v31 = vpack.c.b16 %v334_v25, %v334_v25  ;;  %v338_v32 = vpack.c.b16 %v335_v28, %v335_v28 }
  0x39   : > { %501 = vmatpush.bf16.msra.mxu1 %v787_v8 }
  0x3a   : > { %514 = vmatpush.bf16.msra.mxu2 %v795_v9 }
  0x3c   : > { %489 = vmatpush.bf16.msra.mxu0 %v778_v10 }
  0x3d   : > { %502 = vmatpush.bf16.msra.mxu1 %v786_v11 }
  0x3e   : > { %515 = vmatpush.bf16.msra.mxu2 %v794_v12 }
  0x40   : > { %490 = vmatpush.bf16.msra.mxu0 %v777_v13 }
  0x41   : > { %503 = vmatpush.bf16.msra.mxu1 %v785_v14 }
  0x42   : > { %516 = vmatpush.bf16.msra.mxu2 %v793_v15 }
  0x44   : > { %491 = vmatpush.bf16.msra.mxu0 %v776_v16 }
  0x45   : > { %504 = vmatpush.bf16.msra.mxu1 %v784_v17 }
  0x46   : > { %517 = vmatpush.bf16.msra.mxu2 %v792_v18 }
  0x48   : > { %492 = vmatpush.bf16.msra.mxu0 %v775_v19 }
  0x49   : > { %505 = vmatpush.bf16.msra.mxu1 %v783_v20 }
  0x4a   : > { %518 = vmatpush.bf16.msra.mxu2 %v791_v22 }
  0x4c   : > { %493 = vmatpush.bf16.msra.mxu0 %v774_v26 }
  0x4d   : > { %506 = vmatpush.bf16.msra.mxu1 %v782_v27 }
  0x4e   : > { %519 = vmatpush.bf16.msra.mxu2 %v790_v29 }
  0x4f   : > { %494 = vmatmul.bf16.vlgmr.msra.gmra.mxu0 %v336_v30 }
  0x50   : > { %507 = vmatmul.bf16.vlgmr.msra.gmra.mxu1 %v337_v31 }
  0x51   : > { %520 = vmatmul.bf16.vlgmr.msra.gmra.mxu2 %v338_v32 }
  0xcc   : > { %v495_v33 = vpop.f32.mrf.mxu0 }
  0xcd   : > { %v508_v34 = vpop.f32.mrf.mxu1 }
  0xce   : > { %v509_v35 = vadd.f32 %v508_v34, %v495_v33 }
  0xd4   : > { %v521_v37 = vpop.f32.mrf.mxu2  ;;  %v497_v39 = vpop.f32.mrf.mxu0 }
  0xd5   : > { %v522_v38 = vadd.f32 %v521_v37, %v509_v35  ;;  %v510_v40 = vpop.f32.mrf.mxu1 }
  0xd7   : > { %v525_v41 = vadd.f32 %v522_v38, %v280_v36 }
  0xd8   : > { %530 = sbr.rel (%p770_p3) target bundleno = 232 (0xe8), region = 44 }
  0xd9   : > { %526 = vst [vmem:[#allocation2] sm:$0xff] %v525_v41 }
  0xdc   : > { %v523_v42 = vpop.f32.mrf.mxu2 }
  0xdd   : > { %v875_v44 = vld [vmem:[%s266_s7] ss:$0 sm:$0xff] }
  0xe0   : > { %v531_v43 = vld [vmem:[#allocation2] sm:$0xff] }
  0xe1   : > { %v536_v45 = vadd.f32 %v875_v44, %v531_v43 }
  0xe3   : > { %v537_v46 = vmax.f32 %v536_v45, 0.0 }
  0xe5   : > { %v538_v47 = vpack.c.bf16 %v537_v46, %v537_v46 }
  0xe7   : > { %539 = vst [vmem:[%s1095_s11] sm:$0xf] %v538_v47 }
  0xe8 PF: > { %s16_s19 = sadd.s32 1, %s972_s19   ;;  %s1168_s23 = sld [smem:[#allocation6_spill]] }
  0xe9   : > { %p13_p4 = scmp.ge.s32.totalorder %s16_s19, 8   ;;  %s1169_s12 = smov %s948_s13 }
  0xea   : > { %s1170_s13 = smov %s952_s14  ;;  %s1171_s14 = smov %s1064_s4 }
  0xeb   : > { %s1172_s15 = smov %s964_s17  ;;  %s1173_s16 = smov %s968_s18 }
  0xec   : > { %s1174_s17 = smov %s1177_s21  ;;  %15 = sbr.rel (!%p13_p4) target bundleno = 5 (0x5), region = 86 }
  0xee   : > { %s1175_s18 = smov %s1168_s23 }
  0xf1   :  { %567 = vsyncpa [#allocation4], 1 }
  0xf2   :  { %569 = vsyncpa [#allocation4 + $0x1], 1 }

// kernel: transfer_learning_resnet18_forward.33
= control target key start
LH: loop header
LB: loop body
LE: loop exit
PB: predicated region body
PF: predicated region fallthrough
CT: control target
= control target key end

     0   :  { %9 = vsyncpa [#allocation5], 0  ;;  %s1634_s0 = inlined_call_operand.vmem [shape: bf16[8,2304], index: 0, kind: input, shape index: {}]   ;;  %s1635_s1 = inlined_call_operand.vmem [shape: bf16[2304,256], index: 1, kind: input, shape index: {}]   ;;  %s1636_s2 = inlined_call_operand.hbm [shape: f32[1,256], index: 2, kind: input, shape index: {}]   ;;  %s1637_s3 = inlined_call_operand.vmem [shape: bf16[8,256], index: 3, kind: input, shape index: {}]   ;;  %s1638_s4 = inlined_call_operand.vmem [shape: bf16[8,256], index: 4, kind: output, shape index: {}]  }
   0x1   :  { %11 = vsyncpa [#allocation5 + $0x1], 0  ;;  %s1338_s15 = smov 0   ;;  %s1340_s16 = smov 0  }
   0x2   :  { %s1342_s17 = smov 0   ;;  %s1344_s18 = smov 0  }
   0x3   :  { %s1346_s19 = smov 0   ;;  %s1348_s20 = smov 0  }
   0x4   :  { %s1350_s21 = smov 0   ;;  %s1352_s22 = smov 0  }
   0x5   :  { %s1354_s23 = smov 0   ;;  %s1356_s24 = smov 0  }
   0x6 LB: > { %s979_s25 = sadd.s32 4294967295, %s1310_s24   ;;  %s29_s26 = sadd.s32 1, %s1302_s22  ;;  %s1310_s24 = sphi %s1356_s24, %s17_s24   ;;  %s1306_s23 = sphi %s1354_s23, %s1650_s23   ;;  %s1302_s22 = sphi %s1352_s22, %s1649_s22   ;;  %s1298_s21 = sphi %s1350_s21, %s1648_s21   ;;  %s1294_s20 = sphi %s1348_s20, %s1647_s20   ;;  %s1290_s19 = sphi %s1346_s19, %s1646_s19   ;;  %s1286_s18 = sphi %s1344_s18, %s1645_s18   ;;  %s1282_s17 = sphi %s1342_s17, %s1644_s17   ;;  %s1278_s16 = sphi %s1340_s16, %s1643_s16   ;;  %s1274_s15 = sphi %s1338_s15, %s1642_s15  }
   0x7   : > { %p30_p0 = scmp.ge.s32.totalorder %s29_s26, 6  ;;  %s32_s27 = sadd.s32 1, %s1306_s23 }
   0x8   : > { %s73_s28 = sadd.s32 1, %s1290_s19  ;;  %p80_p1 = scmp.ne.s32.totalorder %s1290_s19, %s1286_s18 }
   0x9   : > { %s1652_s26 = smov (%p30_p0, %s29_s26), 0  ;;  %s1654_s27 = smov (!%p30_p0, %s32_s27), %s1306_s23 }
   0xa   : > { %s68_s29 = ssub.s32 %s1302_s22, %s1652_s26  ;;  %p81_p2 = scmp.eq.s32.totalorder %s1310_s24, 0 }
   0xb   : > { %p34_p3 = scmp.ge.s32.totalorder %s1654_s27, 2  ;;  %s99_s30 = sadd.s32 1, %s1282_s17 }
   0xc   : > { %p1401_p4 = por %p81_p2, %p80_p1  ;;  %p106_p5 = scmp.ne.s32.totalorder %s1282_s17, %s1278_s16 }
   0xd   : > { %s1656_s27 = smov (%p34_p3, %s1654_s27), 0  ;;  %p112_p7 = scmp.ne.s32.totalorder %s1278_s16, %s1274_s15 }
   0xe   : > { %p1409_p6 = por %p106_p5, %p81_p2  ;;  %s69_s7 = ssub.s32 %s1306_s23, %s1656_s27 }
   0xf   : > { %p113_p8 = scmp.eq.s32.totalorder %s979_s25, 0  ;;  %s70_s8 = sor.u32 %s69_s7, %s68_s29 }
  0x10   : > { %p97_p9 = scmp.eq.s32.totalorder %s69_s7, 0  ;;  %p71_p10 = scmp.eq.s32.totalorder %s70_s8, 0 }
  0x11   : > { %p1417_p11 = por %p113_p8, %p112_p7  ;;  %p982_p12 = scmp.ge.s32.totalorder %s1310_s24, 12 }
  0x12   : > { %s1422_s10 = scalar_select %p97_p9, %s1282_s17, %s99_s30  }
  0x13   : > { %s1425_s11 = scalar_select %p71_p10, %s1290_s19, %s73_s28  }
  0x14   : > { %188 = sbr.rel (%p982_p12) target bundleno = 84 (0x54), region = 16 }
  0x19   : > { %204 = sbr.rel (!%p1401_p4) target bundleno = 80 (0x50), region = 24  ;;  %s206_s12 = sand.u32 (%p1401_p4), 1, %s1290_s19  }
  0x1a   : > { %s1089_s13 = smul.u32 (%p1401_p4), 96, %s1302_s22 }
  0x1b   : > { %s1114_s14 = smul.u32 (%p1401_p4), 192, %s206_s12 }
  0x1c   : > { %s211_s15 = sadd.s32 (%p1401_p4), %s1306_s23, %s1089_s13 }
  0x1d   : > { %s984_s25 = sshll.u32 (%p1401_p4), %s211_s15, 2  ;;  %s1441_s28 = scalar_lea.vmem (%p1401_p4), [#allocation3], %s1114_s14 }
  0x1e   : > { %s1436_s30 = scalar_lea.vmem %s1635_s1, %s984_s25 }
  0x1f   : > { %v230_v0 = vld [vmem:[%s1436_s30] sm:$0xf]  ;;  %v232_v1 = vld [vmem:[%s1436_s30 + $0x8] sm:$0xf]  ;;  %v234_v2 = vld [vmem:[%s1436_s30 + $0x10] sm:$0xf] }
  0x20   : > { %231 = vst [vmem:[%s1441_s28] sm:$0xf] %v230_v0  ;;  %v236_v3 = vld [vmem:[%s1436_s30 + $0x18] sm:$0xf]  ;;  %v238_v4 = vld [vmem:[%s1436_s30 + $0x20] sm:$0xf] }
  0x21   : > { %233 = vst [vmem:[%s1441_s28 + $0x4] sm:$0xf] %v232_v1  ;;  %v240_v5 = vld [vmem:[%s1436_s30 + $0x28] sm:$0xf]  ;;  %v242_v6 = vld [vmem:[%s1436_s30 + $0x30] sm:$0xf] }
  0x22   : > { %235 = vst [vmem:[%s1441_s28 + $0x8] sm:$0xf] %v234_v2  ;;  %v244_v7 = vld [vmem:[%s1436_s30 + $0x38] sm:$0xf]  ;;  %v246_v8 = vld [vmem:[%s1436_s30 + $0x40] sm:$0xf] }
  0x23   : > { %237 = vst [vmem:[%s1441_s28 + $0xc] sm:$0xf] %v236_v3  ;;  %v248_v9 = vld [vmem:[%s1436_s30 + $0x48] sm:$0xf]  ;;  %v250_v10 = vld [vmem:[%s1436_s30 + $0x50] sm:$0xf] }
  0x24   : > { %239 = vst [vmem:[%s1441_s28 + $0x10] sm:$0xf] %v238_v4  ;;  %v252_v11 = vld [vmem:[%s1436_s30 + $0x58] sm:$0xf]  ;;  %v254_v12 = vld [vmem:[%s1436_s30 + $0x60] sm:$0xf] }
  0x25   : > { %241 = vst [vmem:[%s1441_s28 + $0x14] sm:$0xf] %v240_v5  ;;  %v256_v13 = vld [vmem:[%s1436_s30 + $0x68] sm:$0xf]  ;;  %v258_v14 = vld [vmem:[%s1436_s30 + $0x70] sm:$0xf] }
  0x26   : > { %243 = vst [vmem:[%s1441_s28 + $0x18] sm:$0xf] %v242_v6  ;;  %v260_v15 = vld [vmem:[%s1436_s30 + $0x78] sm:$0xf]  ;;  %v262_v16 = vld [vmem:[%s1436_s30 + $0x80] sm:$0xf] }
  0x27   : > { %245 = vst [vmem:[%s1441_s28 + $0x1c] sm:$0xf] %v244_v7  ;;  %v264_v17 = vld [vmem:[%s1436_s30 + $0x88] sm:$0xf]  ;;  %v266_v18 = vld [vmem:[%s1436_s30 + $0x90] sm:$0xf] }
  0x28   : > { %247 = vst [vmem:[%s1441_s28 + $0x20] sm:$0xf] %v246_v8  ;;  %v268_v19 = vld [vmem:[%s1436_s30 + $0x98] sm:$0xf]  ;;  %v270_v20 = vld [vmem:[%s1436_s30 + $0xa0] sm:$0xf] }
  0x29   : > { %249 = vst [vmem:[%s1441_s28 + $0x24] sm:$0xf] %v248_v9  ;;  %v272_v21 = vld [vmem:[%s1436_s30 + $0xa8] sm:$0xf]  ;;  %v274_v22 = vld [vmem:[%s1436_s30 + $0xb0] sm:$0xf] }
  0x2a   : > { %251 = vst [vmem:[%s1441_s28 + $0x28] sm:$0xf] %v250_v10  ;;  %v276_v23 = vld [vmem:[%s1436_s30 + $0xb8] sm:$0xf]  ;;  %v278_v24 = vld [vmem:[%s1436_s30 + $0xc0] sm:$0xf] }
  0x2b   : > { %253 = vst [vmem:[%s1441_s28 + $0x2c] sm:$0xf] %v252_v11  ;;  %v280_v25 = vld [vmem:[%s1436_s30 + $0xc8] sm:$0xf]  ;;  %v282_v26 = vld [vmem:[%s1436_s30 + $0xd0] sm:$0xf] }
  0x2c   : > { %255 = vst [vmem:[%s1441_s28 + $0x30] sm:$0xf] %v254_v12  ;;  %v284_v27 = vld [vmem:[%s1436_s30 + $0xd8] sm:$0xf]  ;;  %v286_v28 = vld [vmem:[%s1436_s30 + $0xe0] sm:$0xf] }
  0x2d   : > { %257 = vst [vmem:[%s1441_s28 + $0x34] sm:$0xf] %v256_v13  ;;  %v288_v29 = vld [vmem:[%s1436_s30 + $0xe8] sm:$0xf]  ;;  %v290_v30 = vld [vmem:[%s1436_s30 + $0xf0] sm:$0xf] }
  0x2e   : > { %259 = vst [vmem:[%s1441_s28 + $0x38] sm:$0xf] %v258_v14  ;;  %v292_v31 = vld [vmem:[%s1436_s30 + $0xf8] sm:$0xf]  ;;  %v294_v32 = vld [vmem:[%s1436_s30 + $0x100] sm:$0xf] }
  0x2f   : > { %261 = vst [vmem:[%s1441_s28 + $0x3c] sm:$0xf] %v260_v15  ;;  %v296_v33 = vld [vmem:[%s1436_s30 + $0x108] sm:$0xf]  ;;  %v298_v34 = vld [vmem:[%s1436_s30 + $0x110] sm:$0xf] }
  0x30   : > { %263 = vst [vmem:[%s1441_s28 + $0x40] sm:$0xf] %v262_v16  ;;  %v300_v35 = vld [vmem:[%s1436_s30 + $0x118] sm:$0xf]  ;;  %v302_v36 = vld [vmem:[%s1436_s30 + $0x120] sm:$0xf] }
  0x31   : > { %265 = vst [vmem:[%s1441_s28 + $0x44] sm:$0xf] %v264_v17  ;;  %v304_v37 = vld [vmem:[%s1436_s30 + $0x128] sm:$0xf]  ;;  %v306_v38 = vld [vmem:[%s1436_s30 + $0x130] sm:$0xf] }
  0x32   : > { %267 = vst [vmem:[%s1441_s28 + $0x48] sm:$0xf] %v266_v18  ;;  %v308_v39 = vld [vmem:[%s1436_s30 + $0x138] sm:$0xf]  ;;  %v310_v40 = vld [vmem:[%s1436_s30 + $0x140] sm:$0xf] }
  0x33   : > { %269 = vst [vmem:[%s1441_s28 + $0x4c] sm:$0xf] %v268_v19  ;;  %v312_v41 = vld [vmem:[%s1436_s30 + $0x148] sm:$0xf]  ;;  %v314_v42 = vld [vmem:[%s1436_s30 + $0x150] sm:$0xf] }
  0x34   : > { %271 = vst [vmem:[%s1441_s28 + $0x50] sm:$0xf] %v270_v20  ;;  %v316_v43 = vld [vmem:[%s1436_s30 + $0x158] sm:$0xf]  ;;  %v318_v44 = vld [vmem:[%s1436_s30 + $0x160] sm:$0xf] }
  0x35   : > { %273 = vst [vmem:[%s1441_s28 + $0x54] sm:$0xf] %v272_v21  ;;  %v320_v45 = vld [vmem:[%s1436_s30 + $0x168] sm:$0xf]  ;;  %v322_v46 = vld [vmem:[%s1436_s30 + $0x170] sm:$0xf] }
  0x36   : > { %275 = vst [vmem:[%s1441_s28 + $0x58] sm:$0xf] %v274_v22  ;;  %v324_v47 = vld [vmem:[%s1436_s30 + $0x178] sm:$0xf] }
  0x37   : > { %277 = vst [vmem:[%s1441_s28 + $0x5c] sm:$0xf] %v276_v23 }
  0x38   : > { %279 = vst [vmem:[%s1441_s28 + $0x60] sm:$0xf] %v278_v24 }
  0x39   : > { %281 = vst [vmem:[%s1441_s28 + $0x64] sm:$0xf] %v280_v25 }
  0x3a   : > { %283 = vst [vmem:[%s1441_s28 + $0x68] sm:$0xf] %v282_v26 }
  0x3b   : > { %285 = vst [vmem:[%s1441_s28 + $0x6c] sm:$0xf] %v284_v27 }
  0x3c   : > { %287 = vst [vmem:[%s1441_s28 + $0x70] sm:$0xf] %v286_v28 }
  0x3d   : > { %289 = vst [vmem:[%s1441_s28 + $0x74] sm:$0xf] %v288_v29 }
  0x3e   : > { %291 = vst [vmem:[%s1441_s28 + $0x78] sm:$0xf] %v290_v30 }
  0x3f   : > { %293 = vst [vmem:[%s1441_s28 + $0x7c] sm:$0xf] %v292_v31 }
  0x40   : > { %295 = vst [vmem:[%s1441_s28 + $0x80] sm:$0xf] %v294_v32 }
  0x41   : > { %297 = vst [vmem:[%s1441_s28 + $0x84] sm:$0xf] %v296_v33 }
  0x42   : > { %299 = vst [vmem:[%s1441_s28 + $0x88] sm:$0xf] %v298_v34 }
  0x43   : > { %301 = vst [vmem:[%s1441_s28 + $0x8c] sm:$0xf] %v300_v35 }
  0x44   : > { %303 = vst [vmem:[%s1441_s28 + $0x90] sm:$0xf] %v302_v36 }
  0x45   : > { %305 = vst [vmem:[%s1441_s28 + $0x94] sm:$0xf] %v304_v37 }
  0x46   : > { %307 = vst [vmem:[%s1441_s28 + $0x98] sm:$0xf] %v306_v38 }
  0x47   : > { %309 = vst [vmem:[%s1441_s28 + $0x9c] sm:$0xf] %v308_v39 }
  0x48   : > { %311 = vst [vmem:[%s1441_s28 + $0xa0] sm:$0xf] %v310_v40 }
  0x49   : > { %313 = vst [vmem:[%s1441_s28 + $0xa4] sm:$0xf] %v312_v41 }
  0x4a   : > { %315 = vst [vmem:[%s1441_s28 + $0xa8] sm:$0xf] %v314_v42 }
  0x4b   : > { %317 = vst [vmem:[%s1441_s28 + $0xac] sm:$0xf] %v316_v43 }
  0x4c   : > { %319 = vst [vmem:[%s1441_s28 + $0xb0] sm:$0xf] %v318_v44 }
  0x4d   : > { %321 = vst [vmem:[%s1441_s28 + $0xb4] sm:$0xf] %v320_v45 }
  0x4e   : > { %323 = vst [vmem:[%s1441_s28 + $0xb8] sm:$0xf] %v322_v46 }
  0x4f   : > { %325 = vst [vmem:[%s1441_s28 + $0xbc] sm:$0xf] %v324_v47 }
  0x50 PF: > { %s446_s5 = sand.u32 1, %s1282_s17   ;;  %s452_s13 = scalar_lea.hbm %s1636_s2, %s1306_s23 }
  0x51   : > { %s454_s14 = sshll.u32 %s452_s13, 4  ;;  %s449_s15 = scalar_lea.vmem [#allocation4], %s446_s5  ;;  %s455_s14 = int_to_ptr.hbm [resolvable:$true] %s454_s14 }
  0x52   : > { %s456_s25 = sshll.u32 %s449_s15, 4  ;;  %s447_s29 = scalar_lea.sflag [#allocation5], %s446_s5  ;;  %s457_s25 = int_to_ptr.vmem [resolvable:$true] %s456_s25 }
  0x53   : > { %1116 = dma.hbm_to_vmem [thread:$0]  (%p1409_p6), %s455_s14, 16, %s457_s25, %s447_s29  }
  0x54 PF: > { %p985_p13 = scmp.ge.s32.totalorder %s1310_s24, 1  ;;  %p472_p0 = scmp.lt.s32.totalorder %s1310_s24, 13 }
  0x56   : > { %p473_p1 = pnand %p985_p13, %p472_p0 }
  0x57   : > { %s479_s7 = sand.u32 (!%p473_p1), 1, %s1286_s18   ;;  %s485_s30 = sand.u32 (!%p473_p1), 1, %s1278_s16  }
  0x58   : > { %476 = sbr.rel (%p473_p1) target bundleno = 291 (0x123), region = 73  ;;  %s486_s12 = scalar_lea.sflag (!%p473_p1), [#allocation5], %s485_s30 }
  0x59   : > { %s1115_s28 = smul.u32 (!%p473_p1), 192, %s479_s7  ;;  %s1549_s13 = scalar_lea.vmem (!%p473_p1), [#allocation4], %s485_s30 }
  0x5b   : > { %s1547_s8 = scalar_lea.vmem (!%p473_p1), [#allocation3], %s1115_s28 }
  0x5d   : > { %1269 = dma.done.wait (%p1417_p11), %s486_s12, 16  }
  0x5e   : > { %1271 = vsyncadd (%p1417_p11), %s486_s12, 4294967280  ;;  %s537_s6 = smul.u32 3, %s1294_s20  ;;  %p550_p2 = scmp.lt.s32.totalorder %s1298_s21, 1 }
  0x5f   : > { %p989_p4 = scmp.ne.s32.totalorder %s1294_s20, 0 }
  0x60   : > { %p540_p3 = scmp.lt.s32.totalorder %s537_s6, 17  ;;  %s1658_s21 = smov (!%p550_p2, %s1298_s21), 1 }
  0x61   : > { %s987_s18 = sshll.u32 %s1658_s21, 2  ;;  %567 = sbr.rel (%p989_p4) target bundleno = 104 (0x68), region = 85 }
  0x62   : > { %s1660_s6 = smov (!%p540_p3, %s537_s6), 17  ;;  %s1561_s25 = scalar_lea.vmem %s1637_s3, %s987_s18 }
  0x63   : > { %s986_s5 = sshll.u32 %s1660_s6, 2  ;;  %s1571_s12 = scalar_lea.vmem %s1638_s4, %s987_s18 }
  0x64   : > { %s1566_s9 = scalar_lea.vmem %s1634_s0, %s986_s5 }
  0x66   : > { %v1312_v48 = vmov 0.0  }
  0x67   : > { %568 = vst [vmem:[#allocation2] sm:$0xff] %v1312_v48 }
  0x68 PF: > { %v1097_v49 = vld [vmem:[%s1547_s8 + $0x38] sm:$0xff]  ;;  %v1096_v52 = vld [vmem:[%s1547_s8 + $0x30] sm:$0xff]  ;;  %v1095_v55 = vld [vmem:[%s1547_s8 + $0x28] sm:$0xff]  ;;  %p1086_p5 = scmp.ne.s32.totalorder %s1294_s20, 5 }
  0x69   : > { %v1105_v50 = vld [vmem:[%s1547_s8 + $0x78] sm:$0xff]  ;;  %775 = vmatpush.bf16.msra.mxu0 %v1097_v49  ;;  %v1104_v53 = vld [vmem:[%s1547_s8 + $0x70] sm:$0xff]  ;;  %v1103_v56 = vld [vmem:[%s1547_s8 + $0x68] sm:$0xff] }
  0x6a   : > { %v1113_v51 = vld [vmem:[%s1547_s8 + $0xb8] sm:$0xff]  ;;  %788 = vmatpush.bf16.msra.mxu1 %v1105_v50  ;;  %v1112_v54 = vld [vmem:[%s1547_s8 + $0xb0] sm:$0xff]  ;;  %v1111_v57 = vld [vmem:[%s1547_s8 + $0xa8] sm:$0xff] }
  0x6b   : > { %801 = vmatpush.bf16.msra.mxu2 %v1113_v51  ;;  %v1094_v58 = vld [vmem:[%s1547_s8 + $0x20] sm:$0xff]  ;;  %v1093_v61 = vld [vmem:[%s1547_s8 + $0x18] sm:$0xff]  ;;  %v1092_v0 = vld [vmem:[%s1547_s8 + $0x10] sm:$0xff] }
  0x6c   : > { %v1102_v59 = vld [vmem:[%s1547_s8 + $0x60] sm:$0xff]  ;;  %v1101_v62 = vld [vmem:[%s1547_s8 + $0x58] sm:$0xff]  ;;  %v1100_v1 = vld [vmem:[%s1547_s8 + $0x50] sm:$0xff] }
  0x6d   : > { %776 = vmatpush.bf16.msra.mxu0 %v1096_v52  ;;  %v1110_v60 = vld [vmem:[%s1547_s8 + $0xa0] sm:$0xff]  ;;  %v1109_v63 = vld [vmem:[%s1547_s8 + $0x98] sm:$0xff]  ;;  %v1108_v2 = vld [vmem:[%s1547_s8 + $0x90] sm:$0xff] }
  0x6e   : > { %789 = vmatpush.bf16.msra.mxu1 %v1104_v53  ;;  %v1091_v3 = vld [vmem:[%s1547_s8 + $0x8] sm:$0xff]  ;;  %v570_v5 = vld [vmem:[%s1566_s9] sm:$0xff]  ;;  %v571_v7 = vld [vmem:[%s1566_s9 + $0x8] sm:$0xf] }
  0x6f   : > { %802 = vmatpush.bf16.msra.mxu2 %v1112_v54  ;;  %v1099_v4 = vld [vmem:[%s1547_s8 + $0x48] sm:$0xff]  ;;  %v622_v8 = vunpack.c.l.b16 %v570_v5  ;;  %v623_v9 = vunpack.c.h.b16 %v570_v5  ;;  %v1090_v10 = vld [vmem:[%s1547_s8] sm:$0xff]  ;;  %v624_v12 = vunpack.c.l.b16 %v571_v7  ;;  %v569_v20 = vld [vmem:[#allocation2] sm:$0xff] }
  0x70   : > { %v1107_v6 = vld [vmem:[%s1547_s8 + $0x88] sm:$0xff]  ;;  %v1098_v11 = vld [vmem:[%s1547_s8 + $0x40] sm:$0xff] }
  0x71   : > { %777 = vmatpush.bf16.msra.mxu0 %v1095_v55  ;;  %v1106_v13 = vld [vmem:[%s1547_s8 + $0x80] sm:$0xff]  ;;  %v625_v14 = vpack.c.b16 %v622_v8, %v622_v8  ;;  %v626_v15 = vpack.c.b16 %v623_v9, %v623_v9  ;;  %v627_v16 = vpack.c.b16 %v624_v12, %v624_v12 }
  0x72   : > { %790 = vmatpush.bf16.msra.mxu1 %v1103_v56 }
  0x73   : > { %803 = vmatpush.bf16.msra.mxu2 %v1111_v57 }
  0x75   : > { %778 = vmatpush.bf16.msra.mxu0 %v1094_v58 }
  0x76   : > { %791 = vmatpush.bf16.msra.mxu1 %v1102_v59 }
  0x77   : > { %804 = vmatpush.bf16.msra.mxu2 %v1110_v60 }
  0x79   : > { %779 = vmatpush.bf16.msra.mxu0 %v1093_v61 }
  0x7a   : > { %792 = vmatpush.bf16.msra.mxu1 %v1101_v62 }
  0x7b   : > { %805 = vmatpush.bf16.msra.mxu2 %v1109_v63 }
  0x7d   : > { %780 = vmatpush.bf16.msra.mxu0 %v1092_v0 }
  0x7e   : > { %793 = vmatpush.bf16.msra.mxu1 %v1100_v1 }
  0x7f   : > { %806 = vmatpush.bf16.msra.mxu2 %v1108_v2 }
  0x81   : > { %781 = vmatpush.bf16.msra.mxu0 %v1091_v3 }
  0x82   : > { %794 = vmatpush.bf16.msra.mxu1 %v1099_v4 }
  0x83   : > { %807 = vmatpush.bf16.msra.mxu2 %v1107_v6 }
  0x85   : > { %782 = vmatpush.bf16.msra.mxu0 %v1090_v10 }
  0x86   : > { %795 = vmatpush.bf16.msra.mxu1 %v1098_v11 }
  0x87   : > { %808 = vmatpush.bf16.msra.mxu2 %v1106_v13 }
  0x88   : > { %783 = vmatmul.bf16.vlgmr.msra.gmra.mxu0 %v625_v14 }
  0x89   : > { %796 = vmatmul.bf16.vlgmr.msra.gmra.mxu1 %v626_v15 }
  0x8a   : > { %809 = vmatmul.bf16.vlgmr.msra.gmra.mxu2 %v627_v16 }
 0x105   : > { %v784_v17 = vpop.f32.mrf.mxu0 }
 0x106   : > { %v797_v18 = vpop.f32.mrf.mxu1 }
 0x107   : > { %v798_v19 = vadd.f32 %v797_v18, %v784_v17 }
 0x10d   : > { %v810_v21 = vpop.f32.mrf.mxu2  ;;  %v786_v23 = vpop.f32.mrf.mxu0 }
 0x10e   : > { %v811_v22 = vadd.f32 %v810_v21, %v798_v19  ;;  %v799_v24 = vpop.f32.mrf.mxu1 }
 0x110   : > { %v814_v25 = vadd.f32 %v811_v22, %v569_v20 }
 0x111   : > { %819 = sbr.rel (%p1086_p5) target bundleno = 291 (0x123), region = 89 }
 0x112   : > { %815 = vst [vmem:[#allocation2] sm:$0xff] %v814_v25 }
 0x115   : > { %v812_v26 = vpop.f32.mrf.mxu2 }
 0x116   : > { %v822_v28 = vld [vmem:[%s1561_s25] sm:$0xf] }
 0x117   : > { %v1199_v29 = vld [vmem:[%s1549_s13] ss:$0 sm:$0xff]  ;;  %v827_v30 = vunpack.c.l.bf16 %v822_v28 }
 0x119   : > { %v820_v27 = vld [vmem:[#allocation2] sm:$0xff] }
 0x11a   : > { %v826_v31 = vadd.f32 %v1199_v29, %v820_v27 }
 0x11c   : > { %v828_v32 = vadd.f32 %v827_v30, %v826_v31 }
 0x11e   : > { %v829_v33 = vmax.f32 %v828_v32, 0.0 }
 0x120   : > { %v830_v34 = vpack.c.bf16 %v829_v33, %v829_v33 }
 0x122   : > { %831 = vst [vmem:[%s1571_s12] sm:$0xf] %v830_v34 }
 0x123 PF: > { %s17_s24 = sadd.s32 1, %s1310_s24   ;;  %s1642_s15 = smov %s1278_s16 }
 0x124   : > { %p14_p6 = scmp.ge.s32.totalorder %s17_s24, 14   ;;  %s1643_s16 = smov %s1282_s17 }
 0x125   : > { %s1644_s17 = smov %s1422_s10  ;;  %s1645_s18 = smov %s1290_s19 }
 0x126   : > { %s1646_s19 = smov %s1425_s11  ;;  %s1647_s20 = smov %s1302_s22 }
 0x127   : > { %s1648_s21 = smov %s1306_s23  ;;  %s1649_s22 = smov %s1652_s26 }
 0x128   : > { %s1650_s23 = smov %s1656_s27  ;;  %16 = sbr.rel (!%p14_p6) target bundleno = 6 (0x6), region = 139 }
 0x12d   :  { %859 = vsyncpa [#allocation5], 1 }
 0x12e   :  { %861 = vsyncpa [#allocation5 + $0x1], 1 }

// kernel: transfer_learning_resnet18_forward.34
= control target key start
LH: loop header
LB: loop body
LE: loop exit
PB: predicated region body
PF: predicated region fallthrough
CT: control target
= control target key end

     0   :  { %s1342_s0 = inlined_call_operand.vmem [shape: bf16[8,2304], index: 0, kind: input, shape index: {}]   ;;  %s1343_s1 = inlined_call_operand.hbm [shape: bf16[2304,256], index: 1, kind: input, shape index: {}]   ;;  %s1344_s2 = inlined_call_operand.hbm [shape: f32[1,256], index: 2, kind: input, shape index: {}]   ;;  %s1345_s3 = inlined_call_operand.vmem [shape: bf16[8,256], index: 3, kind: output, shape index: {}]  }
   0x1   :  { %1347 = sst [smem:[#allocation10_spill]] %s1343_s1 }
   0x2   :  { %8 = vsyncpa [#allocation4], 0 }
   0x3   :  { %10 = vsyncpa [#allocation4 + $0x1], 0 }
   0x4   :  { %11 = vsyncpa [#allocation6], 0 }
   0x5   :  { %13 = vsyncpa [#allocation6 + $0x1], 0  ;;  %s1116_s12 = smov 0   ;;  %s1118_s13 = smov 0  }
   0x6   :  { %s1120_s14 = smov 0   ;;  %s1122_s15 = smov 0  }
   0x7   :  { %s1124_s16 = smov 0   ;;  %s1126_s17 = smov 0  }
   0x8   :  { %s1128_s18 = smov 0   ;;  %s1130_s19 = smov 0  }
   0x9   :  { %s1132_s20 = smov 0   ;;  %s1134_s21 = smov 0  }
   0xa   :  { %s1136_s22 = smov 0  }
   0xb LB: > { %s31_s23 = sadd.s32 1, %s1082_s20  ;;  %p82_p1 = scmp.ne.s32.totalorder %s1070_s17, %s1066_s16  ;;  %s1090_s22 = sphi %s1136_s22, %s19_s22   ;;  %s1086_s21 = sphi %s1134_s21, %s1365_s21   ;;  %s1082_s20 = sphi %s1132_s20, %s1364_s20   ;;  %s1078_s19 = sphi %s1130_s19, %s1363_s19   ;;  %s1074_s18 = sphi %s1128_s18, %s1362_s18   ;;  %s1070_s17 = sphi %s1126_s17, %s1361_s17   ;;  %s1066_s16 = sphi %s1124_s16, %s1360_s16   ;;  %s1062_s15 = sphi %s1122_s15, %s1359_s15   ;;  %s1058_s14 = sphi %s1120_s14, %s1358_s14   ;;  %s1054_s13 = sphi %s1118_s13, %s1357_s13   ;;  %s1050_s12 = sphi %s1116_s12, %s1356_s12  }
   0xc   : > { %p1172_p0 = scmp.ge.s32.totalorder %s31_s23, 6  ;;  %p83_p2 = scmp.eq.s32.totalorder %s1090_s22, 0 }
   0xd   : > { %p842_p4 = scmp.lt.s32.totalorder %s1090_s22, 12  ;;  %s75_s25 = sadd.s32 1, %s1070_s17 }
   0xe   : > { %s1367_s23 = smov (%p1172_p0, %s31_s23), 0  ;;  %p84_p3 = por %p83_p2, %p82_p1 }
   0xf   : > { %s179_s26 = sand.u32 1, %s1070_s17   ;;  %s804_s28 = smul.u32 96, %s1082_s20 }
  0x10   : > { %s829_s27 = smul.u32 192, %s179_s26  ;;  %p836_p5 = pnand %p842_p4, %p84_p3 }
  0x11   : > { %s188_s29 = sadd.s32 %s1086_s21, %s804_s28  ;;  %s1349_s1 = sld [smem:[#allocation10_spill]] }
  0x12   : > { %s183_s30 = scalar_lea.vmem [#allocation3], %s829_s27  ;;  %s700_s5 = sshll.u32 %s188_s29, 2 }
  0x13   : > { %s193_s4 = sshll.u32 %s183_s30, 4  ;;  %s180_s10 = scalar_lea.sflag [#allocation4], %s179_s26  ;;  %s194_s4 = int_to_ptr.vmem [resolvable:$true] %s193_s4 }
  0x14   : > { %s1092_s11 = smov 128   ;;  %s1093_s27 = smov 64  }
  0x15   : > { %s1094_s28 = smov 4   ;;  %p701_p6 = scmp.ge.s32.totalorder %s1090_s22, 1 }
  0x16   : > { %p218_p7 = scmp.lt.s32.totalorder %s1090_s22, 13  ;;  %s695_s30 = sadd.s32 4294967295, %s1090_s22  }
  0x17   : > { %s190_s8 = scalar_lea.hbm %s1349_s1, %s700_s5  ;;  %s34_s5 = sadd.s32 1, %s1086_s21 }
  0x18   : > { %s191_s9 = sshll.u32 %s190_s8, 4  ;;  %p1197_p8 = pnand %p701_p6, %p218_p7  ;;  %s192_s9 = int_to_ptr.hbm [resolvable:$true] %s191_s9 }
  0x19   : > { %838 = dma.hbm_to_vmem [thread:$0]  (!%p836_p5), %s192_s9, 3072, %s194_s4, %s180_s10, %s1092_s11, %s1093_s27, %s1094_s28  }
  0x1a   : > { %p88_p9 = scmp.ne.s32.totalorder %s1066_s16, %s1062_s15  ;;  %s1369_s5 = smov (!%p1172_p0, %s34_s5), %s1086_s21 }
  0x1b   : > { %s70_s26 = ssub.s32 %s1082_s20, %s1367_s23  ;;  %p89_p10 = scmp.eq.s32.totalorder %s695_s30, 0 }
  0x1c   : > { %p36_p11 = scmp.ge.s32.totalorder %s1369_s5, 2  ;;  %p108_p12 = scmp.ne.s32.totalorder %s1058_s14, %s1054_s13 }
  0x1d   : > { %p1212_p13 = por %p89_p10, %p88_p9  ;;  %p114_p1 = scmp.ne.s32.totalorder %s1054_s13, %s1050_s12 }
  0x1e   : > { %s1371_s5 = smov (%p36_p11, %s1369_s5), 0  ;;  %s101_s15 = sadd.s32 1, %s1058_s14 }
  0x1f   : > { %1352 = sst [smem:[#allocation9_spill]] %s1371_s5  ;;  %p1221_p3 = por %p114_p1, %p89_p10 }
  0x20   : > { %s71_s6 = ssub.s32 %s1086_s21, %s1371_s5  ;;  %p1229_p0 = por %p108_p12, %p83_p2 }
  0x21   : > { %s72_s8 = sor.u32 %s71_s6, %s70_s26  ;;  %p99_p5 = scmp.eq.s32.totalorder %s71_s6, 0 }
  0x22   : > { %p73_p6 = scmp.eq.s32.totalorder %s72_s8, 0  ;;  %s203_s12 = sand.u32 1, %s1058_s14  }
  0x23   : > { %s1235_s9 = scalar_select %p99_p5, %s1058_s14, %s101_s15  }
  0x24   : > { %s1240_s10 = scalar_select %p73_p6, %s1070_s17, %s75_s25  }
  0x25   : > { %s209_s28 = scalar_lea.hbm %s1344_s2, %s1086_s21  ;;  %s206_s1 = scalar_lea.vmem [#allocation5], %s203_s12 }
  0x26   : > { %s211_s30 = sshll.u32 %s209_s28, 4  ;;  %s213_s5 = sshll.u32 %s206_s1, 4  ;;  %s212_s30 = int_to_ptr.hbm [resolvable:$true] %s211_s30  ;;  %s214_s5 = int_to_ptr.vmem [resolvable:$true] %s213_s5 }
  0x27   : > { %p839_p2 = pnand %p842_p4, %p1229_p0  ;;  %s204_s26 = scalar_lea.sflag [#allocation6], %s203_s12 }
  0x28   : > { %222 = sbr.rel (%p1197_p8) target bundleno = 244 (0xf4), region = 32  ;;  %s224_s25 = sand.u32 (!%p1197_p8), 1, %s1066_s16  }
  0x29   : > { %841 = dma.hbm_to_vmem [thread:$0]  (!%p839_p2), %s212_s30, 16, %s214_s5, %s204_s26  }
  0x2a   : > { %s830_s15 = smul.u32 (!%p1197_p8), 192, %s224_s25  ;;  %s225_s6 = scalar_lea.sflag (!%p1197_p8), [#allocation4], %s224_s25 }
  0x2c   : > { %s1253_s8 = scalar_lea.vmem (!%p1197_p8), [#allocation3], %s830_s15 }
  0x2d   : > { %1041 = dma.done.wait (%p1212_p13), %s225_s6, 3072  }
  0x2e   : > { %1043 = vsyncadd (%p1212_p13), %s225_s6, 4294964224  ;;  %s234_s1 = sand.u32 1, %s1054_s13  }
  0x2f   : > { %s235_s7 = scalar_lea.sflag [#allocation6], %s234_s1  ;;  %s1260_s5 = scalar_lea.vmem [#allocation5], %s234_s1 }
  0x30   : > { %1045 = dma.done.wait (%p1221_p3), %s235_s7, 16  }
  0x31   : > { %1047 = vsyncadd (%p1221_p3), %s235_s7, 4294967280  ;;  %s277_s29 = smul.u32 3, %s1074_s18  ;;  %p290_p4 = scmp.lt.s32.totalorder %s1078_s19, 1 }
  0x32   : > { %p704_p8 = scmp.ne.s32.totalorder %s1074_s18, 0 }
  0x33   : > { %p280_p7 = scmp.lt.s32.totalorder %s277_s29, 17  ;;  %s1373_s19 = smov (!%p290_p4, %s1078_s19), 1 }
  0x34   : > { %s703_s4 = sshll.u32 %s1373_s19, 2  ;;  %299 = sbr.rel (%p704_p8) target bundleno = 59 (0x3b), region = 44 }
  0x35   : > { %s1375_s29 = smov (!%p280_p7, %s277_s29), 17  ;;  %s1272_s28 = scalar_lea.vmem %s1345_s3, %s703_s4 }
  0x36   : > { %s702_s12 = sshll.u32 %s1375_s29, 2 }
  0x37   : > { %s1277_s24 = scalar_lea.vmem %s1342_s0, %s702_s12 }
  0x39   : > { %v1095_v0 = vmov 0.0  }
  0x3a   : > { %300 = vst [vmem:[#allocation2] sm:$0xff] %v1095_v0 }
  0x3b PF: > { %v812_v1 = vld [vmem:[%s1253_s8 + $0x38] sm:$0xff]  ;;  %v811_v4 = vld [vmem:[%s1253_s8 + $0x30] sm:$0xff]  ;;  %v810_v7 = vld [vmem:[%s1253_s8 + $0x28] sm:$0xff]  ;;  %p801_p9 = scmp.ne.s32.totalorder %s1074_s18, 5 }
  0x3c   : > { %v820_v2 = vld [vmem:[%s1253_s8 + $0x78] sm:$0xff]  ;;  %507 = vmatpush.bf16.msra.mxu0 %v812_v1  ;;  %v819_v5 = vld [vmem:[%s1253_s8 + $0x70] sm:$0xff]  ;;  %v818_v8 = vld [vmem:[%s1253_s8 + $0x68] sm:$0xff] }
  0x3d   : > { %v828_v3 = vld [vmem:[%s1253_s8 + $0xb8] sm:$0xff]  ;;  %520 = vmatpush.bf16.msra.mxu1 %v820_v2  ;;  %v827_v6 = vld [vmem:[%s1253_s8 + $0xb0] sm:$0xff]  ;;  %v826_v9 = vld [vmem:[%s1253_s8 + $0xa8] sm:$0xff] }
  0x3e   : > { %533 = vmatpush.bf16.msra.mxu2 %v828_v3  ;;  %v809_v10 = vld [vmem:[%s1253_s8 + $0x20] sm:$0xff]  ;;  %v808_v13 = vld [vmem:[%s1253_s8 + $0x18] sm:$0xff]  ;;  %v807_v16 = vld [vmem:[%s1253_s8 + $0x10] sm:$0xff] }
  0x3f   : > { %v817_v11 = vld [vmem:[%s1253_s8 + $0x60] sm:$0xff]  ;;  %v816_v14 = vld [vmem:[%s1253_s8 + $0x58] sm:$0xff]  ;;  %v815_v17 = vld [vmem:[%s1253_s8 + $0x50] sm:$0xff] }
  0x40   : > { %508 = vmatpush.bf16.msra.mxu0 %v811_v4  ;;  %v825_v12 = vld [vmem:[%s1253_s8 + $0xa0] sm:$0xff]  ;;  %v824_v15 = vld [vmem:[%s1253_s8 + $0x98] sm:$0xff]  ;;  %v823_v18 = vld [vmem:[%s1253_s8 + $0x90] sm:$0xff] }
  0x41   : > { %521 = vmatpush.bf16.msra.mxu1 %v819_v5  ;;  %v806_v19 = vld [vmem:[%s1253_s8 + $0x8] sm:$0xff]  ;;  %v302_v21 = vld [vmem:[%s1277_s24] sm:$0xff]  ;;  %v303_v23 = vld [vmem:[%s1277_s24 + $0x8] sm:$0xf] }
  0x42   : > { %534 = vmatpush.bf16.msra.mxu2 %v827_v6  ;;  %v814_v20 = vld [vmem:[%s1253_s8 + $0x48] sm:$0xff]  ;;  %v354_v24 = vunpack.c.l.b16 %v302_v21  ;;  %v355_v25 = vunpack.c.h.b16 %v302_v21  ;;  %v805_v26 = vld [vmem:[%s1253_s8] sm:$0xff]  ;;  %v356_v28 = vunpack.c.l.b16 %v303_v23  ;;  %v301_v36 = vld [vmem:[#allocation2] sm:$0xff] }
  0x43   : > { %v822_v22 = vld [vmem:[%s1253_s8 + $0x88] sm:$0xff]  ;;  %v813_v27 = vld [vmem:[%s1253_s8 + $0x40] sm:$0xff] }
  0x44   : > { %509 = vmatpush.bf16.msra.mxu0 %v810_v7  ;;  %v821_v29 = vld [vmem:[%s1253_s8 + $0x80] sm:$0xff]  ;;  %v357_v30 = vpack.c.b16 %v354_v24, %v354_v24  ;;  %v358_v31 = vpack.c.b16 %v355_v25, %v355_v25  ;;  %v359_v32 = vpack.c.b16 %v356_v28, %v356_v28 }
  0x45   : > { %522 = vmatpush.bf16.msra.mxu1 %v818_v8 }
  0x46   : > { %535 = vmatpush.bf16.msra.mxu2 %v826_v9 }
  0x48   : > { %510 = vmatpush.bf16.msra.mxu0 %v809_v10 }
  0x49   : > { %523 = vmatpush.bf16.msra.mxu1 %v817_v11 }
  0x4a   : > { %536 = vmatpush.bf16.msra.mxu2 %v825_v12 }
  0x4c   : > { %511 = vmatpush.bf16.msra.mxu0 %v808_v13 }
  0x4d   : > { %524 = vmatpush.bf16.msra.mxu1 %v816_v14 }
  0x4e   : > { %537 = vmatpush.bf16.msra.mxu2 %v824_v15 }
  0x50   : > { %512 = vmatpush.bf16.msra.mxu0 %v807_v16 }
  0x51   : > { %525 = vmatpush.bf16.msra.mxu1 %v815_v17 }
  0x52   : > { %538 = vmatpush.bf16.msra.mxu2 %v823_v18 }
  0x54   : > { %513 = vmatpush.bf16.msra.mxu0 %v806_v19 }
  0x55   : > { %526 = vmatpush.bf16.msra.mxu1 %v814_v20 }
  0x56   : > { %539 = vmatpush.bf16.msra.mxu2 %v822_v22 }
  0x58   : > { %514 = vmatpush.bf16.msra.mxu0 %v805_v26 }
  0x59   : > { %527 = vmatpush.bf16.msra.mxu1 %v813_v27 }
  0x5a   : > { %540 = vmatpush.bf16.msra.mxu2 %v821_v29 }
  0x5b   : > { %515 = vmatmul.bf16.vlgmr.msra.gmra.mxu0 %v357_v30 }
  0x5c   : > { %528 = vmatmul.bf16.vlgmr.msra.gmra.mxu1 %v358_v31 }
  0x5d   : > { %541 = vmatmul.bf16.vlgmr.msra.gmra.mxu2 %v359_v32 }
  0xd8   : > { %v516_v33 = vpop.f32.mrf.mxu0 }
  0xd9   : > { %v529_v34 = vpop.f32.mrf.mxu1 }
  0xda   : > { %v530_v35 = vadd.f32 %v529_v34, %v516_v33 }
  0xe0   : > { %v542_v37 = vpop.f32.mrf.mxu2  ;;  %v518_v39 = vpop.f32.mrf.mxu0 }
  0xe1   : > { %v543_v38 = vadd.f32 %v542_v37, %v530_v35  ;;  %v531_v40 = vpop.f32.mrf.mxu1 }
  0xe3   : > { %v546_v41 = vadd.f32 %v543_v38, %v301_v36 }
  0xe4   : > { %551 = sbr.rel (%p801_p9) target bundleno = 244 (0xf4), region = 48 }
  0xe5   : > { %547 = vst [vmem:[#allocation2] sm:$0xff] %v546_v41 }
  0xe8   : > { %v544_v42 = vpop.f32.mrf.mxu2 }
  0xe9   : > { %v935_v44 = vld [vmem:[%s1260_s5] ss:$0 sm:$0xff] }
  0xec   : > { %v552_v43 = vld [vmem:[#allocation2] sm:$0xff] }
  0xed   : > { %v557_v45 = vadd.f32 %v935_v44, %v552_v43 }
  0xef   : > { %v558_v46 = vmax.f32 %v557_v45, 0.0 }
  0xf1   : > { %v559_v47 = vpack.c.bf16 %v558_v46, %v558_v46 }
  0xf3   : > { %560 = vst [vmem:[%s1272_s28] sm:$0xf] %v559_v47 }
  0xf4 PF: > { %s19_s22 = sadd.s32 1, %s1090_s22   ;;  %s1355_s25 = sld [smem:[#allocation9_spill]] }
  0xf5   : > { %p16_p10 = scmp.ge.s32.totalorder %s19_s22, 14   ;;  %s1356_s12 = smov %s1054_s13 }
  0xf6   : > { %s1357_s13 = smov %s1058_s14  ;;  %s1358_s14 = smov %s1235_s9 }
  0xf7   : > { %s1359_s15 = smov %s1066_s16  ;;  %s1360_s16 = smov %s1070_s17 }
  0xf8   : > { %s1361_s17 = smov %s1240_s10  ;;  %s1362_s18 = smov %s1082_s20 }
  0xf9   : > { %s1363_s19 = smov %s1086_s21  ;;  %s1364_s20 = smov %s1367_s23 }
  0xfa   : > { %s1365_s21 = smov %s1355_s25  ;;  %18 = sbr.rel (!%p16_p10) target bundleno = 11 (0xb), region = 96 }
  0xff   :  { %588 = vsyncpa [#allocation4], 1 }
 0x100   :  { %590 = vsyncpa [#allocation4 + $0x1], 1 }
 0x101   :  { %591 = vsyncpa [#allocation6], 1 }
 0x102   :  { %593 = vsyncpa [#allocation6 + $0x1], 1 }

// kernel: transfer_learning_resnet18_forward.35
= control target key start
LH: loop header
LB: loop body
LE: loop exit
PB: predicated region body
PF: predicated region fallthrough
CT: control target
= control target key end

     0   :  { %s1433_s0 = inlined_call_operand.vmem [shape: bf16[8,2304], index: 0, kind: input, shape index: {}]   ;;  %s1434_s1 = inlined_call_operand.hbm [shape: bf16[2304,256], index: 1, kind: input, shape index: {}]   ;;  %s1435_s2 = inlined_call_operand.hbm [shape: f32[1,256], index: 2, kind: input, shape index: {}]   ;;  %s1436_s3 = inlined_call_operand.vmem [shape: bf16[8,256], index: 3, kind: input, shape index: {}]   ;;  %s1437_s4 = inlined_call_operand.vmem [shape: bf16[8,256], index: 4, kind: output, shape index: {}]  }
   0x1   :  { %1440 = sst [smem:[#allocation11_spill]] %s1434_s1 }
   0x2   :  { %9 = vsyncpa [#allocation4], 0 }
   0x3   :  { %11 = vsyncpa [#allocation4 + $0x1], 0 }
   0x4   :  { %12 = vsyncpa [#allocation6], 0 }
   0x5   :  { %14 = vsyncpa [#allocation6 + $0x1], 0  ;;  %s1201_s15 = smov 0   ;;  %s1203_s16 = smov 0  }
   0x6   :  { %s1205_s17 = smov 0   ;;  %s1207_s18 = smov 0  }
   0x7   :  { %s1209_s19 = smov 0   ;;  %s1211_s20 = smov 0  }
   0x8   :  { %s1213_s21 = smov 0   ;;  %s1215_s22 = smov 0  }
   0x9   :  { %s1217_s23 = smov 0   ;;  %s1219_s24 = smov 0  }
   0xa   :  { %s1221_s25 = smov 0  }
   0xb LB: > { %s32_s26 = sadd.s32 1, %s1162_s23  ;;  %p83_p1 = scmp.ne.s32.totalorder %s1150_s20, %s1146_s19  ;;  %s1170_s25 = sphi %s1221_s25, %s20_s25   ;;  %s1166_s24 = sphi %s1219_s24, %s1460_s24   ;;  %s1162_s23 = sphi %s1217_s23, %s1459_s23   ;;  %s1158_s22 = sphi %s1215_s22, %s1458_s22   ;;  %s1154_s21 = sphi %s1213_s21, %s1457_s21   ;;  %s1150_s20 = sphi %s1211_s20, %s1456_s20   ;;  %s1146_s19 = sphi %s1209_s19, %s1455_s19   ;;  %s1142_s18 = sphi %s1207_s18, %s1454_s18   ;;  %s1138_s17 = sphi %s1205_s17, %s1453_s17   ;;  %s1134_s16 = sphi %s1203_s16, %s1452_s16   ;;  %s1130_s15 = sphi %s1201_s15, %s1451_s15  }
   0xc   : > { %p1257_p0 = scmp.ge.s32.totalorder %s32_s26, 6  ;;  %p84_p2 = scmp.eq.s32.totalorder %s1170_s25, 0 }
   0xd   : > { %p922_p4 = scmp.lt.s32.totalorder %s1170_s25, 12  ;;  %s76_s28 = sadd.s32 1, %s1150_s20 }
   0xe   : > { %s1462_s26 = smov (%p1257_p0, %s32_s26), 0  ;;  %p85_p3 = por %p84_p2, %p83_p1 }
   0xf   : > { %1442 = sst [smem:[#allocation9_spill]] %s1462_s26  ;;  %s208_s29 = sand.u32 1, %s1150_s20  }
  0x10   : > { %s909_s30 = smul.u32 192, %s208_s29  ;;  %p916_p5 = pnand %p922_p4, %p85_p3 }
  0x11   : > { %s884_s5 = smul.u32 96, %s1162_s23  ;;  %s1443_s1 = sld [smem:[#allocation11_spill]] }
  0x12   : > { %s212_s7 = scalar_lea.vmem [#allocation3], %s909_s30  ;;  %s209_s14 = scalar_lea.sflag [#allocation4], %s208_s29 }
  0x13   : > { %s217_s6 = sadd.s32 %s1166_s24, %s884_s5  ;;  %s222_s8 = sshll.u32 %s212_s7, 4  ;;  %s223_s8 = int_to_ptr.vmem [resolvable:$true] %s222_s8 }
  0x14   : > { %s779_s9 = sshll.u32 %s217_s6, 2  ;;  %s1172_s30 = smov 128  }
  0x15   : > { %s1173_s5 = smov 64   ;;  %s1174_s7 = smov 4  }
  0x16   : > { %p780_p6 = scmp.ge.s32.totalorder %s1170_s25, 1  ;;  %p258_p7 = scmp.lt.s32.totalorder %s1170_s25, 13 }
  0x17   : > { %s219_s12 = scalar_lea.hbm %s1443_s1, %s779_s9  ;;  %s774_s9 = sadd.s32 4294967295, %s1170_s25  }
  0x18   : > { %s220_s13 = sshll.u32 %s219_s12, 4  ;;  %p1282_p8 = pnand %p780_p6, %p258_p7  ;;  %s221_s13 = int_to_ptr.hbm [resolvable:$true] %s220_s13 }
  0x19   : > { %918 = dma.hbm_to_vmem [thread:$0]  (!%p916_p5), %s221_s13, 3072, %s223_s8, %s209_s14, %s1172_s30, %s1173_s5, %s1174_s7  }
  0x1a   : > { %s35_s10 = sadd.s32 1, %s1166_s24  ;;  %p89_p9 = scmp.ne.s32.totalorder %s1146_s19, %s1142_s18 }
  0x1b   : > { %s1464_s10 = smov (!%p1257_p0, %s35_s10), %s1166_s24  ;;  %s71_s29 = ssub.s32 %s1162_s23, %s1462_s26 }
  0x1c   : > { %p90_p10 = scmp.eq.s32.totalorder %s774_s9, 0  ;;  %p37_p11 = scmp.ge.s32.totalorder %s1464_s10, 2 }
  0x1d   : > { %p109_p12 = scmp.ne.s32.totalorder %s1138_s17, %s1134_s16  ;;  %p115_p1 = scmp.ne.s32.totalorder %s1134_s16, %s1130_s15 }
  0x1e   : > { %p1297_p13 = por %p90_p10, %p89_p9  ;;  %s1466_s10 = smov (%p37_p11, %s1464_s10), 0 }
  0x1f   : > { %1446 = sst [smem:[#allocation10_spill]] %s1466_s10  ;;  %s102_s18 = sadd.s32 1, %s1138_s17 }
  0x20   : > { %p1306_p3 = por %p115_p1, %p90_p10  ;;  %s72_s11 = ssub.s32 %s1166_s24, %s1466_s10 }
  0x21   : > { %p1314_p0 = por %p109_p12, %p84_p2  ;;  %s73_s13 = sor.u32 %s72_s11, %s71_s29 }
  0x22   : > { %p100_p5 = scmp.eq.s32.totalorder %s72_s11, 0  ;;  %p74_p6 = scmp.eq.s32.totalorder %s73_s13, 0 }
  0x23   : > { %s232_s15 = sand.u32 1, %s1138_s17   ;;  %s238_s9 = scalar_lea.hbm %s1435_s2, %s1166_s24 }
  0x24   : > { %s1320_s14 = scalar_select %p100_p5, %s1138_s17, %s102_s18  }
  0x25   : > { %s1325_s30 = scalar_select %p74_p6, %s1150_s20, %s76_s28  }
  0x26   : > { %s240_s1 = sshll.u32 %s238_s9, 4  ;;  %s235_s10 = scalar_lea.vmem [#allocation5], %s232_s15  ;;  %s241_s1 = int_to_ptr.hbm [resolvable:$true] %s240_s1 }
  0x27   : > { %s242_s26 = sshll.u32 %s235_s10, 4  ;;  %p919_p2 = pnand %p922_p4, %p1314_p0  ;;  %s243_s26 = int_to_ptr.vmem [resolvable:$true] %s242_s26 }
  0x28   : > { %s233_s29 = scalar_lea.sflag [#allocation6], %s232_s15  ;;  %262 = sbr.rel (%p1282_p8) target bundleno = 247 (0xf7), region = 36 }
  0x29   : > { %921 = dma.hbm_to_vmem [thread:$0]  (!%p919_p2), %s241_s1, 16, %s243_s26, %s233_s29  }
  0x2a   : > { %s264_s28 = sand.u32 (!%p1282_p8), 1, %s1146_s19  }
  0x2b   : > { %s910_s18 = smul.u32 (!%p1282_p8), 192, %s264_s28  ;;  %s265_s11 = scalar_lea.sflag (!%p1282_p8), [#allocation4], %s264_s28 }
  0x2d   : > { %s1338_s13 = scalar_lea.vmem [#allocation3], %s910_s18 }
  0x2e   : > { %1121 = dma.done.wait (%p1297_p13), %s265_s11, 3072  }
  0x2f   : > { %1123 = vsyncadd (%p1297_p13), %s265_s11, 4294964224  ;;  %s274_s10 = sand.u32 1, %s1134_s16  }
  0x30   : > { %s275_s12 = scalar_lea.sflag [#allocation6], %s274_s10  ;;  %s1345_s1 = scalar_lea.vmem [#allocation5], %s274_s10 }
  0x31   : > { %1125 = dma.done.wait (%p1306_p3), %s275_s12, 16  }
  0x32   : > { %1127 = vsyncadd (%p1306_p3), %s275_s12, 4294967280  ;;  %s327_s26 = smul.u32 3, %s1154_s21  ;;  %p340_p4 = scmp.lt.s32.totalorder %s1158_s22, 1 }
  0x33   : > { %p784_p8 = scmp.ne.s32.totalorder %s1154_s21, 0 }
  0x34   : > { %p330_p7 = scmp.lt.s32.totalorder %s327_s26, 17  ;;  %s1468_s22 = smov (!%p340_p4, %s1158_s22), 1 }
  0x35   : > { %s782_s6 = sshll.u32 %s1468_s22, 2  ;;  %357 = sbr.rel (%p784_p8) target bundleno = 60 (0x3c), region = 48 }
  0x36   : > { %s1470_s26 = smov (!%p330_p7, %s327_s26), 17  ;;  %s1357_s7 = scalar_lea.vmem %s1436_s3, %s782_s6 }
  0x37   : > { %s781_s8 = sshll.u32 %s1470_s26, 2  ;;  %s1367_s11 = scalar_lea.vmem %s1437_s4, %s782_s6 }
  0x38   : > { %s1362_s27 = scalar_lea.vmem %s1433_s0, %s781_s8 }
  0x3a   : > { %v1175_v0 = vmov 0.0  }
  0x3b   : > { %358 = vst [vmem:[#allocation2] sm:$0xff] %v1175_v0 }
  0x3c PF: > { %v892_v1 = vld [vmem:[%s1338_s13 + $0x38] sm:$0xff]  ;;  %v891_v4 = vld [vmem:[%s1338_s13 + $0x30] sm:$0xff]  ;;  %v890_v7 = vld [vmem:[%s1338_s13 + $0x28] sm:$0xff]  ;;  %p881_p9 = scmp.ne.s32.totalorder %s1154_s21, 5 }
  0x3d   : > { %v900_v2 = vld [vmem:[%s1338_s13 + $0x78] sm:$0xff]  ;;  %565 = vmatpush.bf16.msra.mxu0 %v892_v1  ;;  %v899_v5 = vld [vmem:[%s1338_s13 + $0x70] sm:$0xff]  ;;  %v898_v8 = vld [vmem:[%s1338_s13 + $0x68] sm:$0xff] }
  0x3e   : > { %v908_v3 = vld [vmem:[%s1338_s13 + $0xb8] sm:$0xff]  ;;  %578 = vmatpush.bf16.msra.mxu1 %v900_v2  ;;  %v907_v6 = vld [vmem:[%s1338_s13 + $0xb0] sm:$0xff]  ;;  %v906_v9 = vld [vmem:[%s1338_s13 + $0xa8] sm:$0xff] }
  0x3f   : > { %591 = vmatpush.bf16.msra.mxu2 %v908_v3  ;;  %v889_v10 = vld [vmem:[%s1338_s13 + $0x20] sm:$0xff]  ;;  %v888_v13 = vld [vmem:[%s1338_s13 + $0x18] sm:$0xff]  ;;  %v887_v16 = vld [vmem:[%s1338_s13 + $0x10] sm:$0xff] }
  0x40   : > { %v897_v11 = vld [vmem:[%s1338_s13 + $0x60] sm:$0xff]  ;;  %v896_v14 = vld [vmem:[%s1338_s13 + $0x58] sm:$0xff]  ;;  %v895_v17 = vld [vmem:[%s1338_s13 + $0x50] sm:$0xff] }
  0x41   : > { %566 = vmatpush.bf16.msra.mxu0 %v891_v4  ;;  %v905_v12 = vld [vmem:[%s1338_s13 + $0xa0] sm:$0xff]  ;;  %v904_v15 = vld [vmem:[%s1338_s13 + $0x98] sm:$0xff]  ;;  %v903_v18 = vld [vmem:[%s1338_s13 + $0x90] sm:$0xff] }
  0x42   : > { %579 = vmatpush.bf16.msra.mxu1 %v899_v5  ;;  %v886_v19 = vld [vmem:[%s1338_s13 + $0x8] sm:$0xff]  ;;  %v360_v21 = vld [vmem:[%s1362_s27] sm:$0xff]  ;;  %v361_v23 = vld [vmem:[%s1362_s27 + $0x8] sm:$0xf] }
  0x43   : > { %592 = vmatpush.bf16.msra.mxu2 %v907_v6  ;;  %v894_v20 = vld [vmem:[%s1338_s13 + $0x48] sm:$0xff]  ;;  %v412_v24 = vunpack.c.l.b16 %v360_v21  ;;  %v413_v25 = vunpack.c.h.b16 %v360_v21  ;;  %v885_v26 = vld [vmem:[%s1338_s13] sm:$0xff]  ;;  %v414_v28 = vunpack.c.l.b16 %v361_v23  ;;  %v359_v36 = vld [vmem:[#allocation2] sm:$0xff] }
  0x44   : > { %v902_v22 = vld [vmem:[%s1338_s13 + $0x88] sm:$0xff]  ;;  %v893_v27 = vld [vmem:[%s1338_s13 + $0x40] sm:$0xff] }
  0x45   : > { %567 = vmatpush.bf16.msra.mxu0 %v890_v7  ;;  %v901_v29 = vld [vmem:[%s1338_s13 + $0x80] sm:$0xff]  ;;  %v415_v30 = vpack.c.b16 %v412_v24, %v412_v24  ;;  %v416_v31 = vpack.c.b16 %v413_v25, %v413_v25  ;;  %v417_v32 = vpack.c.b16 %v414_v28, %v414_v28 }
  0x46   : > { %580 = vmatpush.bf16.msra.mxu1 %v898_v8 }
  0x47   : > { %593 = vmatpush.bf16.msra.mxu2 %v906_v9 }
  0x49   : > { %568 = vmatpush.bf16.msra.mxu0 %v889_v10 }
  0x4a   : > { %581 = vmatpush.bf16.msra.mxu1 %v897_v11 }
  0x4b   : > { %594 = vmatpush.bf16.msra.mxu2 %v905_v12 }
  0x4d   : > { %569 = vmatpush.bf16.msra.mxu0 %v888_v13 }
  0x4e   : > { %582 = vmatpush.bf16.msra.mxu1 %v896_v14 }
  0x4f   : > { %595 = vmatpush.bf16.msra.mxu2 %v904_v15 }
  0x51   : > { %570 = vmatpush.bf16.msra.mxu0 %v887_v16 }
  0x52   : > { %583 = vmatpush.bf16.msra.mxu1 %v895_v17 }
  0x53   : > { %596 = vmatpush.bf16.msra.mxu2 %v903_v18 }
  0x55   : > { %571 = vmatpush.bf16.msra.mxu0 %v886_v19 }
  0x56   : > { %584 = vmatpush.bf16.msra.mxu1 %v894_v20 }
  0x57   : > { %597 = vmatpush.bf16.msra.mxu2 %v902_v22 }
  0x59   : > { %572 = vmatpush.bf16.msra.mxu0 %v885_v26 }
  0x5a   : > { %585 = vmatpush.bf16.msra.mxu1 %v893_v27 }
  0x5b   : > { %598 = vmatpush.bf16.msra.mxu2 %v901_v29 }
  0x5c   : > { %573 = vmatmul.bf16.vlgmr.msra.gmra.mxu0 %v415_v30 }
  0x5d   : > { %586 = vmatmul.bf16.vlgmr.msra.gmra.mxu1 %v416_v31 }
  0x5e   : > { %599 = vmatmul.bf16.vlgmr.msra.gmra.mxu2 %v417_v32 }
  0xd9   : > { %v574_v33 = vpop.f32.mrf.mxu0 }
  0xda   : > { %v587_v34 = vpop.f32.mrf.mxu1 }
  0xdb   : > { %v588_v35 = vadd.f32 %v587_v34, %v574_v33 }
  0xe1   : > { %v600_v37 = vpop.f32.mrf.mxu2  ;;  %v576_v39 = vpop.f32.mrf.mxu0 }
  0xe2   : > { %v601_v38 = vadd.f32 %v600_v37, %v588_v35  ;;  %v589_v40 = vpop.f32.mrf.mxu1 }
  0xe4   : > { %v604_v41 = vadd.f32 %v601_v38, %v359_v36 }
  0xe5   : > { %609 = sbr.rel (%p881_p9) target bundleno = 247 (0xf7), region = 52 }
  0xe6   : > { %605 = vst [vmem:[#allocation2] sm:$0xff] %v604_v41 }
  0xe9   : > { %v602_v42 = vpop.f32.mrf.mxu2 }
  0xea   : > { %v612_v44 = vld [vmem:[%s1357_s7] sm:$0xf] }
  0xeb   : > { %v1015_v45 = vld [vmem:[%s1345_s1] ss:$0 sm:$0xff]  ;;  %v617_v46 = vunpack.c.l.bf16 %v612_v44 }
  0xed   : > { %v610_v43 = vld [vmem:[#allocation2] sm:$0xff] }
  0xee   : > { %v616_v47 = vadd.f32 %v1015_v45, %v610_v43 }
  0xf0   : > { %v618_v48 = vadd.f32 %v617_v46, %v616_v47 }
  0xf2   : > { %v619_v49 = vmax.f32 %v618_v48, 0.0 }
  0xf4   : > { %v620_v50 = vpack.c.bf16 %v619_v49, %v619_v49 }
  0xf6   : > { %621 = vst [vmem:[%s1367_s11] sm:$0xf] %v620_v50 }
  0xf7 PF: > { %s20_s25 = sadd.s32 1, %s1170_s25   ;;  %s1449_s13 = sld [smem:[#allocation9_spill]] }
  0xf8   : > { %p17_p10 = scmp.ge.s32.totalorder %s20_s25, 14   ;;  %s1450_s10 = sld [smem:[#allocation10_spill]] }
  0xf9   : > { %s1451_s15 = smov %s1134_s16  ;;  %s1452_s16 = smov %s1138_s17 }
  0xfa   : > { %s1453_s17 = smov %s1320_s14  ;;  %s1454_s18 = smov %s1146_s19 }
  0xfb   : > { %s1455_s19 = smov %s1150_s20  ;;  %s1456_s20 = smov %s1325_s30 }
  0xfc   : > { %s1457_s21 = smov %s1162_s23  ;;  %s1458_s22 = smov %s1166_s24 }
  0xfd   : > { %s1459_s23 = smov %s1449_s13  ;;  %19 = sbr.rel (!%p17_p10) target bundleno = 11 (0xb), region = 103 }
  0xfe   : > { %s1460_s24 = smov %s1450_s10 }
 0x102   :  { %649 = vsyncpa [#allocation4], 1 }
 0x103   :  { %651 = vsyncpa [#allocation4 + $0x1], 1 }
 0x104   :  { %652 = vsyncpa [#allocation6], 1 }
 0x105   :  { %654 = vsyncpa [#allocation6 + $0x1], 1 }

// kernel: transfer_learning_resnet18_forward.36
= control target key start
LH: loop header
LB: loop body
LE: loop exit
PB: predicated region body
PF: predicated region fallthrough
CT: control target
= control target key end

     0   :  { %8 = vsyncpa [#allocation5], 0  ;;  %s1543_s0 = inlined_call_operand.vmem [shape: bf16[8,2304], index: 0, kind: input, shape index: {}]   ;;  %s1544_s1 = inlined_call_operand.vmem [shape: bf16[2304,512], index: 1, kind: input, shape index: {}]   ;;  %s1545_s2 = inlined_call_operand.hbm [shape: f32[1,512], index: 2, kind: input, shape index: {}]   ;;  %s1546_s3 = inlined_call_operand.vmem [shape: bf16[8,512], index: 3, kind: output, shape index: {}]  }
   0x1   :  { %10 = vsyncpa [#allocation5 + $0x1], 0  ;;  %s1253_s12 = smov 0   ;;  %s1255_s13 = smov 0  }
   0x2   :  { %s1257_s14 = smov 0   ;;  %s1259_s15 = smov 0  }
   0x3   :  { %s1261_s16 = smov 0   ;;  %s1263_s17 = smov 0  }
   0x4   :  { %s1265_s18 = smov 0   ;;  %s1267_s19 = smov 0  }
   0x5   :  { %s1269_s20 = smov 0   ;;  %s1271_s21 = smov 0  }
   0x6 LB: > { %s900_s22 = sadd.s32 4294967295, %s1230_s21   ;;  %s28_s23 = sadd.s32 1, %s1222_s19  ;;  %s1230_s21 = sphi %s1271_s21, %s16_s21   ;;  %s1226_s20 = sphi %s1269_s20, %s1558_s20   ;;  %s1222_s19 = sphi %s1267_s19, %s1557_s19   ;;  %s1218_s18 = sphi %s1265_s18, %s1556_s18   ;;  %s1214_s17 = sphi %s1263_s17, %s1555_s17   ;;  %s1210_s16 = sphi %s1261_s16, %s1554_s16   ;;  %s1206_s15 = sphi %s1259_s15, %s1553_s15   ;;  %s1202_s14 = sphi %s1257_s14, %s1552_s14   ;;  %s1198_s13 = sphi %s1255_s13, %s1551_s13   ;;  %s1194_s12 = sphi %s1253_s12, %s1550_s12  }
   0x7   : > { %p29_p0 = scmp.ge.s32.totalorder %s28_s23, 6  ;;  %s31_s24 = sadd.s32 1, %s1226_s20 }
   0x8   : > { %s72_s25 = sadd.s32 1, %s1210_s16  ;;  %p79_p1 = scmp.ne.s32.totalorder %s1210_s16, %s1206_s15 }
   0x9   : > { %s1560_s23 = smov (%p29_p0, %s28_s23), 0  ;;  %s1562_s24 = smov (!%p29_p0, %s31_s24), %s1226_s20 }
   0xa   : > { %s67_s26 = ssub.s32 %s1222_s19, %s1560_s23  ;;  %p80_p2 = scmp.eq.s32.totalorder %s1230_s21, 0 }
   0xb   : > { %p33_p3 = scmp.ge.s32.totalorder %s1562_s24, 4  ;;  %s98_s27 = sadd.s32 1, %s1202_s14 }
   0xc   : > { %p1316_p4 = por %p80_p2, %p79_p1  ;;  %p105_p5 = scmp.ne.s32.totalorder %s1202_s14, %s1198_s13 }
   0xd   : > { %s1564_s24 = smov (%p33_p3, %s1562_s24), 0  ;;  %p111_p7 = scmp.ne.s32.totalorder %s1198_s13, %s1194_s12 }
   0xe   : > { %p1324_p6 = por %p105_p5, %p80_p2  ;;  %s68_s30 = ssub.s32 %s1226_s20, %s1564_s24 }
   0xf   : > { %p112_p8 = scmp.eq.s32.totalorder %s900_s22, 0  ;;  %s69_s4 = sor.u32 %s68_s30, %s67_s26 }
  0x10   : > { %p96_p9 = scmp.eq.s32.totalorder %s68_s30, 0  ;;  %p70_p10 = scmp.eq.s32.totalorder %s69_s4, 0 }
  0x11   : > { %p1332_p11 = por %p112_p8, %p111_p7  ;;  %p903_p12 = scmp.ge.s32.totalorder %s1230_s21, 24 }
  0x12   : > { %s1337_s6 = scalar_select %p96_p9, %s1202_s14, %s98_s27  }
  0x13   : > { %s1340_s7 = scalar_select %p70_p10, %s1210_s16, %s72_s25  }
  0x14   : > { %159 = sbr.rel (%p903_p12) target bundleno = 84 (0x54), region = 16 }
  0x19   : > { %175 = sbr.rel (!%p1316_p4) target bundleno = 80 (0x50), region = 24  ;;  %s177_s8 = sand.u32 (%p1316_p4), 1, %s1210_s16  }
  0x1a   : > { %s1009_s9 = smul.u32 (%p1316_p4), 192, %s1222_s19 }
  0x1b   : > { %s1034_s10 = smul.u32 (%p1316_p4), 192, %s177_s8 }
  0x1c   : > { %s182_s11 = sadd.s32 (%p1316_p4), %s1226_s20, %s1009_s9 }
  0x1d   : > { %s905_s12 = sshll.u32 (%p1316_p4), %s182_s11, 2  ;;  %s1356_s25 = scalar_lea.vmem (%p1316_p4), [#allocation3], %s1034_s10 }
  0x1e   : > { %s1351_s27 = scalar_lea.vmem %s1544_s1, %s905_s12 }
  0x1f   : > { %v201_v0 = vld [vmem:[%s1351_s27] sm:$0xf]  ;;  %v203_v1 = vld [vmem:[%s1351_s27 + $0x10] sm:$0xf] }
  0x20   : > { %v205_v2 = vld [vmem:[%s1351_s27 + $0x20] sm:$0xf]  ;;  %202 = vst [vmem:[%s1356_s25] sm:$0xf] %v201_v0  ;;  %v207_v3 = vld [vmem:[%s1351_s27 + $0x30] sm:$0xf] }
  0x21   : > { %204 = vst [vmem:[%s1356_s25 + $0x4] sm:$0xf] %v203_v1  ;;  %v209_v4 = vld [vmem:[%s1351_s27 + $0x40] sm:$0xf]  ;;  %v211_v5 = vld [vmem:[%s1351_s27 + $0x50] sm:$0xf] }
  0x22   : > { %206 = vst [vmem:[%s1356_s25 + $0x8] sm:$0xf] %v205_v2  ;;  %v213_v6 = vld [vmem:[%s1351_s27 + $0x60] sm:$0xf]  ;;  %v215_v7 = vld [vmem:[%s1351_s27 + $0x70] sm:$0xf] }
  0x23   : > { %208 = vst [vmem:[%s1356_s25 + $0xc] sm:$0xf] %v207_v3  ;;  %v217_v8 = vld [vmem:[%s1351_s27 + $0x80] sm:$0xf]  ;;  %v219_v9 = vld [vmem:[%s1351_s27 + $0x90] sm:$0xf] }
  0x24   : > { %210 = vst [vmem:[%s1356_s25 + $0x10] sm:$0xf] %v209_v4  ;;  %v221_v10 = vld [vmem:[%s1351_s27 + $0xa0] sm:$0xf]  ;;  %v223_v11 = vld [vmem:[%s1351_s27 + $0xb0] sm:$0xf] }
  0x25   : > { %212 = vst [vmem:[%s1356_s25 + $0x14] sm:$0xf] %v211_v5  ;;  %v225_v12 = vld [vmem:[%s1351_s27 + $0xc0] sm:$0xf]  ;;  %v227_v13 = vld [vmem:[%s1351_s27 + $0xd0] sm:$0xf] }
  0x26   : > { %214 = vst [vmem:[%s1356_s25 + $0x18] sm:$0xf] %v213_v6  ;;  %v229_v14 = vld [vmem:[%s1351_s27 + $0xe0] sm:$0xf]  ;;  %v231_v15 = vld [vmem:[%s1351_s27 + $0xf0] sm:$0xf] }
  0x27   : > { %216 = vst [vmem:[%s1356_s25 + $0x1c] sm:$0xf] %v215_v7  ;;  %v233_v16 = vld [vmem:[%s1351_s27 + $0x100] sm:$0xf]  ;;  %v235_v17 = vld [vmem:[%s1351_s27 + $0x110] sm:$0xf] }
  0x28   : > { %218 = vst [vmem:[%s1356_s25 + $0x20] sm:$0xf] %v217_v8  ;;  %v237_v18 = vld [vmem:[%s1351_s27 + $0x120] sm:$0xf]  ;;  %v239_v19 = vld [vmem:[%s1351_s27 + $0x130] sm:$0xf] }
  0x29   : > { %220 = vst [vmem:[%s1356_s25 + $0x24] sm:$0xf] %v219_v9  ;;  %v241_v20 = vld [vmem:[%s1351_s27 + $0x140] sm:$0xf]  ;;  %v243_v21 = vld [vmem:[%s1351_s27 + $0x150] sm:$0xf] }
  0x2a   : > { %222 = vst [vmem:[%s1356_s25 + $0x28] sm:$0xf] %v221_v10  ;;  %v245_v22 = vld [vmem:[%s1351_s27 + $0x160] sm:$0xf]  ;;  %v247_v23 = vld [vmem:[%s1351_s27 + $0x170] sm:$0xf] }
  0x2b   : > { %224 = vst [vmem:[%s1356_s25 + $0x2c] sm:$0xf] %v223_v11  ;;  %v249_v24 = vld [vmem:[%s1351_s27 + $0x180] sm:$0xf]  ;;  %v251_v25 = vld [vmem:[%s1351_s27 + $0x190] sm:$0xf] }
  0x2c   : > { %226 = vst [vmem:[%s1356_s25 + $0x30] sm:$0xf] %v225_v12  ;;  %v253_v26 = vld [vmem:[%s1351_s27 + $0x1a0] sm:$0xf]  ;;  %v255_v27 = vld [vmem:[%s1351_s27 + $0x1b0] sm:$0xf] }
  0x2d   : > { %228 = vst [vmem:[%s1356_s25 + $0x34] sm:$0xf] %v227_v13  ;;  %v257_v28 = vld [vmem:[%s1351_s27 + $0x1c0] sm:$0xf]  ;;  %v259_v29 = vld [vmem:[%s1351_s27 + $0x1d0] sm:$0xf] }
  0x2e   : > { %230 = vst [vmem:[%s1356_s25 + $0x38] sm:$0xf] %v229_v14  ;;  %v261_v30 = vld [vmem:[%s1351_s27 + $0x1e0] sm:$0xf]  ;;  %v263_v31 = vld [vmem:[%s1351_s27 + $0x1f0] sm:$0xf] }
  0x2f   : > { %232 = vst [vmem:[%s1356_s25 + $0x3c] sm:$0xf] %v231_v15  ;;  %v265_v32 = vld [vmem:[%s1351_s27 + $0x200] sm:$0xf]  ;;  %v267_v33 = vld [vmem:[%s1351_s27 + $0x210] sm:$0xf] }
  0x30   : > { %234 = vst [vmem:[%s1356_s25 + $0x40] sm:$0xf] %v233_v16  ;;  %v269_v34 = vld [vmem:[%s1351_s27 + $0x220] sm:$0xf]  ;;  %v271_v35 = vld [vmem:[%s1351_s27 + $0x230] sm:$0xf] }
  0x31   : > { %236 = vst [vmem:[%s1356_s25 + $0x44] sm:$0xf] %v235_v17  ;;  %v273_v36 = vld [vmem:[%s1351_s27 + $0x240] sm:$0xf]  ;;  %v275_v37 = vld [vmem:[%s1351_s27 + $0x250] sm:$0xf] }
  0x32   : > { %238 = vst [vmem:[%s1356_s25 + $0x48] sm:$0xf] %v237_v18  ;;  %v277_v38 = vld [vmem:[%s1351_s27 + $0x260] sm:$0xf]  ;;  %v279_v39 = vld [vmem:[%s1351_s27 + $0x270] sm:$0xf] }
  0x33   : > { %240 = vst [vmem:[%s1356_s25 + $0x4c] sm:$0xf] %v239_v19  ;;  %v281_v40 = vld [vmem:[%s1351_s27 + $0x280] sm:$0xf]  ;;  %v283_v41 = vld [vmem:[%s1351_s27 + $0x290] sm:$0xf] }
  0x34   : > { %242 = vst [vmem:[%s1356_s25 + $0x50] sm:$0xf] %v241_v20  ;;  %v285_v42 = vld [vmem:[%s1351_s27 + $0x2a0] sm:$0xf]  ;;  %v287_v43 = vld [vmem:[%s1351_s27 + $0x2b0] sm:$0xf] }
  0x35   : > { %244 = vst [vmem:[%s1356_s25 + $0x54] sm:$0xf] %v243_v21  ;;  %v289_v44 = vld [vmem:[%s1351_s27 + $0x2c0] sm:$0xf]  ;;  %v291_v45 = vld [vmem:[%s1351_s27 + $0x2d0] sm:$0xf] }
  0x36   : > { %246 = vst [vmem:[%s1356_s25 + $0x58] sm:$0xf] %v245_v22  ;;  %v293_v46 = vld [vmem:[%s1351_s27 + $0x2e0] sm:$0xf]  ;;  %v295_v47 = vld [vmem:[%s1351_s27 + $0x2f0] sm:$0xf] }
  0x37   : > { %248 = vst [vmem:[%s1356_s25 + $0x5c] sm:$0xf] %v247_v23 }
  0x38   : > { %250 = vst [vmem:[%s1356_s25 + $0x60] sm:$0xf] %v249_v24 }
  0x39   : > { %252 = vst [vmem:[%s1356_s25 + $0x64] sm:$0xf] %v251_v25 }
  0x3a   : > { %254 = vst [vmem:[%s1356_s25 + $0x68] sm:$0xf] %v253_v26 }
  0x3b   : > { %256 = vst [vmem:[%s1356_s25 + $0x6c] sm:$0xf] %v255_v27 }
  0x3c   : > { %258 = vst [vmem:[%s1356_s25 + $0x70] sm:$0xf] %v257_v28 }
  0x3d   : > { %260 = vst [vmem:[%s1356_s25 + $0x74] sm:$0xf] %v259_v29 }
  0x3e   : > { %262 = vst [vmem:[%s1356_s25 + $0x78] sm:$0xf] %v261_v30 }
  0x3f   : > { %264 = vst [vmem:[%s1356_s25 + $0x7c] sm:$0xf] %v263_v31 }
  0x40   : > { %266 = vst [vmem:[%s1356_s25 + $0x80] sm:$0xf] %v265_v32 }
  0x41   : > { %268 = vst [vmem:[%s1356_s25 + $0x84] sm:$0xf] %v267_v33 }
  0x42   : > { %270 = vst [vmem:[%s1356_s25 + $0x88] sm:$0xf] %v269_v34 }
  0x43   : > { %272 = vst [vmem:[%s1356_s25 + $0x8c] sm:$0xf] %v271_v35 }
  0x44   : > { %274 = vst [vmem:[%s1356_s25 + $0x90] sm:$0xf] %v273_v36 }
  0x45   : > { %276 = vst [vmem:[%s1356_s25 + $0x94] sm:$0xf] %v275_v37 }
  0x46   : > { %278 = vst [vmem:[%s1356_s25 + $0x98] sm:$0xf] %v277_v38 }
  0x47   : > { %280 = vst [vmem:[%s1356_s25 + $0x9c] sm:$0xf] %v279_v39 }
  0x48   : > { %282 = vst [vmem:[%s1356_s25 + $0xa0] sm:$0xf] %v281_v40 }
  0x49   : > { %284 = vst [vmem:[%s1356_s25 + $0xa4] sm:$0xf] %v283_v41 }
  0x4a   : > { %286 = vst [vmem:[%s1356_s25 + $0xa8] sm:$0xf] %v285_v42 }
  0x4b   : > { %288 = vst [vmem:[%s1356_s25 + $0xac] sm:$0xf] %v287_v43 }
  0x4c   : > { %290 = vst [vmem:[%s1356_s25 + $0xb0] sm:$0xf] %v289_v44 }
  0x4d   : > { %292 = vst [vmem:[%s1356_s25 + $0xb4] sm:$0xf] %v291_v45 }
  0x4e   : > { %294 = vst [vmem:[%s1356_s25 + $0xb8] sm:$0xf] %v293_v46 }
  0x4f   : > { %296 = vst [vmem:[%s1356_s25 + $0xbc] sm:$0xf] %v295_v47 }
  0x50 PF: > { %s417_s28 = sand.u32 1, %s1202_s14   ;;  %s423_s8 = scalar_lea.hbm %s1545_s2, %s1226_s20 }
  0x51   : > { %s425_s9 = sshll.u32 %s423_s8, 4  ;;  %s420_s10 = scalar_lea.vmem [#allocation4], %s417_s28  ;;  %s426_s9 = int_to_ptr.hbm [resolvable:$true] %s425_s9 }
  0x52   : > { %s427_s11 = sshll.u32 %s420_s10, 4  ;;  %s418_s12 = scalar_lea.sflag [#allocation5], %s417_s28  ;;  %s428_s11 = int_to_ptr.vmem [resolvable:$true] %s427_s11 }
  0x53   : > { %1036 = dma.hbm_to_vmem [thread:$0]  (%p1324_p6), %s426_s9, 16, %s428_s11, %s418_s12  }
  0x54 PF: > { %p906_p13 = scmp.ge.s32.totalorder %s1230_s21, 1  ;;  %p432_p0 = scmp.lt.s32.totalorder %s1230_s21, 25 }
  0x56   : > { %p433_p1 = pnand %p906_p13, %p432_p0 }
  0x57   : > { %s439_s22 = sand.u32 (!%p433_p1), 1, %s1206_s15   ;;  %s445_s26 = sand.u32 (!%p433_p1), 1, %s1198_s13  }
  0x58   : > { %436 = sbr.rel (%p433_p1) target bundleno = 289 (0x121), region = 69  ;;  %s446_s30 = scalar_lea.sflag (!%p433_p1), [#allocation5], %s445_s26 }
  0x59   : > { %s1035_s27 = smul.u32 (!%p433_p1), 192, %s439_s22  ;;  %s1464_s4 = scalar_lea.vmem (!%p433_p1), [#allocation4], %s445_s26 }
  0x5b   : > { %s1462_s25 = scalar_lea.vmem (!%p433_p1), [#allocation3], %s1035_s27 }
  0x5d   : > { %1189 = dma.done.wait (%p1332_p11), %s446_s30, 16  }
  0x5e   : > { %1191 = vsyncadd (%p1332_p11), %s446_s30, 4294967280  ;;  %s487_s29 = smul.u32 3, %s1214_s17  ;;  %p500_p2 = scmp.lt.s32.totalorder %s1218_s18, 3 }
  0x5f   : > { %p909_p4 = scmp.ne.s32.totalorder %s1214_s17, 0 }
  0x60   : > { %p490_p3 = scmp.lt.s32.totalorder %s487_s29, 17  ;;  %s1566_s18 = smov (!%p500_p2, %s1218_s18), 3 }
  0x61   : > { %s908_s15 = sshll.u32 %s1566_s18, 2  ;;  %509 = sbr.rel (%p909_p4) target bundleno = 104 (0x68), region = 81 }
  0x62   : > { %s1568_s29 = smov (!%p490_p3, %s487_s29), 17  ;;  %s1476_s10 = scalar_lea.vmem %s1546_s3, %s908_s15 }
  0x63   : > { %s907_s28 = sshll.u32 %s1568_s29, 2 }
  0x64   : > { %s1481_s5 = scalar_lea.vmem %s1543_s0, %s907_s28 }
  0x66   : > { %v1232_v48 = vmov 0.0  }
  0x67   : > { %510 = vst [vmem:[#allocation2] sm:$0xff] %v1232_v48 }
  0x68 PF: > { %v1017_v49 = vld [vmem:[%s1462_s25 + $0x38] sm:$0xff]  ;;  %v1016_v52 = vld [vmem:[%s1462_s25 + $0x30] sm:$0xff]  ;;  %v1015_v55 = vld [vmem:[%s1462_s25 + $0x28] sm:$0xff]  ;;  %p1006_p5 = scmp.ne.s32.totalorder %s1214_s17, 5 }
  0x69   : > { %v1025_v50 = vld [vmem:[%s1462_s25 + $0x78] sm:$0xff]  ;;  %717 = vmatpush.bf16.msra.mxu0 %v1017_v49  ;;  %v1024_v53 = vld [vmem:[%s1462_s25 + $0x70] sm:$0xff]  ;;  %v1023_v56 = vld [vmem:[%s1462_s25 + $0x68] sm:$0xff] }
  0x6a   : > { %v1033_v51 = vld [vmem:[%s1462_s25 + $0xb8] sm:$0xff]  ;;  %730 = vmatpush.bf16.msra.mxu1 %v1025_v50  ;;  %v1032_v54 = vld [vmem:[%s1462_s25 + $0xb0] sm:$0xff]  ;;  %v1031_v57 = vld [vmem:[%s1462_s25 + $0xa8] sm:$0xff] }
  0x6b   : > { %743 = vmatpush.bf16.msra.mxu2 %v1033_v51  ;;  %v1014_v58 = vld [vmem:[%s1462_s25 + $0x20] sm:$0xff]  ;;  %v1013_v61 = vld [vmem:[%s1462_s25 + $0x18] sm:$0xff]  ;;  %v1012_v0 = vld [vmem:[%s1462_s25 + $0x10] sm:$0xff] }
  0x6c   : > { %v1022_v59 = vld [vmem:[%s1462_s25 + $0x60] sm:$0xff]  ;;  %v1021_v62 = vld [vmem:[%s1462_s25 + $0x58] sm:$0xff]  ;;  %v1020_v1 = vld [vmem:[%s1462_s25 + $0x50] sm:$0xff] }
  0x6d   : > { %718 = vmatpush.bf16.msra.mxu0 %v1016_v52  ;;  %v1030_v60 = vld [vmem:[%s1462_s25 + $0xa0] sm:$0xff]  ;;  %v1029_v63 = vld [vmem:[%s1462_s25 + $0x98] sm:$0xff]  ;;  %v1028_v2 = vld [vmem:[%s1462_s25 + $0x90] sm:$0xff] }
  0x6e   : > { %731 = vmatpush.bf16.msra.mxu1 %v1024_v53  ;;  %v1011_v3 = vld [vmem:[%s1462_s25 + $0x8] sm:$0xff]  ;;  %v512_v5 = vld [vmem:[%s1481_s5] sm:$0xff]  ;;  %v513_v7 = vld [vmem:[%s1481_s5 + $0x8] sm:$0xf] }
  0x6f   : > { %744 = vmatpush.bf16.msra.mxu2 %v1032_v54  ;;  %v1019_v4 = vld [vmem:[%s1462_s25 + $0x48] sm:$0xff]  ;;  %v564_v8 = vunpack.c.l.b16 %v512_v5  ;;  %v565_v9 = vunpack.c.h.b16 %v512_v5  ;;  %v1010_v10 = vld [vmem:[%s1462_s25] sm:$0xff]  ;;  %v566_v12 = vunpack.c.l.b16 %v513_v7  ;;  %v511_v20 = vld [vmem:[#allocation2] sm:$0xff] }
  0x70   : > { %v1027_v6 = vld [vmem:[%s1462_s25 + $0x88] sm:$0xff]  ;;  %v1018_v11 = vld [vmem:[%s1462_s25 + $0x40] sm:$0xff] }
  0x71   : > { %719 = vmatpush.bf16.msra.mxu0 %v1015_v55  ;;  %v1026_v13 = vld [vmem:[%s1462_s25 + $0x80] sm:$0xff]  ;;  %v567_v14 = vpack.c.b16 %v564_v8, %v564_v8  ;;  %v568_v15 = vpack.c.b16 %v565_v9, %v565_v9  ;;  %v569_v16 = vpack.c.b16 %v566_v12, %v566_v12 }
  0x72   : > { %732 = vmatpush.bf16.msra.mxu1 %v1023_v56 }
  0x73   : > { %745 = vmatpush.bf16.msra.mxu2 %v1031_v57 }
  0x75   : > { %720 = vmatpush.bf16.msra.mxu0 %v1014_v58 }
  0x76   : > { %733 = vmatpush.bf16.msra.mxu1 %v1022_v59 }
  0x77   : > { %746 = vmatpush.bf16.msra.mxu2 %v1030_v60 }
  0x79   : > { %721 = vmatpush.bf16.msra.mxu0 %v1013_v61 }
  0x7a   : > { %734 = vmatpush.bf16.msra.mxu1 %v1021_v62 }
  0x7b   : > { %747 = vmatpush.bf16.msra.mxu2 %v1029_v63 }
  0x7d   : > { %722 = vmatpush.bf16.msra.mxu0 %v1012_v0 }
  0x7e   : > { %735 = vmatpush.bf16.msra.mxu1 %v1020_v1 }
  0x7f   : > { %748 = vmatpush.bf16.msra.mxu2 %v1028_v2 }
  0x81   : > { %723 = vmatpush.bf16.msra.mxu0 %v1011_v3 }
  0x82   : > { %736 = vmatpush.bf16.msra.mxu1 %v1019_v4 }
  0x83   : > { %749 = vmatpush.bf16.msra.mxu2 %v1027_v6 }
  0x85   : > { %724 = vmatpush.bf16.msra.mxu0 %v1010_v10 }
  0x86   : > { %737 = vmatpush.bf16.msra.mxu1 %v1018_v11 }
  0x87   : > { %750 = vmatpush.bf16.msra.mxu2 %v1026_v13 }
  0x88   : > { %725 = vmatmul.bf16.vlgmr.msra.gmra.mxu0 %v567_v14 }
  0x89   : > { %738 = vmatmul.bf16.vlgmr.msra.gmra.mxu1 %v568_v15 }
  0x8a   : > { %751 = vmatmul.bf16.vlgmr.msra.gmra.mxu2 %v569_v16 }
 0x105   : > { %v726_v17 = vpop.f32.mrf.mxu0 }
 0x106   : > { %v739_v18 = vpop.f32.mrf.mxu1 }
 0x107   : > { %v740_v19 = vadd.f32 %v739_v18, %v726_v17 }
 0x10d   : > { %v752_v21 = vpop.f32.mrf.mxu2  ;;  %v728_v23 = vpop.f32.mrf.mxu0 }
 0x10e   : > { %v753_v22 = vadd.f32 %v752_v21, %v740_v19  ;;  %v741_v24 = vpop.f32.mrf.mxu1 }
 0x110   : > { %v756_v25 = vadd.f32 %v753_v22, %v511_v20 }
 0x111   : > { %761 = sbr.rel (%p1006_p5) target bundleno = 289 (0x121), region = 85 }
 0x112   : > { %757 = vst [vmem:[#allocation2] sm:$0xff] %v756_v25 }
 0x115   : > { %v754_v26 = vpop.f32.mrf.mxu2 }
 0x116   : > { %v1119_v28 = vld [vmem:[%s1464_s4] ss:$0 sm:$0xff] }
 0x119   : > { %v762_v27 = vld [vmem:[#allocation2] sm:$0xff] }
 0x11a   : > { %v767_v29 = vadd.f32 %v1119_v28, %v762_v27 }
 0x11c   : > { %v768_v30 = vmax.f32 %v767_v29, 0.0 }
 0x11e   : > { %v769_v31 = vpack.c.bf16 %v768_v30, %v768_v30 }
 0x120   : > { %770 = vst [vmem:[%s1476_s10] sm:$0xf] %v769_v31 }
 0x121 PF: > { %s16_s21 = sadd.s32 1, %s1230_s21   ;;  %s1550_s12 = smov %s1198_s13 }
 0x122   : > { %p13_p6 = scmp.ge.s32.totalorder %s16_s21, 26   ;;  %s1551_s13 = smov %s1202_s14 }
 0x123   : > { %s1552_s14 = smov %s1337_s6  ;;  %s1553_s15 = smov %s1210_s16 }
 0x124   : > { %s1554_s16 = smov %s1340_s7  ;;  %s1555_s17 = smov %s1222_s19 }
 0x125   : > { %s1556_s18 = smov %s1226_s20  ;;  %s1557_s19 = smov %s1560_s23 }
 0x126   : > { %s1558_s20 = smov %s1564_s24  ;;  %15 = sbr.rel (!%p13_p6) target bundleno = 6 (0x6), region = 132 }
 0x12b   :  { %798 = vsyncpa [#allocation5], 1 }
 0x12c   :  { %800 = vsyncpa [#allocation5 + $0x1], 1 }

// kernel: transfer_learning_resnet18_forward.38
= control target key start
LH: loop header
LB: loop body
LE: loop exit
PB: predicated region body
PF: predicated region fallthrough
CT: control target
= control target key end

     0   :  { %9 = vsyncpa [#allocation4], 0  ;;  %s1383_s0 = inlined_call_operand.vmem [shape: bf16[8,4608], index: 0, kind: input, shape index: {}]   ;;  %s1384_s1 = inlined_call_operand.hbm [shape: bf16[4608,512], index: 1, kind: input, shape index: {}]   ;;  %s1385_s2 = inlined_call_operand.vmem [shape: f32[1,512], index: 2, kind: input, shape index: {}]   ;;  %s1386_s3 = inlined_call_operand.vmem [shape: bf16[8,512], index: 3, kind: input, shape index: {}]   ;;  %s1387_s4 = inlined_call_operand.vmem [shape: bf16[8,512], index: 4, kind: output, shape index: {}]  }
   0x1   :  { %11 = vsyncpa [#allocation4 + $0x1], 0  ;;  %s1205_s15 = smov 0   ;;  %s1207_s16 = smov 0  }
   0x2   :  { %s1209_s17 = smov 0   ;;  %s1211_s18 = smov 0  }
   0x3   :  { %s1213_s19 = smov 0   ;;  %s1215_s20 = smov 0  }
   0x4   :  { %s1217_s21 = smov 0   ;;  %s1219_s22 = smov 0  }
   0x5 LB: > { %s823_s23 = sadd.s32 4294967295, %s1174_s22   ;;  %s29_s24 = sadd.s32 1, %s1166_s20  ;;  %s1174_s22 = sphi %s1219_s22, %s17_s22   ;;  %s1170_s21 = sphi %s1217_s21, %s1399_s21   ;;  %s1166_s20 = sphi %s1215_s20, %s1398_s20   ;;  %s1162_s19 = sphi %s1213_s19, %s1397_s19   ;;  %s1158_s18 = sphi %s1211_s18, %s1396_s18   ;;  %s1154_s17 = sphi %s1209_s17, %s1395_s17   ;;  %s1150_s16 = sphi %s1207_s16, %s1394_s16   ;;  %s1146_s15 = sphi %s1205_s15, %s1393_s15  }
   0x6   : > { %p30_p0 = scmp.ge.s32.totalorder %s29_s24, 9  ;;  %s32_s25 = sadd.s32 1, %s1170_s21 }
   0x7   : > { %s73_s26 = sadd.s32 1, %s1154_s17  ;;  %p80_p1 = scmp.ne.s32.totalorder %s1154_s17, %s1150_s16 }
   0x8   : > { %s1401_s24 = smov (%p30_p0, %s29_s24), 0  ;;  %s1403_s25 = smov (!%p30_p0, %s32_s25), %s1170_s21 }
   0x9   : > { %s68_s27 = ssub.s32 %s1166_s20, %s1401_s24  ;;  %p81_p2 = scmp.eq.s32.totalorder %s1174_s22, 0 }
   0xa   : > { %p34_p3 = scmp.ge.s32.totalorder %s1403_s25, 4  ;;  %p86_p4 = scmp.ne.s32.totalorder %s1150_s16, %s1146_s15 }
   0xb   : > { %p1256_p5 = por %p81_p2, %p80_p1  ;;  %p87_p6 = scmp.eq.s32.totalorder %s823_s23, 0 }
   0xc   : > { %s1405_s25 = smov (%p34_p3, %s1403_s25), 0  ;;  %p1008_p8 = scmp.lt.s32.totalorder %s1174_s22, 36 }
   0xd   : > { %1390 = sst [smem:[#allocation6_spill]] %s1405_s25  ;;  %p1262_p7 = por %p87_p6, %p86_p4 }
   0xe   : > { %s69_s30 = ssub.s32 %s1170_s21, %s1405_s25  ;;  %s205_s6 = sand.u32 1, %s1154_s17  }
   0xf   : > { %s70_s5 = sor.u32 %s69_s30, %s68_s27  ;;  %s827_s7 = sshll.u32 %s205_s6, 8 }
  0x10   : > { %p71_p9 = scmp.eq.s32.totalorder %s70_s5, 0  ;;  %s969_s8 = sshll.u32 %s1166_s20, 8 }
  0x11   : > { %s214_s10 = sadd.s32 %s1170_s21, %s969_s8  ;;  %s209_s12 = scalar_lea.vmem [#allocation3], %s827_s7 }
  0x12   : > { %s1272_s9 = scalar_select %p71_p9, %s1154_s17, %s73_s26  }
  0x13   : > { %s830_s11 = sshll.u32 %s214_s10, 2  ;;  %s219_s13 = sshll.u32 %s209_s12, 4  ;;  %s220_s13 = int_to_ptr.vmem [resolvable:$true] %s219_s13 }
  0x14   : > { %s216_s23 = scalar_lea.hbm %s1384_s1, %s830_s11  ;;  %p1005_p10 = pnand %p1008_p8, %p1256_p5 }
  0x15   : > { %s217_s25 = sshll.u32 %s216_s23, 4  ;;  %p831_p11 = scmp.ge.s32.totalorder %s1174_s22, 1  ;;  %s218_s25 = int_to_ptr.hbm [resolvable:$true] %s217_s25 }
  0x16   : > { %s206_s27 = scalar_lea.sflag [#allocation4], %s205_s6  ;;  %s1176_s30 = smov 256  }
  0x17   : > { %s1177_s26 = smov 64   ;;  %s1178_s5 = smov 4  }
  0x18   : > { %1007 = dma.hbm_to_vmem [thread:$0]  (!%p1005_p10), %s218_s25, 4096, %s220_s13, %s206_s27, %s1176_s30, %s1177_s26, %s1178_s5  }
  0x19   : > { %p244_p12 = scmp.lt.s32.totalorder %s1174_s22, 37 }
  0x1b   : > { %p245_p13 = pnand %p831_p11, %p244_p12 }
  0x1c   : > { %s250_s7 = sand.u32 (!%p245_p13), 1, %s1150_s16  }
  0x1d   : > { %248 = sbr.rel (%p245_p13) target bundleno = 237 (0xed), region = 36  ;;  %s832_s8 = sshll.u32 (!%p245_p13), %s250_s7, 8 }
  0x1e   : > { %s251_s10 = scalar_lea.sflag (!%p245_p13), [#allocation4], %s250_s7  ;;  %s1285_s11 = scalar_lea.vmem (!%p245_p13), [#allocation3], %s832_s8 }
  0x22   : > { %1141 = dma.done.wait (%p1262_p7), %s251_s10, 4096  }
  0x23   : > { %1143 = vsyncadd (%p1262_p7), %s251_s10, 4294963200  ;;  %s833_s28 = sshll.u32 %s1158_s18, 2  ;;  %p314_p0 = scmp.lt.s32.totalorder %s1162_s19, 3 }
  0x24   : > { %p306_p1 = scmp.lt.s32.totalorder %s833_s28, 35  ;;  %p837_p2 = scmp.ne.s32.totalorder %s1158_s18, 0 }
  0x25   : > { %s1407_s19 = smov (!%p314_p0, %s1162_s19), 3 }
  0x26   : > { %s1409_s28 = smov (!%p306_p1, %s833_s28), 35  ;;  %s316_s12 = scalar_lea.vmem %s1385_s2, %s1407_s19 }
  0x27   : > { %s835_s13 = sshll.u32 %s1407_s19, 2  ;;  %s834_s14 = sshll.u32 %s1409_s28, 2 }
  0x28   : > { %s1304_s23 = scalar_lea.vmem %s1386_s3, %s835_s13  ;;  %s1309_s26 = scalar_lea.vmem %s1383_s0, %s834_s14 }
  0x29   : > { %s1314_s8 = scalar_lea.vmem %s1387_s4, %s835_s13  ;;  %336 = sbr.rel (%p837_p2) target bundleno = 48 (0x30), region = 44 }
  0x2e   : > { %v1179_v0 = vmov 0.0  }
  0x2f   : > { %337 = vst [vmem:[#allocation2] sm:$0xff] %v1179_v0 }
  0x30 PF: > { %v977_v1 = vld [vmem:[%s1285_s11 + $0x38] sm:$0xff]  ;;  %v976_v5 = vld [vmem:[%s1285_s11 + $0x30] sm:$0xff]  ;;  %v975_v9 = vld [vmem:[%s1285_s11 + $0x28] sm:$0xff]  ;;  %p966_p3 = scmp.ne.s32.totalorder %s1158_s18, 8 }
  0x31   : > { %v985_v2 = vld [vmem:[%s1285_s11 + $0x78] sm:$0xff]  ;;  %611 = vmatpush.bf16.msra.mxu0 %v977_v1  ;;  %v984_v6 = vld [vmem:[%s1285_s11 + $0x70] sm:$0xff]  ;;  %v983_v10 = vld [vmem:[%s1285_s11 + $0x68] sm:$0xff] }
  0x32   : > { %v993_v3 = vld [vmem:[%s1285_s11 + $0xb8] sm:$0xff]  ;;  %624 = vmatpush.bf16.msra.mxu1 %v985_v2  ;;  %v992_v7 = vld [vmem:[%s1285_s11 + $0xb0] sm:$0xff]  ;;  %v991_v11 = vld [vmem:[%s1285_s11 + $0xa8] sm:$0xff] }
  0x33   : > { %v1001_v4 = vld [vmem:[%s1285_s11 + $0xf8] sm:$0xff]  ;;  %637 = vmatpush.bf16.msra.mxu2 %v993_v3  ;;  %v1000_v8 = vld [vmem:[%s1285_s11 + $0xf0] sm:$0xff]  ;;  %v999_v12 = vld [vmem:[%s1285_s11 + $0xe8] sm:$0xff] }
  0x34   : > { %650 = vmatpush.bf16.msra.mxu3 %v1001_v4  ;;  %v974_v13 = vld [vmem:[%s1285_s11 + $0x20] sm:$0xff]  ;;  %v973_v17 = vld [vmem:[%s1285_s11 + $0x18] sm:$0xff]  ;;  %v972_v21 = vld [vmem:[%s1285_s11 + $0x10] sm:$0xff] }
  0x35   : > { %612 = vmatpush.bf16.msra.mxu0 %v976_v5  ;;  %v982_v14 = vld [vmem:[%s1285_s11 + $0x60] sm:$0xff]  ;;  %v981_v18 = vld [vmem:[%s1285_s11 + $0x58] sm:$0xff]  ;;  %v980_v22 = vld [vmem:[%s1285_s11 + $0x50] sm:$0xff] }
  0x36   : > { %625 = vmatpush.bf16.msra.mxu1 %v984_v6  ;;  %v990_v15 = vld [vmem:[%s1285_s11 + $0xa0] sm:$0xff]  ;;  %v989_v19 = vld [vmem:[%s1285_s11 + $0x98] sm:$0xff]  ;;  %v988_v23 = vld [vmem:[%s1285_s11 + $0x90] sm:$0xff] }
  0x37   : > { %638 = vmatpush.bf16.msra.mxu2 %v992_v7  ;;  %v998_v16 = vld [vmem:[%s1285_s11 + $0xe0] sm:$0xff]  ;;  %v997_v20 = vld [vmem:[%s1285_s11 + $0xd8] sm:$0xff]  ;;  %v996_v24 = vld [vmem:[%s1285_s11 + $0xd0] sm:$0xff] }
  0x38   : > { %651 = vmatpush.bf16.msra.mxu3 %v1000_v8  ;;  %v971_v25 = vld [vmem:[%s1285_s11 + $0x8] sm:$0xff]  ;;  %v339_v27 = vld [vmem:[%s1309_s26] sm:$0xff]  ;;  %v340_v30 = vld [vmem:[%s1309_s26 + $0x8] sm:$0xff] }
  0x39   : > { %613 = vmatpush.bf16.msra.mxu0 %v975_v9  ;;  %v979_v26 = vld [vmem:[%s1285_s11 + $0x48] sm:$0xff]  ;;  %v407_v31 = vunpack.c.l.b16 %v339_v27  ;;  %v408_v32 = vunpack.c.h.b16 %v339_v27  ;;  %v970_v33 = vld [vmem:[%s1285_s11] sm:$0xff]  ;;  %v409_v35 = vunpack.c.l.b16 %v340_v30  ;;  %v410_v36 = vunpack.c.h.b16 %v340_v30  ;;  %v338_v51 = vld [vmem:[#allocation2] sm:$0xff] }
  0x3a   : > { %626 = vmatpush.bf16.msra.mxu1 %v983_v10  ;;  %v987_v28 = vld [vmem:[%s1285_s11 + $0x88] sm:$0xff]  ;;  %v978_v34 = vld [vmem:[%s1285_s11 + $0x40] sm:$0xff] }
  0x3b   : > { %639 = vmatpush.bf16.msra.mxu2 %v991_v11  ;;  %v995_v29 = vld [vmem:[%s1285_s11 + $0xc8] sm:$0xff]  ;;  %v986_v37 = vld [vmem:[%s1285_s11 + $0x80] sm:$0xff]  ;;  %v411_v39 = vpack.c.b16 %v407_v31, %v407_v31  ;;  %v412_v40 = vpack.c.b16 %v408_v32, %v408_v32  ;;  %v413_v41 = vpack.c.b16 %v409_v35, %v409_v35  ;;  %v414_v42 = vpack.c.b16 %v410_v36, %v410_v36 }
  0x3c   : > { %652 = vmatpush.bf16.msra.mxu3 %v999_v12  ;;  %v994_v38 = vld [vmem:[%s1285_s11 + $0xc0] sm:$0xff] }
  0x3d   : > { %614 = vmatpush.bf16.msra.mxu0 %v974_v13 }
  0x3e   : > { %627 = vmatpush.bf16.msra.mxu1 %v982_v14 }
  0x3f   : > { %640 = vmatpush.bf16.msra.mxu2 %v990_v15 }
  0x40   : > { %653 = vmatpush.bf16.msra.mxu3 %v998_v16 }
  0x41   : > { %615 = vmatpush.bf16.msra.mxu0 %v973_v17 }
  0x42   : > { %628 = vmatpush.bf16.msra.mxu1 %v981_v18 }
  0x43   : > { %641 = vmatpush.bf16.msra.mxu2 %v989_v19 }
  0x44   : > { %654 = vmatpush.bf16.msra.mxu3 %v997_v20 }
  0x45   : > { %616 = vmatpush.bf16.msra.mxu0 %v972_v21 }
  0x46   : > { %629 = vmatpush.bf16.msra.mxu1 %v980_v22 }
  0x47   : > { %642 = vmatpush.bf16.msra.mxu2 %v988_v23 }
  0x48   : > { %655 = vmatpush.bf16.msra.mxu3 %v996_v24 }
  0x49   : > { %617 = vmatpush.bf16.msra.mxu0 %v971_v25 }
  0x4a   : > { %630 = vmatpush.bf16.msra.mxu1 %v979_v26 }
  0x4b   : > { %643 = vmatpush.bf16.msra.mxu2 %v987_v28 }
  0x4c   : > { %656 = vmatpush.bf16.msra.mxu3 %v995_v29 }
  0x4d   : > { %618 = vmatpush.bf16.msra.mxu0 %v970_v33 }
  0x4e   : > { %631 = vmatpush.bf16.msra.mxu1 %v978_v34 }
  0x4f   : > { %644 = vmatpush.bf16.msra.mxu2 %v986_v37 }
  0x50   : > { %657 = vmatpush.bf16.msra.mxu3 %v994_v38  ;;  %619 = vmatmul.bf16.vlgmr.msra.gmra.mxu0 %v411_v39 }
  0x51   : > { %632 = vmatmul.bf16.vlgmr.msra.gmra.mxu1 %v412_v40 }
  0x52   : > { %645 = vmatmul.bf16.vlgmr.msra.gmra.mxu2 %v413_v41 }
  0x53   : > { %658 = vmatmul.bf16.vlgmr.msra.gmra.mxu3 %v414_v42 }
  0xcd   : > { %v620_v43 = vpop.f32.mrf.mxu0 }
  0xce   : > { %v633_v44 = vpop.f32.mrf.mxu1 }
  0xcf   : > { %v634_v45 = vadd.f32 %v633_v44, %v620_v43 }
  0xd5   : > { %v646_v46 = vpop.f32.mrf.mxu2  ;;  %v622_v49 = vpop.f32.mrf.mxu0 }
  0xd6   : > { %v659_v47 = vpop.f32.mrf.mxu3  ;;  %v647_v48 = vadd.f32 %v646_v46, %v634_v45  ;;  %v635_v50 = vpop.f32.mrf.mxu1 }
  0xd8   : > { %v660_v52 = vadd.f32 %v659_v47, %v647_v48 }
  0xda   : > { %v663_v53 = vadd.f32 %v660_v52, %v338_v51  ;;  %668 = sbr.rel (%p966_p3) target bundleno = 237 (0xed), region = 48 }
  0xdc   : > { %664 = vst [vmem:[#allocation2] sm:$0xff] %v663_v53 }
  0xdd   : > { %v648_v54 = vpop.f32.mrf.mxu2 }
  0xde   : > { %v661_v55 = vpop.f32.mrf.mxu3 }
  0xdf   : > { %v671_v57 = vld [vmem:[%s1304_s23] sm:$0xf] }
  0xe0   : > { %v1077_v58 = vld [vmem:[%s316_s12] ss:$0 sm:$0xff]  ;;  %v676_v59 = vunpack.c.l.bf16 %v671_v57 }
  0xe3   : > { %v669_v56 = vld [vmem:[#allocation2] sm:$0xff] }
  0xe4   : > { %v675_v60 = vadd.f32 %v1077_v58, %v669_v56 }
  0xe6   : > { %v677_v61 = vadd.f32 %v676_v59, %v675_v60 }
  0xe8   : > { %v678_v62 = vmax.f32 %v677_v61, 0.0 }
  0xea   : > { %v679_v63 = vpack.c.bf16 %v678_v62, %v678_v62 }
  0xec   : > { %680 = vst [vmem:[%s1314_s8] sm:$0xf] %v679_v63 }
  0xed PF: > { %s17_s22 = sadd.s32 1, %s1174_s22   ;;  %s1392_s28 = sld [smem:[#allocation6_spill]] }
  0xee   : > { %p14_p4 = scmp.ge.s32.totalorder %s17_s22, 38   ;;  %s1393_s15 = smov %s1150_s16 }
  0xef   : > { %s1394_s16 = smov %s1154_s17  ;;  %s1395_s17 = smov %s1272_s9 }
  0xf0   : > { %s1396_s18 = smov %s1166_s20  ;;  %s1397_s19 = smov %s1170_s21 }
  0xf1   : > { %s1398_s20 = smov %s1401_s24  ;;  %16 = sbr.rel (!%p14_p4) target bundleno = 5 (0x5), region = 93 }
  0xf3   : > { %s1399_s21 = smov %s1392_s28 }
  0xf6   :  { %708 = vsyncpa [#allocation4], 1 }
  0xf7   :  { %710 = vsyncpa [#allocation4 + $0x1], 1 }

// kernel: transfer_learning_resnet18_forward.37
= control target key start
LH: loop header
LB: loop body
LE: loop exit
PB: predicated region body
PF: predicated region fallthrough
CT: control target
= control target key end

     0   :  { %8 = vsyncpa [#allocation4], 0  ;;  %s1173_s0 = inlined_call_operand.vmem [shape: bf16[8,256], index: 0, kind: input, shape index: {}]   ;;  %s1174_s1 = inlined_call_operand.vmem [shape: bf16[256,512], index: 1, kind: input, shape index: {}]   ;;  %s1175_s2 = inlined_call_operand.hbm [shape: f32[1,512], index: 2, kind: input, shape index: {}]   ;;  %s1176_s3 = inlined_call_operand.vmem [shape: bf16[8,512], index: 3, kind: output, shape index: {}]  }
   0x1   :  { %10 = vsyncpa [#allocation4 + $0x1], 0  ;;  %s982_s12 = smov 0   ;;  %s984_s13 = smov 0  }
   0x2   :  { %s986_s14 = smov 0   ;;  %s988_s15 = smov 0  }
   0x3   :  { %s990_s16 = smov 0   ;;  %s992_s17 = smov 0  }
   0x4 LB: > { %s739_s18 = sadd.s32 4294967295, %s960_s17   ;;  %s31_s19 = sadd.s32 1, %s956_s16  ;;  %s960_s17 = sphi %s992_s17, %s16_s17   ;;  %s956_s16 = sphi %s990_s16, %s1183_s16   ;;  %s952_s15 = sphi %s988_s15, %s1182_s15   ;;  %s948_s14 = sphi %s986_s14, %s1181_s14   ;;  %s944_s13 = sphi %s984_s13, %s1180_s13   ;;  %s940_s12 = sphi %s982_s12, %s1179_s12  }
   0x5   : > { %p33_p0 = scmp.ge.s32.totalorder %s31_s19, 4  ;;  %s72_s20 = sadd.s32 1, %s948_s14 }
   0x6   : > { %p79_p1 = scmp.ne.s32.totalorder %s948_s14, %s944_s13  ;;  %p80_p2 = scmp.eq.s32.totalorder %s960_s17, 0 }
   0x7   : > { %s1185_s19 = smov (%p33_p0, %s31_s19), 0  ;;  %p111_p4 = scmp.ne.s32.totalorder %s944_s13, %s940_s12 }
   0x8   : > { %p1018_p3 = por %p80_p2, %p79_p1  ;;  %s68_s22 = ssub.s32 %s956_s16, %s1185_s19 }
   0x9   : > { %p112_p5 = scmp.eq.s32.totalorder %s739_s18, 0  ;;  %p70_p6 = scmp.eq.s32.totalorder %s68_s22, 0 }
   0xa   : > { %p743_p8 = scmp.ge.s32.totalorder %s960_s17, 4 }
   0xb   : > { %p1025_p7 = por %p112_p5, %p111_p4 }
   0xc   : > { %s1030_s24 = scalar_select %p70_p6, %s948_s14, %s72_s20  }
   0xd   : > { %172 = sbr.rel (%p743_p8) target bundleno = 58 (0x3a), region = 20 }
  0x12   : > { %175 = sbr.rel (!%p1018_p3) target bundleno = 54 (0x36), region = 24  ;;  %s177_s25 = sand.u32 (%p1018_p3), 1, %s948_s14  }
  0x13   : > { %s745_s26 = sshll.u32 (%p1018_p3), %s956_s16, 2  ;;  %s744_s27 = sshll.u32 (%p1018_p3), %s177_s25, 7 }
  0x14   : > { %s1040_s30 = scalar_lea.vmem (%p1018_p3), %s1174_s1, %s745_s26  ;;  %s1044_s4 = scalar_lea.vmem (%p1018_p3), [#allocation2], %s744_s27 }
  0x15   : > { %v201_v0 = vld [vmem:[%s1040_s30] sm:$0xf] (%p1018_p3)  ;;  %v203_v1 = vld [vmem:[%s1040_s30 + $0x10] sm:$0xf] (%p1018_p3) }
  0x16   : > { %202 = vst [vmem:[%s1044_s4] sm:$0xf] (%p1018_p3), %v201_v0  ;;  %v205_v2 = vld [vmem:[%s1040_s30 + $0x20] sm:$0xf] (%p1018_p3)  ;;  %v207_v3 = vld [vmem:[%s1040_s30 + $0x30] sm:$0xf] (%p1018_p3) }
  0x17   : > { %204 = vst [vmem:[%s1044_s4 + $0x4] sm:$0xf] %v203_v1  ;;  %v209_v4 = vld [vmem:[%s1040_s30 + $0x40] sm:$0xf]  ;;  %v211_v5 = vld [vmem:[%s1040_s30 + $0x50] sm:$0xf] }
  0x18   : > { %206 = vst [vmem:[%s1044_s4 + $0x8] sm:$0xf] %v205_v2  ;;  %v213_v6 = vld [vmem:[%s1040_s30 + $0x60] sm:$0xf]  ;;  %v215_v7 = vld [vmem:[%s1040_s30 + $0x70] sm:$0xf] }
  0x19   : > { %208 = vst [vmem:[%s1044_s4 + $0xc] sm:$0xf] %v207_v3  ;;  %v217_v8 = vld [vmem:[%s1040_s30 + $0x80] sm:$0xf]  ;;  %v219_v9 = vld [vmem:[%s1040_s30 + $0x90] sm:$0xf] }
  0x1a   : > { %210 = vst [vmem:[%s1044_s4 + $0x10] sm:$0xf] %v209_v4  ;;  %v221_v10 = vld [vmem:[%s1040_s30 + $0xa0] sm:$0xf]  ;;  %v223_v11 = vld [vmem:[%s1040_s30 + $0xb0] sm:$0xf] }
  0x1b   : > { %212 = vst [vmem:[%s1044_s4 + $0x14] sm:$0xf] %v211_v5  ;;  %v225_v12 = vld [vmem:[%s1040_s30 + $0xc0] sm:$0xf]  ;;  %v227_v13 = vld [vmem:[%s1040_s30 + $0xd0] sm:$0xf] }
  0x1c   : > { %214 = vst [vmem:[%s1044_s4 + $0x18] sm:$0xf] %v213_v6  ;;  %v229_v14 = vld [vmem:[%s1040_s30 + $0xe0] sm:$0xf]  ;;  %v231_v15 = vld [vmem:[%s1040_s30 + $0xf0] sm:$0xf] }
  0x1d   : > { %216 = vst [vmem:[%s1044_s4 + $0x1c] sm:$0xf] %v215_v7  ;;  %v233_v16 = vld [vmem:[%s1040_s30 + $0x100] sm:$0xf]  ;;  %v235_v17 = vld [vmem:[%s1040_s30 + $0x110] sm:$0xf] }
  0x1e   : > { %218 = vst [vmem:[%s1044_s4 + $0x20] sm:$0xf] %v217_v8  ;;  %v237_v18 = vld [vmem:[%s1040_s30 + $0x120] sm:$0xf]  ;;  %v239_v19 = vld [vmem:[%s1040_s30 + $0x130] sm:$0xf] }
  0x1f   : > { %220 = vst [vmem:[%s1044_s4 + $0x24] sm:$0xf] %v219_v9  ;;  %v241_v20 = vld [vmem:[%s1040_s30 + $0x140] sm:$0xf]  ;;  %v243_v21 = vld [vmem:[%s1040_s30 + $0x150] sm:$0xf] }
  0x20   : > { %222 = vst [vmem:[%s1044_s4 + $0x28] sm:$0xf] %v221_v10  ;;  %v245_v22 = vld [vmem:[%s1040_s30 + $0x160] sm:$0xf]  ;;  %v247_v23 = vld [vmem:[%s1040_s30 + $0x170] sm:$0xf] }
  0x21   : > { %224 = vst [vmem:[%s1044_s4 + $0x2c] sm:$0xf] %v223_v11  ;;  %v249_v24 = vld [vmem:[%s1040_s30 + $0x180] sm:$0xf]  ;;  %v251_v25 = vld [vmem:[%s1040_s30 + $0x190] sm:$0xf] }
  0x22   : > { %226 = vst [vmem:[%s1044_s4 + $0x30] sm:$0xf] %v225_v12  ;;  %v253_v26 = vld [vmem:[%s1040_s30 + $0x1a0] sm:$0xf]  ;;  %v255_v27 = vld [vmem:[%s1040_s30 + $0x1b0] sm:$0xf] }
  0x23   : > { %228 = vst [vmem:[%s1044_s4 + $0x34] sm:$0xf] %v227_v13  ;;  %v257_v28 = vld [vmem:[%s1040_s30 + $0x1c0] sm:$0xf]  ;;  %v259_v29 = vld [vmem:[%s1040_s30 + $0x1d0] sm:$0xf] }
  0x24   : > { %230 = vst [vmem:[%s1044_s4 + $0x38] sm:$0xf] %v229_v14  ;;  %v261_v30 = vld [vmem:[%s1040_s30 + $0x1e0] sm:$0xf]  ;;  %v263_v31 = vld [vmem:[%s1040_s30 + $0x1f0] sm:$0xf] }
  0x25   : > { %232 = vst [vmem:[%s1044_s4 + $0x3c] sm:$0xf] %v231_v15 }
  0x26   : > { %234 = vst [vmem:[%s1044_s4 + $0x40] sm:$0xf] %v233_v16 }
  0x27   : > { %236 = vst [vmem:[%s1044_s4 + $0x44] sm:$0xf] %v235_v17 }
  0x28   : > { %238 = vst [vmem:[%s1044_s4 + $0x48] sm:$0xf] %v237_v18 }
  0x29   : > { %240 = vst [vmem:[%s1044_s4 + $0x4c] sm:$0xf] %v239_v19 }
  0x2a   : > { %242 = vst [vmem:[%s1044_s4 + $0x50] sm:$0xf] %v241_v20 }
  0x2b   : > { %244 = vst [vmem:[%s1044_s4 + $0x54] sm:$0xf] %v243_v21 }
  0x2c   : > { %246 = vst [vmem:[%s1044_s4 + $0x58] sm:$0xf] %v245_v22 }
  0x2d   : > { %248 = vst [vmem:[%s1044_s4 + $0x5c] sm:$0xf] %v247_v23 }
  0x2e   : > { %250 = vst [vmem:[%s1044_s4 + $0x60] sm:$0xf] %v249_v24 }
  0x2f   : > { %252 = vst [vmem:[%s1044_s4 + $0x64] sm:$0xf] %v251_v25 }
  0x30   : > { %254 = vst [vmem:[%s1044_s4 + $0x68] sm:$0xf] %v253_v26 }
  0x31   : > { %256 = vst [vmem:[%s1044_s4 + $0x6c] sm:$0xf] %v255_v27 }
  0x32   : > { %258 = vst [vmem:[%s1044_s4 + $0x70] sm:$0xf] %v257_v28 }
  0x33   : > { %260 = vst [vmem:[%s1044_s4 + $0x74] sm:$0xf] %v259_v29 }
  0x34   : > { %262 = vst [vmem:[%s1044_s4 + $0x78] sm:$0xf] %v261_v30 }
  0x35   : > { %264 = vst [vmem:[%s1044_s4 + $0x7c] sm:$0xf] %v263_v31 }
  0x36 PF: > { %s353_s5 = sand.u32 1, %s948_s14   ;;  %s359_s8 = scalar_lea.hbm %s1175_s2, %s956_s16 }
  0x37   : > { %s361_s9 = sshll.u32 %s359_s8, 4  ;;  %s356_s10 = scalar_lea.vmem [#allocation3], %s353_s5  ;;  %s362_s9 = int_to_ptr.hbm [resolvable:$true] %s361_s9 }
  0x38   : > { %s363_s11 = sshll.u32 %s356_s10, 4  ;;  %s354_s12 = scalar_lea.sflag [#allocation4], %s353_s5  ;;  %s364_s11 = int_to_ptr.vmem [resolvable:$true] %s363_s11 }
  0x39   : > { %831 = dma.hbm_to_vmem [thread:$0]  (%p1018_p3), %s362_s9, 16, %s364_s11, %s354_s12  }
  0x3a PF: > { %p746_p9 = scmp.ge.s32.totalorder %s960_s17, 1  ;;  %p368_p10 = scmp.lt.s32.totalorder %s960_s17, 5 }
  0x3c   : > { %p369_p11 = pnand %p746_p9, %p368_p10 }
  0x3d   : > { %s1118_s18 = sand.u32 (!%p369_p11), 1, %s944_s13  }
  0x3e   : > { %372 = sbr.rel (%p369_p11) target bundleno = 235 (0xeb), region = 69  ;;  %s747_s20 = sshll.u32 (!%p369_p11), %s1118_s18, 7 }
  0x3f   : > { %s1121_s22 = scalar_lea.vmem (!%p369_p11), [#allocation2], %s747_s20  ;;  %s382_s25 = scalar_lea.sflag (!%p369_p11), [#allocation4], %s1118_s18 }
  0x40   : > { %s384_s21 = scalar_lea.vmem (!%p369_p11), [#allocation3], %s1118_s18 }
  0x43   : > { %935 = dma.done.wait (%p1025_p7), %s382_s25, 16  }
  0x44   : > { %937 = vsyncadd (%p1025_p7), %s382_s25, 4294967280  ;;  %v822_v32 = vld [vmem:[%s1121_s22 + $0x38] sm:$0xff]  ;;  %v821_v34 = vld [vmem:[%s1121_s22 + $0x30] sm:$0xff]  ;;  %p436_p12 = scmp.lt.s32.totalorder %s952_s15, 3 }
  0x45   : > { %v830_v33 = vld [vmem:[%s1121_s22 + $0x78] sm:$0xff]  ;;  %582 = vmatpush.bf16.msra.mxu0 %v822_v32  ;;  %v829_v35 = vld [vmem:[%s1121_s22 + $0x70] sm:$0xff]  ;;  %v820_v36 = vld [vmem:[%s1121_s22 + $0x28] sm:$0xff] }
  0x46   : > { %595 = vmatpush.bf16.msra.mxu1 %v830_v33  ;;  %v828_v37 = vld [vmem:[%s1121_s22 + $0x68] sm:$0xff]  ;;  %v819_v38 = vld [vmem:[%s1121_s22 + $0x20] sm:$0xff]  ;;  %v818_v40 = vld [vmem:[%s1121_s22 + $0x18] sm:$0xff]  ;;  %s1187_s15 = smov (!%p436_p12, %s952_s15), 3 }
  0x47   : > { %v827_v39 = vld [vmem:[%s1121_s22 + $0x60] sm:$0xff]  ;;  %v826_v41 = vld [vmem:[%s1121_s22 + $0x58] sm:$0xff]  ;;  %v817_v42 = vld [vmem:[%s1121_s22 + $0x10] sm:$0xff]  ;;  %s748_s27 = sshll.u32 %s1187_s15, 2 }
  0x48   : > { %v825_v43 = vld [vmem:[%s1121_s22 + $0x50] sm:$0xff]  ;;  %v816_v44 = vld [vmem:[%s1121_s22 + $0x8] sm:$0xff]  ;;  %v442_v46 = vld [vmem:[%s1173_s0] sm:$0xff]  ;;  %s441_s30 = scalar_lea.vmem %s1176_s3, %s748_s27 }
  0x49   : > { %583 = vmatpush.bf16.msra.mxu0 %v821_v34  ;;  %v824_v45 = vld [vmem:[%s1121_s22 + $0x48] sm:$0xff]  ;;  %v480_v47 = vunpack.c.l.b16 %v442_v46  ;;  %v481_v48 = vunpack.c.h.b16 %v442_v46  ;;  %v815_v49 = vld [vmem:[%s1121_s22] sm:$0xff] }
  0x4a   : > { %596 = vmatpush.bf16.msra.mxu1 %v829_v35  ;;  %v823_v50 = vld [vmem:[%s1121_s22 + $0x40] sm:$0xff] }
  0x4b   : > { %v482_v51 = vpack.c.b16 %v480_v47, %v480_v47  ;;  %v483_v52 = vpack.c.b16 %v481_v48, %v481_v48  ;;  %v881_v53 = vld [vmem:[%s384_s21] ss:$0 sm:$0xff] }
  0x4d   : > { %584 = vmatpush.bf16.msra.mxu0 %v820_v36 }
  0x4e   : > { %597 = vmatpush.bf16.msra.mxu1 %v828_v37 }
  0x51   : > { %585 = vmatpush.bf16.msra.mxu0 %v819_v38 }
  0x52   : > { %598 = vmatpush.bf16.msra.mxu1 %v827_v39 }
  0x55   : > { %586 = vmatpush.bf16.msra.mxu0 %v818_v40 }
  0x56   : > { %599 = vmatpush.bf16.msra.mxu1 %v826_v41 }
  0x59   : > { %587 = vmatpush.bf16.msra.mxu0 %v817_v42 }
  0x5a   : > { %600 = vmatpush.bf16.msra.mxu1 %v825_v43 }
  0x5d   : > { %588 = vmatpush.bf16.msra.mxu0 %v816_v44 }
  0x5e   : > { %601 = vmatpush.bf16.msra.mxu1 %v824_v45 }
  0x61   : > { %589 = vmatpush.bf16.msra.mxu0 %v815_v49 }
  0x62   : > { %602 = vmatpush.bf16.msra.mxu1 %v823_v50 }
  0x64   : > { %590 = vmatmul.bf16.vlgmr.msra.gmra.mxu0 %v482_v51 }
  0x65   : > { %603 = vmatmul.bf16.vlgmr.msra.gmra.mxu1 %v483_v52 }
  0xe1   : > { %v591_v54 = vpop.f32.mrf.mxu0 }
  0xe2   : > { %v604_v55 = vpop.f32.mrf.mxu1  ;;  %v592_v56 = vadd.f32 %v881_v53, %v591_v54 }
  0xe4   : > { %v605_v57 = vadd.f32 %v604_v55, %v592_v56 }
  0xe6   : > { %v608_v58 = vpack.c.bf16 %v605_v57, %v605_v57 }
  0xe8   : > { %609 = vst [vmem:[%s441_s30] sm:$0xf] %v608_v58 }
  0xe9   : > { %v593_v59 = vpop.f32.mrf.mxu0 }
  0xea   : > { %v606_v60 = vpop.f32.mrf.mxu1 }
  0xeb PF: > { %s16_s17 = sadd.s32 1, %s960_s17   ;;  %s1179_s12 = smov %s944_s13 }
  0xec   : > { %p13_p13 = scmp.ge.s32.totalorder %s16_s17, 6   ;;  %s1180_s13 = smov %s948_s14 }
  0xed   : > { %s1181_s14 = smov %s1030_s24  ;;  %s1182_s15 = smov %s956_s16 }
  0xee   : > { %s1183_s16 = smov %s1185_s19  ;;  %15 = sbr.rel (!%p13_p13) target bundleno = 4 (0x4), region = 124 }
  0xf3   :  { %637 = vsyncpa [#allocation4], 1 }
  0xf4   :  { %639 = vsyncpa [#allocation4 + $0x1], 1 }

// kernel: transfer_learning_resnet18_forward.39
= control target key start
LH: loop header
LB: loop body
LE: loop exit
PB: predicated region body
PF: predicated region fallthrough
CT: control target
= control target key end

     0   :  { %8 = vsyncpa [#allocation4], 0  ;;  %s1292_s0 = inlined_call_operand.vmem [shape: bf16[8,4608], index: 0, kind: input, shape index: {}]   ;;  %s1293_s1 = inlined_call_operand.hbm [shape: bf16[4608,512], index: 1, kind: input, shape index: {}]   ;;  %s1294_s2 = inlined_call_operand.vmem [shape: f32[1,512], index: 2, kind: input, shape index: {}]   ;;  %s1295_s3 = inlined_call_operand.vmem [shape: bf16[8,512], index: 3, kind: output, shape index: {}]  }
   0x1   :  { %10 = vsyncpa [#allocation4 + $0x1], 0  ;;  %s1120_s12 = smov 0   ;;  %s1122_s13 = smov 0  }
   0x2   :  { %s1124_s14 = smov 0   ;;  %s1126_s15 = smov 0  }
   0x3   :  { %s1128_s16 = smov 0   ;;  %s1130_s17 = smov 0  }
   0x4   :  { %s1132_s18 = smov 0   ;;  %s1134_s19 = smov 0  }
   0x5 LB: > { %s744_s20 = sadd.s32 4294967295, %s1094_s19   ;;  %s28_s21 = sadd.s32 1, %s1086_s17  ;;  %s1094_s19 = sphi %s1134_s19, %s16_s19   ;;  %s1090_s18 = sphi %s1132_s18, %s1304_s18   ;;  %s1086_s17 = sphi %s1130_s17, %s1303_s17   ;;  %s1082_s16 = sphi %s1128_s16, %s1302_s16   ;;  %s1078_s15 = sphi %s1126_s15, %s1301_s15   ;;  %s1074_s14 = sphi %s1124_s14, %s1300_s14   ;;  %s1070_s13 = sphi %s1122_s13, %s1299_s13   ;;  %s1066_s12 = sphi %s1120_s12, %s1298_s12  }
   0x6   : > { %p29_p0 = scmp.ge.s32.totalorder %s28_s21, 9  ;;  %s31_s22 = sadd.s32 1, %s1090_s18 }
   0x7   : > { %s72_s23 = sadd.s32 1, %s1074_s14  ;;  %p79_p1 = scmp.ne.s32.totalorder %s1074_s14, %s1070_s13 }
   0x8   : > { %s1306_s21 = smov (%p29_p0, %s28_s21), 0  ;;  %s1308_s22 = smov (!%p29_p0, %s31_s22), %s1090_s18 }
   0x9   : > { %s67_s24 = ssub.s32 %s1086_s17, %s1306_s21  ;;  %p80_p2 = scmp.eq.s32.totalorder %s1094_s19, 0 }
   0xa   : > { %p33_p3 = scmp.ge.s32.totalorder %s1308_s22, 4  ;;  %p85_p4 = scmp.ne.s32.totalorder %s1070_s13, %s1066_s12 }
   0xb   : > { %p1171_p5 = por %p80_p2, %p79_p1  ;;  %p86_p6 = scmp.eq.s32.totalorder %s744_s20, 0 }
   0xc   : > { %s1310_s22 = smov (%p33_p3, %s1308_s22), 0  ;;  %p928_p8 = scmp.lt.s32.totalorder %s1094_s19, 36 }
   0xd   : > { %p1177_p7 = por %p86_p6, %p85_p4  ;;  %s68_s27 = ssub.s32 %s1090_s18, %s1310_s22 }
   0xe   : > { %s69_s28 = sor.u32 %s68_s27, %s67_s24  ;;  %s176_s29 = sand.u32 1, %s1074_s14  }
   0xf   : > { %p70_p9 = scmp.eq.s32.totalorder %s69_s28, 0  ;;  %s748_s30 = sshll.u32 %s176_s29, 8 }
  0x10   : > { %s889_s4 = sshll.u32 %s1086_s17, 8  ;;  %s180_s8 = scalar_lea.vmem [#allocation3], %s748_s30 }
  0x11   : > { %s1187_s5 = scalar_select %p70_p9, %s1074_s14, %s72_s23  }
  0x12   : > { %s185_s6 = sadd.s32 %s1090_s18, %s889_s4  ;;  %s190_s9 = sshll.u32 %s180_s8, 4  ;;  %s191_s9 = int_to_ptr.vmem [resolvable:$true] %s190_s9 }
  0x13   : > { %s751_s7 = sshll.u32 %s185_s6, 2  ;;  %p925_p10 = pnand %p928_p8, %p1171_p5 }
  0x14   : > { %s187_s12 = scalar_lea.hbm %s1293_s1, %s751_s7  ;;  %p752_p11 = scmp.ge.s32.totalorder %s1094_s19, 1 }
  0x15   : > { %s188_s20 = sshll.u32 %s187_s12, 4  ;;  %s177_s24 = scalar_lea.sflag [#allocation4], %s176_s29  ;;  %s189_s20 = int_to_ptr.hbm [resolvable:$true] %s188_s20 }
  0x16   : > { %s1096_s27 = smov 256   ;;  %s1097_s23 = smov 64  }
  0x17   : > { %s1098_s28 = smov 4   ;;  %p204_p12 = scmp.lt.s32.totalorder %s1094_s19, 37 }
  0x18   : > { %927 = dma.hbm_to_vmem [thread:$0]  (!%p925_p10), %s189_s20, 4096, %s191_s9, %s177_s24, %s1096_s27, %s1097_s23, %s1098_s28  }
  0x19   : > { %p205_p13 = pnand %p752_p11, %p204_p12 }
  0x1a   : > { %s210_s30 = sand.u32 (!%p205_p13), 1, %s1070_s13  }
  0x1b   : > { %208 = sbr.rel (%p205_p13) target bundleno = 233 (0xe9), region = 32  ;;  %s753_s4 = sshll.u32 (!%p205_p13), %s210_s30, 8 }
  0x1c   : > { %s211_s6 = scalar_lea.sflag (!%p205_p13), [#allocation4], %s210_s30  ;;  %s1200_s7 = scalar_lea.vmem (!%p205_p13), [#allocation3], %s753_s4 }
  0x20   : > { %1061 = dma.done.wait (%p1177_p7), %s211_s6, 4096  }
  0x21   : > { %1063 = vsyncadd (%p1177_p7), %s211_s6, 4294963200  ;;  %s754_s25 = sshll.u32 %s1078_s15, 2  ;;  %p264_p0 = scmp.lt.s32.totalorder %s1082_s16, 3 }
  0x22   : > { %p256_p1 = scmp.lt.s32.totalorder %s754_s25, 35  ;;  %p757_p2 = scmp.ne.s32.totalorder %s1078_s15, 0 }
  0x23   : > { %s1312_s16 = smov (!%p264_p0, %s1082_s16), 3 }
  0x24   : > { %s1314_s25 = smov (!%p256_p1, %s754_s25), 35  ;;  %s266_s9 = scalar_lea.vmem %s1294_s2, %s1312_s16 }
  0x25   : > { %s756_s10 = sshll.u32 %s1312_s16, 2  ;;  %s755_s11 = sshll.u32 %s1314_s25, 2 }
  0x26   : > { %s1219_s20 = scalar_lea.vmem %s1295_s3, %s756_s10  ;;  %s1224_s23 = scalar_lea.vmem %s1292_s0, %s755_s11 }
  0x27   : > { %278 = sbr.rel (%p757_p2) target bundleno = 46 (0x2e), region = 40 }
  0x2c   : > { %v1099_v0 = vmov 0.0  }
  0x2d   : > { %279 = vst [vmem:[#allocation2] sm:$0xff] %v1099_v0 }
  0x2e PF: > { %v897_v1 = vld [vmem:[%s1200_s7 + $0x38] sm:$0xff]  ;;  %v896_v5 = vld [vmem:[%s1200_s7 + $0x30] sm:$0xff]  ;;  %v895_v9 = vld [vmem:[%s1200_s7 + $0x28] sm:$0xff]  ;;  %p886_p3 = scmp.ne.s32.totalorder %s1078_s15, 8 }
  0x2f   : > { %v905_v2 = vld [vmem:[%s1200_s7 + $0x78] sm:$0xff]  ;;  %553 = vmatpush.bf16.msra.mxu0 %v897_v1  ;;  %v904_v6 = vld [vmem:[%s1200_s7 + $0x70] sm:$0xff]  ;;  %v903_v10 = vld [vmem:[%s1200_s7 + $0x68] sm:$0xff] }
  0x30   : > { %v913_v3 = vld [vmem:[%s1200_s7 + $0xb8] sm:$0xff]  ;;  %566 = vmatpush.bf16.msra.mxu1 %v905_v2  ;;  %v912_v7 = vld [vmem:[%s1200_s7 + $0xb0] sm:$0xff]  ;;  %v911_v11 = vld [vmem:[%s1200_s7 + $0xa8] sm:$0xff] }
  0x31   : > { %v921_v4 = vld [vmem:[%s1200_s7 + $0xf8] sm:$0xff]  ;;  %579 = vmatpush.bf16.msra.mxu2 %v913_v3  ;;  %v920_v8 = vld [vmem:[%s1200_s7 + $0xf0] sm:$0xff]  ;;  %v919_v12 = vld [vmem:[%s1200_s7 + $0xe8] sm:$0xff] }
  0x32   : > { %592 = vmatpush.bf16.msra.mxu3 %v921_v4  ;;  %v894_v13 = vld [vmem:[%s1200_s7 + $0x20] sm:$0xff]  ;;  %v893_v17 = vld [vmem:[%s1200_s7 + $0x18] sm:$0xff]  ;;  %v892_v21 = vld [vmem:[%s1200_s7 + $0x10] sm:$0xff] }
  0x33   : > { %554 = vmatpush.bf16.msra.mxu0 %v896_v5  ;;  %v902_v14 = vld [vmem:[%s1200_s7 + $0x60] sm:$0xff]  ;;  %v901_v18 = vld [vmem:[%s1200_s7 + $0x58] sm:$0xff]  ;;  %v900_v22 = vld [vmem:[%s1200_s7 + $0x50] sm:$0xff] }
  0x34   : > { %567 = vmatpush.bf16.msra.mxu1 %v904_v6  ;;  %v910_v15 = vld [vmem:[%s1200_s7 + $0xa0] sm:$0xff]  ;;  %v909_v19 = vld [vmem:[%s1200_s7 + $0x98] sm:$0xff]  ;;  %v908_v23 = vld [vmem:[%s1200_s7 + $0x90] sm:$0xff] }
  0x35   : > { %580 = vmatpush.bf16.msra.mxu2 %v912_v7  ;;  %v918_v16 = vld [vmem:[%s1200_s7 + $0xe0] sm:$0xff]  ;;  %v917_v20 = vld [vmem:[%s1200_s7 + $0xd8] sm:$0xff]  ;;  %v916_v24 = vld [vmem:[%s1200_s7 + $0xd0] sm:$0xff] }
  0x36   : > { %593 = vmatpush.bf16.msra.mxu3 %v920_v8  ;;  %v891_v25 = vld [vmem:[%s1200_s7 + $0x8] sm:$0xff]  ;;  %v281_v27 = vld [vmem:[%s1224_s23] sm:$0xff]  ;;  %v282_v30 = vld [vmem:[%s1224_s23 + $0x8] sm:$0xff] }
  0x37   : > { %555 = vmatpush.bf16.msra.mxu0 %v895_v9  ;;  %v899_v26 = vld [vmem:[%s1200_s7 + $0x48] sm:$0xff]  ;;  %v349_v31 = vunpack.c.l.b16 %v281_v27  ;;  %v350_v32 = vunpack.c.h.b16 %v281_v27  ;;  %v890_v33 = vld [vmem:[%s1200_s7] sm:$0xff]  ;;  %v351_v35 = vunpack.c.l.b16 %v282_v30  ;;  %v352_v36 = vunpack.c.h.b16 %v282_v30  ;;  %v280_v51 = vld [vmem:[#allocation2] sm:$0xff] }
  0x38   : > { %568 = vmatpush.bf16.msra.mxu1 %v903_v10  ;;  %v907_v28 = vld [vmem:[%s1200_s7 + $0x88] sm:$0xff]  ;;  %v898_v34 = vld [vmem:[%s1200_s7 + $0x40] sm:$0xff] }
  0x39   : > { %581 = vmatpush.bf16.msra.mxu2 %v911_v11  ;;  %v915_v29 = vld [vmem:[%s1200_s7 + $0xc8] sm:$0xff]  ;;  %v906_v37 = vld [vmem:[%s1200_s7 + $0x80] sm:$0xff]  ;;  %v353_v39 = vpack.c.b16 %v349_v31, %v349_v31  ;;  %v354_v40 = vpack.c.b16 %v350_v32, %v350_v32  ;;  %v355_v41 = vpack.c.b16 %v351_v35, %v351_v35  ;;  %v356_v42 = vpack.c.b16 %v352_v36, %v352_v36 }
  0x3a   : > { %594 = vmatpush.bf16.msra.mxu3 %v919_v12  ;;  %v914_v38 = vld [vmem:[%s1200_s7 + $0xc0] sm:$0xff] }
  0x3b   : > { %556 = vmatpush.bf16.msra.mxu0 %v894_v13 }
  0x3c   : > { %569 = vmatpush.bf16.msra.mxu1 %v902_v14 }
  0x3d   : > { %582 = vmatpush.bf16.msra.mxu2 %v910_v15 }
  0x3e   : > { %595 = vmatpush.bf16.msra.mxu3 %v918_v16 }
  0x3f   : > { %557 = vmatpush.bf16.msra.mxu0 %v893_v17 }
  0x40   : > { %570 = vmatpush.bf16.msra.mxu1 %v901_v18 }
  0x41   : > { %583 = vmatpush.bf16.msra.mxu2 %v909_v19 }
  0x42   : > { %596 = vmatpush.bf16.msra.mxu3 %v917_v20 }
  0x43   : > { %558 = vmatpush.bf16.msra.mxu0 %v892_v21 }
  0x44   : > { %571 = vmatpush.bf16.msra.mxu1 %v900_v22 }
  0x45   : > { %584 = vmatpush.bf16.msra.mxu2 %v908_v23 }
  0x46   : > { %597 = vmatpush.bf16.msra.mxu3 %v916_v24 }
  0x47   : > { %559 = vmatpush.bf16.msra.mxu0 %v891_v25 }
  0x48   : > { %572 = vmatpush.bf16.msra.mxu1 %v899_v26 }
  0x49   : > { %585 = vmatpush.bf16.msra.mxu2 %v907_v28 }
  0x4a   : > { %598 = vmatpush.bf16.msra.mxu3 %v915_v29 }
  0x4b   : > { %560 = vmatpush.bf16.msra.mxu0 %v890_v33 }
  0x4c   : > { %573 = vmatpush.bf16.msra.mxu1 %v898_v34 }
  0x4d   : > { %586 = vmatpush.bf16.msra.mxu2 %v906_v37 }
  0x4e   : > { %599 = vmatpush.bf16.msra.mxu3 %v914_v38  ;;  %561 = vmatmul.bf16.vlgmr.msra.gmra.mxu0 %v353_v39 }
  0x4f   : > { %574 = vmatmul.bf16.vlgmr.msra.gmra.mxu1 %v354_v40 }
  0x50   : > { %587 = vmatmul.bf16.vlgmr.msra.gmra.mxu2 %v355_v41 }
  0x51   : > { %600 = vmatmul.bf16.vlgmr.msra.gmra.mxu3 %v356_v42 }
  0xcb   : > { %v562_v43 = vpop.f32.mrf.mxu0 }
  0xcc   : > { %v575_v44 = vpop.f32.mrf.mxu1 }
  0xcd   : > { %v576_v45 = vadd.f32 %v575_v44, %v562_v43 }
  0xd3   : > { %v588_v46 = vpop.f32.mrf.mxu2  ;;  %v564_v49 = vpop.f32.mrf.mxu0 }
  0xd4   : > { %v601_v47 = vpop.f32.mrf.mxu3  ;;  %v589_v48 = vadd.f32 %v588_v46, %v576_v45  ;;  %v577_v50 = vpop.f32.mrf.mxu1 }
  0xd6   : > { %v602_v52 = vadd.f32 %v601_v47, %v589_v48 }
  0xd8   : > { %v605_v53 = vadd.f32 %v602_v52, %v280_v51  ;;  %610 = sbr.rel (%p886_p3) target bundleno = 233 (0xe9), region = 44 }
  0xda   : > { %606 = vst [vmem:[#allocation2] sm:$0xff] %v605_v53 }
  0xdb   : > { %v590_v54 = vpop.f32.mrf.mxu2 }
  0xdc   : > { %v603_v55 = vpop.f32.mrf.mxu3 }
  0xdd   : > { %v997_v57 = vld [vmem:[%s266_s9] ss:$0 sm:$0xff] }
  0xe1   : > { %v611_v56 = vld [vmem:[#allocation2] sm:$0xff] }
  0xe2   : > { %v616_v58 = vadd.f32 %v997_v57, %v611_v56 }
  0xe4   : > { %v617_v59 = vmax.f32 %v616_v58, 0.0 }
  0xe6   : > { %v618_v60 = vpack.c.bf16 %v617_v59, %v617_v59 }
  0xe8   : > { %619 = vst [vmem:[%s1219_s20] sm:$0xf] %v618_v60 }
  0xe9 PF: > { %s16_s19 = sadd.s32 1, %s1094_s19   ;;  %s1298_s12 = smov %s1070_s13 }
  0xea   : > { %p13_p4 = scmp.ge.s32.totalorder %s16_s19, 38   ;;  %s1299_s13 = smov %s1074_s14 }
  0xeb   : > { %s1300_s14 = smov %s1187_s5  ;;  %s1301_s15 = smov %s1086_s17 }
  0xec   : > { %s1302_s16 = smov %s1090_s18  ;;  %s1303_s17 = smov %s1306_s21 }
  0xed   : > { %s1304_s18 = smov %s1310_s22  ;;  %15 = sbr.rel (!%p13_p4) target bundleno = 5 (0x5), region = 86 }
  0xf2   :  { %647 = vsyncpa [#allocation4], 1 }
  0xf3   :  { %649 = vsyncpa [#allocation4 + $0x1], 1 }

// kernel: transfer_learning_resnet18_forward.41
= control target key start
LH: loop header
LB: loop body
LE: loop exit
PB: predicated region body
PF: predicated region fallthrough
CT: control target
= control target key end

     0   :  { %s463_s0 = inlined_call_operand.vmem [shape: bf16[2,1,512], index: 0, kind: input, shape index: {}]   ;;  %s464_s1 = inlined_call_operand.vmem [shape: f32[512,128], index: 1, kind: input, shape index: {}]   ;;  %s465_s2 = inlined_call_operand.vmem [shape: f32[1,128], index: 2, kind: input, shape index: {}]   ;;  %s466_s3 = inlined_call_operand.hbm [shape: f32[2,128], index: 3, kind: output, shape index: {}]  }
   0x1   :  { %v68_v0 = vld [vmem:[%s464_s1 + $0x178] sm:$0xff]  ;;  %v67_v2 = vld [vmem:[%s464_s1 + $0x170] sm:$0xff]  ;;  %v66_v6 = vld [vmem:[%s464_s1 + $0x168] sm:$0xff] }
   0x2   :  { %v36_v1 = vld [vmem:[%s464_s1 + $0x78] sm:$0xff]  ;;  %148 = vmatpush.msra.mxu2 %v68_v0  ;;  %v35_v4 = vld [vmem:[%s464_s1 + $0x70] sm:$0xff]  ;;  %v34_v8 = vld [vmem:[%s464_s1 + $0x68] sm:$0xff] }
   0x3   :  { %108 = vmatpush.msra.mxu0 %v36_v1  ;;  %v84_v3 = vld [vmem:[%s464_s1 + $0x1f8] sm:$0xff]  ;;  %v83_v7 = vld [vmem:[%s464_s1 + $0x1f0] sm:$0xff]  ;;  %v82_v10 = vld [vmem:[%s464_s1 + $0x1e8] sm:$0xff] }
   0x4   :  { %v52_v5 = vld [vmem:[%s464_s1 + $0xf8] sm:$0xff]  ;;  %168 = vmatpush.msra.mxu3 %v84_v3  ;;  %149 = vmatpush.msra.mxu2 %v67_v2  ;;  %v51_v9 = vld [vmem:[%s464_s1 + $0xf0] sm:$0xff]  ;;  %v65_v11 = vld [vmem:[%s464_s1 + $0x160] sm:$0xff] }
   0x5   :  { %128 = vmatpush.msra.mxu1 %v52_v5  ;;  %109 = vmatpush.msra.mxu0 %v35_v4  ;;  %v33_v12 = vld [vmem:[%s464_s1 + $0x60] sm:$0xff]  ;;  %v50_v13 = vld [vmem:[%s464_s1 + $0xe8] sm:$0xff]  ;;  %v64_v16 = vld [vmem:[%s464_s1 + $0x158] sm:$0xff] }
   0x6   :  { %169 = vmatpush.msra.mxu3 %v83_v7  ;;  %150 = vmatpush.msra.mxu2 %v66_v6  ;;  %v81_v14 = vld [vmem:[%s464_s1 + $0x1e0] sm:$0xff]  ;;  %v32_v17 = vld [vmem:[%s464_s1 + $0x58] sm:$0xff]  ;;  %v63_v20 = vld [vmem:[%s464_s1 + $0x150] sm:$0xff] }
   0x7   :  { %129 = vmatpush.msra.mxu1 %v51_v9  ;;  %110 = vmatpush.msra.mxu0 %v34_v8  ;;  %v49_v15 = vld [vmem:[%s464_s1 + $0xe0] sm:$0xff]  ;;  %v80_v18 = vld [vmem:[%s464_s1 + $0x1d8] sm:$0xff]  ;;  %v31_v21 = vld [vmem:[%s464_s1 + $0x50] sm:$0xff] }
   0x8   :  { %170 = vmatpush.msra.mxu3 %v82_v10  ;;  %151 = vmatpush.msra.mxu2 %v65_v11  ;;  %v48_v19 = vld [vmem:[%s464_s1 + $0xd8] sm:$0xff]  ;;  %v79_v22 = vld [vmem:[%s464_s1 + $0x1d0] sm:$0xff]  ;;  %v62_v24 = vld [vmem:[%s464_s1 + $0x148] sm:$0xff] }
   0x9   :  { %130 = vmatpush.msra.mxu1 %v50_v13  ;;  %111 = vmatpush.msra.mxu0 %v33_v12  ;;  %v47_v23 = vld [vmem:[%s464_s1 + $0xd0] sm:$0xff]  ;;  %v30_v25 = vld [vmem:[%s464_s1 + $0x48] sm:$0xff]  ;;  %v61_v28 = vld [vmem:[%s464_s1 + $0x140] sm:$0xff] }
   0xa   :  { %171 = vmatpush.msra.mxu3 %v81_v14  ;;  %152 = vmatpush.msra.mxu2 %v64_v16  ;;  %v78_v26 = vld [vmem:[%s464_s1 + $0x1c8] sm:$0xff]  ;;  %v29_v29 = vld [vmem:[%s464_s1 + $0x40] sm:$0xff]  ;;  %v60_v32 = vld [vmem:[%s464_s1 + $0x138] sm:$0xff] }
   0xb   :  { %131 = vmatpush.msra.mxu1 %v49_v15  ;;  %112 = vmatpush.msra.mxu0 %v32_v17  ;;  %v46_v27 = vld [vmem:[%s464_s1 + $0xc8] sm:$0xff]  ;;  %v77_v30 = vld [vmem:[%s464_s1 + $0x1c0] sm:$0xff]  ;;  %v28_v33 = vld [vmem:[%s464_s1 + $0x38] sm:$0xff] }
   0xc   :  { %172 = vmatpush.msra.mxu3 %v80_v18  ;;  %153 = vmatpush.msra.mxu2 %v63_v20  ;;  %v45_v31 = vld [vmem:[%s464_s1 + $0xc0] sm:$0xff]  ;;  %v76_v34 = vld [vmem:[%s464_s1 + $0x1b8] sm:$0xff]  ;;  %v59_v36 = vld [vmem:[%s464_s1 + $0x130] sm:$0xff] }
   0xd   :  { %132 = vmatpush.msra.mxu1 %v48_v19  ;;  %113 = vmatpush.msra.mxu0 %v31_v21  ;;  %v44_v35 = vld [vmem:[%s464_s1 + $0xb8] sm:$0xff]  ;;  %v27_v37 = vld [vmem:[%s464_s1 + $0x30] sm:$0xff]  ;;  %v58_v40 = vld [vmem:[%s464_s1 + $0x128] sm:$0xff] }
   0xe   :  { %173 = vmatpush.msra.mxu3 %v79_v22  ;;  %154 = vmatpush.msra.mxu2 %v62_v24  ;;  %v75_v38 = vld [vmem:[%s464_s1 + $0x1b0] sm:$0xff]  ;;  %v26_v41 = vld [vmem:[%s464_s1 + $0x28] sm:$0xff]  ;;  %v57_v44 = vld [vmem:[%s464_s1 + $0x120] sm:$0xff] }
   0xf   :  { %133 = vmatpush.msra.mxu1 %v47_v23  ;;  %114 = vmatpush.msra.mxu0 %v30_v25  ;;  %v43_v39 = vld [vmem:[%s464_s1 + $0xb0] sm:$0xff]  ;;  %v74_v42 = vld [vmem:[%s464_s1 + $0x1a8] sm:$0xff]  ;;  %v25_v45 = vld [vmem:[%s464_s1 + $0x20] sm:$0xff] }
  0x10   :  { %174 = vmatpush.msra.mxu3 %v78_v26  ;;  %155 = vmatpush.msra.mxu2 %v61_v28  ;;  %v42_v43 = vld [vmem:[%s464_s1 + $0xa8] sm:$0xff]  ;;  %v206_v46 = vld [vmem:[%s463_s0] sm:$0xff]   ;;  %v56_v51 = vld [vmem:[%s464_s1 + $0x118] sm:$0xff] }
  0x11   :  { %134 = vmatpush.msra.mxu1 %v46_v27  ;;  %115 = vmatpush.msra.mxu0 %v29_v29  ;;  %v73_v47 = vld [vmem:[%s464_s1 + $0x1a0] sm:$0xff]  ;;  %v207_v49 = vunpack.c.l.bf16 %v206_v46  ;;  %v208_v50 = vunpack.c.h.bf16 %v206_v46  ;;  %v24_v52 = vld [vmem:[%s464_s1 + $0x18] sm:$0xff] }
  0x12   :  { %175 = vmatpush.msra.mxu3 %v77_v30  ;;  %156 = vmatpush.msra.mxu2 %v60_v32  ;;  %v41_v48 = vld [vmem:[%s464_s1 + $0xa0] sm:$0xff] }
  0x13   :  { %135 = vmatpush.msra.mxu1 %v45_v31  ;;  %116 = vmatpush.msra.mxu0 %v28_v33 }
  0x14   :  { %176 = vmatpush.msra.mxu3 %v76_v34  ;;  %157 = vmatpush.msra.mxu2 %v59_v36 }
  0x15   :  { %136 = vmatpush.msra.mxu1 %v44_v35  ;;  %117 = vmatpush.msra.mxu0 %v27_v37 }
  0x16   :  { %177 = vmatpush.msra.mxu3 %v75_v38  ;;  %158 = vmatpush.msra.mxu2 %v58_v40 }
  0x17   :  { %137 = vmatpush.msra.mxu1 %v43_v39  ;;  %118 = vmatpush.msra.mxu0 %v26_v41 }
  0x18   :  { %178 = vmatpush.msra.mxu3 %v74_v42 }
  0x19   :  { %138 = vmatpush.msra.mxu1 %v42_v43 }
  0x1a   :  { %8 = vsyncpa [#allocation3], 0  ;;  %159 = vmatpush.msra.mxu2 %v57_v44  ;;  %119 = vmatpush.msra.mxu0 %v25_v45  ;;  %v72_v53 = vld [vmem:[%s464_s1 + $0x198] sm:$0xff]  ;;  %v55_v55 = vld [vmem:[%s464_s1 + $0x110] sm:$0xff]  ;;  %v93_v59 = vperm.slane %v207_v49, 4  ;;  %v97_v60 = vperm.slane %v208_v50, 4 }
  0x1b   :  { %v40_v54 = vld [vmem:[%s464_s1 + $0x98] sm:$0xff]  ;;  %179 = vmatpush.msra.mxu3 %v73_v47  ;;  %139 = vmatpush.msra.mxu1 %v41_v48  ;;  %v23_v56 = vld [vmem:[%s464_s1 + $0x10] sm:$0xff]  ;;  %vm99_vm0 = vcmask 1041409   ;;  %v54_v61 = vld [vmem:[%s464_s1 + $0x108] sm:$0xff]  ;;  %v91_v63 = vperm.slane %v207_v49, 0  ;;  %v95_v0 = vperm.slane %v208_v50, 0 }
  0x1c   :  { %160 = vmatpush.msra.mxu2 %v56_v51  ;;  %120 = vmatpush.msra.mxu0 %v24_v52  ;;  %v71_v57 = vld [vmem:[%s464_s1 + $0x190] sm:$0xff]  ;;  %v22_v62 = vld [vmem:[%s464_s1 + $0x8] sm:$0xff]  ;;  %v94_v1 = vperm.slane %v207_v49, 6  ;;  %v98_v2 = vperm.slane %v208_v50, 6  ;;  %v53_v5 = vld [vmem:[%s464_s1 + $0x100] sm:$0xff]  ;;  %v92_v7 = vperm.slane %v207_v49, 2  ;;  %v102_v9 = vsel %vm99_vm0, %v97_v60, %v93_v59 }
  0x1d   :  { %v39_v58 = vld [vmem:[%s464_s1 + $0x90] sm:$0xff]  ;;  %180 = vmatpush.msra.mxu3 %v72_v53  ;;  %140 = vmatpush.msra.mxu1 %v40_v54  ;;  %v70_v3 = vld [vmem:[%s464_s1 + $0x188] sm:$0xff]  ;;  %v21_v6 = vld [vmem:[%s464_s1] sm:$0xff]  ;;  %v96_v8 = vperm.slane %v208_v50, 2  ;;  %v100_v11 = vsel %vm99_vm0, %v95_v0, %v91_v63  ;;  %s237_s7 = smov [#allocation2]   ;;  %s196_s10 = sshll.u32 %s466_s3, 4  ;;  %s197_s10 = int_to_ptr.hbm [resolvable:$true] %s196_s10 }
  0x1e   :  { %161 = vmatpush.msra.mxu2 %v55_v55  ;;  %121 = vmatpush.msra.mxu0 %v23_v56  ;;  %v38_v4 = vld [vmem:[%s464_s1 + $0x88] sm:$0xff]  ;;  %v69_v10 = vld [vmem:[%s464_s1 + $0x180] sm:$0xff]  ;;  %v103_v12 = vsel %vm99_vm0, %v98_v2, %v94_v1  ;;  %s194_s8 = sshll.u32 %s237_s7, 4  ;;  %s195_s8 = int_to_ptr.vmem [resolvable:$true] %s194_s8 }
  0x1f   :  { %181 = vmatpush.msra.mxu3 %v71_v57  ;;  %141 = vmatpush.msra.mxu1 %v39_v58  ;;  %v37_v13 = vld [vmem:[%s464_s1 + $0x80] sm:$0xff]  ;;  %v101_v14 = vsel %vm99_vm0, %v96_v8, %v92_v7 }
  0x20   :  { %162 = vmatpush.msra.mxu2 %v54_v61  ;;  %122 = vmatpush.msra.mxu0 %v22_v62  ;;  %v210_v15 = vld [vmem:[%s465_s2] ss:$0 sm:$0xff] }
  0x21   :  { %182 = vmatpush.msra.mxu3 %v70_v3  ;;  %142 = vmatpush.msra.mxu1 %v38_v4 }
  0x22   :  { %163 = vmatpush.msra.mxu2 %v53_v5  ;;  %123 = vmatpush.msra.mxu0 %v21_v6 }
  0x23   :  { %164 = vmatmul.f32.vlgmr.msra.gmra.mxu2 %v102_v9  ;;  %183 = vmatpush.msra.mxu3 %v69_v10 }
  0x24   :  { %124 = vmatmul.f32.vlgmr.msra.gmra.mxu0 %v100_v11  ;;  %184 = vmatmul.f32.vlgmr.msra.gmra.mxu3 %v103_v12 }
  0x25   :  { %143 = vmatpush.msra.mxu1 %v37_v13 }
  0x26   :  { %144 = vmatmul.f32.vlgmr.msra.gmra.mxu1 %v101_v14 }
  0xa1   :  { %v125_v16 = vpop.f32.mrf.mxu0 }
  0xa2   :  { %v126_v17 = vadd.f32 %v210_v15, %v125_v16 }
  0xa3   :  { %v145_v18 = vpop.f32.mrf.mxu1 }
  0xa4   :  { %v146_v19 = vadd.f32 %v145_v18, %v126_v17 }
  0xa6   :  { %v165_v20 = vpop.f32.mrf.mxu2 }
  0xa7   :  { %v166_v21 = vadd.f32 %v165_v20, %v146_v19  ;;  %v185_v22 = vpop.f32.mrf.mxu3 }
  0xa9   :  { %v186_v23 = vadd.f32 %v185_v22, %v166_v21 }
  0xab   :  { %188 = vst [vmem:[#allocation2] sm:$0x3] %v186_v23 }
  0xac   :  { %199 = dma.vmem_to_hbm [thread:$0]  %s195_s8, 32, %s197_s10, [#allocation3]  }
  0xad   :  { %235 = dma.done.wait [#allocation3], 32  }
  0xae   :  { %236 = vsyncadd [#allocation3], 4294967264 }
  0xaf   :  { %204 = vsyncpa [#allocation3], 1 }

</bundles_post_ra>
